<compile_context>
chip_gen: v7x
topology: tpu7x:2x2x1
jax: 0.10.0
libtpu: 0.0.40
codegen_flags: <defaults>
</compile_context>

<pallas_src>
from functools import partial

import jax
import jax.numpy as jnp
from jax.experimental import pallas as pl
from jax.experimental.pallas import tpu as pltpu


def sepconv_bn_kernel(x_ref, w_ref, gamma_ref, beta_ref, o_ref, *, k, stride, pad, eps):
    """One grid step: depthwise conv + BN for one channel block and one within-group j.

    x_ref:     (N, H,  W,  cb)   raw (unpadded) input channels of this block
    w_ref:     (k*k, cb)         per-tap, per-channel weights for this j
    gamma_ref: (1, cb)
    beta_ref:  (1, cb)
    o_ref:     (N, Ho, Wo, cb)
    """
    N, Ho, Wo, C = o_ref.shape
    _, H, W, _ = x_ref.shape

    x = x_ref[...]
    # Zero-pad H (untiled dim) and W (sublane dim) in VMEM -- no HBM pad round trip.
    if pad > 0:
        zh = jnp.zeros((N, pad, W, C), x.dtype)
        x = jnp.concatenate([zh, x, zh], axis=1)
        zw = jnp.zeros((N, H + 2 * pad, pad, C), x.dtype)
        x = jnp.concatenate([zw, x, zw], axis=2)

    # For stride > 1, deinterleave stride phases ONCE per block instead of doing a
    # strided slice for every one of the k*k taps.
    if stride == 1:
        phases = [[x]]
    else:
        phases = [[x[:, rh::stride, rw::stride, :] for rw in range(stride)]
                  for rh in range(stride)]

    w = w_ref[...]                       # (k*k, C): load all tap weights once.

    acc = jnp.zeros((N, Ho, Wo, C), jnp.float32)
    for kh in range(k):                  # k is small & static -> fully unrolled.
        for kw in range(k):
            ph = phases[kh % stride][kw % stride]
            oh, ow = kh // stride, kw // stride
            win = ph[:, oh:oh + Ho, ow:ow + Wo, :]
            acc = acc + win * w[kh * k + kw]     # per-channel lane-vector weight

    # BatchNorm2d training-mode forward: per-channel batch stats over (N, Ho, Wo),
    # biased variance, computed in ONE pass (sum and sum-of-squares).
    inv_cnt = jnp.float32(1.0 / (N * Ho * Wo))
    s = jnp.sum(acc, axis=(0, 1, 2), keepdims=True)
    ss = jnp.sum(acc * acc, axis=(0, 1, 2), keepdims=True)
    mean = s * inv_cnt
    var = ss * inv_cnt - mean * mean
    scale = gamma_ref[...].reshape(1, 1, 1, C) * jax.lax.rsqrt(var + eps)
    shift = beta_ref[...].reshape(1, 1, 1, C) - mean * scale
    o_ref[...] = (acc * scale + shift).astype(o_ref.dtype)


def _pick_cin_block(cin, n, h, w, k, stride, budget_bytes=12 * 1024 * 1024):
    """Largest legal input-channel block (divisor of cin, 128-multiple or full) that
    keeps the double-buffered working set under a conservative per-step VMEM budget."""
    p = (k - 1) // 2
    ho = (h + 2 * p - k) // stride + 1
    wo = (w + 2 * p - k) // stride + 1

    def footprint(cb):
        x_b = n * h * w * cb * 4
        xp_b = n * (h + 2 * p) * (w + 2 * p) * cb * 4
        o_b = n * ho * wo * cb * 4
        # 2x for pipelined in/out buffers, plus padded copy, acc and epilogue temps.
        return 2 * x_b + 2 * o_b + xp_b * (1 if stride == 1 else 2) + 3 * o_b

    if cin <= 128 or footprint(cin) <= budget_bytes:
        return cin
    cands = [cb for cb in range(128, cin + 1, 128) if cin % cb == 0]
    if not cands:
        return cin
    fits = [cb for cb in cands if footprint(cb) <= budget_bytes]
    return max(fits) if fits else min(cands)


def pnasnet_sepconv(x, conv_w, gamma, beta, *, in_planes, out_planes, kernel_size,
                    stride, eps=1e-5):
    """x: (N, in_planes, H, W) f32; conv_w: (out_planes, 1, k, k) f32 (groups=in_planes)."""
    N, Cin, H, W = x.shape
    assert Cin == in_planes and out_planes % in_planes == 0
    k = kernel_size
    p = (k - 1) // 2
    cpg = out_planes // in_planes            # output channels per group
    Ho = (H + 2 * p - k) // stride + 1
    Wo = (W + 2 * p - k) // stride + 1

    # Layout plumbing (wrapper side): NCHW -> channels-last so C sits on the lane axis.
    x_nhwc = jnp.transpose(x, (0, 2, 3, 1))

    # Regroup weights / BN params by within-group index j so that grid step (c, j) only
    # needs a contiguous block of *input* channels (no channel expansion in HBM).
    # w_j[j, kh*k+kw, g] = conv_w[g*cpg + j, 0, kh, kw]
    w_j = jnp.transpose(conv_w[:, 0].reshape(Cin, cpg, k, k),
                        (1, 2, 3, 0)).reshape(cpg, k * k, Cin)
    gamma_j = jnp.transpose(gamma.reshape(Cin, cpg)).reshape(cpg, 1, Cin)
    beta_j = jnp.transpose(beta.reshape(Cin, cpg)).reshape(cpg, 1, Cin)

    cb = _pick_cin_block(Cin, N, H, W, k, stride)
    n_cb = Cin // cb

    kern = partial(sepconv_bn_kernel, k=k, stride=stride, pad=p, eps=eps)
    out_j = pl.pallas_call(
        kern,
        out_shape=jax.ShapeDtypeStruct((cpg, N, Ho, Wo, Cin), jnp.float32),
        grid=(n_cb, cpg),                                         # j is the inner axis
        in_specs=[
            # x block index is constant over the inner j axis -> fetched once per c.
            pl.BlockSpec((N, H, W, cb), lambda c, j: (0, 0, 0, c)),
            pl.BlockSpec((None, k * k, cb), lambda c, j: (j, 0, c)),
            pl.BlockSpec((None, 1, cb), lambda c, j: (j, 0, c)),
            pl.BlockSpec((None, 1, cb), lambda c, j: (j, 0, c)),
        ],
        out_specs=pl.BlockSpec((None, N, Ho, Wo, cb), lambda c, j: (j, 0, 0, 0, c)),
        compiler_params=pltpu.CompilerParams(
            dimension_semantics=("parallel", "arbitrary"),
            vmem_limit_bytes=32 * 1024 * 1024),
    )(x_nhwc, w_j, gamma_j, beta_j)

    # out_j[j, n, h, w, g] is PyTorch output channel o = g*cpg + j; fold the channel
    # permutation into the single channels-last -> NCHW transpose.
    out = jnp.transpose(out_j, (1, 4, 0, 2, 3)).reshape(N, out_planes, Ho, Wo)
    return out


def reference(x, conv_w, gamma, beta, *, in_planes, stride, kernel_size, eps=1e-5):
    p = (kernel_size - 1) // 2
    y = jax.lax.conv_general_dilated(
        x, conv_w, window_strides=(stride, stride), padding=[(p, p), (p, p)],
        dimension_numbers=("NCHW", "OIHW", "NCHW"), feature_group_count=in_planes)
    mean = jnp.mean(y, axis=(0, 2, 3), keepdims=True)
    var = jnp.mean((y - mean) ** 2, axis=(0, 2, 3), keepdims=True)
    return gamma.reshape(1, -1, 1, 1) * (y - mean) * jax.lax.rsqrt(var + eps) \
        + beta.reshape(1, -1, 1, 1)


if __name__ == "__main__":
    # Small shapes consistent with the module: in_planes=4, out_planes=8, k=3, stride=1.
    in_planes, out_planes, kernel_size, stride = 4, 8, 3, 1
    N, H, W = 2, 16, 16

    key = jax.random.PRNGKey(0)
    kx, kw = jax.random.split(key)
    x = jax.random.normal(kx, (N, in_planes, H, W), dtype=jnp.float32)
    # Conv2d weight shape with groups=in_planes: (out_planes, 1, k, k)
    conv_w = jax.random.normal(kw, (out_planes, 1, kernel_size, kernel_size),
                               dtype=jnp.float32) * 0.1
    # BatchNorm2d default init: weight=1, bias=0.
    gamma = jnp.ones((out_planes,), dtype=jnp.float32)
    beta = jnp.zeros((out_planes,), dtype=jnp.float32)

    out = pnasnet_sepconv(x, conv_w, gamma, beta,
                          in_planes=in_planes, out_planes=out_planes,
                          kernel_size=kernel_size, stride=stride)
    out = jax.block_until_ready(out)

    ref = reference(x, conv_w, gamma, beta, in_planes=in_planes,
                    stride=stride, kernel_size=kernel_size)
    assert out.shape == ref.shape == (N, out_planes, H, W)
    err = float(jnp.max(jnp.abs(out - ref)))
    assert err < 1e-4, err

    print("KERNEL_OK")
</pallas_src>

<mosaic_0001>
module attributes {stable_mosaic.version = 11 : i64} {
  func.func @sepconv_bn_kernel(%arg0: i32, %arg1: i32, %arg2: memref<2x16x16x4xf32, #tpu.memory_space<vmem>>, %arg3: memref<1x9x4xf32, #tpu.memory_space<vmem>>, %arg4: memref<1x1x4xf32, #tpu.memory_space<vmem>>, %arg5: memref<1x1x4xf32, #tpu.memory_space<vmem>>, %arg6: memref<1x2x16x16x4xf32, #tpu.memory_space<vmem>>) attributes {dimension_semantics = [#tpu.dimension_semantics<parallel>, #tpu.dimension_semantics<arbitrary>], iteration_bounds = array<i64: 1, 2>, scalar_prefetch = 0 : i64, scratch_operands = 0 : i64, tpu.core_type = #tpu.core_type<tc>, window_params = [{transform_indices = @transform_0, window_bounds = array<i64: 2, 16, 16, 4>}, {transform_indices = @transform_1, window_bounds = array<i64: 1, 9, 4>}, {transform_indices = @transform_2, window_bounds = array<i64: 1, 1, 4>}, {transform_indices = @transform_3, window_bounds = array<i64: 1, 1, 4>}, {transform_indices = @transform_4, window_bounds = array<i64: 1, 2, 16, 16, 4>}]} {
    %c0 = arith.constant 0 : index
    %c0_0 = arith.constant 0 : index
    %c0_1 = arith.constant 0 : index
    %c0_2 = arith.constant 0 : index
    %0 = vector.load %arg2[%c0, %c0_0, %c0_1, %c0_2] : memref<2x16x16x4xf32, #tpu.memory_space<vmem>>, vector<2x16x16x4xf32>
    %cst = arith.constant 0.000000e+00 : f32
    %1 = vector.broadcast %cst : f32 to vector<2x1x16x4xf32>
    %2 = tpu.concatenate %1, %0, %1 in 1 : vector<2x1x16x4xf32>, vector<2x16x16x4xf32>, vector<2x1x16x4xf32> -> vector<2x18x16x4xf32>
    %cst_3 = arith.constant 0.000000e+00 : f32
    %3 = vector.broadcast %cst_3 : f32 to vector<2x18x1x4xf32>
    %4 = tpu.concatenate %3, %2, %3 in 2 : vector<2x18x1x4xf32>, vector<2x18x16x4xf32>, vector<2x18x1x4xf32> -> vector<2x18x18x4xf32>
    %c0_4 = arith.constant 0 : index
    %c0_5 = arith.constant 0 : index
    %c0_6 = arith.constant 0 : index
    %5 = vector.load %arg3[%c0_4, %c0_5, %c0_6] : memref<1x9x4xf32, #tpu.memory_space<vmem>>, vector<1x9x4xf32>
    %6 = vector.shape_cast %5 : vector<1x9x4xf32> to vector<9x4xf32>
    %cst_7 = arith.constant 0.000000e+00 : f32
    %7 = vector.broadcast %cst_7 : f32 to vector<2x16x16x4xf32>
    %8 = vector.extract_strided_slice %4 {offsets = [0, 0, 0, 0], sizes = [2, 16, 16, 4], strides = [1, 1, 1, 1]} : vector<2x18x18x4xf32> to vector<2x16x16x4xf32>
    %9 = vector.extract_strided_slice %6 {offsets = [0, 0], sizes = [1, 4], strides = [1, 1]} : vector<9x4xf32> to vector<1x4xf32>
    %10 = vector.shape_cast %9 : vector<1x4xf32> to vector<4xf32>
    %11 = vector.shape_cast %10 : vector<4xf32> to vector<1x1x1x4xf32>
    %12 = vector.broadcast %11 : vector<1x1x1x4xf32> to vector<2x16x16x4xf32>
    %13 = arith.mulf %8, %12 : vector<2x16x16x4xf32>
    %14 = arith.addf %7, %13 : vector<2x16x16x4xf32>
    %15 = vector.extract_strided_slice %4 {offsets = [0, 0, 1, 0], sizes = [2, 16, 16, 4], strides = [1, 1, 1, 1]} : vector<2x18x18x4xf32> to vector<2x16x16x4xf32>
    %16 = vector.extract_strided_slice %6 {offsets = [1, 0], sizes = [1, 4], strides = [1, 1]} : vector<9x4xf32> to vector<1x4xf32>
    %17 = vector.shape_cast %16 : vector<1x4xf32> to vector<4xf32>
    %18 = vector.shape_cast %17 : vector<4xf32> to vector<1x1x1x4xf32>
    %19 = vector.broadcast %18 : vector<1x1x1x4xf32> to vector<2x16x16x4xf32>
    %20 = arith.mulf %15, %19 : vector<2x16x16x4xf32>
    %21 = arith.addf %14, %20 : vector<2x16x16x4xf32>
    %22 = vector.extract_strided_slice %4 {offsets = [0, 0, 2, 0], sizes = [2, 16, 16, 4], strides = [1, 1, 1, 1]} : vector<2x18x18x4xf32> to vector<2x16x16x4xf32>
    %23 = vector.extract_strided_slice %6 {offsets = [2, 0], sizes = [1, 4], strides = [1, 1]} : vector<9x4xf32> to vector<1x4xf32>
    %24 = vector.shape_cast %23 : vector<1x4xf32> to vector<4xf32>
    %25 = vector.shape_cast %24 : vector<4xf32> to vector<1x1x1x4xf32>
    %26 = vector.broadcast %25 : vector<1x1x1x4xf32> to vector<2x16x16x4xf32>
    %27 = arith.mulf %22, %26 : vector<2x16x16x4xf32>
    %28 = arith.addf %21, %27 : vector<2x16x16x4xf32>
    %29 = vector.extract_strided_slice %4 {offsets = [0, 1, 0, 0], sizes = [2, 16, 16, 4], strides = [1, 1, 1, 1]} : vector<2x18x18x4xf32> to vector<2x16x16x4xf32>
    %30 = vector.extract_strided_slice %6 {offsets = [3, 0], sizes = [1, 4], strides = [1, 1]} : vector<9x4xf32> to vector<1x4xf32>
    %31 = vector.shape_cast %30 : vector<1x4xf32> to vector<4xf32>
    %32 = vector.shape_cast %31 : vector<4xf32> to vector<1x1x1x4xf32>
    %33 = vector.broadcast %32 : vector<1x1x1x4xf32> to vector<2x16x16x4xf32>
    %34 = arith.mulf %29, %33 : vector<2x16x16x4xf32>
    %35 = arith.addf %28, %34 : vector<2x16x16x4xf32>
    %36 = vector.extract_strided_slice %4 {offsets = [0, 1, 1, 0], sizes = [2, 16, 16, 4], strides = [1, 1, 1, 1]} : vector<2x18x18x4xf32> to vector<2x16x16x4xf32>
    %37 = vector.extract_strided_slice %6 {offsets = [4, 0], sizes = [1, 4], strides = [1, 1]} : vector<9x4xf32> to vector<1x4xf32>
    %38 = vector.shape_cast %37 : vector<1x4xf32> to vector<4xf32>
    %39 = vector.shape_cast %38 : vector<4xf32> to vector<1x1x1x4xf32>
    %40 = vector.broadcast %39 : vector<1x1x1x4xf32> to vector<2x16x16x4xf32>
    %41 = arith.mulf %36, %40 : vector<2x16x16x4xf32>
    %42 = arith.addf %35, %41 : vector<2x16x16x4xf32>
    %43 = vector.extract_strided_slice %4 {offsets = [0, 1, 2, 0], sizes = [2, 16, 16, 4], strides = [1, 1, 1, 1]} : vector<2x18x18x4xf32> to vector<2x16x16x4xf32>
    %44 = vector.extract_strided_slice %6 {offsets = [5, 0], sizes = [1, 4], strides = [1, 1]} : vector<9x4xf32> to vector<1x4xf32>
    %45 = vector.shape_cast %44 : vector<1x4xf32> to vector<4xf32>
    %46 = vector.shape_cast %45 : vector<4xf32> to vector<1x1x1x4xf32>
    %47 = vector.broadcast %46 : vector<1x1x1x4xf32> to vector<2x16x16x4xf32>
    %48 = arith.mulf %43, %47 : vector<2x16x16x4xf32>
    %49 = arith.addf %42, %48 : vector<2x16x16x4xf32>
    %50 = vector.extract_strided_slice %4 {offsets = [0, 2, 0, 0], sizes = [2, 16, 16, 4], strides = [1, 1, 1, 1]} : vector<2x18x18x4xf32> to vector<2x16x16x4xf32>
    %51 = vector.extract_strided_slice %6 {offsets = [6, 0], sizes = [1, 4], strides = [1, 1]} : vector<9x4xf32> to vector<1x4xf32>
    %52 = vector.shape_cast %51 : vector<1x4xf32> to vector<4xf32>
    %53 = vector.shape_cast %52 : vector<4xf32> to vector<1x1x1x4xf32>
    %54 = vector.broadcast %53 : vector<1x1x1x4xf32> to vector<2x16x16x4xf32>
    %55 = arith.mulf %50, %54 : vector<2x16x16x4xf32>
    %56 = arith.addf %49, %55 : vector<2x16x16x4xf32>
    %57 = vector.extract_strided_slice %4 {offsets = [0, 2, 1, 0], sizes = [2, 16, 16, 4], strides = [1, 1, 1, 1]} : vector<2x18x18x4xf32> to vector<2x16x16x4xf32>
    %58 = vector.extract_strided_slice %6 {offsets = [7, 0], sizes = [1, 4], strides = [1, 1]} : vector<9x4xf32> to vector<1x4xf32>
    %59 = vector.shape_cast %58 : vector<1x4xf32> to vector<4xf32>
    %60 = vector.shape_cast %59 : vector<4xf32> to vector<1x1x1x4xf32>
    %61 = vector.broadcast %60 : vector<1x1x1x4xf32> to vector<2x16x16x4xf32>
    %62 = arith.mulf %57, %61 : vector<2x16x16x4xf32>
    %63 = arith.addf %56, %62 : vector<2x16x16x4xf32>
    %64 = vector.extract_strided_slice %4 {offsets = [0, 2, 2, 0], sizes = [2, 16, 16, 4], strides = [1, 1, 1, 1]} : vector<2x18x18x4xf32> to vector<2x16x16x4xf32>
    %65 = vector.extract_strided_slice %6 {offsets = [8, 0], sizes = [1, 4], strides = [1, 1]} : vector<9x4xf32> to vector<1x4xf32>
    %66 = vector.shape_cast %65 : vector<1x4xf32> to vector<4xf32>
    %67 = vector.shape_cast %66 : vector<4xf32> to vector<1x1x1x4xf32>
    %68 = vector.broadcast %67 : vector<1x1x1x4xf32> to vector<2x16x16x4xf32>
    %69 = arith.mulf %64, %68 : vector<2x16x16x4xf32>
    %70 = arith.addf %63, %69 : vector<2x16x16x4xf32>
    %cst_8 = arith.constant dense<0.000000e+00> : vector<4xf32>
    %71 = vector.multi_reduction <add>, %70, %cst_8 [0, 1, 2] : vector<2x16x16x4xf32> to vector<4xf32>
    %72 = vector.shape_cast %71 : vector<4xf32> to vector<1x1x1x4xf32>
    %73 = arith.mulf %70, %70 : vector<2x16x16x4xf32>
    %cst_9 = arith.constant dense<0.000000e+00> : vector<4xf32>
    %74 = vector.multi_reduction <add>, %73, %cst_9 [0, 1, 2] : vector<2x16x16x4xf32> to vector<4xf32>
    %75 = vector.shape_cast %74 : vector<4xf32> to vector<1x1x1x4xf32>
    %cst_10 = arith.constant 0.001953125 : f32
    %76 = vector.broadcast %cst_10 : f32 to vector<1x1x1x4xf32>
    %77 = arith.mulf %72, %76 : vector<1x1x1x4xf32>
    %cst_11 = arith.constant 0.001953125 : f32
    %78 = vector.broadcast %cst_11 : f32 to vector<1x1x1x4xf32>
    %79 = arith.mulf %75, %78 : vector<1x1x1x4xf32>
    %80 = arith.mulf %77, %77 : vector<1x1x1x4xf32>
    %81 = arith.subf %79, %80 : vector<1x1x1x4xf32>
    %c0_12 = arith.constant 0 : index
    %c0_13 = arith.constant 0 : index
    %c0_14 = arith.constant 0 : index
    %82 = vector.load %arg4[%c0_12, %c0_13, %c0_14] : memref<1x1x4xf32, #tpu.memory_space<vmem>>, vector<1x1x4xf32>
    %83 = vector.shape_cast %82 : vector<1x1x4xf32> to vector<1x4xf32>
    %84 = vector.shape_cast %83 : vector<1x4xf32> to vector<1x1x1x4xf32>
    %cst_15 = arith.constant 9.99999974E-6 : f32
    %85 = vector.broadcast %cst_15 : f32 to vector<1x1x1x4xf32>
    %86 = arith.addf %81, %85 : vector<1x1x1x4xf32>
    %87 = math.rsqrt %86 : vector<1x1x1x4xf32>
    %88 = arith.mulf %84, %87 : vector<1x1x1x4xf32>
    %c0_16 = arith.constant 0 : index
    %c0_17 = arith.constant 0 : index
    %c0_18 = arith.constant 0 : index
    %89 = vector.load %arg5[%c0_16, %c0_17, %c0_18] : memref<1x1x4xf32, #tpu.memory_space<vmem>>, vector<1x1x4xf32>
    %90 = vector.shape_cast %89 : vector<1x1x4xf32> to vector<1x4xf32>
    %91 = vector.shape_cast %90 : vector<1x4xf32> to vector<1x1x1x4xf32>
    %92 = arith.mulf %77, %88 : vector<1x1x1x4xf32>
    %93 = arith.subf %91, %92 : vector<1x1x1x4xf32>
    %94 = vector.broadcast %88 : vector<1x1x1x4xf32> to vector<2x16x16x4xf32>
    %95 = arith.mulf %70, %94 : vector<2x16x16x4xf32>
    %96 = vector.broadcast %93 : vector<1x1x1x4xf32> to vector<2x16x16x4xf32>
    %97 = arith.addf %95, %96 : vector<2x16x16x4xf32>
    %c0_19 = arith.constant 0 : index
    %c0_20 = arith.constant 0 : index
    %c0_21 = arith.constant 0 : index
    %c0_22 = arith.constant 0 : index
    %c0_23 = arith.constant 0 : index
    %98 = vector.load %arg6[%c0_19, %c0_20, %c0_21, %c0_22, %c0_23] : memref<1x2x16x16x4xf32, #tpu.memory_space<vmem>>, vector<1x2x16x16x4xf32>
    %99 = vector.shape_cast %98 : vector<1x2x16x16x4xf32> to vector<2x16x16x4xf32>
    %100 = vector.shape_cast %97 : vector<2x16x16x4xf32> to vector<1x2x16x16x4xf32>
    tpu.vector_store %arg6[%c0_19, %c0_20, %c0_21, %c0_22, %c0_23], %100 {strides = array<i32>} : memref<1x2x16x16x4xf32, #tpu.memory_space<vmem>>, vector<1x2x16x16x4xf32>,
    return
  }
  func.func @transform_0(%arg0: i32, %arg1: i32) -> (i32, i32, i32, i32) {
    %c0_i32 = arith.constant 0 : i32
    %c0_i32_0 = arith.constant 0 : i32
    %c0_i32_1 = arith.constant 0 : i32
    %c0_i32_2 = arith.constant 0 : i32
    return %c0_i32, %c0_i32_0, %c0_i32_1, %arg0 : i32, i32, i32, i32
  }
  func.func @transform_1(%arg0: i32, %arg1: i32) -> (i32, i32, i32) {
    %c0_i32 = arith.constant 0 : i32
    %c0_i32_0 = arith.constant 0 : i32
    return %arg1, %c0_i32, %arg0 : i32, i32, i32
  }
  func.func @transform_2(%arg0: i32, %arg1: i32) -> (i32, i32, i32) {
    %c0_i32 = arith.constant 0 : i32
    %c0_i32_0 = arith.constant 0 : i32
    return %arg1, %c0_i32, %arg0 : i32, i32, i32
  }
  func.func @transform_3(%arg0: i32, %arg1: i32) -> (i32, i32, i32) {
    %c0_i32 = arith.constant 0 : i32
    %c0_i32_0 = arith.constant 0 : i32
    return %arg1, %c0_i32, %arg0 : i32, i32, i32
  }
  func.func @transform_4(%arg0: i32, %arg1: i32) -> (i32, i32, i32, i32, i32) {
    %c0_i32 = arith.constant 0 : i32
    %c0_i32_0 = arith.constant 0 : i32
    %c0_i32_1 = arith.constant 0 : i32
    %c0_i32_2 = arith.constant 0 : i32
    return %arg1, %c0_i32, %c0_i32_0, %c0_i32_1, %arg0 : i32, i32, i32, i32, i32
  }
}

</mosaic_0001>

<bundles_post_ra>
// kernel: tpu_custom_call.1
= control target key start
LH: loop header
LB: loop body
LE: loop exit
PB: predicated region body
PF: predicated region fallthrough
CT: control target
= control target key end

     0   :  { %s4694_s15 = smov 0   ;;  %s4696_s16 = smov 0   ;;  %s12272_s0 = inlined_call_operand.vmem [shape: f32[2,16,16,4], index: 0, kind: input, shape index: {}]   ;;  %s12273_s1 = inlined_call_operand.vmem [shape: f32[2,9,4], index: 1, kind: input, shape index: {}]   ;;  %s12274_s2 = inlined_call_operand.vmem [shape: f32[2,1,4], index: 2, kind: input, shape index: {}]   ;;  %s12275_s3 = inlined_call_operand.vmem [shape: f32[2,1,4], index: 3, kind: input, shape index: {}]   ;;  %s12276_s4 = inlined_call_operand.vmem [shape: f32[2,2,16,16,4], index: 4, kind: output, shape index: {}]  }
   0x1   :  { %s4698_s17 = smov 0  }
   0x2 LB: > { %s23_s18 = sadd.s32 1, %s4662_s16  ;;  %p4604_p0 = scmp.ge.s32.totalorder %s4666_s17, 1  ;;  %s4666_s17 = sphi %s4698_s17, %s14_s17   ;;  %s4662_s16 = sphi %s4696_s16, %s15099_s16   ;;  %s4658_s15 = sphi %s4694_s15, %s15098_s15  }
   0x3   : > { %p24_p1 = scmp.ge.s32.totalorder %s23_s18, 2  ;;  %p216_p2 = scmp.lt.s32.totalorder %s4666_s17, 3 }
   0x5   : > { %s15101_s18 = smov (%p24_p1, %s23_s18), 0  ;;  %p217_p3 = pnand %p4604_p0, %p216_p2 }
   0x7   : > { %220 = sbr.rel (%p217_p3) target bundleno = 1015 (0x3f7), region = 36 }
   0xe   : > { %v4715_v0 = vld [vmem:[%s12272_s0] sm:$0xff]  ;;  %v4720_v1 = vld [vmem:[%s12272_s0 + $0x8] sm:$0xff]  ;;  %p268_p4 = scmp.lt.s32.totalorder %s4658_s15, 1  ;;  %v4725_v2 = vld [vmem:[%s12272_s0 + $0x10] sm:$0xff]  ;;  %vm425_vm0 = vcmask 1040384   ;;  %v4668_v14 = vmov 0.0   ;;  %v690_v46 = vlaneseq }
   0xf   : > { %12589 = vst [vmem:[#allocation2_spill] sm:$0xff] %v4715_v0  ;;  %12590 = vst [vmem:[#allocation3_spill] sm:$0xff] %v4720_v1  ;;  %v4730_v3 = vld [vmem:[%s12272_s0 + $0x18] sm:$0xff]  ;;  %v4735_v4 = vld [vmem:[%s12272_s0 + $0x100] sm:$0xff]  ;;  %v4782_v15 = vrot.slane %v4668_v14, 7  ;;  %vm1008_vm1 = vcmask 1046528  }
  0x10   : > { %12591 = vst [vmem:[#allocation4_spill] sm:$0xff] %v4725_v2  ;;  %12592 = vst [vmem:[#allocation5_spill] sm:$0xff] %v4730_v3  ;;  %v4740_v5 = vld [vmem:[%s12272_s0 + $0x108] sm:$0xff]  ;;  %v4745_v6 = vld [vmem:[%s12272_s0 + $0x110] sm:$0xff]  ;;  %s15103_s15 = smov (!%p268_p4, %s4658_s15), 1  ;;  %v476_v26 = vrot.slane %v4735_v4, 7 }
  0x11   : > { %v4750_v7 = vld [vmem:[%s12272_s0 + $0x118] sm:$0xff]  ;;  %v4755_v8 = vld [vmem:[%s12272_s0 + $0x120] sm:$0xff]  ;;  %v4760_v9 = vld [vmem:[%s12272_s0 + $0x128] sm:$0xff]  ;;  %12593 = vst [vmem:[#allocation6_spill] sm:$0xff] %v4782_v15  ;;  %v12291_v27 = vrot.slane %v4740_v5, 7  ;;  %v479_v31 = vrot.slane %v4745_v6, 7  ;;  %s281_s22 = scalar_lea.vmem %s12274_s2, %s15103_s15  ;;  %s287_s26 = scalar_lea.vmem %s12275_s3, %s15103_s15 }
  0x12   : > { %v4765_v10 = vld [vmem:[%s12272_s0 + $0x130] sm:$0xff]  ;;  %v4770_v11 = vld [vmem:[%s12272_s0 + $0x138] sm:$0xff]  ;;  %v4775_v12 = vld [vmem:[%s12272_s0 + $0x140] sm:$0xff]  ;;  %v12288_v32 = vrot.slane %v4750_v7, 7  ;;  %v482_v33 = vrot.slane %v4755_v8, 7  ;;  %v12286_v37 = vrot.slane %v4760_v9, 7 }
  0x13   : > { %v4780_v13 = vld [vmem:[%s12272_s0 + $0x148] sm:$0xff]  ;;  %v4791_v17 = vld [vmem:[%s12272_s0 + $0x150] sm:$0xff]  ;;  %v4796_v18 = vld [vmem:[%s12272_s0 + $0x158] sm:$0xff]  ;;  %v485_v38 = vrot.slane %v4765_v10, 7  ;;  %v12281_v39 = vrot.slane %v4770_v11, 7  ;;  %v488_v43 = vrot.slane %v4775_v12, 7  ;;  %v4895_v50 = vsel %vm425_vm0, %v476_v26, %v12291_v27 }
  0x14   : > { %v4801_v19 = vld [vmem:[%s12272_s0 + $0x160] sm:$0xff]  ;;  %v4808_v22 = vld [vmem:[%s12272_s0 + $0x168] sm:$0xff]  ;;  %v4813_v23 = vld [vmem:[%s12272_s0 + $0x170] sm:$0xff]  ;;  %v12280_v44 = vrot.slane %v4780_v13, 7  ;;  %v491_v45 = vrot.slane %v4791_v17, 7  ;;  %12594 = vst [vmem:[#allocation7_spill] sm:$0xff] %v4895_v50 }
  0x15   : > { %v4818_v24 = vld [vmem:[%s12272_s0 + $0x178] sm:$0xff]  ;;  %v4826_v28 = vld [vmem:[%s12272_s0 + $0x180] sm:$0xff]  ;;  %v4831_v29 = vld [vmem:[%s12272_s0 + $0x188] sm:$0xff]  ;;  %v12277_v51 = vrot.slane %v4796_v18, 7  ;;  %v494_v52 = vrot.slane %v4801_v19, 7  ;;  %v12278_v53 = vrot.slane %v4808_v22, 7 }
  0x16   : > { %v4836_v30 = vld [vmem:[%s12272_s0 + $0x190] sm:$0xff]  ;;  %v4844_v34 = vld [vmem:[%s12272_s0 + $0x198] sm:$0xff]  ;;  %v4849_v35 = vld [vmem:[%s12272_s0 + $0x1a0] sm:$0xff]  ;;  %v497_v56 = vrot.slane %v4813_v23, 7  ;;  %v12279_v57 = vrot.slane %v4818_v24, 7  ;;  %v500_v58 = vrot.slane %v4826_v28, 7  ;;  %v4926_v28 = vsel %vm425_vm0, %v479_v31, %v12288_v32 }
  0x17   : > { %v4854_v36 = vld [vmem:[%s12272_s0 + $0x1a8] sm:$0xff]  ;;  %v4862_v40 = vld [vmem:[%s12272_s0 + $0x1b0] sm:$0xff]  ;;  %v4867_v41 = vld [vmem:[%s12272_s0 + $0x1b8] sm:$0xff]  ;;  %v12282_v59 = vrot.slane %v4831_v29, 7  ;;  %v503_v60 = vrot.slane %v4836_v30, 7  ;;  %v12283_v61 = vrot.slane %v4844_v34, 7  ;;  %v4931_v30 = vsel %vm425_vm0, %v482_v33, %v12286_v37 }
  0x18   : > { %v4872_v42 = vld [vmem:[%s12272_s0 + $0x1c0] sm:$0xff]  ;;  %v4880_v47 = vld [vmem:[%s12272_s0 + $0x1c8] sm:$0xff]  ;;  %v354_v48 = vld [vmem:[%s12272_s0 + $0x1d0] sm:$0xff]  ;;  %v506_v62 = vrot.slane %v4849_v35, 7  ;;  %v12284_v63 = vrot.slane %v4854_v36, 7  ;;  %v509_v6 = vrot.slane %v4862_v40, 7  ;;  %v4936_v35 = vsel %vm425_vm0, %v485_v38, %v12281_v39 }
  0x19   : > { %v4888_v49 = vld [vmem:[%s12272_s0 + $0x1d8] sm:$0xff]  ;;  %v356_v54 = vld [vmem:[%s12272_s0 + $0x1e0] sm:$0xff]  ;;  %v4906_v55 = vld [vmem:[%s12272_s0 + $0x1e8] sm:$0xff]  ;;  %v12285_v8 = vrot.slane %v4867_v41, 7  ;;  %v512_v10 = vrot.slane %v4872_v42, 7  ;;  %v12287_v12 = vrot.slane %v4880_v47, 7  ;;  %v4943_v42 = vsel %vm425_vm0, %v488_v43, %v12280_v44 }
  0x1a   : > { %s4612_s21 = sshll.u32 %s15103_s15, 4  ;;  %v515_v14 = vrot.slane %v354_v48, 7  ;;  %v12289_v17 = vrot.slane %v4888_v49, 7  ;;  %v518_v19 = vrot.slane %v356_v54, 7  ;;  %v12290_v23 = vrot.slane %v4906_v55, 7  ;;  %12595 = vst [vmem:[#allocation8_spill] sm:$0xff] %v4926_v28 }
  0x1b   : > { %12596 = vst [vmem:[#allocation9_spill] sm:$0xff] %v4931_v30  ;;  %12597 = vst [vmem:[#allocation10_spill] sm:$0xff] %v4936_v35  ;;  %v4938_v40 = vshrl.u32 %v690_v46, 7  ;;  %v4948_v48 = vsel %vm425_vm0, %v491_v45, %v12277_v51  ;;  %v4953_v54 = vsel %vm425_vm0, %v494_v52, %v12278_v53  ;;  %v4958_v46 = vsel %vm425_vm0, %v497_v56, %v12279_v57  ;;  %s4963_s24 = scalar_lea.vmem %s12273_s1, %s4612_s21  ;;  %v5191_v15 = vld [vmem:[%s12272_s0 + $0x58] sm:$0xff]  ;;  %s4613_s27 = sshll.u32 %s15103_s15, 9 }
  0x1c   : > { %12599 = vst [vmem:[#allocation12_spill] sm:$0xff] %v4943_v42  ;;  %12600 = vst [vmem:[#allocation13_spill] sm:$0xff] %v4948_v48  ;;  %v4968_v51 = vsel %vm425_vm0, %v500_v58, %v12282_v59  ;;  %v4973_v53 = vsel %vm425_vm0, %v503_v60, %v12283_v61  ;;  %v4978_v57 = vsel %vm425_vm0, %v506_v62, %v12284_v63  ;;  %v5009_v37 = vsel %vm425_vm0, 0.0, %v479_v31  ;;  %v5030_v31 = vld [vmem:[%s4963_s24] sm:$0xff]  ;;  %s11961_s29 = scalar_lea.vmem %s12276_s4, %s4613_s27 }
  0x1d   : > { %12598 = vst [vmem:[#allocation11_spill] sm:$0xff] %v4938_v40  ;;  %12601 = vst [vmem:[#allocation14_spill] sm:$0xff] %v4953_v54  ;;  %v4981_v44 = vsub.s32 0, %v4938_v40  ;;  %v4986_v39 = vsel %vm425_vm0, %v509_v6, %v12285_v8  ;;  %v4991_v59 = vsel %vm425_vm0, %v512_v10, %v12287_v12  ;;  %v4996_v61 = vsel %vm425_vm0, %v515_v14, %v12289_v17 }
  0x1e   : > { %12602 = vst [vmem:[#allocation15_spill] sm:$0xff] %v4958_v46  ;;  %12603 = vst [vmem:[#allocation16_spill] sm:$0xff] %v4968_v51  ;;  %v5001_v63 = vsel %vm425_vm0, %v518_v19, %v12290_v23  ;;  %v5006_v8 = vsel %vm425_vm0, 0.0, %v476_v26  ;;  %v5012_v12 = vsel %vm425_vm0, 0.0, %v482_v33  ;;  %v5015_v32 = vsel %vm425_vm0, 0.0, %v485_v38 }
  0x1f   : > { %12604 = vst [vmem:[#allocation17_spill] sm:$0xff] %v4973_v53  ;;  %12605 = vst [vmem:[#allocation18_spill] sm:$0xff] %v4978_v57  ;;  %v5018_v17 = vsel %vm425_vm0, 0.0, %v488_v43  ;;  %v5021_v23 = vsel %vm425_vm0, 0.0, %v491_v45  ;;  %v5024_v4 = vsel %vm425_vm0, 0.0, %v494_v52  ;;  %v5027_v26 = vsel %vm425_vm0, 0.0, %v497_v56 }
  0x20   : > { %12606 = vst [vmem:[#allocation19_spill] sm:$0xff] %v4981_v44  ;;  %12607 = vst [vmem:[#allocation20_spill] sm:$0xff] %v4986_v39  ;;  %v5033_v33 = vsel %vm425_vm0, 0.0, %v500_v58  ;;  %v5036_v38 = vsel %vm425_vm0, 0.0, %v503_v60  ;;  %v5039_v43 = vsel %vm425_vm0, 0.0, %v506_v62  ;;  %v5043_v45 = vrot.slane %v5030_v31, %v4981_v44 }
  0x21   : > { %12608 = vst [vmem:[#allocation21_spill] sm:$0xff] %v4991_v59  ;;  %12609 = vst [vmem:[#allocation22_spill] sm:$0xff] %v4996_v61  ;;  %v5046_v52 = vsel %vm425_vm0, 0.0, %v509_v6  ;;  %v5049_v56 = vsel %vm425_vm0, 0.0, %v512_v10  ;;  %v5052_v27 = vsel %vm425_vm0, 0.0, %v515_v14  ;;  %v5055_v58 = vsel %vm425_vm0, 0.0, %v518_v19 }
  0x22   : > { %12610 = vst [vmem:[#allocation23_spill] sm:$0xff] %v5001_v63  ;;  %12611 = vst [vmem:[#allocation24_spill] sm:$0xff] %v5006_v8  ;;  %v5059_v60 = vmul.f32 %v5043_v45, %v5006_v8  ;;  %v5063_v62 = vmul.f32 %v5043_v45, %v4895_v50  ;;  %v5067_v6 = vmul.f32 %v5043_v45, %v5009_v37  ;;  %vm1478_vm2 = vcmask 1045504  }
  0x23   : > { %12612 = vst [vmem:[#allocation25_spill] sm:$0xff] %v5009_v37  ;;  %12613 = vst [vmem:[#allocation26_spill] sm:$0xff] %v5012_v12  ;;  %v5071_v10 = vmul.f32 %v5043_v45, %v4926_v28  ;;  %v5075_v14 = vmul.f32 %v5043_v45, %v5012_v12  ;;  %v5079_v19 = vmul.f32 %v5043_v45, %v4931_v30  ;;  %vm3930_vm3 = vcmask 31744  }
  0x24   : > { %12614 = vst [vmem:[#allocation27_spill] sm:$0xff] %v5015_v32  ;;  %12615 = vst [vmem:[#allocation28_spill] sm:$0xff] %v5018_v17  ;;  %v5083_v21 = vmul.f32 %v5043_v45, %v5015_v32  ;;  %v5087_v25 = vmul.f32 %v5043_v45, %v4936_v35  ;;  %v5091_v16 = vmul.f32 %v5043_v45, %v5018_v17 }
  0x25   : > { %12616 = vst [vmem:[#allocation29_spill] sm:$0xff] %v5021_v23  ;;  %12617 = vst [vmem:[#allocation30_spill] sm:$0xff] %v5024_v4  ;;  %v5095_v20 = vmul.f32 %v5043_v45, %v4943_v42  ;;  %v5099_v44 = vmul.f32 %v5043_v45, %v5021_v23 }
  0x26   : > { %12618 = vst [vmem:[#allocation31_spill] sm:$0xff] %v5027_v26  ;;  %12619 = vst [vmem:[#allocation32_spill] sm:$0xff] %v5033_v33 }
  0x27   : > { %12620 = vst [vmem:[#allocation33_spill] sm:$0xff] %v5036_v38  ;;  %12621 = vst [vmem:[#allocation34_spill] sm:$0xff] %v5039_v43 }
  0x28   : > { %12622 = vst [vmem:[#allocation35_spill] sm:$0xff] %v5043_v45  ;;  %12623 = vst [vmem:[#allocation36_spill] sm:$0xff] %v5046_v52 }
  0x29   : > { %12624 = vst [vmem:[#allocation37_spill] sm:$0xff] %v5049_v56  ;;  %12625 = vst [vmem:[#allocation38_spill] sm:$0xff] %v5052_v27 }
  0x2a   : > { %12626 = vst [vmem:[#allocation39_spill] sm:$0xff] %v5055_v58  ;;  %12627 = vst [vmem:[#allocation40_spill] sm:$0xff] %v5059_v60  ;;  %v5186_v60 = vmul.f32 %v5043_v45, %v4986_v39  ;;  %v5213_v39 = vmul.f32 %v5043_v45, %v5052_v27  ;;  %v5242_v27 = vmul.f32 %v5043_v45, %v5001_v63  ;;  %v5270_v63 = vld [vmem:[%s12272_s0 + $0xa8] sm:$0xff] }
  0x2b   : > { %12628 = vst [vmem:[#allocation41_spill] sm:$0xff] %v5063_v62  ;;  %12629 = vst [vmem:[#allocation42_spill] sm:$0xff] %v5067_v6  ;;  %v5160_v6 = vld [vmem:[%s12272_s0 + $0x40] sm:$0xff]  ;;  %v5182_v62 = vmul.f32 %v5043_v45, %v5046_v52  ;;  %v5217_v52 = vmul.f32 %v5043_v45, %v4996_v61  ;;  %v12667_v61 = vrot.slane %v4720_v1, 7 }
  0x2c   : > { %12630 = vst [vmem:[#allocation43_spill] sm:$0xff] %v5071_v10  ;;  %12631 = vst [vmem:[#allocation44_spill] sm:$0xff] %v5075_v14  ;;  %v5151_v14 = vmul.f32 %v5043_v45, %v5036_v38  ;;  %v5155_v10 = vmul.f32 %v5043_v45, %v4973_v53  ;;  %v5295_v1 = vld [vmem:[%s12272_s0 + $0xc0] sm:$0xff] }
  0x2d   : > { %12632 = vst [vmem:[#allocation45_spill] sm:$0xff] %v5079_v19  ;;  %12633 = vst [vmem:[#allocation46_spill] sm:$0xff] %v5083_v21  ;;  %v5103_v19 = vmul.f32 %v5043_v45, %v4948_v48  ;;  %v5129_v21 = vld [vmem:[%s12272_s0 + $0x28] sm:$0xff] }
  0x2e   : > { %12634 = vst [vmem:[#allocation47_spill] sm:$0xff] %v5087_v25  ;;  %12635 = vst [vmem:[#allocation48_spill] sm:$0xff] %v5091_v16  ;;  %v5108_v25 = vld [vmem:[%s12272_s0 + $0x20] sm:$0xff]  ;;  %v5112_v16 = vmul.f32 %v5043_v45, %v5024_v4 }
  0x2f   : > { %12636 = vst [vmem:[#allocation49_spill] sm:$0xff] %v5095_v20  ;;  %12637 = vst [vmem:[#allocation50_spill] sm:$0xff] %v5099_v44  ;;  %v5116_v20 = vmul.f32 %v5043_v45, %v4953_v54  ;;  %v5120_v44 = vmul.f32 %v5043_v45, %v5027_v26 }
  0x30   : > { %12638 = vst [vmem:[#allocation51_spill] sm:$0xff] %v5103_v19  ;;  %12639 = vst [vmem:[#allocation52_spill] sm:$0xff] %v5108_v25  ;;  %v5124_v19 = vmul.f32 %v5043_v45, %v4958_v46 }
  0x31   : > { %12640 = vst [vmem:[#allocation53_spill] sm:$0xff] %v5112_v16  ;;  %12641 = vst [vmem:[#allocation54_spill] sm:$0xff] %v5116_v20  ;;  %v5134_v16 = vld [vmem:[%s12272_s0 + $0x30] sm:$0xff]  ;;  %v5139_v20 = vld [vmem:[%s12272_s0 + $0x38] sm:$0xff] }
  0x32   : > { %12642 = vst [vmem:[#allocation55_spill] sm:$0xff] %v5120_v44  ;;  %12643 = vst [vmem:[#allocation56_spill] sm:$0xff] %v5124_v19  ;;  %v5143_v44 = vmul.f32 %v5043_v45, %v5033_v33  ;;  %v5147_v19 = vmul.f32 %v5043_v45, %v4968_v51 }
  0x33   : > { %12644 = vst [vmem:[#allocation57_spill] sm:$0xff] %v5129_v21  ;;  %12645 = vst [vmem:[#allocation58_spill] sm:$0xff] %v5134_v16  ;;  %v12671_v16 = vrot.slane %v4725_v2, 7  ;;  %v12676_v2 = vrot.slane %v4740_v5, 7  ;;  %v12684_v5 = vrot.slane %v4780_v13, 7  ;;  %v12692_v13 = vrot.slane %v4831_v29, 7 }
  0x34   : > { %12646 = vst [vmem:[#allocation59_spill] sm:$0xff] %v5139_v20  ;;  %12647 = vst [vmem:[#allocation60_spill] sm:$0xff] %v5143_v44  ;;  %v5165_v44 = vld [vmem:[%s12272_s0 + $0x48] sm:$0xff] }
  0x35   : > { %12648 = vst [vmem:[#allocation61_spill] sm:$0xff] %v5147_v19  ;;  %12649 = vst [vmem:[#allocation62_spill] sm:$0xff] %v5151_v14  ;;  %v5170_v19 = vld [vmem:[%s12272_s0 + $0x50] sm:$0xff]  ;;  %v5174_v14 = vmul.f32 %v5043_v45, %v5039_v43  ;;  %v5290_v43 = vld [vmem:[%s12272_s0 + $0xb8] sm:$0xff] }
  0x36   : > { %12650 = vst [vmem:[#allocation63_spill] sm:$0xff] %v5155_v10  ;;  %12651 = vst [vmem:[#allocation64_spill] sm:$0xff] %v5160_v6  ;;  %v5178_v10 = vmul.f32 %v5043_v45, %v4978_v57  ;;  %v5222_v57 = vld [vmem:[%s12272_s0 + $0x70] sm:$0xff]  ;;  %v12674_v6 = vrot.slane %v5108_v25, 7 }
  0x37   : > { %12652 = vst [vmem:[#allocation65_spill] sm:$0xff] %v5170_v19  ;;  %12653 = vst [vmem:[#allocation66_spill] sm:$0xff] %v5174_v14  ;;  %v5196_v14 = vld [vmem:[%s12272_s0 + $0x60] sm:$0xff]  ;;  %v5315_v19 = vld [vmem:[%s12272_s0 + $0xd0] sm:$0xff] }
  0x38   : > { %12654 = vst [vmem:[#allocation67_spill] sm:$0xff] %v5178_v10  ;;  %12655 = vst [vmem:[#allocation68_spill] sm:$0xff] %v5182_v62  ;;  %v5201_v10 = vld [vmem:[%s12272_s0 + $0x68] sm:$0xff]  ;;  %v5205_v62 = vmul.f32 %v5043_v45, %v5049_v56  ;;  %v5252_v56 = vld [vmem:[%s12272_s0 + $0x90] sm:$0xff] }
  0x39   : > { %12656 = vst [vmem:[#allocation69_spill] sm:$0xff] %v5186_v60  ;;  %v5209_v60 = vmul.f32 %v5043_v45, %v4991_v59  ;;  %12659 = vst [vmem:[#allocation72_spill] sm:$0xff] %v5213_v39  ;;  %v5247_v59 = vld [vmem:[%s12272_s0 + $0x88] sm:$0xff]  ;;  %v5257_v39 = vld [vmem:[%s12272_s0 + $0x98] sm:$0xff] }
  0x3a   : > { %12657 = vst [vmem:[#allocation70_spill] sm:$0xff] %v5205_v62  ;;  %12660 = vst [vmem:[#allocation73_spill] sm:$0xff] %v5217_v52  ;;  %v5227_v62 = vld [vmem:[%s12272_s0 + $0x78] sm:$0xff]  ;;  %v5238_v52 = vmul.f32 %v5043_v45, %v5055_v58  ;;  %v5265_v45 = vld [vmem:[%s12272_s0 + $0xa0] sm:$0xff] }
  0x3b   : > { %12658 = vst [vmem:[#allocation71_spill] sm:$0xff] %v5209_v60  ;;  %12661 = vst [vmem:[#allocation74_spill] sm:$0xff] %v5222_v57  ;;  %v5232_v60 = vld [vmem:[%s12272_s0 + $0x80] sm:$0xff]  ;;  %v5275_v58 = vld [vmem:[%s12272_s0 + $0xb0] sm:$0xff] }
  0x3c   : > { %12662 = vst [vmem:[#allocation75_spill] sm:$0xff] %v5227_v62  ;;  %12663 = vst [vmem:[#allocation76_spill] sm:$0xff] %v5232_v60  ;;  %v5340_v57 = vld [vmem:[%s12272_s0 + $0xe8] sm:$0xff]  ;;  %v820_v60 = vsub.s32 1, %v4938_v40  ;;  %v12680_v62 = vrot.slane %v4760_v9, 7  ;;  %v12688_v9 = vrot.slane %v4808_v22, 7 }
  0x3d   : > { %12664 = vst [vmem:[#allocation77_spill] sm:$0xff] %v5238_v52  ;;  %12665 = vst [vmem:[#allocation78_spill] sm:$0xff] %v5242_v27  ;;  %v12668_v52 = vrot.slane %v4715_v0, 7 }
  0x3e   : > { %12666 = vst [vmem:[#allocation79_spill] sm:$0xff] %v5247_v59  ;;  %v5374_v25 = vsel %vm425_vm0, %v12680_v62, 0.0  ;;  %v5394_v62 = vsel %vm425_vm0, %v12688_v9, 0.0  ;;  %v12697_v9 = vrot.slane %v4854_v36, 7  ;;  %v12705_v36 = vrot.slane %v4906_v55, 7 }
  0x3f   : > { %v5282_v27 = vsel %vm425_vm0, %v12668_v52, %v12667_v61  ;;  %v5300_v61 = vld [vmem:[%s12272_s0 + $0xc8] sm:$0xff]  ;;  %v12670_v52 = vrot.slane %v4730_v3, 7  ;;  %v5320_v3 = vld [vmem:[%s12272_s0 + $0xd8] sm:$0xff]  ;;  %12681 = vst [vmem:[#allocation85_spill] sm:$0xff] %v5374_v25  ;;  %12689 = vst [vmem:[#allocation89_spill] sm:$0xff] %v5394_v62 }
  0x40   : > { %12669 = vst [vmem:[#allocation80_spill] sm:$0xff] %v5282_v27  ;;  %v5364_v27 = vsel %vm425_vm0, %v12676_v2, 0.0  ;;  %v5384_v2 = vsel %vm425_vm0, %v12684_v5, 0.0  ;;  %v5404_v5 = vsel %vm425_vm0, %v12692_v13, 0.0  ;;  %v12701_v13 = vrot.slane %v4880_v47, 7 }
  0x41   : > { %v5307_v20 = vsel %vm425_vm0, %v12671_v16, %v12670_v52  ;;  %v5325_v16 = vld [vmem:[%s12272_s0 + $0xe0] sm:$0xff]  ;;  %v12673_v52 = vrot.slane %v5129_v21, 7  ;;  %v5345_v21 = vld [vmem:[%s12272_s0 + $0xf0] sm:$0xff]  ;;  %12677 = vst [vmem:[#allocation83_spill] sm:$0xff] %v5364_v27  ;;  %12685 = vst [vmem:[#allocation87_spill] sm:$0xff] %v5384_v2 }
  0x42   : > { %12672 = vst [vmem:[#allocation81_spill] sm:$0xff] %v5307_v20  ;;  %12693 = vst [vmem:[#allocation91_spill] sm:$0xff] %v5404_v5 }
  0x43   : > { %v5332_v0 = vsel %vm425_vm0, %v12674_v6, %v12673_v52  ;;  %v12682_v6 = vrot.slane %v4770_v11, 7  ;;  %v12690_v11 = vrot.slane %v4818_v24, 7  ;;  %v5417_v24 = vsel %vm425_vm0, %v12697_v9, 0.0 }
  0x44   : > { %12675 = vst [vmem:[#allocation82_spill] sm:$0xff] %v5332_v0  ;;  %v12678_v0 = vrot.slane %v4750_v7, 7  ;;  %v12686_v7 = vrot.slane %v4796_v18, 7  ;;  %v5407_v18 = vrot.slane %v5030_v31, %v820_v60  ;;  %12698 = vst [vmem:[#allocation94_spill] sm:$0xff] %v5417_v24  ;;  %v5427_v60 = vsel %vm425_vm0, %v12701_v13, 0.0 }
  0x45   : > { %v5379_v52 = vsel %vm425_vm0, %v12682_v6, 0.0  ;;  %v5399_v6 = vsel %vm425_vm0, %v12690_v11, 0.0  ;;  %v12699_v11 = vrot.slane %v4867_v41, 7  ;;  %12702 = vst [vmem:[#allocation96_spill] sm:$0xff] %v5427_v60  ;;  %v5437_v9 = vsel %vm425_vm0, %v12705_v36, 0.0 }
  0x46   : > { %v5369_v40 = vsel %vm425_vm0, %v12678_v0, 0.0  ;;  %12683 = vst [vmem:[#allocation86_spill] sm:$0xff] %v5379_v52  ;;  %v5389_v0 = vsel %vm425_vm0, %v12686_v7, 0.0  ;;  %12691 = vst [vmem:[#allocation90_spill] sm:$0xff] %v5399_v6  ;;  %v12695_v7 = vrot.slane %v4844_v34, 7  ;;  %v12703_v34 = vrot.slane %v4888_v49, 7 }
  0x47   : > { %12679 = vst [vmem:[#allocation84_spill] sm:$0xff] %v5369_v40  ;;  %12687 = vst [vmem:[#allocation88_spill] sm:$0xff] %v5389_v0  ;;  %v5422_v29 = vsel %vm425_vm0, %v12699_v11, 0.0  ;;  %v5441_v41 = vmul.f32 %v5407_v18, %v5006_v8  ;;  %v5445_v47 = vmul.f32 %v5407_v18, %v4895_v50  ;;  %v5449_v11 = vmul.f32 %v5407_v18, %v5364_v27  ;;  %v12729_v27 = vld [vmem:[#allocation36_spill] sm:$0xff] }
  0x48   : > { %12694 = vst [vmem:[#allocation92_spill] sm:$0xff] %v5407_v18  ;;  %v5412_v22 = vsel %vm425_vm0, %v12695_v7, 0.0  ;;  %12700 = vst [vmem:[#allocation95_spill] sm:$0xff] %v5422_v29  ;;  %v5432_v7 = vsel %vm425_vm0, %v12703_v34, 0.0  ;;  %v5453_v49 = vmul.f32 %v5407_v18, %v5009_v37  ;;  %v5457_v55 = vmul.f32 %v5407_v18, %v4926_v28  ;;  %v12724_v28 = vld [vmem:[#allocation34_spill] sm:$0xff]  ;;  %v358_v50 = vld [vmem:[%s12272_s0 + $0x1f0] sm:$0xff] }
  0x49   : > { %12696 = vst [vmem:[#allocation93_spill] sm:$0xff] %v5412_v22  ;;  %12704 = vst [vmem:[#allocation97_spill] sm:$0xff] %v5432_v7  ;;  %v5461_v13 = vmul.f32 %v5407_v18, %v5369_v40  ;;  %v5465_v34 = vmul.f32 %v5407_v18, %v5012_v12  ;;  %v5469_v36 = vmul.f32 %v5407_v18, %v4931_v30  ;;  %v12726_v37 = vld [vmem:[#allocation18_spill] sm:$0xff]  ;;  %v12731_v8 = vld [vmem:[#allocation20_spill] sm:$0xff] }
  0x4a   : > { %12706 = vst [vmem:[#allocation98_spill] sm:$0xff] %v5437_v9  ;;  %v5473_v20 = vmul.f32 %v5407_v18, %v5374_v25  ;;  %v5477_v59 = vmul.f32 %v5407_v18, %v5015_v32  ;;  %v5481_v40 = vmul.f32 %v5407_v18, %v4936_v35  ;;  %v5485_v12 = vmul.f32 %v5407_v18, %v5379_v52 }
  0x4b   : > { %v5489_v30 = vmul.f32 %v5407_v18, %v5018_v17  ;;  %v5493_v25 = vmul.f32 %v5407_v18, %v4943_v42  ;;  %v5497_v32 = vmul.f32 %v5407_v18, %v5384_v2  ;;  %v5501_v35 = vmul.f32 %v5407_v18, %v5021_v23 }
  0x4c   : > { %v5505_v52 = vmul.f32 %v5407_v18, %v4948_v48  ;;  %v5509_v17 = vmul.f32 %v5407_v18, %v5389_v0  ;;  %v5513_v42 = vmul.f32 %v5407_v18, %v5024_v4  ;;  %v5517_v2 = vmul.f32 %v5407_v18, %v4953_v54 }
  0x4d   : > { %12707 = vst [vmem:[#allocation99_spill] sm:$0xff] %v5493_v25  ;;  %12708 = vst [vmem:[#allocation100_spill] sm:$0xff] %v5497_v32  ;;  %v5521_v23 = vmul.f32 %v5407_v18, %v5394_v62  ;;  %v5525_v48 = vmul.f32 %v5407_v18, %v5027_v26  ;;  %v5529_v0 = vmul.f32 %v5407_v18, %v4958_v46 }
  0x4e   : > { %12709 = vst [vmem:[#allocation101_spill] sm:$0xff] %v5501_v35  ;;  %12710 = vst [vmem:[#allocation102_spill] sm:$0xff] %v5505_v52  ;;  %v5533_v4 = vmul.f32 %v5407_v18, %v5399_v6  ;;  %v5537_v54 = vmul.f32 %v5407_v18, %v5033_v33  ;;  %v5541_v62 = vmul.f32 %v5407_v18, %v4968_v51  ;;  %v5562_v51 = vld [vmem:[%s12272_s0 + $0xf8] sm:$0xff]  ;;  %v12791_v52 = vrot.slane %v5325_v16, 7  ;;  %v12801_v35 = vld [vmem:[#allocation4_spill] sm:$0xff] }
  0x4f   : > { %12711 = vst [vmem:[#allocation103_spill] sm:$0xff] %v5509_v17  ;;  %12712 = vst [vmem:[#allocation104_spill] sm:$0xff] %v5513_v42  ;;  %v5545_v26 = vmul.f32 %v5407_v18, %v5404_v5  ;;  %v5549_v46 = vmul.f32 %v5407_v18, %v5036_v38  ;;  %v5553_v6 = vmul.f32 %v5407_v18, %v4973_v53  ;;  %v12785_v42 = vrot.slane %v5295_v1, 7 }
  0x50   : > { %12713 = vst [vmem:[#allocation105_spill] sm:$0xff] %v5517_v2  ;;  %12714 = vst [vmem:[#allocation106_spill] sm:$0xff] %v5521_v23  ;;  %v5557_v33 = vmul.f32 %v5407_v18, %v5412_v22  ;;  %v5566_v5 = vmul.f32 %v5407_v18, %v12724_v28  ;;  %v5570_v38 = vmul.f32 %v5407_v18, %v12726_v37  ;;  %v5586_v28 = vld [vmem:[%s12272_s0 + $0x1f8] sm:$0xff]  ;;  %v12779_v23 = vrot.slane %v5265_v45, 7 }
  0x51   : > { %12715 = vst [vmem:[#allocation107_spill] sm:$0xff] %v5525_v48  ;;  %12716 = vst [vmem:[#allocation108_spill] sm:$0xff] %v5529_v0  ;;  %v5574_v53 = vmul.f32 %v5407_v18, %v5417_v24  ;;  %v5578_v22 = vmul.f32 %v5407_v18, %v12729_v27  ;;  %v5590_v37 = vmul.f32 %v5407_v18, %v12731_v8  ;;  %v12776_v48 = vrot.slane %v5252_v56, 7 }
  0x52   : > { %12717 = vst [vmem:[#allocation109_spill] sm:$0xff] %v5533_v4  ;;  %12718 = vst [vmem:[#allocation110_spill] sm:$0xff] %v5537_v54  ;;  %v5594_v24 = vmul.f32 %v5407_v18, %v5422_v29  ;;  %v12772_v4 = vld [vmem:[#allocation76_spill] sm:$0xff]  ;;  %v12782_v2 = vrot.slane %v5275_v58, 7  ;;  %v12788_v17 = vrot.slane %v5315_v19, 7 }
  0x53   : > { %12719 = vst [vmem:[#allocation111_spill] sm:$0xff] %v5541_v62  ;;  %12720 = vst [vmem:[#allocation112_spill] sm:$0xff] %v5545_v26  ;;  %v12765_v26 = vld [vmem:[#allocation75_spill] sm:$0xff]  ;;  %v12773_v0 = vrot.slane %v12772_v4, 7 }
  0x54   : > { %12721 = vst [vmem:[#allocation113_spill] sm:$0xff] %v5549_v46  ;;  %12722 = vst [vmem:[#allocation114_spill] sm:$0xff] %v5553_v6  ;;  %v12770_v62 = vld [vmem:[#allocation79_spill] sm:$0xff] }
  0x55   : > { %12723 = vst [vmem:[#allocation115_spill] sm:$0xff] %v5557_v33  ;;  %12725 = vst [vmem:[#allocation116_spill] sm:$0xff] %v5566_v5  ;;  %v5606_v5 = vmul.f32 %v5407_v18, %v5427_v60  ;;  %v12739_v33 = vld [vmem:[#allocation38_spill] sm:$0xff]  ;;  %v12746_v60 = vld [vmem:[#allocation23_spill] sm:$0xff]  ;;  %v12771_v54 = vrot.slane %v12770_v62, 7 }
  0x56   : > { %12727 = vst [vmem:[#allocation117_spill] sm:$0xff] %v5570_v38  ;;  %12728 = vst [vmem:[#allocation118_spill] sm:$0xff] %v5574_v53  ;;  %v12734_v53 = vld [vmem:[#allocation37_spill] sm:$0xff]  ;;  %v5610_v8 = vmul.f32 %v5407_v18, %v12739_v33  ;;  %v5631_v33 = vmul.f32 %v5407_v18, %v5437_v9  ;;  %v12758_v9 = vrot.slane %v5191_v15, 7 }
  0x57   : > { %12730 = vst [vmem:[#allocation119_spill] sm:$0xff] %v5578_v22  ;;  %12732 = vst [vmem:[#allocation120_spill] sm:$0xff] %v5590_v37  ;;  %v5598_v27 = vmul.f32 %v5407_v18, %v12734_v53  ;;  %v12736_v22 = vld [vmem:[#allocation21_spill] sm:$0xff]  ;;  %v12741_v37 = vld [vmem:[#allocation22_spill] sm:$0xff]  ;;  %v5618_v53 = vmul.f32 %v5407_v18, %v5432_v7 }
  0x58   : > { %12733 = vst [vmem:[#allocation121_spill] sm:$0xff] %v5594_v24  ;;  %v5602_v38 = vmul.f32 %v5407_v18, %v12736_v22  ;;  %12738 = vst [vmem:[#allocation124_spill] sm:$0xff] %v5606_v5  ;;  %v5614_v29 = vmul.f32 %v5407_v18, %v12741_v37  ;;  %v12744_v22 = vld [vmem:[#allocation39_spill] sm:$0xff]  ;;  %v5627_v5 = vmul.f32 %v5407_v18, %v12746_v60  ;;  %v521_v60 = vrot.slane %v358_v50, 7 }
  0x59   : > { %12735 = vst [vmem:[#allocation122_spill] sm:$0xff] %v5598_v27  ;;  %12740 = vst [vmem:[#allocation125_spill] sm:$0xff] %v5610_v8  ;;  %v474_v27 = vrot.slane %v5562_v51, 7  ;;  %v12749_v37 = vld [vmem:[#allocation59_spill] sm:$0xff]  ;;  %v12751_v8 = vld [vmem:[#allocation58_spill] sm:$0xff]  ;;  %v12754_v51 = vrot.slane %v5165_v44, 7 }
  0x5a   : > { %12737 = vst [vmem:[#allocation123_spill] sm:$0xff] %v5602_v38  ;;  %12742 = vst [vmem:[#allocation126_spill] sm:$0xff] %v5614_v29  ;;  %v5623_v38 = vmul.f32 %v5407_v18, %v12744_v22  ;;  %v12750_v29 = vrot.slane %v12749_v37, 7  ;;  %v12752_v24 = vrot.slane %v12751_v8, 7  ;;  %v12759_v18 = vld [vmem:[#allocation65_spill] sm:$0xff]  ;;  %v12807_v32 = vrot.slane %v12751_v8, 7 }
  0x5b   : > { %12743 = vst [vmem:[#allocation127_spill] sm:$0xff] %v5618_v53  ;;  %12747 = vst [vmem:[#allocation129_spill] sm:$0xff] %v5627_v5  ;;  %v12755_v53 = vld [vmem:[#allocation64_spill] sm:$0xff]  ;;  %v522_v5 = vrot.slane %v5586_v28, 7 }
  0x5c   : > { %12745 = vst [vmem:[#allocation128_spill] sm:$0xff] %v5623_v38  ;;  %12748 = vst [vmem:[#allocation130_spill] sm:$0xff] %v5631_v33  ;;  %v5638_v7 = vsel %vm425_vm0, %v12752_v24, %v12750_v29  ;;  %v12756_v22 = vrot.slane %v12755_v53, 7  ;;  %v12760_v33 = vrot.slane %v12759_v18, 7  ;;  %v12762_v24 = vrot.slane %v5201_v10, 7 }
  0x5d   : > { %12753 = vst [vmem:[#allocation59_spill] sm:$0xff] %v5638_v7  ;;  %v12763_v29 = vrot.slane %v5196_v14, 7  ;;  %v5748_v25 = vsel %vm425_vm0, 0.0, %v12807_v32 }
  0x5e   : > { %v5645_v38 = vsel %vm425_vm0, %v12756_v22, %v12754_v51  ;;  %v5653_v6 = vsel %vm425_vm0, %v12760_v33, %v12758_v9  ;;  %v12766_v22 = vrot.slane %v12765_v26, 7  ;;  %v12767_v51 = vld [vmem:[#allocation74_spill] sm:$0xff]  ;;  %v5674_v33 = vsel %vm425_vm0, %v12773_v0, %v12771_v54  ;;  %12808 = vst [vmem:[#allocation138_spill] sm:$0xff] %v5748_v25 }
  0x5f   : > { %12757 = vst [vmem:[#allocation58_spill] sm:$0xff] %v5645_v38  ;;  %12761 = vst [vmem:[#allocation64_spill] sm:$0xff] %v5653_v6  ;;  %v5660_v46 = vsel %vm425_vm0, %v12763_v29, %v12762_v24  ;;  %v12768_v50 = vrot.slane %v12767_v51, 7  ;;  %v12775_v9 = vrot.slane %v5257_v39, 7  ;;  %v12778_v29 = vrot.slane %v5270_v63, 7 }
  0x60   : > { %12764 = vst [vmem:[#allocation65_spill] sm:$0xff] %v5660_v46  ;;  %12774 = vst [vmem:[#allocation74_spill] sm:$0xff] %v5674_v33  ;;  %v12784_v0 = vrot.slane %v5300_v61, 7  ;;  %v12815_v8 = vrot.slane %v12767_v51, 7  ;;  %v12823_v51 = vrot.slane %v5275_v58, 7  ;;  %v12831_v58 = vrot.slane %v5345_v21, 7 }
  0x61   : > { %v5667_v28 = vsel %vm425_vm0, %v12768_v50, %v12766_v22  ;;  %v5681_v24 = vsel %vm425_vm0, %v12776_v48, %v12775_v9  ;;  %v5688_v22 = vsel %vm425_vm0, %v12779_v23, %v12778_v29  ;;  %v12781_v50 = vrot.slane %v5290_v43, 7 }
  0x62   : > { %12769 = vst [vmem:[#allocation75_spill] sm:$0xff] %v5667_v28  ;;  %12777 = vst [vmem:[#allocation79_spill] sm:$0xff] %v5681_v24  ;;  %v5702_v48 = vsel %vm425_vm0, %v12785_v42, %v12784_v0  ;;  %v12787_v9 = vrot.slane %v5320_v3, 7  ;;  %v12790_v29 = vrot.slane %v5340_v57, 7  ;;  %v12795_v42 = vld [vmem:[#allocation6_spill] sm:$0xff]  ;;  %v5768_v32 = vsel %vm425_vm0, 0.0, %v12815_v8 }
  0x63   : > { %12780 = vst [vmem:[#allocation76_spill] sm:$0xff] %v5688_v22  ;;  %v5695_v54 = vsel %vm425_vm0, %v12782_v2, %v12781_v50  ;;  %12786 = vst [vmem:[#allocation132_spill] sm:$0xff] %v5702_v48  ;;  %v12793_v50 = vrot.slane %v5345_v21, 7  ;;  %v5725_v0 = vsel %vm425_vm0, 0.0, %v12795_v42  ;;  %v5728_v48 = vsel %vm425_vm0, %v521_v60, %v522_v5  ;;  %v12841_v21 = vld [vmem:[#allocation57_spill] sm:$0xff] }
  0x64   : > { %12783 = vst [vmem:[#allocation131_spill] sm:$0xff] %v5695_v54  ;;  %v5709_v23 = vsel %vm425_vm0, %v12788_v17, %v12787_v9  ;;  %v5716_v2 = vsel %vm425_vm0, %v12791_v52, %v12790_v29  ;;  %12796 = vst [vmem:[#allocation136_spill] sm:$0xff] %v5725_v0  ;;  %v12798_v17 = vld [vmem:[#allocation2_spill] sm:$0xff]  ;;  %v12802_v52 = vrot.slane %v12801_v35, 7  ;;  %v12811_v35 = vrot.slane %v12759_v18, 7 }
  0x65   : > { %12789 = vst [vmem:[#allocation133_spill] sm:$0xff] %v5709_v23  ;;  %12792 = vst [vmem:[#allocation134_spill] sm:$0xff] %v5716_v2  ;;  %v5721_v54 = vsel %vm425_vm0, %v12793_v50, %v474_v27  ;;  %v12799_v9 = vrot.slane %v12798_v17, 7  ;;  %v12804_v2 = vld [vmem:[#allocation52_spill] sm:$0xff]  ;;  %v12809_v17 = vrot.slane %v12755_v53, 7  ;;  %v12817_v53 = vrot.slane %v12772_v4, 7 }
  0x66   : > { %12794 = vst [vmem:[#allocation135_spill] sm:$0xff] %v5721_v54  ;;  %12797 = vst [vmem:[#allocation137_spill] sm:$0xff] %v5728_v48  ;;  %v5738_v29 = vsel %vm425_vm0, 0.0, %v12802_v52  ;;  %v12805_v50 = vrot.slane %v12804_v2, 7  ;;  %v5758_v52 = vsel %vm425_vm0, 0.0, %v12811_v35  ;;  %v12813_v2 = vrot.slane %v5196_v14, 7 }
  0x67   : > { %v5733_v23 = vsel %vm425_vm0, 0.0, %v12799_v9  ;;  %12803 = vst [vmem:[#allocation4_spill] sm:$0xff] %v5738_v29  ;;  %v5753_v9 = vsel %vm425_vm0, 0.0, %v12809_v17  ;;  %12812 = vst [vmem:[#allocation140_spill] sm:$0xff] %v5758_v52  ;;  %v5773_v17 = vsel %vm425_vm0, 0.0, %v12817_v53  ;;  %v12819_v18 = vrot.slane %v5252_v56, 7 }
  0x68   : > { %12800 = vst [vmem:[#allocation2_spill] sm:$0xff] %v5733_v23  ;;  %v5743_v54 = vsel %vm425_vm0, 0.0, %v12805_v50  ;;  %12810 = vst [vmem:[#allocation139_spill] sm:$0xff] %v5753_v9  ;;  %v5763_v50 = vsel %vm425_vm0, 0.0, %v12813_v2  ;;  %v12821_v14 = vrot.slane %v5265_v45, 7  ;;  %v5788_v8 = vsel %vm425_vm0, 0.0, %v12823_v51 }
  0x69   : > { %12806 = vst [vmem:[#allocation52_spill] sm:$0xff] %v5743_v54  ;;  %12814 = vst [vmem:[#allocation141_spill] sm:$0xff] %v5763_v50  ;;  %v5778_v35 = vsel %vm425_vm0, 0.0, %v12819_v18  ;;  %v12825_v4 = vrot.slane %v5295_v1, 7  ;;  %v12827_v56 = vrot.slane %v5315_v19, 7  ;;  %v12829_v45 = vrot.slane %v5325_v16, 7 }
  0x6a   : > { %12816 = vst [vmem:[#allocation142_spill] sm:$0xff] %v5768_v32  ;;  %12818 = vst [vmem:[#allocation143_spill] sm:$0xff] %v5773_v17  ;;  %v5783_v2 = vsel %vm425_vm0, 0.0, %v12821_v14  ;;  %v5808_v51 = vsel %vm425_vm0, 0.0, %v12831_v58  ;;  %v5811_v1 = vsel %vm425_vm0, 0.0, %v521_v60  ;;  %v12835_v19 = vld [vmem:[#allocation3_spill] sm:$0xff] }
  0x6b   : > { %12820 = vst [vmem:[#allocation144_spill] sm:$0xff] %v5778_v35  ;;  %12822 = vst [vmem:[#allocation145_spill] sm:$0xff] %v5783_v2  ;;  %v5793_v53 = vsel %vm425_vm0, 0.0, %v12825_v4  ;;  %v5798_v18 = vsel %vm425_vm0, 0.0, %v12827_v56  ;;  %v5803_v14 = vsel %vm425_vm0, 0.0, %v12829_v45  ;;  %v5815_v4 = vsel %vm425_vm0, %v12795_v42, 0.0 }
  0x6c   : > { %12824 = vst [vmem:[#allocation146_spill] sm:$0xff] %v5788_v8  ;;  %12826 = vst [vmem:[#allocation147_spill] sm:$0xff] %v5793_v53  ;;  %v12836_v56 = vrot.slane %v12835_v19, 7  ;;  %v12838_v16 = vld [vmem:[#allocation5_spill] sm:$0xff]  ;;  %v12842_v58 = vrot.slane %v12841_v21, 7  ;;  %v12844_v60 = vrot.slane %v12749_v37, 7 }
  0x6d   : > { %12828 = vst [vmem:[#allocation148_spill] sm:$0xff] %v5798_v18  ;;  %12830 = vst [vmem:[#allocation149_spill] sm:$0xff] %v5803_v14  ;;  %v12839_v45 = vrot.slane %v12838_v16, 7  ;;  %v12849_v16 = vrot.slane %v5191_v15, 7  ;;  %v12851_v21 = vrot.slane %v5201_v10, 7  ;;  %v12853_v37 = vrot.slane %v12765_v26, 7 }
  0x6e   : > { %12832 = vst [vmem:[#allocation150_spill] sm:$0xff] %v5808_v51  ;;  %12833 = vst [vmem:[#allocation151_spill] sm:$0xff] %v5811_v1  ;;  %v5820_v48 = vsel %vm425_vm0, %v12836_v56, 0.0  ;;  %v5830_v51 = vsel %vm425_vm0, %v12842_v58, 0.0  ;;  %v5835_v1 = vsel %vm425_vm0, %v12844_v60, 0.0  ;;  %v12847_v56 = vrot.slane %v5165_v44, 7 }
  0x6f   : > { %12834 = vst [vmem:[#allocation152_spill] sm:$0xff] %v5815_v4  ;;  %12837 = vst [vmem:[#allocation3_spill] sm:$0xff] %v5820_v48  ;;  %v5825_v14 = vsel %vm425_vm0, %v12839_v45, 0.0  ;;  %v12846_v4 = vld [vmem:[#allocation11_spill] sm:$0xff]  ;;  %v5846_v45 = vsel %vm425_vm0, %v12849_v16, 0.0  ;;  %v5851_v58 = vsel %vm425_vm0, %v12851_v21, 0.0 }
  0x70   : > { %12840 = vst [vmem:[#allocation5_spill] sm:$0xff] %v5825_v14  ;;  %12843 = vst [vmem:[#allocation57_spill] sm:$0xff] %v5830_v51  ;;  %v1290_v19 = vsub.s32 2, %v12846_v4  ;;  %v5841_v48 = vsel %vm425_vm0, %v12847_v56, 0.0  ;;  %v5856_v60 = vsel %vm425_vm0, %v12853_v37, 0.0  ;;  %v12855_v44 = vrot.slane %v12770_v62, 7 }
  0x71   : > { %12845 = vst [vmem:[#allocation153_spill] sm:$0xff] %v5835_v1  ;;  %12848 = vst [vmem:[#allocation154_spill] sm:$0xff] %v5841_v48  ;;  %v12857_v15 = vrot.slane %v5257_v39, 7  ;;  %v12859_v10 = vrot.slane %v5270_v63, 7  ;;  %v12861_v26 = vrot.slane %v5290_v43, 7  ;;  %v12863_v62 = vrot.slane %v5300_v61, 7 }
  0x72   : > { %12850 = vst [vmem:[#allocation155_spill] sm:$0xff] %v5846_v45  ;;  %12852 = vst [vmem:[#allocation156_spill] sm:$0xff] %v5851_v58  ;;  %v5861_v56 = vsel %vm425_vm0, %v12855_v44, 0.0  ;;  %v12865_v39 = vrot.slane %v5320_v3, 7  ;;  %v12867_v63 = vrot.slane %v5340_v57, 7  ;;  %v5894_v43 = vsel %vm425_vm0, %v474_v27, 0.0 }
  0x73   : > { %12854 = vst [vmem:[#allocation157_spill] sm:$0xff] %v5856_v60  ;;  %12856 = vst [vmem:[#allocation158_spill] sm:$0xff] %v5861_v56  ;;  %v5866_v16 = vsel %vm425_vm0, %v12857_v15, 0.0  ;;  %v5871_v21 = vsel %vm425_vm0, %v12859_v10, 0.0  ;;  %v5876_v37 = vsel %vm425_vm0, %v12861_v26, 0.0  ;;  %v5881_v44 = vsel %vm425_vm0, %v12863_v62, 0.0 }
  0x74   : > { %12858 = vst [vmem:[#allocation159_spill] sm:$0xff] %v5866_v16  ;;  %12860 = vst [vmem:[#allocation160_spill] sm:$0xff] %v5871_v21  ;;  %v5886_v15 = vsel %vm425_vm0, %v12865_v39, 0.0  ;;  %v5891_v10 = vsel %vm425_vm0, %v12867_v63, 0.0  ;;  %v5897_v26 = vsel %vm425_vm0, %v522_v5, 0.0  ;;  %v12871_v61 = vld [vmem:[#allocation35_spill] sm:$0xff]  ;;  %v5904_v3 = vrot.slane %v5030_v31, %v1290_v19 }
  0x75   : > { %12862 = vst [vmem:[#allocation161_spill] sm:$0xff] %v5876_v37  ;;  %12864 = vst [vmem:[#allocation162_spill] sm:$0xff] %v5881_v44  ;;  %v5901_v62 = vmul.f32 %v12871_v61, %v5725_v0  ;;  %v5908_v57 = vmul.f32 %v12871_v61, %v12795_v42  ;;  %v5912_v39 = vmul.f32 %v12871_v61, %v5733_v23  ;;  %v12876_v27 = vld [vmem:[#allocation80_spill] sm:$0xff]  ;;  %v12906_v44 = vld [vmem:[#allocation105_spill] sm:$0xff] }
  0x76   : > { %12866 = vst [vmem:[#allocation163_spill] sm:$0xff] %v5886_v15  ;;  %12868 = vst [vmem:[#allocation164_spill] sm:$0xff] %v5891_v10  ;;  %v5916_v5 = vmul.f32 %v12871_v61, %v12876_v27  ;;  %v5920_v63 = vmul.f32 %v12871_v61, %v5738_v29  ;;  %v5928_v19 = vmul.f32 %v12871_v61, %v5743_v54  ;;  %v12905_v15 = vld [vmem:[#allocation104_spill] sm:$0xff]  ;;  %v12919_v56 = vld [vmem:[#allocation117_spill] sm:$0xff] }
  0x77   : > { %12869 = vst [vmem:[#allocation165_spill] sm:$0xff] %v5894_v43  ;;  %12870 = vst [vmem:[#allocation166_spill] sm:$0xff] %v5897_v26  ;;  %v12879_v43 = vld [vmem:[#allocation81_spill] sm:$0xff]  ;;  %v12882_v26 = vld [vmem:[#allocation82_spill] sm:$0xff] }
  0x78   : > { %12872 = vst [vmem:[#allocation35_spill] sm:$0xff] %v5901_v62  ;;  %12873 = vst [vmem:[#allocation167_spill] sm:$0xff] %v5904_v3  ;;  %v5924_v31 = vmul.f32 %v12871_v61, %v12879_v43  ;;  %v5932_v4 = vmul.f32 %v12871_v61, %v12882_v26  ;;  %v1100_v3 = vrot.slane %v5469_v36, 1  ;;  %v12900_v36 = vld [vmem:[#allocation99_spill] sm:$0xff] }
  0x79   : > { %12874 = vst [vmem:[#allocation168_spill] sm:$0xff] %v5908_v57  ;;  %12875 = vst [vmem:[#allocation169_spill] sm:$0xff] %v5912_v39  ;;  %v5936_v39 = vmul.f32 %v12871_v61, %v5748_v25  ;;  %v1092_v57 = vrot.slane %v5449_v11, 1  ;;  %v1099_v11 = vrot.slane %v5465_v34, 1 }
  0x7a   : > { %12877 = vst [vmem:[#allocation170_spill] sm:$0xff] %v5916_v5  ;;  %12878 = vst [vmem:[#allocation171_spill] sm:$0xff] %v5920_v63  ;;  %v5940_v5 = vmul.f32 %v12871_v61, %v5638_v7  ;;  %v5944_v63 = vmul.f32 %v12871_v61, %v5753_v9 }
  0x7b   : > { %12880 = vst [vmem:[#allocation172_spill] sm:$0xff] %v5924_v31  ;;  %12881 = vst [vmem:[#allocation173_spill] sm:$0xff] %v5928_v19  ;;  %v5948_v31 = vmul.f32 %v12871_v61, %v5645_v38  ;;  %v5952_v19 = vmul.f32 %v12871_v61, %v5758_v52  ;;  %v6024_v34 = vsel %vm1008_vm1, %v1099_v11, %v1100_v3 }
  0x7c   : > { %12883 = vst [vmem:[#allocation174_spill] sm:$0xff] %v5932_v4  ;;  %12884 = vst [vmem:[#allocation175_spill] sm:$0xff] %v5936_v39  ;;  %v5956_v4 = vmul.f32 %v12871_v61, %v5653_v6  ;;  %v5960_v39 = vmul.f32 %v12871_v61, %v5763_v50 }
  0x7d   : > { %12885 = vst [vmem:[#allocation176_spill] sm:$0xff] %v5940_v5  ;;  %12886 = vst [vmem:[#allocation177_spill] sm:$0xff] %v5944_v63  ;;  %v5964_v5 = vmul.f32 %v12871_v61, %v5660_v46  ;;  %v5968_v63 = vmul.f32 %v12871_v61, %v5768_v32 }
  0x7e   : > { %12887 = vst [vmem:[#allocation178_spill] sm:$0xff] %v5948_v31  ;;  %12888 = vst [vmem:[#allocation179_spill] sm:$0xff] %v5952_v19  ;;  %v5972_v31 = vmul.f32 %v12871_v61, %v5667_v28  ;;  %v5976_v19 = vmul.f32 %v12871_v61, %v5773_v17  ;;  %v12924_v28 = vld [vmem:[#allocation122_spill] sm:$0xff] }
  0x7f   : > { %12889 = vst [vmem:[#allocation180_spill] sm:$0xff] %v5956_v4  ;;  %12890 = vst [vmem:[#allocation181_spill] sm:$0xff] %v5960_v39  ;;  %v5980_v4 = vmul.f32 %v12871_v61, %v5674_v33  ;;  %v1089_v39 = vrot.slane %v5441_v41, 1  ;;  %v1094_v41 = vrot.slane %v5453_v49, 1  ;;  %v1104_v49 = vrot.slane %v5477_v59, 1 }
  0x80   : > { %12891 = vst [vmem:[#allocation182_spill] sm:$0xff] %v5964_v5  ;;  %12892 = vst [vmem:[#allocation183_spill] sm:$0xff] %v5968_v63  ;;  %v5985_v5 = vmul.f32 %v12871_v61, %v5778_v35  ;;  %v5989_v63 = vmul.f32 %v12871_v61, %v5681_v24  ;;  %v12917_v35 = vld [vmem:[#allocation116_spill] sm:$0xff] }
  0x81   : > { %12893 = vst [vmem:[#allocation184_spill] sm:$0xff] %v5972_v31  ;;  %12894 = vst [vmem:[#allocation185_spill] sm:$0xff] %v5976_v19  ;;  %v1090_v31 = vrot.slane %v5445_v47, 1  ;;  %v5995_v19 = vmul.f32 %v12871_v61, %v5783_v2  ;;  %v1097_v47 = vrot.slane %v5461_v13, 1  ;;  %v1109_v13 = vrot.slane %v5489_v30, 1  ;;  %v12911_v2 = vld [vmem:[#allocation110_spill] sm:$0xff] }
  0x82   : > { %12895 = vst [vmem:[#allocation186_spill] sm:$0xff] %v5980_v4  ;;  %12896 = vst [vmem:[#allocation187_spill] sm:$0xff] %v5985_v5  ;;  %v5999_v4 = vmul.f32 %v12871_v61, %v5688_v22  ;;  %v1095_v5 = vrot.slane %v5457_v55, 1 }
  0x83   : > { %12897 = vst [vmem:[#allocation188_spill] sm:$0xff] %v5989_v63  ;;  %12898 = vst [vmem:[#allocation189_spill] sm:$0xff] %v5995_v19  ;;  %v6004_v62 = vsel %vm1008_vm1, %v1089_v39, %v1090_v31  ;;  %v6007_v63 = vsel %vm1008_vm1, %v1090_v31, %v1092_v57  ;;  %v1105_v39 = vrot.slane %v5481_v40, 1  ;;  %v1107_v57 = vrot.slane %v5485_v12, 1  ;;  %v12902_v40 = vld [vmem:[#allocation101_spill] sm:$0xff] }
  0x84   : > { %12899 = vst [vmem:[#allocation190_spill] sm:$0xff] %v5999_v4  ;;  %v6012_v19 = vsel %vm1008_vm1, %v1094_v41, %v1095_v5  ;;  %v1102_v4 = vrot.slane %v5473_v20, 1  ;;  %v6018_v55 = vsel %vm1008_vm1, %v1095_v5, %v1097_v47  ;;  %v1110_v41 = vrot.slane %v12900_v36, 1  ;;  %v12901_v20 = vld [vmem:[#allocation100_spill] sm:$0xff]  ;;  %v12903_v47 = vld [vmem:[#allocation102_spill] sm:$0xff] }
  0x85   : > { %v1112_v10 = vrot.slane %v12901_v20, 1  ;;  %v6032_v59 = vsel %vm1008_vm1, %v1104_v49, %v1105_v39  ;;  %v6035_v5 = vsel %vm1008_vm1, %v1105_v39, %v1107_v57  ;;  %v1114_v12 = vrot.slane %v12902_v40, 1  ;;  %v12907_v57 = vld [vmem:[#allocation106_spill] sm:$0xff]  ;;  %v12908_v40 = vld [vmem:[#allocation107_spill] sm:$0xff] }
  0x86   : > { %v6027_v31 = vsel %vm1008_vm1, %v1100_v3, %v1102_v4  ;;  %v1115_v30 = vrot.slane %v12903_v47, 1  ;;  %v6040_v11 = vsel %vm1008_vm1, %v1109_v13, %v1110_v41  ;;  %v12904_v3 = vld [vmem:[#allocation103_spill] sm:$0xff]  ;;  %v1119_v20 = vrot.slane %v12905_v15, 1  ;;  %v12909_v13 = vld [vmem:[#allocation108_spill] sm:$0xff] }
  0x87   : > { %v6043_v4 = vsel %vm1008_vm1, %v1110_v41, %v1112_v10  ;;  %v1117_v36 = vrot.slane %v12904_v3, 1  ;;  %v1120_v39 = vrot.slane %v12906_v44, 1  ;;  %v1122_v37 = vrot.slane %v12907_v57, 1  ;;  %v12910_v10 = vld [vmem:[#allocation109_spill] sm:$0xff]  ;;  %v12912_v44 = vld [vmem:[#allocation111_spill] sm:$0xff]  ;;  %v12913_v57 = vld [vmem:[#allocation112_spill] sm:$0xff] }
  0x88   : > { %v6048_v49 = vsel %vm1008_vm1, %v1114_v12, %v1115_v30  ;;  %v1124_v21 = vrot.slane %v12908_v40, 1  ;;  %v1125_v22 = vrot.slane %v12909_v13, 1  ;;  %v1127_v41 = vrot.slane %v12910_v10, 1  ;;  %v12915_v10 = vld [vmem:[#allocation114_spill] sm:$0xff] }
  0x89   : > { %v6054_v47 = vsel %vm1008_vm1, %v1115_v30, %v1117_v36  ;;  %v1129_v3 = vrot.slane %v12911_v2, 1  ;;  %v6060_v15 = vsel %vm1008_vm1, %v1119_v20, %v1120_v39  ;;  %v6063_v12 = vsel %vm1008_vm1, %v1120_v39, %v1122_v37  ;;  %v12914_v36 = vld [vmem:[#allocation113_spill] sm:$0xff]  ;;  %v12916_v39 = vld [vmem:[#allocation115_spill] sm:$0xff] }
  0x8a   : > { %v1130_v16 = vrot.slane %v12912_v44, 1  ;;  %v1132_v24 = vrot.slane %v12913_v57, 1  ;;  %v6068_v40 = vsel %vm1008_vm1, %v1124_v21, %v1125_v22  ;;  %v6071_v30 = vsel %vm1008_vm1, %v1125_v22, %v1127_v41  ;;  %v12920_v41 = vld [vmem:[#allocation118_spill] sm:$0xff] }
  0x8b   : > { %v1134_v13 = vrot.slane %v12914_v36, 1  ;;  %v1135_v2 = vrot.slane %v12915_v10, 1  ;;  %v1137_v44 = vrot.slane %v12916_v39, 1  ;;  %v1139_v57 = vrot.slane %v12917_v35, 1  ;;  %v12921_v36 = vld [vmem:[#allocation119_spill] sm:$0xff] }
  0x8c   : > { %v6076_v20 = vsel %vm1008_vm1, %v1129_v3, %v1130_v16  ;;  %v6079_v37 = vsel %vm1008_vm1, %v1130_v16, %v1132_v24  ;;  %v1140_v22 = vrot.slane %v12919_v56, 1  ;;  %v1142_v33 = vrot.slane %v12920_v41, 1  ;;  %v12922_v3 = vld [vmem:[#allocation120_spill] sm:$0xff]  ;;  %v12923_v24 = vld [vmem:[#allocation121_spill] sm:$0xff]  ;;  %v12926_v56 = vld [vmem:[#allocation123_spill] sm:$0xff] }
  0x8d   : > { %v6084_v21 = vsel %vm1008_vm1, %v1134_v13, %v1135_v2  ;;  %v1144_v17 = vrot.slane %v12921_v36, 1  ;;  %v6090_v10 = vsel %vm1008_vm1, %v1135_v2, %v1137_v44  ;;  %v1145_v60 = vrot.slane %v12922_v3, 1  ;;  %v12927_v41 = vld [vmem:[#allocation124_spill] sm:$0xff]  ;;  %v12929_v44 = vld [vmem:[#allocation125_spill] sm:$0xff] }
  0x8e   : > { %12918 = vst [vmem:[#allocation99_spill] sm:$0xff] %v6084_v21  ;;  %v1147_v16 = vrot.slane %v12923_v24, 1  ;;  %v1149_v39 = vrot.slane %v12924_v28, 1  ;;  %v6096_v35 = vsel %vm1008_vm1, %v1139_v57, %v1140_v22  ;;  %v6099_v13 = vsel %vm1008_vm1, %v1140_v22, %v1142_v33  ;;  %v12930_v24 = vld [vmem:[#allocation126_spill] sm:$0xff]  ;;  %v12932_v22 = vld [vmem:[#allocation127_spill] sm:$0xff] }
  0x8f   : > { %12925 = vst [vmem:[#allocation100_spill] sm:$0xff] %v6099_v13  ;;  %v1150_v32 = vrot.slane %v12926_v56, 1  ;;  %v1152_v21 = vrot.slane %v12927_v41, 1  ;;  %v6104_v36 = vsel %vm1008_vm1, %v1144_v17, %v1145_v60  ;;  %v1154_v3 = vrot.slane %v12929_v44, 1  ;;  %v12933_v13 = vld [vmem:[#allocation128_spill] sm:$0xff] }
  0x90   : > { %v6107_v2 = vsel %vm1008_vm1, %v1145_v60, %v1147_v16  ;;  %v1155_v28 = vrot.slane %v12930_v24, 1  ;;  %v1157_v56 = vrot.slane %v12932_v22, 1  ;;  %v1159_v41 = vrot.slane %v12933_v13, 1  ;;  %v12935_v16 = vld [vmem:[#allocation129_spill] sm:$0xff]  ;;  %v12936_v24 = vld [vmem:[#allocation130_spill] sm:$0xff] }
  0x91   : > { %12928 = vst [vmem:[#allocation101_spill] sm:$0xff] %v6107_v2  ;;  %v6112_v57 = vsel %vm1008_vm1, %v1149_v39, %v1150_v32  ;;  %v6115_v33 = vsel %vm1008_vm1, %v1150_v32, %v1152_v21  ;;  %v6121_v17 = vmul.f32 %v12871_v61, %v5788_v8  ;;  %v1160_v44 = vrot.slane %v12935_v16, 1  ;;  %v12937_v39 = vld [vmem:[#allocation131_spill] sm:$0xff]  ;;  %v12940_v21 = vld [vmem:[#allocation132_spill] sm:$0xff]  ;;  %v12943_v16 = vld [vmem:[#allocation133_spill] sm:$0xff] }
  0x92   : > { %12931 = vst [vmem:[#allocation102_spill] sm:$0xff] %v6112_v57  ;;  %v6124_v60 = vsel %vm1008_vm1, %v1154_v3, %v1155_v28  ;;  %v1162_v2 = vrot.slane %v12936_v24, 1  ;;  %v6130_v57 = vmul.f32 %v12871_v61, %v12937_v39  ;;  %v6134_v32 = vmul.f32 %v12871_v61, %v5793_v53  ;;  %v12945_v53 = vld [vmem:[#allocation149_spill] sm:$0xff] }
  0x93   : > { %12934 = vst [vmem:[#allocation103_spill] sm:$0xff] %v6121_v17  ;;  %v6138_v13 = vmul.f32 %v12871_v61, %v12940_v21  ;;  %v1158_v22 = vsel %vm1008_vm1, %v1155_v28, %v1157_v56  ;;  %v6143_v3 = vmul.f32 %v12871_v61, %v5798_v18  ;;  %v6147_v24 = vmul.f32 %v12871_v61, %v12943_v16  ;;  %v12947_v21 = vld [vmem:[#allocation134_spill] sm:$0xff]  ;;  %v12949_v28 = vld [vmem:[#allocation92_spill] sm:$0xff] }
  0x94   : > { %12938 = vst [vmem:[#allocation104_spill] sm:$0xff] %v6130_v57  ;;  %12939 = vst [vmem:[#allocation105_spill] sm:$0xff] %v6134_v32  ;;  %v1161_v57 = vsel %vm1008_vm1, %v1159_v41, %v1160_v44  ;;  %v1163_v17 = vsel %vm1008_vm1, %v1160_v44, %v1162_v2  ;;  %v6153_v32 = vmul.f32 %v12871_v61, %v12945_v53  ;;  %v12951_v44 = vld [vmem:[#allocation3_spill] sm:$0xff] }
  0x95   : > { %12941 = vst [vmem:[#allocation106_spill] sm:$0xff] %v6138_v13  ;;  %12942 = vst [vmem:[#allocation107_spill] sm:$0xff] %v6143_v3  ;;  %v6157_v13 = vmul.f32 %v12871_v61, %v12947_v21  ;;  %v6161_v56 = vmul.f32 %v12949_v28, %v5725_v0  ;;  %v6165_v3 = vmul.f32 %v12949_v28, %v12795_v42 }
  0x96   : > { %12944 = vst [vmem:[#allocation108_spill] sm:$0xff] %v6147_v24  ;;  %12946 = vst [vmem:[#allocation109_spill] sm:$0xff] %v6153_v32  ;;  %v12950_v24 = vld [vmem:[#allocation152_spill] sm:$0xff]  ;;  %v6173_v2 = vmul.f32 %v12949_v28, %v5733_v23  ;;  %v6177_v61 = vmul.f32 %v12949_v28, %v12876_v27  ;;  %v6181_v0 = vmul.f32 %v12949_v28, %v12951_v44  ;;  %v12958_v32 = vld [vmem:[#allocation41_spill] sm:$0xff] }
  0x97   : > { %12948 = vst [vmem:[#allocation110_spill] sm:$0xff] %v6157_v13  ;;  %v6169_v41 = vmul.f32 %v12949_v28, %v12950_v24  ;;  %v6185_v42 = vmul.f32 %v12949_v28, %v5738_v29  ;;  %v6189_v24 = vmul.f32 %v12949_v28, %v12879_v43  ;;  %v6193_v23 = vmul.f32 %v12949_v28, %v5825_v14  ;;  %v12956_v13 = vld [vmem:[#allocation40_spill] sm:$0xff] }
  0x98   : > { %v6197_v27 = vmul.f32 %v12949_v28, %v5743_v54  ;;  %v6201_v44 = vmul.f32 %v12949_v28, %v12882_v26  ;;  %v6205_v29 = vmul.f32 %v12949_v28, %v5830_v51  ;;  %v6209_v43 = vmul.f32 %v12949_v28, %v5748_v25 }
  0x99   : > { %v6213_v14 = vmul.f32 %v12949_v28, %v5638_v7  ;;  %v6217_v54 = vmul.f32 %v12949_v28, %v5835_v1  ;;  %v6221_v26 = vmul.f32 %v12949_v28, %v5753_v9  ;;  %v6225_v51 = vmul.f32 %v12949_v28, %v5645_v38 }
  0x9a   : > { %v6229_v25 = vmul.f32 %v12949_v28, %v5841_v48  ;;  %v6233_v7 = vmul.f32 %v12949_v28, %v5758_v52  ;;  %v6237_v1 = vmul.f32 %v12949_v28, %v5653_v6  ;;  %v6241_v9 = vmul.f32 %v12949_v28, %v5846_v45 }
  0x9b   : > { %v6245_v38 = vmul.f32 %v12949_v28, %v5763_v50  ;;  %v6249_v48 = vmul.f32 %v12949_v28, %v5660_v46  ;;  %v6253_v52 = vmul.f32 %v12949_v28, %v5851_v58  ;;  %v6257_v6 = vadd.f32 %v6004_v62, %v12956_v13  ;;  %v12968_v13 = vld [vmem:[#allocation46_spill] sm:$0xff] }
  0x9c   : > { %12952 = vst [vmem:[#allocation111_spill] sm:$0xff] %v6241_v9  ;;  %v6261_v45 = vadd.f32 %v6007_v63, %v12958_v32  ;;  %v12960_v9 = vld [vmem:[#allocation42_spill] sm:$0xff]  ;;  %v6281_v63 = vadd.f32 %v6032_v59, %v12968_v13  ;;  %v12970_v32 = vld [vmem:[#allocation47_spill] sm:$0xff]  ;;  %v12980_v13 = vld [vmem:[#allocation53_spill] sm:$0xff] }
  0x9d   : > { %12953 = vst [vmem:[#allocation112_spill] sm:$0xff] %v6245_v38  ;;  %12954 = vst [vmem:[#allocation113_spill] sm:$0xff] %v6249_v48  ;;  %v6265_v50 = vadd.f32 %v6012_v19, %v12960_v9  ;;  %v12962_v38 = vld [vmem:[#allocation43_spill] sm:$0xff]  ;;  %v12964_v48 = vld [vmem:[#allocation44_spill] sm:$0xff]  ;;  %v6285_v9 = vadd.f32 %v6035_v5, %v12970_v32  ;;  %v6305_v5 = vadd.f32 %v6060_v15, %v12980_v13 }
  0x9e   : > { %12955 = vst [vmem:[#allocation114_spill] sm:$0xff] %v6253_v52  ;;  %12957 = vst [vmem:[#allocation115_spill] sm:$0xff] %v6257_v6  ;;  %v6269_v46 = vadd.f32 %v6018_v55, %v12962_v38  ;;  %v6273_v58 = vadd.f32 %v6024_v34, %v12964_v48  ;;  %v12966_v52 = vld [vmem:[#allocation45_spill] sm:$0xff]  ;;  %v12972_v19 = vld [vmem:[#allocation48_spill] sm:$0xff] }
  0x9f   : > { %12959 = vst [vmem:[#allocation116_spill] sm:$0xff] %v6261_v45  ;;  %12961 = vst [vmem:[#allocation117_spill] sm:$0xff] %v6265_v50  ;;  %v6277_v62 = vadd.f32 %v6027_v31, %v12966_v52  ;;  %v6289_v38 = vadd.f32 %v6040_v11, %v12972_v19  ;;  %v12974_v55 = vld [vmem:[#allocation49_spill] sm:$0xff]  ;;  %v12976_v34 = vld [vmem:[#allocation50_spill] sm:$0xff] }
  0xa0   : > { %12963 = vst [vmem:[#allocation118_spill] sm:$0xff] %v6269_v46  ;;  %12965 = vst [vmem:[#allocation119_spill] sm:$0xff] %v6273_v58  ;;  %v6293_v48 = vadd.f32 %v6043_v4, %v12974_v55  ;;  %v6297_v52 = vadd.f32 %v6048_v49, %v12976_v34  ;;  %v12978_v31 = vld [vmem:[#allocation51_spill] sm:$0xff]  ;;  %v12982_v32 = vld [vmem:[#allocation54_spill] sm:$0xff] }
  0xa1   : > { %12967 = vst [vmem:[#allocation120_spill] sm:$0xff] %v6277_v62  ;;  %12969 = vst [vmem:[#allocation121_spill] sm:$0xff] %v6281_v63  ;;  %v6301_v59 = vadd.f32 %v6054_v47, %v12978_v31  ;;  %v6309_v11 = vadd.f32 %v6063_v12, %v12982_v32  ;;  %v12984_v19 = vld [vmem:[#allocation55_spill] sm:$0xff]  ;;  %v12986_v55 = vld [vmem:[#allocation56_spill] sm:$0xff] }
  0xa2   : > { %12971 = vst [vmem:[#allocation122_spill] sm:$0xff] %v6285_v9  ;;  %12973 = vst [vmem:[#allocation123_spill] sm:$0xff] %v6289_v38  ;;  %v6313_v4 = vadd.f32 %v6068_v40, %v12984_v19  ;;  %v6317_v49 = vadd.f32 %v6071_v30, %v12986_v55  ;;  %v12988_v34 = vld [vmem:[#allocation60_spill] sm:$0xff]  ;;  %v12990_v31 = vld [vmem:[#allocation61_spill] sm:$0xff] }
  0xa3   : > { %12975 = vst [vmem:[#allocation124_spill] sm:$0xff] %v6293_v48  ;;  %12977 = vst [vmem:[#allocation125_spill] sm:$0xff] %v6297_v52  ;;  %v6321_v47 = vadd.f32 %v6076_v20, %v12988_v34  ;;  %v6325_v15 = vadd.f32 %v6079_v37, %v12990_v31  ;;  %v12992_v13 = vld [vmem:[#allocation62_spill] sm:$0xff]  ;;  %v12995_v32 = vld [vmem:[#allocation63_spill] sm:$0xff]  ;;  %v1035_v52 = vrot.slane %v6225_v51, 1 }
  0xa4   : > { %12979 = vst [vmem:[#allocation126_spill] sm:$0xff] %v6301_v59  ;;  %12981 = vst [vmem:[#allocation127_spill] sm:$0xff] %v6305_v5  ;;  %v12993_v5 = vld [vmem:[#allocation99_spill] sm:$0xff]  ;;  %v6333_v40 = vadd.f32 %v6090_v10, %v12995_v32  ;;  %v12997_v19 = vld [vmem:[#allocation66_spill] sm:$0xff]  ;;  %v13038_v59 = vrot.slane %v6177_v61, 1 }
  0xa5   : > { %12983 = vst [vmem:[#allocation128_spill] sm:$0xff] %v6309_v11  ;;  %12985 = vst [vmem:[#allocation129_spill] sm:$0xff] %v6313_v4  ;;  %v6329_v12 = vadd.f32 %v12993_v5, %v12992_v13  ;;  %v6337_v30 = vadd.f32 %v6096_v35, %v12997_v19  ;;  %v12999_v55 = vld [vmem:[#allocation67_spill] sm:$0xff]  ;;  %v13002_v34 = vld [vmem:[#allocation68_spill] sm:$0xff] }
  0xa6   : > { %12987 = vst [vmem:[#allocation130_spill] sm:$0xff] %v6317_v49  ;;  %12989 = vst [vmem:[#allocation92_spill] sm:$0xff] %v6321_v47  ;;  %v13000_v49 = vld [vmem:[#allocation100_spill] sm:$0xff]  ;;  %v6345_v37 = vadd.f32 %v6104_v36, %v13002_v34  ;;  %v13004_v31 = vld [vmem:[#allocation69_spill] sm:$0xff] }
  0xa7   : > { %12991 = vst [vmem:[#allocation40_spill] sm:$0xff] %v6325_v15  ;;  %12994 = vst [vmem:[#allocation41_spill] sm:$0xff] %v6329_v12  ;;  %v6341_v20 = vadd.f32 %v13000_v49, %v12999_v55  ;;  %v13005_v15 = vld [vmem:[#allocation101_spill] sm:$0xff]  ;;  %v13007_v13 = vld [vmem:[#allocation70_spill] sm:$0xff] }
  0xa8   : > { %12996 = vst [vmem:[#allocation42_spill] sm:$0xff] %v6333_v40  ;;  %12998 = vst [vmem:[#allocation43_spill] sm:$0xff] %v6337_v30  ;;  %v6349_v5 = vadd.f32 %v13005_v15, %v13004_v31  ;;  %v13008_v12 = vld [vmem:[#allocation102_spill] sm:$0xff]  ;;  %v13010_v32 = vld [vmem:[#allocation71_spill] sm:$0xff]  ;;  %v6463_v30 = vmul.f32 %v12949_v28, %v12945_v53 }
  0xa9   : > { %13001 = vst [vmem:[#allocation44_spill] sm:$0xff] %v6341_v20  ;;  %13003 = vst [vmem:[#allocation45_spill] sm:$0xff] %v6345_v37  ;;  %v6353_v10 = vadd.f32 %v13008_v12, %v13007_v13  ;;  %v6357_v35 = vadd.f32 %v6115_v33, %v13010_v32  ;;  %v13012_v19 = vld [vmem:[#allocation72_spill] sm:$0xff]  ;;  %v13014_v55 = vld [vmem:[#allocation73_spill] sm:$0xff]  ;;  %v1012_v37 = vrot.slane %v6169_v41, 1 }
  0xaa   : > { %13006 = vst [vmem:[#allocation46_spill] sm:$0xff] %v6349_v5  ;;  %v6361_v49 = vadd.f32 %v6124_v60, %v13012_v19  ;;  %v6364_v20 = vadd.f32 %v1158_v22, %v13014_v55  ;;  %v13016_v36 = vld [vmem:[#allocation77_spill] sm:$0xff]  ;;  %v13018_v15 = vld [vmem:[#allocation78_spill] sm:$0xff]  ;;  %v13021_v13 = vld [vmem:[#allocation75_spill] sm:$0xff] }
  0xab   : > { %13009 = vst [vmem:[#allocation47_spill] sm:$0xff] %v6353_v10  ;;  %13011 = vst [vmem:[#allocation48_spill] sm:$0xff] %v6357_v35  ;;  %v6367_v34 = vadd.f32 %v1161_v57, %v13016_v36  ;;  %v6370_v31 = vadd.f32 %v1163_v17, %v13018_v15  ;;  %v13020_v5 = vld [vmem:[#allocation142_spill] sm:$0xff]  ;;  %v6378_v33 = vmul.f32 %v12949_v28, %v13021_v13  ;;  %v13022_v32 = vld [vmem:[#allocation157_spill] sm:$0xff]  ;;  %v1009_v10 = vrot.slane %v6161_v56, 1 }
  0xac   : > { %13013 = vst [vmem:[#allocation49_spill] sm:$0xff] %v6361_v49  ;;  %13015 = vst [vmem:[#allocation50_spill] sm:$0xff] %v6364_v20  ;;  %v6374_v12 = vmul.f32 %v12949_v28, %v13020_v5  ;;  %v6382_v60 = vmul.f32 %v12949_v28, %v13022_v32  ;;  %v13023_v22 = vld [vmem:[#allocation143_spill] sm:$0xff]  ;;  %v13024_v57 = vld [vmem:[#allocation74_spill] sm:$0xff]  ;;  %v6455_v56 = vmul.f32 %v12949_v28, %v12943_v16 }
  0xad   : > { %13017 = vst [vmem:[#allocation51_spill] sm:$0xff] %v6367_v34  ;;  %13019 = vst [vmem:[#allocation53_spill] sm:$0xff] %v6370_v31  ;;  %v6386_v19 = vmul.f32 %v12949_v28, %v13023_v22  ;;  %v6390_v17 = vmul.f32 %v12949_v28, %v13024_v57  ;;  %v13025_v55 = vld [vmem:[#allocation158_spill] sm:$0xff]  ;;  %v13026_v15 = vld [vmem:[#allocation144_spill] sm:$0xff] }
  0xae   : > { %v6394_v36 = vmul.f32 %v12949_v28, %v13025_v55  ;;  %v6398_v31 = vmul.f32 %v12949_v28, %v13026_v15  ;;  %v13027_v34 = vld [vmem:[#allocation79_spill] sm:$0xff]  ;;  %v13029_v5 = vld [vmem:[#allocation145_spill] sm:$0xff]  ;;  %v13030_v20 = vld [vmem:[#allocation76_spill] sm:$0xff] }
  0xaf   : > { %v6402_v32 = vmul.f32 %v12949_v28, %v13027_v34  ;;  %v13028_v13 = vld [vmem:[#allocation159_spill] sm:$0xff]  ;;  %v6410_v57 = vmul.f32 %v12949_v28, %v13029_v5  ;;  %v6414_v55 = vmul.f32 %v12949_v28, %v13030_v20  ;;  %v13031_v49 = vld [vmem:[#allocation160_spill] sm:$0xff]  ;;  %v6422_v34 = vmul.f32 %v12949_v28, %v5788_v8  ;;  %v13032_v35 = vld [vmem:[#allocation161_spill] sm:$0xff] }
  0xb0   : > { %v6406_v22 = vmul.f32 %v12949_v28, %v13028_v13  ;;  %v6418_v15 = vmul.f32 %v12949_v28, %v13031_v49  ;;  %v6426_v13 = vmul.f32 %v12949_v28, %v12937_v39  ;;  %v6430_v5 = vmul.f32 %v12949_v28, %v13032_v35  ;;  %v13033_v8 = vld [vmem:[#allocation147_spill] sm:$0xff]  ;;  %v13034_v39 = vld [vmem:[#allocation132_spill] sm:$0xff]  ;;  %v13035_v35 = vld [vmem:[#allocation162_spill] sm:$0xff] }
  0xb1   : > { %v1010_v20 = vrot.slane %v6165_v3, 1  ;;  %v1014_v49 = vrot.slane %v6173_v2, 1  ;;  %v6439_v40 = vmul.f32 %v12949_v28, %v13033_v8  ;;  %v6443_v47 = vmul.f32 %v12949_v28, %v13034_v39  ;;  %v13036_v41 = vld [vmem:[#allocation163_spill] sm:$0xff]  ;;  %v13037_v39 = vld [vmem:[#allocation164_spill] sm:$0xff]  ;;  %v13044_v51 = vld [vmem:[#allocation25_spill] sm:$0xff] }
  0xb2   : > { %v6447_v4 = vmul.f32 %v12949_v28, %v13035_v35  ;;  %v6451_v3 = vmul.f32 %v12949_v28, %v5798_v18  ;;  %v6459_v2 = vmul.f32 %v12949_v28, %v13036_v41  ;;  %v6467_v35 = vmul.f32 %v12949_v28, %v12947_v21  ;;  %v13040_v48 = vld [vmem:[#allocation24_spill] sm:$0xff]  ;;  %v13041_v16 = vld [vmem:[#allocation167_spill] sm:$0xff]  ;;  %v13048_v9 = vld [vmem:[#allocation26_spill] sm:$0xff] }
  0xb3   : > { %v6471_v18 = vmul.f32 %v12949_v28, %v13037_v39  ;;  %v6477_v41 = vsel %vm1008_vm1, %v1009_v10, %v1010_v20  ;;  %v6480_v53 = vsel %vm1008_vm1, %v1010_v20, %v1012_v37  ;;  %v6485_v21 = vsel %vm1008_vm1, %v1014_v49, %v13038_v59  ;;  %v13039_v28 = vld [vmem:[#allocation111_spill] sm:$0xff]  ;;  %v13050_v63 = vld [vmem:[#allocation9_spill] sm:$0xff]  ;;  %v13056_v46 = vld [vmem:[#allocation10_spill] sm:$0xff] }
  0xb4   : > { %v1032_v20 = vrot.slane %v6217_v54, 1  ;;  %v1034_v37 = vrot.slane %v6221_v26, 1  ;;  %v1037_v59 = vrot.slane %v6229_v25, 1  ;;  %v1039_v49 = vrot.slane %v6233_v7, 1  ;;  %v13042_v11 = vld [vmem:[#allocation7_spill] sm:$0xff]  ;;  %v13045_v7 = vld [vmem:[#allocation8_spill] sm:$0xff] }
  0xb5   : > { %v1040_v39 = vrot.slane %v6237_v1, 1  ;;  %v1042_v8 = vrot.slane %v13039_v28, 1  ;;  %v6502_v38 = vmul.f32 %v13041_v16, %v13040_v48  ;;  %v6506_v10 = vmul.f32 %v13041_v16, %v13042_v11  ;;  %v13043_v54 = vld [vmem:[#allocation83_spill] sm:$0xff]  ;;  %v13046_v28 = vld [vmem:[#allocation84_spill] sm:$0xff]  ;;  %v13052_v62 = vld [vmem:[#allocation85_spill] sm:$0xff] }
  0xb6   : > { %v6510_v26 = vmul.f32 %v13041_v16, %v13043_v54  ;;  %v6514_v25 = vmul.f32 %v13041_v16, %v13044_v51  ;;  %v6518_v1 = vmul.f32 %v13041_v16, %v13045_v7  ;;  %v6522_v48 = vmul.f32 %v13041_v16, %v13046_v28  ;;  %v13054_v58 = vld [vmem:[#allocation27_spill] sm:$0xff]  ;;  %v13058_v50 = vld [vmem:[#allocation86_spill] sm:$0xff]  ;;  %v13060_v45 = vld [vmem:[#allocation28_spill] sm:$0xff] }
  0xb7   : > { %v6526_v11 = vmul.f32 %v13041_v16, %v13048_v9  ;;  %v6530_v54 = vmul.f32 %v13041_v16, %v13050_v63  ;;  %v6534_v51 = vmul.f32 %v13041_v16, %v13052_v62  ;;  %v6538_v7 = vmul.f32 %v13041_v16, %v13054_v58  ;;  %v13062_v6 = vld [vmem:[#allocation12_spill] sm:$0xff] }
  0xb8   : > { %13047 = vst [vmem:[#allocation54_spill] sm:$0xff] %v6522_v48  ;;  %v6542_v28 = vmul.f32 %v13041_v16, %v13056_v46  ;;  %v6546_v9 = vmul.f32 %v13041_v16, %v13058_v50  ;;  %v6550_v63 = vmul.f32 %v13041_v16, %v13060_v45  ;;  %v6554_v62 = vmul.f32 %v13041_v16, %v13062_v6 }
  0xb9   : > { %13049 = vst [vmem:[#allocation55_spill] sm:$0xff] %v6526_v11  ;;  %13051 = vst [vmem:[#allocation56_spill] sm:$0xff] %v6530_v54  ;;  %v13126_v11 = vld [vmem:[#allocation114_spill] sm:$0xff] }
  0xba   : > { %13053 = vst [vmem:[#allocation60_spill] sm:$0xff] %v6534_v51  ;;  %13055 = vst [vmem:[#allocation61_spill] sm:$0xff] %v6538_v7  ;;  %v13064_v51 = vld [vmem:[#allocation87_spill] sm:$0xff]  ;;  %v13066_v7 = vld [vmem:[#allocation29_spill] sm:$0xff]  ;;  %v1047_v48 = vrot.slane %v13126_v11, 1 }
  0xbb   : > { %13057 = vst [vmem:[#allocation62_spill] sm:$0xff] %v6542_v28  ;;  %13059 = vst [vmem:[#allocation99_spill] sm:$0xff] %v6546_v9  ;;  %v6558_v58 = vmul.f32 %v13041_v16, %v13064_v51  ;;  %v6562_v46 = vmul.f32 %v13041_v16, %v13066_v7  ;;  %v13068_v28 = vld [vmem:[#allocation13_spill] sm:$0xff]  ;;  %v13070_v9 = vld [vmem:[#allocation88_spill] sm:$0xff] }
  0xbc   : > { %13061 = vst [vmem:[#allocation63_spill] sm:$0xff] %v6550_v63  ;;  %13063 = vst [vmem:[#allocation66_spill] sm:$0xff] %v6554_v62  ;;  %v6566_v50 = vmul.f32 %v13041_v16, %v13068_v28  ;;  %v6570_v45 = vmul.f32 %v13041_v16, %v13070_v9  ;;  %v13072_v63 = vld [vmem:[#allocation30_spill] sm:$0xff] }
  0xbd   : > { %13065 = vst [vmem:[#allocation67_spill] sm:$0xff] %v6558_v58  ;;  %13067 = vst [vmem:[#allocation100_spill] sm:$0xff] %v6562_v46  ;;  %v6574_v6 = vmul.f32 %v13041_v16, %v13072_v63  ;;  %v13074_v62 = vld [vmem:[#allocation14_spill] sm:$0xff]  ;;  %v13076_v58 = vld [vmem:[#allocation89_spill] sm:$0xff] }
  0xbe   : > { %13069 = vst [vmem:[#allocation68_spill] sm:$0xff] %v6566_v50  ;;  %13071 = vst [vmem:[#allocation69_spill] sm:$0xff] %v6570_v45  ;;  %v6578_v51 = vmul.f32 %v13041_v16, %v13074_v62  ;;  %v6582_v7 = vmul.f32 %v13041_v16, %v13076_v58  ;;  %v13078_v46 = vld [vmem:[#allocation31_spill] sm:$0xff]  ;;  %v13082_v45 = vld [vmem:[#allocation90_spill] sm:$0xff] }
  0xbf   : > { %13073 = vst [vmem:[#allocation101_spill] sm:$0xff] %v6574_v6  ;;  %v6586_v28 = vmul.f32 %v13041_v16, %v13078_v46  ;;  %v13080_v50 = vld [vmem:[#allocation15_spill] sm:$0xff]  ;;  %v6594_v63 = vmul.f32 %v13041_v16, %v13082_v45  ;;  %v13084_v6 = vld [vmem:[#allocation32_spill] sm:$0xff] }
  0xc0   : > { %13075 = vst [vmem:[#allocation70_spill] sm:$0xff] %v6578_v51  ;;  %13077 = vst [vmem:[#allocation102_spill] sm:$0xff] %v6582_v7  ;;  %v6590_v9 = vmul.f32 %v13041_v16, %v13080_v50  ;;  %v6598_v62 = vmul.f32 %v13041_v16, %v13084_v6  ;;  %v13086_v51 = vld [vmem:[#allocation16_spill] sm:$0xff]  ;;  %v13088_v7 = vld [vmem:[#allocation91_spill] sm:$0xff] }
  0xc1   : > { %13079 = vst [vmem:[#allocation71_spill] sm:$0xff] %v6586_v28  ;;  %13083 = vst [vmem:[#allocation73_spill] sm:$0xff] %v6594_v63  ;;  %v6602_v58 = vmul.f32 %v13041_v16, %v13086_v51  ;;  %v6606_v46 = vmul.f32 %v13041_v16, %v13088_v7  ;;  %v13090_v28 = vld [vmem:[#allocation33_spill] sm:$0xff] }
  0xc2   : > { %13081 = vst [vmem:[#allocation72_spill] sm:$0xff] %v6590_v9  ;;  %13085 = vst [vmem:[#allocation77_spill] sm:$0xff] %v6598_v62  ;;  %v6610_v50 = vmul.f32 %v13041_v16, %v13090_v28  ;;  %v13092_v9 = vld [vmem:[#allocation17_spill] sm:$0xff]  ;;  %v13096_v62 = vld [vmem:[#allocation34_spill] sm:$0xff] }
  0xc3   : > { %13087 = vst [vmem:[#allocation78_spill] sm:$0xff] %v6602_v58  ;;  %13089 = vst [vmem:[#allocation111_spill] sm:$0xff] %v6606_v46  ;;  %v6614_v45 = vmul.f32 %v13041_v16, %v13092_v9  ;;  %v13094_v63 = vld [vmem:[#allocation93_spill] sm:$0xff]  ;;  %v6622_v51 = vmul.f32 %v13041_v16, %v13096_v62  ;;  %v13098_v58 = vld [vmem:[#allocation18_spill] sm:$0xff] }
  0xc4   : > { %13091 = vst [vmem:[#allocation167_spill] sm:$0xff] %v6610_v50  ;;  %v6618_v6 = vmul.f32 %v13041_v16, %v13094_v63  ;;  %v6626_v7 = vmul.f32 %v13041_v16, %v13098_v58  ;;  %v13100_v46 = vld [vmem:[#allocation94_spill] sm:$0xff]  ;;  %v13102_v50 = vld [vmem:[#allocation36_spill] sm:$0xff] }
  0xc5   : > { %13093 = vst [vmem:[#allocation191_spill] sm:$0xff] %v6614_v45  ;;  %13097 = vst [vmem:[#allocation193_spill] sm:$0xff] %v6622_v51  ;;  %v6630_v28 = vmul.f32 %v13041_v16, %v13100_v46  ;;  %v6634_v9 = vmul.f32 %v13041_v16, %v13102_v50  ;;  %v13104_v45 = vld [vmem:[#allocation20_spill] sm:$0xff]  ;;  %v13108_v51 = vld [vmem:[#allocation37_spill] sm:$0xff] }
  0xc6   : > { %13095 = vst [vmem:[#allocation192_spill] sm:$0xff] %v6618_v6  ;;  %13099 = vst [vmem:[#allocation194_spill] sm:$0xff] %v6626_v7  ;;  %v6638_v63 = vmul.f32 %v13041_v16, %v13104_v45  ;;  %v13106_v6 = vld [vmem:[#allocation95_spill] sm:$0xff]  ;;  %v6646_v58 = vmul.f32 %v13041_v16, %v13108_v51  ;;  %v13110_v7 = vld [vmem:[#allocation21_spill] sm:$0xff] }
  0xc7   : > { %13101 = vst [vmem:[#allocation195_spill] sm:$0xff] %v6630_v28  ;;  %13103 = vst [vmem:[#allocation196_spill] sm:$0xff] %v6634_v9  ;;  %v6642_v62 = vmul.f32 %v13041_v16, %v13106_v6  ;;  %v6650_v46 = vmul.f32 %v13041_v16, %v13110_v7  ;;  %v13112_v28 = vld [vmem:[#allocation96_spill] sm:$0xff]  ;;  %v13114_v9 = vld [vmem:[#allocation38_spill] sm:$0xff] }
  0xc8   : > { %13105 = vst [vmem:[#allocation197_spill] sm:$0xff] %v6638_v63  ;;  %13109 = vst [vmem:[#allocation199_spill] sm:$0xff] %v6646_v58  ;;  %v6654_v50 = vmul.f32 %v13041_v16, %v13112_v28  ;;  %v6658_v45 = vmul.f32 %v13041_v16, %v13114_v9  ;;  %v13116_v63 = vld [vmem:[#allocation22_spill] sm:$0xff]  ;;  %v13120_v58 = vld [vmem:[#allocation39_spill] sm:$0xff] }
  0xc9   : > { %13107 = vst [vmem:[#allocation198_spill] sm:$0xff] %v6642_v62  ;;  %13111 = vst [vmem:[#allocation200_spill] sm:$0xff] %v6650_v46  ;;  %v6662_v6 = vmul.f32 %v13041_v16, %v13116_v63  ;;  %v13118_v62 = vld [vmem:[#allocation97_spill] sm:$0xff]  ;;  %v6670_v7 = vmul.f32 %v13041_v16, %v13120_v58  ;;  %v13122_v46 = vld [vmem:[#allocation23_spill] sm:$0xff] }
  0xca   : > { %13113 = vst [vmem:[#allocation201_spill] sm:$0xff] %v6654_v50  ;;  %13115 = vst [vmem:[#allocation202_spill] sm:$0xff] %v6658_v45  ;;  %v6666_v51 = vmul.f32 %v13041_v16, %v13118_v62  ;;  %v6674_v28 = vmul.f32 %v13041_v16, %v13122_v46  ;;  %v13124_v50 = vld [vmem:[#allocation112_spill] sm:$0xff]  ;;  %v13125_v9 = vld [vmem:[#allocation113_spill] sm:$0xff]  ;;  %v13128_v62 = vrot.slane %v6181_v0, 1  ;;  %v13131_v46 = vrot.slane %v6185_v42, 1 }
  0xcb   : > { %13117 = vst [vmem:[#allocation203_spill] sm:$0xff] %v6662_v6  ;;  %13121 = vst [vmem:[#allocation205_spill] sm:$0xff] %v6670_v7  ;;  %v1044_v54 = vrot.slane %v13124_v50, 1  ;;  %v1045_v45 = vrot.slane %v13125_v9, 1  ;;  %v13127_v63 = vld [vmem:[#allocation98_spill] sm:$0xff]  ;;  %v13130_v7 = vrot.slane %v6189_v24, 1 }
  0xcc   : > { %13119 = vst [vmem:[#allocation204_spill] sm:$0xff] %v6666_v51  ;;  %13123 = vst [vmem:[#allocation206_spill] sm:$0xff] %v6674_v28  ;;  %v6681_v6 = vmul.f32 %v13041_v16, %v13127_v63  ;;  %v13129_v51 = vrot.slane %v6177_v61, 1  ;;  %v13132_v9 = vrot.slane %v6193_v23, 1  ;;  %v13134_v63 = vrot.slane %v6201_v44, 1 }
  0xcd   : > { %v1021_v50 = vsel %vm1008_vm1, %v13131_v46, %v13130_v7  ;;  %v13133_v11 = vmov %v13130_v7  ;;  %v13135_v0 = vrot.slane %v6197_v27, 1  ;;  %v13138_v46 = vrot.slane %v6213_v14, 1 }
  0xce   : > { %v1018_v58 = vsel %vm1008_vm1, %v13129_v51, %v13128_v62  ;;  %v1023_v28 = vsel %vm1008_vm1, %v13133_v11, %v13132_v9  ;;  %v13136_v62 = vrot.slane %v6205_v29, 1  ;;  %v13137_v51 = vmov %v13134_v63 }
  0xcf   : > { %v1026_v61 = vsel %vm1008_vm1, %v13135_v0, %v13134_v63  ;;  %v13139_v23 = vrot.slane %v6209_v43, 1  ;;  %v13140_v7 = vmov %v13138_v46  ;;  %v1036_v27 = vsel %vm1008_vm1, %v1034_v37, %v1035_v52 }
  0xd0   : > { %v1028_v42 = vsel %vm1008_vm1, %v13137_v51, %v13136_v62  ;;  %v1033_v9 = vsel %vm1008_vm1, %v13140_v7, %v1032_v20  ;;  %v1038_v63 = vsel %vm1008_vm1, %v1035_v52, %v1037_v59  ;;  %v1041_v29 = vsel %vm1008_vm1, %v1039_v49, %v1040_v39  ;;  %v13141_v7 = vld [vmem:[#allocation35_spill] sm:$0xff] }
  0xd1   : > { %v1031_v24 = vsel %vm1008_vm1, %v13139_v23, %v13138_v46  ;;  %v1043_v44 = vsel %vm1008_vm1, %v1040_v39, %v1042_v8  ;;  %v1049_v11 = vrot.slane %v6374_v12, 1  ;;  %v1046_v0 = vsel %vm1008_vm1, %v1044_v54, %v1045_v45 }
  0xd2   : > { %v1048_v43 = vsel %vm1008_vm1, %v1045_v45, %v1047_v48  ;;  %v1050_v62 = vrot.slane %v6378_v33, 1  ;;  %v1052_v14 = vrot.slane %v6382_v60, 1  ;;  %v1054_v20 = vrot.slane %v6386_v19, 1 }
  0xd3   : > { %v1055_v37 = vrot.slane %v6390_v17, 1  ;;  %v1057_v52 = vrot.slane %v6394_v36, 1  ;;  %v1059_v59 = vrot.slane %v6398_v31, 1  ;;  %v1060_v8 = vrot.slane %v6402_v32, 1 }
  0xd4   : > { %v1062_v39 = vrot.slane %v6406_v22, 1  ;;  %v1064_v12 = vrot.slane %v6410_v57, 1  ;;  %v1065_v45 = vrot.slane %v6414_v55, 1  ;;  %v1067_v48 = vrot.slane %v6418_v15, 1 }
  0xd5   : > { %v1069_v33 = vrot.slane %v6422_v34, 1  ;;  %v1070_v60 = vrot.slane %v6426_v13, 1  ;;  %v1072_v19 = vrot.slane %v6430_v5, 1  ;;  %v1074_v17 = vrot.slane %v6439_v40, 1 }
  0xd6   : > { %v1075_v31 = vrot.slane %v6443_v47, 1  ;;  %v1077_v32 = vrot.slane %v6447_v4, 1  ;;  %v1079_v22 = vrot.slane %v6451_v3, 1  ;;  %v1080_v57 = vrot.slane %v6455_v56, 1 }
  0xd7   : > { %v1082_v55 = vrot.slane %v6459_v2, 1  ;;  %v1084_v36 = vrot.slane %v6463_v30, 1  ;;  %v1085_v34 = vrot.slane %v6467_v35, 1  ;;  %v1051_v13 = vsel %vm1008_vm1, %v1049_v11, %v1050_v62 }
  0xd8   : > { %v1053_v5 = vsel %vm1008_vm1, %v1050_v62, %v1052_v14  ;;  %v1056_v40 = vsel %vm1008_vm1, %v1054_v20, %v1055_v37  ;;  %v1087_v47 = vrot.slane %v6471_v18, 1  ;;  %v1058_v4 = vsel %vm1008_vm1, %v1055_v37, %v1057_v52  ;;  %v13143_v62 = vld [vmem:[#allocation168_spill] sm:$0xff]  ;;  %v13145_v20 = vld [vmem:[#allocation169_spill] sm:$0xff]  ;;  %v13147_v52 = vld [vmem:[#allocation170_spill] sm:$0xff] }
  0xd9   : > { %v1061_v15 = vsel %vm1008_vm1, %v1059_v59, %v1060_v8  ;;  %v1063_v3 = vsel %vm1008_vm1, %v1060_v8, %v1062_v39  ;;  %v1066_v56 = vsel %vm1008_vm1, %v1064_v12, %v1065_v45  ;;  %v1068_v30 = vsel %vm1008_vm1, %v1065_v45, %v1067_v48  ;;  %v13149_v8 = vld [vmem:[#allocation171_spill] sm:$0xff]  ;;  %v13151_v12 = vld [vmem:[#allocation172_spill] sm:$0xff]  ;;  %v13153_v48 = vld [vmem:[#allocation173_spill] sm:$0xff] }
  0xda   : > { %v6755_v35 = vsel %vm1008_vm1, %v1069_v33, %v1070_v60  ;;  %v6758_v2 = vsel %vm1008_vm1, %v1070_v60, %v1072_v19  ;;  %v6761_v49 = vsel %vm1008_vm1, %v1074_v17, %v1075_v31  ;;  %v6764_v18 = vsel %vm1008_vm1, %v1075_v31, %v1077_v32  ;;  %v13155_v33 = vld [vmem:[#allocation174_spill] sm:$0xff] }
  0xdb   : > { %v6767_v54 = vsel %vm1008_vm1, %v1079_v22, %v1080_v57  ;;  %v6770_v51 = vsel %vm1008_vm1, %v1080_v57, %v1082_v55  ;;  %v6773_v46 = vsel %vm1008_vm1, %v1084_v36, %v1085_v34  ;;  %v6776_v23 = vsel %vm1008_vm1, %v1085_v34, %v1087_v47 }
  0xdc   : > { %v6780_v11 = vadd.f32 %v6477_v41, %v13141_v7  ;;  %v6784_v14 = vadd.f32 %v6480_v53, %v13143_v62  ;;  %v6788_v37 = vadd.f32 %v6485_v21, %v13145_v20  ;;  %v6791_v59 = vadd.f32 %v1018_v58, %v13147_v52  ;;  %v13157_v53 = vld [vmem:[#allocation175_spill] sm:$0xff]  ;;  %v13159_v21 = vld [vmem:[#allocation176_spill] sm:$0xff]  ;;  %v13161_v58 = vld [vmem:[#allocation177_spill] sm:$0xff] }
  0xdd   : > { %v6794_v39 = vadd.f32 %v1021_v50, %v13149_v8  ;;  %v6797_v45 = vadd.f32 %v1023_v28, %v13151_v12  ;;  %v6800_v41 = vadd.f32 %v1026_v61, %v13153_v48  ;;  %v6803_v60 = vadd.f32 %v1028_v42, %v13155_v33  ;;  %v13163_v50 = vld [vmem:[#allocation178_spill] sm:$0xff]  ;;  %v13165_v28 = vld [vmem:[#allocation179_spill] sm:$0xff]  ;;  %v13167_v61 = vld [vmem:[#allocation180_spill] sm:$0xff] }
  0xde   : > { %13142 = vst [vmem:[#allocation112_spill] sm:$0xff] %v6780_v11  ;;  %13144 = vst [vmem:[#allocation113_spill] sm:$0xff] %v6784_v14  ;;  %v6806_v19 = vadd.f32 %v1031_v24, %v13157_v53  ;;  %v6809_v17 = vadd.f32 %v1033_v9, %v13159_v21  ;;  %v6812_v31 = vadd.f32 %v1036_v27, %v13161_v58  ;;  %v13169_v42 = vld [vmem:[#allocation181_spill] sm:$0xff]  ;;  %v13171_v24 = vld [vmem:[#allocation182_spill] sm:$0xff]  ;;  %v1562_v12 = vrot.slane %v6510_v26, 2 }
  0xdf   : > { %13146 = vst [vmem:[#allocation114_spill] sm:$0xff] %v6788_v37  ;;  %13148 = vst [vmem:[#allocation35_spill] sm:$0xff] %v6791_v59  ;;  %v6815_v32 = vadd.f32 %v1038_v63, %v13163_v50  ;;  %v6818_v22 = vadd.f32 %v1041_v29, %v13165_v28  ;;  %v6821_v57 = vadd.f32 %v1043_v44, %v13167_v61  ;;  %v13173_v9 = vld [vmem:[#allocation183_spill] sm:$0xff]  ;;  %v13175_v27 = vld [vmem:[#allocation184_spill] sm:$0xff] }
  0xe0   : > { %13150 = vst [vmem:[#allocation168_spill] sm:$0xff] %v6794_v39  ;;  %13152 = vst [vmem:[#allocation169_spill] sm:$0xff] %v6797_v45  ;;  %v6824_v55 = vadd.f32 %v1046_v0, %v13169_v42  ;;  %v6827_v36 = vadd.f32 %v1048_v43, %v13171_v24  ;;  %v6830_v34 = vadd.f32 %v1051_v13, %v13173_v9  ;;  %v13177_v63 = vld [vmem:[#allocation185_spill] sm:$0xff]  ;;  %v13179_v29 = vld [vmem:[#allocation186_spill] sm:$0xff]  ;;  %v1559_v43 = vrot.slane %v6502_v38, 2 }
  0xe1   : > { %13154 = vst [vmem:[#allocation170_spill] sm:$0xff] %v6800_v41  ;;  %13156 = vst [vmem:[#allocation171_spill] sm:$0xff] %v6803_v60  ;;  %v6833_v47 = vadd.f32 %v1053_v5, %v13175_v27  ;;  %v6836_v7 = vadd.f32 %v1056_v40, %v13177_v63  ;;  %v6839_v62 = vadd.f32 %v1058_v4, %v13179_v29  ;;  %v13181_v44 = vld [vmem:[#allocation187_spill] sm:$0xff]  ;;  %v13183_v0 = vld [vmem:[#allocation188_spill] sm:$0xff]  ;;  %v1560_v5 = vrot.slane %v6506_v10, 2 }
  0xe2   : > { %13158 = vst [vmem:[#allocation172_spill] sm:$0xff] %v6806_v19  ;;  %13160 = vst [vmem:[#allocation173_spill] sm:$0xff] %v6809_v17  ;;  %v6842_v20 = vadd.f32 %v1061_v15, %v13181_v44  ;;  %v6845_v52 = vadd.f32 %v1063_v3, %v13183_v0  ;;  %v13185_v8 = vld [vmem:[#allocation189_spill] sm:$0xff]  ;;  %v1564_v40 = vrot.slane %v6514_v25, 2  ;;  %v13187_v48 = vld [vmem:[#allocation190_spill] sm:$0xff]  ;;  %v1565_v15 = vrot.slane %v6518_v1, 2 }
  0xe3   : > { %13162 = vst [vmem:[#allocation174_spill] sm:$0xff] %v6812_v31  ;;  %13164 = vst [vmem:[#allocation175_spill] sm:$0xff] %v6815_v32  ;;  %v6849_v13 = vadd.f32 %v1066_v56, %v13185_v8  ;;  %v6855_v4 = vadd.f32 %v1068_v30, %v13187_v48  ;;  %v13189_v33 = vld [vmem:[#allocation54_spill] sm:$0xff]  ;;  %v13190_v3 = vld [vmem:[#allocation55_spill] sm:$0xff]  ;;  %v6861_v38 = vsel %vm1478_vm2, %v1559_v43, %v1560_v5 }
  0xe4   : > { %13166 = vst [vmem:[#allocation176_spill] sm:$0xff] %v6818_v22  ;;  %13168 = vst [vmem:[#allocation177_spill] sm:$0xff] %v6821_v57  ;;  %v1567_v53 = vrot.slane %v13189_v33, 2  ;;  %v1569_v21 = vrot.slane %v13190_v3, 2  ;;  %v6864_v56 = vsel %vm1478_vm2, %v1560_v5, %v1562_v12  ;;  %v13191_v10 = vld [vmem:[#allocation56_spill] sm:$0xff]  ;;  %v6869_v25 = vsel %vm1478_vm2, %v1564_v40, %v1565_v15  ;;  %v13193_v1 = vld [vmem:[#allocation61_spill] sm:$0xff] }
  0xe5   : > { %13170 = vst [vmem:[#allocation178_spill] sm:$0xff] %v6824_v55  ;;  %13172 = vst [vmem:[#allocation179_spill] sm:$0xff] %v6827_v36  ;;  %v1570_v58 = vrot.slane %v13191_v10, 2  ;;  %v13192_v26 = vld [vmem:[#allocation60_spill] sm:$0xff]  ;;  %v1574_v28 = vrot.slane %v13193_v1, 2  ;;  %v13194_v61 = vld [vmem:[#allocation62_spill] sm:$0xff] }
  0xe6   : > { %13174 = vst [vmem:[#allocation180_spill] sm:$0xff] %v6830_v34  ;;  %13176 = vst [vmem:[#allocation181_spill] sm:$0xff] %v6833_v47  ;;  %v1572_v50 = vrot.slane %v13192_v26, 2  ;;  %v6872_v30 = vsel %vm1478_vm2, %v1565_v15, %v1567_v53  ;;  %v1575_v42 = vrot.slane %v13194_v61, 2  ;;  %v13195_v27 = vld [vmem:[#allocation99_spill] sm:$0xff]  ;;  %v13197_v43 = vld [vmem:[#allocation66_spill] sm:$0xff] }
  0xe7   : > { %13178 = vst [vmem:[#allocation182_spill] sm:$0xff] %v6836_v7  ;;  %13180 = vst [vmem:[#allocation183_spill] sm:$0xff] %v6839_v62  ;;  %v6877_v24 = vsel %vm1478_vm2, %v1569_v21, %v1570_v58  ;;  %v1577_v63 = vrot.slane %v13195_v27, 2  ;;  %v13196_v29 = vld [vmem:[#allocation63_spill] sm:$0xff]  ;;  %v1580_v8 = vrot.slane %v13197_v43, 2  ;;  %v13199_v40 = vld [vmem:[#allocation100_spill] sm:$0xff] }
  0xe8   : > { %13182 = vst [vmem:[#allocation184_spill] sm:$0xff] %v6842_v20  ;;  %13184 = vst [vmem:[#allocation185_spill] sm:$0xff] %v6845_v52  ;;  %v6880_v9 = vsel %vm1478_vm2, %v1570_v58, %v1572_v50  ;;  %v1579_v44 = vrot.slane %v13196_v29, 2  ;;  %v6885_v0 = vsel %vm1478_vm2, %v1574_v28, %v1575_v42  ;;  %v13198_v5 = vld [vmem:[#allocation67_spill] sm:$0xff]  ;;  %v1584_v48 = vrot.slane %v13199_v40, 2  ;;  %v13200_v33 = vld [vmem:[#allocation68_spill] sm:$0xff] }
  0xe9   : > { %13186 = vst [vmem:[#allocation186_spill] sm:$0xff] %v6849_v13  ;;  %13188 = vst [vmem:[#allocation187_spill] sm:$0xff] %v6855_v4  ;;  %v1582_v12 = vrot.slane %v13198_v5, 2  ;;  %v6891_v15 = vsel %vm1478_vm2, %v1575_v42, %v1577_v63  ;;  %v1585_v53 = vrot.slane %v13200_v33, 2  ;;  %v13201_v3 = vld [vmem:[#allocation69_spill] sm:$0xff]  ;;  %v13203_v1 = vld [vmem:[#allocation70_spill] sm:$0xff] }
  0xea   : > { %v1587_v21 = vrot.slane %v13201_v3, 2  ;;  %v13202_v10 = vld [vmem:[#allocation101_spill] sm:$0xff]  ;;  %v6897_v26 = vsel %vm1478_vm2, %v1579_v44, %v1580_v8  ;;  %v1590_v28 = vrot.slane %v13203_v1, 2  ;;  %v13204_v61 = vld [vmem:[#allocation102_spill] sm:$0xff]  ;;  %v13205_v63 = vld [vmem:[#allocation71_spill] sm:$0xff] }
  0xeb   : > { %v1589_v58 = vrot.slane %v13202_v10, 2  ;;  %v6900_v50 = vsel %vm1478_vm2, %v1580_v8, %v1582_v12  ;;  %v1592_v27 = vrot.slane %v13204_v61, 2  ;;  %v6905_v29 = vsel %vm1478_vm2, %v1584_v48, %v1585_v53  ;;  %v13206_v5 = vld [vmem:[#allocation72_spill] sm:$0xff]  ;;  %v13207_v12 = vld [vmem:[#allocation73_spill] sm:$0xff]  ;;  %v13209_v1 = vld [vmem:[#allocation78_spill] sm:$0xff] }
  0xec   : > { %v6908_v42 = vsel %vm1478_vm2, %v1585_v53, %v1587_v21  ;;  %v1594_v43 = vrot.slane %v13205_v63, 2  ;;  %v1595_v40 = vrot.slane %v13206_v5, 2  ;;  %v1597_v33 = vrot.slane %v13207_v12, 2  ;;  %v13208_v3 = vld [vmem:[#allocation77_spill] sm:$0xff]  ;;  %v13210_v21 = vld [vmem:[#allocation111_spill] sm:$0xff]  ;;  %v13221_v47 = vld [vmem:[#allocation200_spill] sm:$0xff] }
  0xed   : > { %v6913_v44 = vsel %vm1478_vm2, %v1589_v58, %v1590_v28  ;;  %v6916_v8 = vsel %vm1478_vm2, %v1590_v28, %v1592_v27  ;;  %v1599_v10 = vrot.slane %v13208_v3, 2  ;;  %v1600_v53 = vrot.slane %v13209_v1, 2  ;;  %v13211_v63 = vld [vmem:[#allocation167_spill] sm:$0xff]  ;;  %v13213_v28 = vld [vmem:[#allocation192_spill] sm:$0xff]  ;;  %v13214_v52 = vld [vmem:[#allocation193_spill] sm:$0xff] }
  0xee   : > { %v6921_v48 = vsel %vm1478_vm2, %v1594_v43, %v1595_v40  ;;  %v1602_v61 = vrot.slane %v13210_v21, 2  ;;  %v1604_v4 = vrot.slane %v13211_v63, 2  ;;  %v6927_v5 = vsel %vm1478_vm2, %v1595_v40, %v1597_v33  ;;  %v13212_v58 = vld [vmem:[#allocation191_spill] sm:$0xff]  ;;  %v13215_v1 = vld [vmem:[#allocation194_spill] sm:$0xff]  ;;  %v13217_v33 = vld [vmem:[#allocation196_spill] sm:$0xff] }
  0xef   : > { %v1605_v13 = vrot.slane %v13212_v58, 2  ;;  %v1607_v27 = vrot.slane %v13213_v28, 2  ;;  %v1609_v12 = vrot.slane %v13214_v52, 2  ;;  %v6933_v3 = vsel %vm1478_vm2, %v1599_v10, %v1600_v53  ;;  %v13216_v21 = vld [vmem:[#allocation195_spill] sm:$0xff]  ;;  %v13218_v28 = vld [vmem:[#allocation197_spill] sm:$0xff]  ;;  %v13260_v32 = vld [vmem:[#allocation58_spill] sm:$0xff] }
  0xf0   : > { %v6936_v43 = vsel %vm1478_vm2, %v1600_v53, %v1602_v61  ;;  %v1610_v20 = vrot.slane %v13215_v1, 2  ;;  %v1612_v62 = vrot.slane %v13216_v21, 2  ;;  %v1614_v58 = vrot.slane %v13217_v33, 2  ;;  %v13219_v61 = vld [vmem:[#allocation198_spill] sm:$0xff]  ;;  %v13220_v7 = vld [vmem:[#allocation199_spill] sm:$0xff]  ;;  %v13226_v57 = vld [vmem:[#allocation205_spill] sm:$0xff] }
  0xf1   : > { %v6941_v63 = vsel %vm1478_vm2, %v1604_v4, %v1605_v13  ;;  %v6944_v40 = vsel %vm1478_vm2, %v1605_v13, %v1607_v27  ;;  %v1615_v52 = vrot.slane %v13218_v28, 2  ;;  %v1617_v1 = vrot.slane %v13219_v61, 2  ;;  %v13222_v27 = vld [vmem:[#allocation201_spill] sm:$0xff]  ;;  %v13223_v33 = vld [vmem:[#allocation202_spill] sm:$0xff]  ;;  %v13262_v17 = vld [vmem:[#allocation140_spill] sm:$0xff] }
  0xf2   : > { %v6949_v10 = vsel %vm1478_vm2, %v1609_v12, %v1610_v20  ;;  %v6952_v53 = vsel %vm1478_vm2, %v1610_v20, %v1612_v62  ;;  %v1619_v21 = vrot.slane %v13220_v7, 2  ;;  %v1620_v13 = vrot.slane %v13221_v47, 2  ;;  %v13224_v12 = vld [vmem:[#allocation203_spill] sm:$0xff]  ;;  %v13225_v62 = vld [vmem:[#allocation204_spill] sm:$0xff]  ;;  %v13227_v47 = vld [vmem:[#allocation206_spill] sm:$0xff] }
  0xf3   : > { %v6957_v4 = vsel %vm1478_vm2, %v1614_v58, %v1615_v52  ;;  %v1622_v34 = vrot.slane %v13222_v27, 2  ;;  %v1624_v36 = vrot.slane %v13223_v33, 2  ;;  %v6963_v28 = vsel %vm1478_vm2, %v1615_v52, %v1617_v1  ;;  %v13228_v33 = vld [vmem:[#allocation103_spill] sm:$0xff]  ;;  %v13230_v1 = vld [vmem:[#allocation104_spill] sm:$0xff]  ;;  %v13261_v31 = vld [vmem:[#allocation154_spill] sm:$0xff] }
  0xf4   : > { %v1625_v55 = vrot.slane %v13224_v12, 2  ;;  %v1627_v20 = vrot.slane %v13225_v62, 2  ;;  %v1629_v61 = vrot.slane %v13226_v57, 2  ;;  %v6969_v7 = vsel %vm1478_vm2, %v1619_v21, %v1620_v13  ;;  %v13232_v62 = vld [vmem:[#allocation105_spill] sm:$0xff]  ;;  %v13263_v19 = vld [vmem:[#allocation64_spill] sm:$0xff]  ;;  %v13264_v60 = vld [vmem:[#allocation155_spill] sm:$0xff] }
  0xf5   : > { %v6972_v58 = vsel %vm1478_vm2, %v1620_v13, %v1622_v34  ;;  %v1630_v22 = vrot.slane %v13227_v47, 2  ;;  %v1632_v27 = vrot.slane %v6681_v6, 2  ;;  %v6978_v52 = vadd.f32 %v6755_v35, %v13228_v33  ;;  %v13234_v13 = vld [vmem:[#allocation106_spill] sm:$0xff]  ;;  %v13236_v33 = vld [vmem:[#allocation107_spill] sm:$0xff]  ;;  %v13265_v41 = vld [vmem:[#allocation141_spill] sm:$0xff] }
  0xf6   : > { %v6982_v12 = vadd.f32 %v6758_v2, %v13230_v1  ;;  %v1626_v57 = vsel %vm1478_vm2, %v1624_v36, %v1625_v55  ;;  %v1628_v21 = vsel %vm1478_vm2, %v1625_v55, %v1627_v20  ;;  %v6988_v34 = vadd.f32 %v6761_v49, %v13232_v62  ;;  %v13238_v1 = vld [vmem:[#allocation108_spill] sm:$0xff]  ;;  %v13240_v55 = vld [vmem:[#allocation109_spill] sm:$0xff]  ;;  %v13242_v20 = vld [vmem:[#allocation110_spill] sm:$0xff] }
  0xf7   : > { %13229 = vst [vmem:[#allocation188_spill] sm:$0xff] %v6978_v52  ;;  %v6992_v47 = vadd.f32 %v6764_v18, %v13234_v13  ;;  %v1631_v6 = vsel %vm1478_vm2, %v1629_v61, %v1630_v22  ;;  %v1633_v35 = vsel %vm1478_vm2, %v1630_v22, %v1632_v27  ;;  %v6998_v2 = vadd.f32 %v6767_v54, %v13236_v33  ;;  %v13244_v62 = vld [vmem:[#allocation136_spill] sm:$0xff]  ;;  %v13245_v22 = vld [vmem:[#allocation6_spill] sm:$0xff]  ;;  %v13259_v52 = vld [vmem:[#allocation139_spill] sm:$0xff] }
  0xf8   : > { %13231 = vst [vmem:[#allocation189_spill] sm:$0xff] %v6982_v12  ;;  %13233 = vst [vmem:[#allocation190_spill] sm:$0xff] %v6988_v34  ;;  %v7002_v36 = vadd.f32 %v6770_v51, %v13238_v1  ;;  %v7006_v49 = vadd.f32 %v6773_v46, %v13240_v55  ;;  %v7010_v18 = vadd.f32 %v6776_v23, %v13242_v20  ;;  %v13246_v27 = vld [vmem:[#allocation152_spill] sm:$0xff]  ;;  %v13247_v13 = vld [vmem:[#allocation2_spill] sm:$0xff] }
  0xf9   : > { %13235 = vst [vmem:[#allocation54_spill] sm:$0xff] %v6992_v47  ;;  %13237 = vst [vmem:[#allocation55_spill] sm:$0xff] %v6998_v2  ;;  %v7014_v61 = vmul.f32 %v13041_v16, %v13244_v62  ;;  %v7018_v54 = vmul.f32 %v13041_v16, %v13245_v22  ;;  %v7022_v51 = vmul.f32 %v13041_v16, %v13246_v27  ;;  %v13248_v33 = vld [vmem:[#allocation80_spill] sm:$0xff]  ;;  %v13249_v1 = vld [vmem:[#allocation3_spill] sm:$0xff] }
  0xfa   : > { %13239 = vst [vmem:[#allocation56_spill] sm:$0xff] %v7002_v36  ;;  %13241 = vst [vmem:[#allocation60_spill] sm:$0xff] %v7006_v49  ;;  %v7026_v46 = vmul.f32 %v13041_v16, %v13247_v13  ;;  %v7030_v23 = vmul.f32 %v13041_v16, %v13248_v33  ;;  %v7034_v55 = vmul.f32 %v13041_v16, %v13249_v1  ;;  %v13250_v20 = vld [vmem:[#allocation4_spill] sm:$0xff]  ;;  %v13251_v62 = vld [vmem:[#allocation81_spill] sm:$0xff] }
  0xfb   : > { %13243 = vst [vmem:[#allocation61_spill] sm:$0xff] %v7010_v18  ;;  %v7038_v22 = vmul.f32 %v13041_v16, %v13250_v20  ;;  %v7042_v27 = vmul.f32 %v13041_v16, %v13251_v62  ;;  %v13252_v18 = vld [vmem:[#allocation5_spill] sm:$0xff]  ;;  %v13253_v49 = vld [vmem:[#allocation52_spill] sm:$0xff]  ;;  %v13254_v36 = vld [vmem:[#allocation82_spill] sm:$0xff] }
  0xfc   : > { %v7046_v13 = vmul.f32 %v13041_v16, %v13252_v18  ;;  %v7050_v33 = vmul.f32 %v13041_v16, %v13253_v49  ;;  %v7054_v1 = vmul.f32 %v13041_v16, %v13254_v36  ;;  %v13255_v2 = vld [vmem:[#allocation57_spill] sm:$0xff]  ;;  %v13256_v47 = vld [vmem:[#allocation138_spill] sm:$0xff]  ;;  %v13257_v34 = vld [vmem:[#allocation59_spill] sm:$0xff]  ;;  %v7074_v36 = vmul.f32 %v13041_v16, %v13259_v52 }
  0xfd   : > { %v7058_v20 = vmul.f32 %v13041_v16, %v13255_v2  ;;  %v7062_v62 = vmul.f32 %v13041_v16, %v13256_v47  ;;  %v7066_v18 = vmul.f32 %v13041_v16, %v13257_v34  ;;  %v13258_v12 = vld [vmem:[#allocation153_spill] sm:$0xff]  ;;  %v7078_v2 = vmul.f32 %v13041_v16, %v13260_v32  ;;  %v13268_v39 = vld [vmem:[#allocation156_spill] sm:$0xff]  ;;  %v13270_v59 = vld [vmem:[#allocation115_spill] sm:$0xff] }
  0xfe   : > { %v7070_v49 = vmul.f32 %v13041_v16, %v13258_v12  ;;  %v7082_v47 = vmul.f32 %v13041_v16, %v13261_v31  ;;  %v7086_v34 = vmul.f32 %v13041_v16, %v13262_v17  ;;  %v7090_v12 = vmul.f32 %v13041_v16, %v13263_v19  ;;  %v13266_v45 = vld [vmem:[#allocation65_spill] sm:$0xff]  ;;  %v13271_v37 = vld [vmem:[#allocation116_spill] sm:$0xff]  ;;  %v13273_v14 = vld [vmem:[#allocation118_spill] sm:$0xff] }
  0xff   : > { %v7094_v52 = vmul.f32 %v13041_v16, %v13264_v60  ;;  %v7098_v32 = vmul.f32 %v13041_v16, %v13265_v41  ;;  %v7102_v31 = vmul.f32 %v13041_v16, %v13266_v45  ;;  %v7106_v17 = vmul.f32 %v13041_v16, %v13268_v39  ;;  %v13272_v11 = vld [vmem:[#allocation117_spill] sm:$0xff] }
 0x100   : > { %v7110_v19 = vadd.f32 %v6861_v38, %v13270_v59  ;;  %v7114_v60 = vadd.f32 %v6864_v56, %v13271_v37  ;;  %v7118_v41 = vadd.f32 %v6869_v25, %v13272_v11  ;;  %v7122_v45 = vadd.f32 %v6872_v30, %v13273_v14  ;;  %v13276_v38 = vld [vmem:[#allocation121_spill] sm:$0xff]  ;;  %v13277_v56 = vld [vmem:[#allocation122_spill] sm:$0xff]  ;;  %v13278_v25 = vld [vmem:[#allocation123_spill] sm:$0xff] }
 0x101   : > { %13267 = vst [vmem:[#allocation62_spill] sm:$0xff] %v7102_v31  ;;  %13269 = vst [vmem:[#allocation99_spill] sm:$0xff] %v7106_v17  ;;  %v13274_v31 = vld [vmem:[#allocation119_spill] sm:$0xff]  ;;  %v13275_v17 = vld [vmem:[#allocation120_spill] sm:$0xff]  ;;  %v7134_v37 = vadd.f32 %v6885_v0, %v13276_v38  ;;  %v7138_v11 = vadd.f32 %v6891_v15, %v13277_v56  ;;  %v7142_v14 = vadd.f32 %v6897_v26, %v13278_v25 }
 0x102   : > { %v7126_v39 = vadd.f32 %v6877_v24, %v13274_v31  ;;  %v7130_v59 = vadd.f32 %v6880_v9, %v13275_v17  ;;  %v13279_v30 = vld [vmem:[#allocation124_spill] sm:$0xff]  ;;  %v13281_v24 = vld [vmem:[#allocation125_spill] sm:$0xff]  ;;  %v13283_v9 = vld [vmem:[#allocation126_spill] sm:$0xff] }
 0x103   : > { %v7146_v31 = vadd.f32 %v6900_v50, %v13279_v30  ;;  %v7150_v17 = vadd.f32 %v6905_v29, %v13281_v24  ;;  %v7154_v0 = vadd.f32 %v6908_v42, %v13283_v9  ;;  %v13285_v38 = vld [vmem:[#allocation127_spill] sm:$0xff]  ;;  %v13287_v56 = vld [vmem:[#allocation128_spill] sm:$0xff]  ;;  %v13289_v25 = vld [vmem:[#allocation129_spill] sm:$0xff] }
 0x104   : > { %v7158_v15 = vadd.f32 %v6913_v44, %v13285_v38  ;;  %v7162_v26 = vadd.f32 %v6916_v8, %v13287_v56  ;;  %v7166_v50 = vadd.f32 %v6921_v48, %v13289_v25  ;;  %v13291_v30 = vld [vmem:[#allocation130_spill] sm:$0xff]  ;;  %v13293_v24 = vld [vmem:[#allocation92_spill] sm:$0xff]  ;;  %v13297_v38 = vld [vmem:[#allocation41_spill] sm:$0xff] }
 0x105   : > { %13280 = vst [vmem:[#allocation63_spill] sm:$0xff] %v7146_v31  ;;  %13282 = vst [vmem:[#allocation66_spill] sm:$0xff] %v7150_v17  ;;  %v7170_v29 = vadd.f32 %v6927_v5, %v13291_v30  ;;  %v7174_v42 = vadd.f32 %v6933_v3, %v13293_v24  ;;  %v13295_v9 = vld [vmem:[#allocation40_spill] sm:$0xff]  ;;  %v7182_v8 = vadd.f32 %v6941_v63, %v13297_v38  ;;  %v13299_v56 = vld [vmem:[#allocation42_spill] sm:$0xff] }
 0x106   : > { %13284 = vst [vmem:[#allocation67_spill] sm:$0xff] %v7154_v0  ;;  %13286 = vst [vmem:[#allocation100_spill] sm:$0xff] %v7158_v15  ;;  %v7178_v44 = vadd.f32 %v6936_v43, %v13295_v9  ;;  %v7186_v48 = vadd.f32 %v6944_v40, %v13299_v56  ;;  %v13301_v25 = vld [vmem:[#allocation43_spill] sm:$0xff]  ;;  %v13303_v30 = vld [vmem:[#allocation44_spill] sm:$0xff] }
 0x107   : > { %13288 = vst [vmem:[#allocation68_spill] sm:$0xff] %v7162_v26  ;;  %13290 = vst [vmem:[#allocation69_spill] sm:$0xff] %v7166_v50  ;;  %v7190_v5 = vadd.f32 %v6949_v10, %v13301_v25  ;;  %v7194_v3 = vadd.f32 %v6952_v53, %v13303_v30  ;;  %v13305_v24 = vld [vmem:[#allocation45_spill] sm:$0xff]  ;;  %v13307_v9 = vld [vmem:[#allocation46_spill] sm:$0xff] }
 0x108   : > { %13292 = vst [vmem:[#allocation101_spill] sm:$0xff] %v7170_v29  ;;  %13294 = vst [vmem:[#allocation70_spill] sm:$0xff] %v7174_v42  ;;  %v7198_v43 = vadd.f32 %v6957_v4, %v13305_v24  ;;  %v7202_v63 = vadd.f32 %v6963_v28, %v13307_v9  ;;  %v13309_v38 = vld [vmem:[#allocation47_spill] sm:$0xff]  ;;  %v13311_v56 = vld [vmem:[#allocation48_spill] sm:$0xff] }
 0x109   : > { %13296 = vst [vmem:[#allocation102_spill] sm:$0xff] %v7178_v44  ;;  %13298 = vst [vmem:[#allocation71_spill] sm:$0xff] %v7182_v8  ;;  %v7206_v40 = vadd.f32 %v6969_v7, %v13309_v38  ;;  %v7210_v10 = vadd.f32 %v6972_v58, %v13311_v56  ;;  %v13313_v25 = vld [vmem:[#allocation49_spill] sm:$0xff]  ;;  %v13315_v53 = vld [vmem:[#allocation50_spill] sm:$0xff] }
 0x10a   : > { %13300 = vst [vmem:[#allocation72_spill] sm:$0xff] %v7186_v48  ;;  %13302 = vst [vmem:[#allocation73_spill] sm:$0xff] %v7190_v5  ;;  %v7213_v5 = vadd.f32 %v1626_v57, %v13313_v25  ;;  %v7216_v30 = vadd.f32 %v1628_v21, %v13315_v53  ;;  %v13317_v4 = vld [vmem:[#allocation142_spill] sm:$0xff]  ;;  %v13318_v28 = vld [vmem:[#allocation75_spill] sm:$0xff]  ;;  %v1482_v48 = vrot.slane %v7022_v51, 2 }
 0x10b   : > { %13304 = vst [vmem:[#allocation77_spill] sm:$0xff] %v7194_v3  ;;  %13306 = vst [vmem:[#allocation78_spill] sm:$0xff] %v7198_v43  ;;  %v7220_v24 = vmul.f32 %v13041_v16, %v13317_v4  ;;  %v7224_v9 = vmul.f32 %v13041_v16, %v13318_v28  ;;  %v13319_v7 = vld [vmem:[#allocation51_spill] sm:$0xff]  ;;  %v13323_v56 = vld [vmem:[#allocation157_spill] sm:$0xff]  ;;  %v1479_v3 = vrot.slane %v7014_v61, 2 }
 0x10c   : > { %13308 = vst [vmem:[#allocation111_spill] sm:$0xff] %v7202_v63  ;;  %13310 = vst [vmem:[#allocation167_spill] sm:$0xff] %v7206_v40  ;;  %v7227_v38 = vadd.f32 %v1631_v6, %v13319_v7  ;;  %v13321_v40 = vld [vmem:[#allocation53_spill] sm:$0xff]  ;;  %v7234_v57 = vmul.f32 %v13041_v16, %v13323_v56  ;;  %v13324_v21 = vld [vmem:[#allocation143_spill] sm:$0xff] }
 0x10d   : > { %13312 = vst [vmem:[#allocation191_spill] sm:$0xff] %v7210_v10  ;;  %13314 = vst [vmem:[#allocation192_spill] sm:$0xff] %v7213_v5  ;;  %v7230_v58 = vadd.f32 %v1633_v35, %v13321_v40  ;;  %v7238_v25 = vmul.f32 %v13041_v16, %v13324_v21  ;;  %v13325_v53 = vld [vmem:[#allocation74_spill] sm:$0xff]  ;;  %v13327_v6 = vld [vmem:[#allocation144_spill] sm:$0xff] }
 0x10e   : > { %13316 = vst [vmem:[#allocation193_spill] sm:$0xff] %v7216_v30  ;;  %13320 = vst [vmem:[#allocation194_spill] sm:$0xff] %v7227_v38  ;;  %v7242_v4 = vmul.f32 %v13041_v16, %v13325_v53  ;;  %v13326_v28 = vld [vmem:[#allocation158_spill] sm:$0xff]  ;;  %v7250_v35 = vmul.f32 %v13041_v16, %v13327_v6  ;;  %v13328_v40 = vld [vmem:[#allocation79_spill] sm:$0xff] }
 0x10f   : > { %13322 = vst [vmem:[#allocation195_spill] sm:$0xff] %v7230_v58  ;;  %v7246_v30 = vmul.f32 %v13041_v16, %v13326_v28  ;;  %v7254_v7 = vmul.f32 %v13041_v16, %v13328_v40  ;;  %v13329_v56 = vld [vmem:[#allocation159_spill] sm:$0xff]  ;;  %v13330_v58 = vld [vmem:[#allocation145_spill] sm:$0xff]  ;;  %v13331_v38 = vld [vmem:[#allocation76_spill] sm:$0xff] }
 0x110   : > { %v7258_v21 = vmul.f32 %v13041_v16, %v13329_v56  ;;  %v7262_v53 = vmul.f32 %v13041_v16, %v13330_v58  ;;  %v7266_v28 = vmul.f32 %v13041_v16, %v13331_v38  ;;  %v13332_v5 = vld [vmem:[#allocation160_spill] sm:$0xff]  ;;  %v13333_v10 = vld [vmem:[#allocation146_spill] sm:$0xff]  ;;  %v13335_v63 = vld [vmem:[#allocation131_spill] sm:$0xff]  ;;  %v1480_v38 = vrot.slane %v7018_v54, 2 }
 0x111   : > { %v7270_v6 = vmul.f32 %v13041_v16, %v13332_v5  ;;  %v7274_v40 = vmul.f32 %v13041_v16, %v13333_v10  ;;  %v7278_v56 = vmul.f32 %v13041_v16, %v13335_v63  ;;  %v13337_v43 = vld [vmem:[#allocation161_spill] sm:$0xff]  ;;  %v13339_v5 = vld [vmem:[#allocation147_spill] sm:$0xff]  ;;  %v13341_v10 = vld [vmem:[#allocation132_spill] sm:$0xff] }
 0x112   : > { %v7282_v58 = vmul.f32 %v13041_v16, %v13337_v43  ;;  %v7289_v8 = vmul.f32 %v13041_v16, %v13339_v5  ;;  %v13343_v63 = vld [vmem:[#allocation162_spill] sm:$0xff]  ;;  %v13345_v43 = vld [vmem:[#allocation148_spill] sm:$0xff]  ;;  %v13347_v61 = vld [vmem:[#allocation133_spill] sm:$0xff] }
 0x113   : > { %13334 = vst [vmem:[#allocation196_spill] sm:$0xff] %v7274_v40  ;;  %13336 = vst [vmem:[#allocation197_spill] sm:$0xff] %v7278_v56  ;;  %v7293_v40 = vmul.f32 %v13041_v16, %v13341_v10  ;;  %v7297_v56 = vmul.f32 %v13041_v16, %v13343_v63  ;;  %v7305_v54 = vmul.f32 %v13041_v16, %v13347_v61  ;;  %v13349_v51 = vld [vmem:[#allocation163_spill] sm:$0xff]  ;;  %v13354_v63 = vld [vmem:[#allocation134_spill] sm:$0xff]  ;;  %v1484_v61 = vrot.slane %v7026_v46, 2 }
 0x114   : > { %13338 = vst [vmem:[#allocation198_spill] sm:$0xff] %v7282_v58  ;;  %13340 = vst [vmem:[#allocation199_spill] sm:$0xff] %v7289_v8  ;;  %v7301_v58 = vmul.f32 %v13041_v16, %v13345_v43  ;;  %v7309_v5 = vmul.f32 %v13041_v16, %v13349_v51  ;;  %v13351_v8 = vld [vmem:[#allocation149_spill] sm:$0xff]  ;;  %v13356_v43 = vld [vmem:[#allocation164_spill] sm:$0xff]  ;;  %v1485_v51 = vrot.slane %v7030_v23, 2  ;;  %v1495_v46 = vrot.slane %v7054_v1, 2 }
 0x115   : > { %13342 = vst [vmem:[#allocation200_spill] sm:$0xff] %v7293_v40  ;;  %13344 = vst [vmem:[#allocation201_spill] sm:$0xff] %v7297_v56  ;;  %v7313_v10 = vmul.f32 %v13041_v16, %v13351_v8  ;;  %v13353_v40 = vld [vmem:[#allocation11_spill] sm:$0xff]  ;;  %v7318_v56 = vmul.f32 %v13041_v16, %v13354_v63  ;;  %v7330_v8 = vsel %vm1478_vm2, %v1480_v38, %v1482_v48  ;;  %v1490_v63 = vrot.slane %v7042_v27, 2  ;;  %v7342_v48 = vld [vmem:[%s4963_s24] sm:$0xff] }
 0x116   : > { %13346 = vst [vmem:[#allocation202_spill] sm:$0xff] %v7301_v58  ;;  %13348 = vst [vmem:[#allocation203_spill] sm:$0xff] %v7305_v54  ;;  %v1760_v44 = vsub.s32 3, %v13353_v40  ;;  %v7322_v58 = vmul.f32 %v13041_v16, %v13356_v43  ;;  %v1487_v40 = vrot.slane %v7034_v55, 2  ;;  %v1494_v16 = vrot.slane %v7050_v33, 2  ;;  %v13369_v54 = vld [vmem:[#allocation12_spill] sm:$0xff] }
 0x117   : > { %13350 = vst [vmem:[#allocation204_spill] sm:$0xff] %v7309_v5  ;;  %13352 = vst [vmem:[#allocation205_spill] sm:$0xff] %v7313_v10  ;;  %v7327_v5 = vsel %vm1478_vm2, %v1479_v3, %v1480_v38  ;;  %v1489_v10 = vrot.slane %v7038_v22, 2  ;;  %v1497_v23 = vrot.slane %v7058_v20, 2  ;;  %v1499_v3 = vrot.slane %v7062_v62, 2  ;;  %v13361_v20 = vld [vmem:[#allocation7_spill] sm:$0xff] }
 0x118   : > { %13355 = vst [vmem:[#allocation206_spill] sm:$0xff] %v7318_v56  ;;  %13357 = vst [vmem:[#allocation103_spill] sm:$0xff] %v7322_v58  ;;  %v1492_v56 = vrot.slane %v7046_v13, 2  ;;  %v1500_v43 = vrot.slane %v7066_v18, 2  ;;  %v7345_v55 = vrot.slane %v7342_v48, %v1760_v44  ;;  %v1502_v22 = vrot.slane %v7070_v49, 2  ;;  %v13362_v18 = vld [vmem:[#allocation25_spill] sm:$0xff] }
 0x119   : > { %13358 = vst [vmem:[#allocation104_spill] sm:$0xff] %v7327_v5  ;;  %13359 = vst [vmem:[#allocation105_spill] sm:$0xff] %v7342_v48  ;;  %v1504_v27 = vrot.slane %v7074_v36, 2  ;;  %v1505_v13 = vrot.slane %v7078_v2, 2  ;;  %v1507_v33 = vrot.slane %v7082_v47, 2  ;;  %v1509_v1 = vrot.slane %v7086_v34, 2 }
 0x11a   : > { %13360 = vst [vmem:[#allocation106_spill] sm:$0xff] %v7345_v55  ;;  %v7354_v62 = vmul.f32 %v7345_v55, %v13361_v20  ;;  %v7358_v38 = vmul.f32 %v7345_v55, %v13362_v18  ;;  %v13363_v44 = vld [vmem:[#allocation8_spill] sm:$0xff]  ;;  %v13364_v49 = vld [vmem:[#allocation26_spill] sm:$0xff]  ;;  %v13365_v2 = vld [vmem:[#allocation9_spill] sm:$0xff]  ;;  %v7481_v31 = vsel %vm1478_vm2, %v1484_v61, %v1485_v51  ;;  %v7499_v61 = vsel %vm1478_vm2, %v1495_v46, %v1497_v23 }
 0x11b   : > { %v7362_v48 = vmul.f32 %v7345_v55, %v13363_v44  ;;  %v7366_v36 = vmul.f32 %v7345_v55, %v13364_v49  ;;  %v7370_v47 = vmul.f32 %v7345_v55, %v13365_v2  ;;  %v13366_v34 = vld [vmem:[#allocation27_spill] sm:$0xff]  ;;  %v13367_v5 = vld [vmem:[#allocation10_spill] sm:$0xff]  ;;  %v13368_v58 = vld [vmem:[#allocation28_spill] sm:$0xff]  ;;  %v7386_v49 = vmul.f32 %v7345_v55, %v13369_v54 }
 0x11c   : > { %v7374_v20 = vmul.f32 %v7345_v55, %v13366_v34  ;;  %v7378_v18 = vmul.f32 %v7345_v55, %v13367_v5  ;;  %v7382_v44 = vmul.f32 %v7345_v55, %v13368_v58  ;;  %v13370_v42 = vld [vmem:[#allocation29_spill] sm:$0xff]  ;;  %v13373_v50 = vld [vmem:[#allocation30_spill] sm:$0xff]  ;;  %v13377_v15 = vld [vmem:[#allocation31_spill] sm:$0xff]  ;;  %v1525_v23 = vrot.slane %v7242_v4, 2 }
 0x11d   : > { %v7390_v2 = vmul.f32 %v7345_v55, %v13370_v42  ;;  %v13371_v29 = vld [vmem:[#allocation13_spill] sm:$0xff]  ;;  %v7398_v5 = vmul.f32 %v7345_v55, %v13373_v50  ;;  %v13375_v26 = vld [vmem:[#allocation14_spill] sm:$0xff]  ;;  %v7406_v54 = vmul.f32 %v7345_v55, %v13377_v15  ;;  %v13379_v0 = vld [vmem:[#allocation15_spill] sm:$0xff]  ;;  %v1535_v4 = vrot.slane %v7266_v28, 2 }
 0x11e   : > { %v7394_v34 = vmul.f32 %v7345_v55, %v13371_v29  ;;  %v7402_v58 = vmul.f32 %v7345_v55, %v13375_v26  ;;  %v7410_v42 = vmul.f32 %v7345_v55, %v13379_v0  ;;  %v13381_v17 = vld [vmem:[#allocation32_spill] sm:$0xff]  ;;  %v7562_v28 = vadd.f32 %v7370_v47, %v7122_v45 }
 0x11f   : > { %13374 = vst [vmem:[#allocation108_spill] sm:$0xff] %v7398_v5  ;;  %13378 = vst [vmem:[#allocation110_spill] sm:$0xff] %v7406_v54  ;;  %v7414_v29 = vmul.f32 %v7345_v55, %v13381_v17  ;;  %v13385_v5 = vld [vmem:[#allocation33_spill] sm:$0xff]  ;;  %v13389_v54 = vld [vmem:[#allocation34_spill] sm:$0xff]  ;;  %v7582_v45 = vadd.f32 %v7390_v2, %v7142_v14 }
 0x120   : > { %13372 = vst [vmem:[#allocation107_spill] sm:$0xff] %v7394_v34  ;;  %13376 = vst [vmem:[#allocation109_spill] sm:$0xff] %v7402_v58  ;;  %v13383_v34 = vld [vmem:[#allocation16_spill] sm:$0xff]  ;;  %v7422_v26 = vmul.f32 %v7345_v55, %v13385_v5  ;;  %v13387_v58 = vld [vmem:[#allocation17_spill] sm:$0xff]  ;;  %v7430_v0 = vmul.f32 %v7345_v55, %v13389_v54 }
 0x121   : > { %13380 = vst [vmem:[#allocation115_spill] sm:$0xff] %v7410_v42  ;;  %13382 = vst [vmem:[#allocation116_spill] sm:$0xff] %v7414_v29  ;;  %v7418_v50 = vmul.f32 %v7345_v55, %v13383_v34  ;;  %v7426_v15 = vmul.f32 %v7345_v55, %v13387_v58  ;;  %v13391_v42 = vld [vmem:[#allocation18_spill] sm:$0xff]  ;;  %v13393_v29 = vld [vmem:[#allocation36_spill] sm:$0xff] }
 0x122   : > { %13386 = vst [vmem:[#allocation118_spill] sm:$0xff] %v7422_v26  ;;  %13390 = vst [vmem:[#allocation120_spill] sm:$0xff] %v7430_v0  ;;  %v7434_v17 = vmul.f32 %v7345_v55, %v13391_v42  ;;  %v7438_v34 = vmul.f32 %v7345_v55, %v13393_v29  ;;  %v13397_v26 = vld [vmem:[#allocation37_spill] sm:$0xff]  ;;  %v13401_v0 = vld [vmem:[#allocation38_spill] sm:$0xff] }
 0x123   : > { %13384 = vst [vmem:[#allocation117_spill] sm:$0xff] %v7418_v50  ;;  %13388 = vst [vmem:[#allocation119_spill] sm:$0xff] %v7426_v15  ;;  %v13395_v50 = vld [vmem:[#allocation20_spill] sm:$0xff]  ;;  %v7446_v58 = vmul.f32 %v7345_v55, %v13397_v26  ;;  %v13399_v15 = vld [vmem:[#allocation21_spill] sm:$0xff]  ;;  %v7454_v42 = vmul.f32 %v7345_v55, %v13401_v0 }
 0x124   : > { %13392 = vst [vmem:[#allocation121_spill] sm:$0xff] %v7434_v17  ;;  %13394 = vst [vmem:[#allocation122_spill] sm:$0xff] %v7438_v34  ;;  %v7442_v5 = vmul.f32 %v7345_v55, %v13395_v50  ;;  %v7450_v54 = vmul.f32 %v7345_v55, %v13399_v15  ;;  %v13403_v17 = vld [vmem:[#allocation22_spill] sm:$0xff]  ;;  %v13405_v34 = vld [vmem:[#allocation39_spill] sm:$0xff] }
 0x125   : > { %13398 = vst [vmem:[#allocation124_spill] sm:$0xff] %v7446_v58  ;;  %13402 = vst [vmem:[#allocation126_spill] sm:$0xff] %v7454_v42  ;;  %v7458_v29 = vmul.f32 %v7345_v55, %v13403_v17  ;;  %v7462_v50 = vmul.f32 %v7345_v55, %v13405_v34  ;;  %v13408_v58 = vld [vmem:[#allocation151_spill] sm:$0xff]  ;;  %v1510_v42 = vrot.slane %v7090_v12, 2  ;;  %v1512_v17 = vrot.slane %v7094_v52, 2  ;;  %v13411_v34 = vld [vmem:[#allocation62_spill] sm:$0xff] }
 0x126   : > { %13396 = vst [vmem:[#allocation123_spill] sm:$0xff] %v7442_v5  ;;  %13400 = vst [vmem:[#allocation125_spill] sm:$0xff] %v7450_v54  ;;  %v13407_v5 = vld [vmem:[#allocation23_spill] sm:$0xff]  ;;  %v7470_v15 = vmul.f32 %v7345_v55, %v13408_v58  ;;  %v13410_v54 = vld [vmem:[#allocation137_spill] sm:$0xff]  ;;  %v7487_v58 = vsel %vm1478_vm2, %v1489_v10, %v1490_v63  ;;  %v7494_v52 = vsel %vm1478_vm2, %v1494_v16, %v1495_v46  ;;  %v12508_v12 = vrot.slane %v7224_v9, 2 }
 0x127   : > { %13404 = vst [vmem:[#allocation127_spill] sm:$0xff] %v7458_v29  ;;  %13406 = vst [vmem:[#allocation128_spill] sm:$0xff] %v7462_v50  ;;  %v7466_v26 = vmul.f32 %v7345_v55, %v13407_v5  ;;  %v7474_v0 = vmul.f32 %v7345_v55, %v13410_v54  ;;  %v1514_v29 = vrot.slane %v7098_v32, 2  ;;  %v1515_v50 = vrot.slane %v13411_v34, 2  ;;  %v13445_v34 = vld [vmem:[#allocation70_spill] sm:$0xff] }
 0x128   : > { %13409 = vst [vmem:[#allocation129_spill] sm:$0xff] %v7470_v15  ;;  %v7484_v5 = vsel %vm1478_vm2, %v1485_v51, %v1487_v40  ;;  %v13412_v15 = vld [vmem:[#allocation99_spill] sm:$0xff]  ;;  %v7491_v54 = vsel %vm1478_vm2, %v1490_v63, %v1492_v56  ;;  %v1519_v32 = vrot.slane %v7220_v24, 2  ;;  %v7502_v40 = vsel %vm1478_vm2, %v1499_v3, %v1500_v43  ;;  %13418 = vst [vmem:[#allocation42_spill] sm:$0xff] %v7562_v28 }
 0x129   : > { %v1517_v55 = vrot.slane %v13412_v15, 2  ;;  %v7505_v10 = vsel %vm1478_vm2, %v1500_v43, %v1502_v22  ;;  %v7508_v15 = vsel %vm1478_vm2, %v1504_v27, %v1505_v13  ;;  %v7511_v63 = vsel %vm1478_vm2, %v1505_v13, %v1507_v33  ;;  %13423 = vst [vmem:[#allocation47_spill] sm:$0xff] %v7582_v45  ;;  %v13430_v13 = vld [vmem:[#allocation67_spill] sm:$0xff]  ;;  %v13431_v33 = vld [vmem:[#allocation109_spill] sm:$0xff] }
 0x12a   : > { %v7514_v56 = vsel %vm1478_vm2, %v1509_v1, %v1510_v42  ;;  %v7517_v24 = vsel %vm1478_vm2, %v1510_v42, %v1512_v17  ;;  %v7520_v51 = vsel %vm1478_vm2, %v1514_v29, %v1515_v50  ;;  %v1522_v43 = vrot.slane %v7234_v57, 2  ;;  %v13413_v29 = vld [vmem:[#allocation113_spill] sm:$0xff]  ;;  %v13433_v1 = vld [vmem:[#allocation100_spill] sm:$0xff]  ;;  %v13559_v28 = vld [vmem:[#allocation31_spill] sm:$0xff] }
 0x12b   : > { %v7523_v16 = vsel %vm1478_vm2, %v1515_v50, %v1517_v55  ;;  %v1524_v46 = vrot.slane %v7238_v25, 2  ;;  %v7531_v3 = vsel %vm1478_vm2, %v1519_v32, %v12508_v12  ;;  %v1527_v17 = vrot.slane %v7246_v30, 2  ;;  %v13443_v2 = vld [vmem:[#allocation117_spill] sm:$0xff]  ;;  %v13446_v32 = vld [vmem:[#allocation118_spill] sm:$0xff] }
 0x12c   : > { %v1529_v42 = vrot.slane %v7250_v35, 2  ;;  %v7537_v22 = vadd.f32 %v7330_v8, %v13413_v29  ;;  %v1530_v50 = vrot.slane %v7254_v7, 2  ;;  %v1532_v57 = vrot.slane %v7258_v21, 2  ;;  %v13425_v35 = vld [vmem:[#allocation107_spill] sm:$0xff]  ;;  %v13427_v7 = vld [vmem:[#allocation66_spill] sm:$0xff]  ;;  %v13464_v12 = vld [vmem:[#allocation124_spill] sm:$0xff] }
 0x12d   : > { %v1534_v25 = vrot.slane %v7262_v53, 2  ;;  %v1537_v55 = vrot.slane %v7270_v6, 2  ;;  %v7550_v30 = vadd.f32 %v7358_v38, %v7110_v19  ;;  %v7554_v8 = vadd.f32 %v7362_v48, %v7114_v60  ;;  %v13424_v6 = vld [vmem:[#allocation63_spill] sm:$0xff]  ;;  %v13428_v48 = vld [vmem:[#allocation108_spill] sm:$0xff]  ;;  %v13439_v38 = vld [vmem:[#allocation69_spill] sm:$0xff] }
 0x12e   : > { %v7546_v27 = vadd.f32 %v7354_v62, %v7537_v22  ;;  %v7558_v21 = vadd.f32 %v7366_v36, %v7118_v41  ;;  %v7566_v53 = vadd.f32 %v7374_v20, %v7126_v39  ;;  %v7570_v19 = vadd.f32 %v7378_v18, %v7130_v59  ;;  %v13434_v20 = vld [vmem:[#allocation110_spill] sm:$0xff]  ;;  %v13436_v62 = vld [vmem:[#allocation68_spill] sm:$0xff]  ;;  %v13437_v18 = vld [vmem:[#allocation115_spill] sm:$0xff] }
 0x12f   : > { %13415 = vst [vmem:[#allocation92_spill] sm:$0xff] %v7550_v30  ;;  %13416 = vst [vmem:[#allocation40_spill] sm:$0xff] %v7554_v8  ;;  %v7574_v60 = vadd.f32 %v7382_v44, %v7134_v37  ;;  %v7578_v41 = vadd.f32 %v7386_v49, %v7138_v11  ;;  %v7586_v39 = vadd.f32 %v13425_v35, %v13424_v6  ;;  %v13440_v44 = vld [vmem:[#allocation116_spill] sm:$0xff]  ;;  %v13442_v36 = vld [vmem:[#allocation101_spill] sm:$0xff] }
 0x130   : > { %13414 = vst [vmem:[#allocation130_spill] sm:$0xff] %v7546_v27  ;;  %13417 = vst [vmem:[#allocation41_spill] sm:$0xff] %v7558_v21  ;;  %v7590_v59 = vadd.f32 %v13428_v48, %v13427_v7  ;;  %v7594_v37 = vadd.f32 %v13431_v33, %v13430_v13  ;;  %v7598_v11 = vadd.f32 %v13434_v20, %v13433_v1  ;;  %v13448_v6 = vld [vmem:[#allocation102_spill] sm:$0xff]  ;;  %v13449_v35 = vld [vmem:[#allocation119_spill] sm:$0xff] }
 0x131   : > { %13419 = vst [vmem:[#allocation43_spill] sm:$0xff] %v7566_v53  ;;  %13420 = vst [vmem:[#allocation44_spill] sm:$0xff] %v7570_v19  ;;  %v7602_v14 = vadd.f32 %v13437_v18, %v13436_v62  ;;  %v7606_v49 = vadd.f32 %v13440_v44, %v13439_v38  ;;  %v7610_v47 = vadd.f32 %v13443_v2, %v13442_v36  ;;  %v13451_v48 = vld [vmem:[#allocation71_spill] sm:$0xff]  ;;  %v13452_v13 = vld [vmem:[#allocation120_spill] sm:$0xff] }
 0x132   : > { %13421 = vst [vmem:[#allocation45_spill] sm:$0xff] %v7574_v60  ;;  %13422 = vst [vmem:[#allocation46_spill] sm:$0xff] %v7578_v41  ;;  %v7614_v29 = vadd.f32 %v13446_v32, %v13445_v34  ;;  %v7618_v7 = vadd.f32 %v13449_v35, %v13448_v6  ;;  %v7622_v33 = vadd.f32 %v13452_v13, %v13451_v48  ;;  %v13454_v1 = vld [vmem:[#allocation72_spill] sm:$0xff]  ;;  %v13455_v20 = vld [vmem:[#allocation121_spill] sm:$0xff] }
 0x133   : > { %13426 = vst [vmem:[#allocation48_spill] sm:$0xff] %v7586_v39  ;;  %13429 = vst [vmem:[#allocation49_spill] sm:$0xff] %v7590_v59  ;;  %v7626_v62 = vadd.f32 %v13455_v20, %v13454_v1  ;;  %v13457_v18 = vld [vmem:[#allocation73_spill] sm:$0xff]  ;;  %v13458_v38 = vld [vmem:[#allocation122_spill] sm:$0xff] }
 0x134   : > { %13432 = vst [vmem:[#allocation50_spill] sm:$0xff] %v7594_v37  ;;  %13435 = vst [vmem:[#allocation51_spill] sm:$0xff] %v7598_v11  ;;  %v7630_v44 = vadd.f32 %v13458_v38, %v13457_v18  ;;  %v13460_v36 = vld [vmem:[#allocation77_spill] sm:$0xff]  ;;  %v13461_v2 = vld [vmem:[#allocation123_spill] sm:$0xff] }
 0x135   : > { %13438 = vst [vmem:[#allocation53_spill] sm:$0xff] %v7602_v14  ;;  %13441 = vst [vmem:[#allocation62_spill] sm:$0xff] %v7606_v49  ;;  %v7634_v34 = vadd.f32 %v13461_v2, %v13460_v36  ;;  %v13463_v32 = vld [vmem:[#allocation78_spill] sm:$0xff]  ;;  %v13466_v35 = vld [vmem:[#allocation111_spill] sm:$0xff] }
 0x136   : > { %13444 = vst [vmem:[#allocation99_spill] sm:$0xff] %v7610_v47  ;;  %13447 = vst [vmem:[#allocation113_spill] sm:$0xff] %v7614_v29  ;;  %v7638_v6 = vadd.f32 %v13464_v12, %v13463_v32  ;;  %v13469_v13 = vld [vmem:[#allocation167_spill] sm:$0xff]  ;;  %v13475_v38 = vld [vmem:[#allocation192_spill] sm:$0xff] }
 0x137   : > { %13450 = vst [vmem:[#allocation63_spill] sm:$0xff] %v7618_v7  ;;  %13453 = vst [vmem:[#allocation107_spill] sm:$0xff] %v7622_v33  ;;  %v13467_v7 = vld [vmem:[#allocation125_spill] sm:$0xff]  ;;  %v13470_v33 = vld [vmem:[#allocation126_spill] sm:$0xff] }
 0x138   : > { %13456 = vst [vmem:[#allocation66_spill] sm:$0xff] %v7626_v62  ;;  %13459 = vst [vmem:[#allocation108_spill] sm:$0xff] %v7630_v44  ;;  %v7642_v48 = vadd.f32 %v13467_v7, %v13466_v35  ;;  %v7646_v1 = vadd.f32 %v13470_v33, %v13469_v13  ;;  %v13472_v20 = vld [vmem:[#allocation191_spill] sm:$0xff]  ;;  %v13476_v44 = vld [vmem:[#allocation128_spill] sm:$0xff] }
 0x139   : > { %13462 = vst [vmem:[#allocation67_spill] sm:$0xff] %v7634_v34  ;;  %13465 = vst [vmem:[#allocation109_spill] sm:$0xff] %v7638_v6  ;;  %v13473_v62 = vld [vmem:[#allocation127_spill] sm:$0xff]  ;;  %v7654_v36 = vadd.f32 %v13476_v44, %v13475_v38  ;;  %v13478_v2 = vld [vmem:[#allocation193_spill] sm:$0xff] }
 0x13a   : > { %13468 = vst [vmem:[#allocation100_spill] sm:$0xff] %v7642_v48  ;;  %13471 = vst [vmem:[#allocation110_spill] sm:$0xff] %v7646_v1  ;;  %v7650_v18 = vadd.f32 %v13473_v62, %v13472_v20  ;;  %v7658_v12 = vadd.f32 %v7466_v26, %v13478_v2  ;;  %v13480_v32 = vld [vmem:[#allocation194_spill] sm:$0xff]  ;;  %v13481_v6 = vld [vmem:[#allocation129_spill] sm:$0xff] }
 0x13b   : > { %13477 = vst [vmem:[#allocation115_spill] sm:$0xff] %v7654_v36  ;;  %v7662_v7 = vadd.f32 %v13481_v6, %v13480_v32  ;;  %v13483_v35 = vld [vmem:[#allocation195_spill] sm:$0xff]  ;;  %v13485_v13 = vld [vmem:[#allocation196_spill] sm:$0xff]  ;;  %v13486_v62 = vld [vmem:[#allocation197_spill] sm:$0xff] }
 0x13c   : > { %13474 = vst [vmem:[#allocation68_spill] sm:$0xff] %v7650_v18  ;;  %13479 = vst [vmem:[#allocation69_spill] sm:$0xff] %v7658_v12  ;;  %v7666_v33 = vadd.f32 %v7474_v0, %v13483_v35  ;;  %v1539_v1 = vrot.slane %v13485_v13, 2  ;;  %v1540_v20 = vrot.slane %v13486_v62, 2  ;;  %v13487_v18 = vld [vmem:[#allocation198_spill] sm:$0xff]  ;;  %v13488_v44 = vld [vmem:[#allocation199_spill] sm:$0xff] }
 0x13d   : > { %13482 = vst [vmem:[#allocation116_spill] sm:$0xff] %v7662_v7  ;;  %v1542_v48 = vrot.slane %v13487_v18, 2  ;;  %v1544_v38 = vrot.slane %v13488_v44, 2  ;;  %v13489_v36 = vld [vmem:[#allocation200_spill] sm:$0xff]  ;;  %v13490_v26 = vld [vmem:[#allocation201_spill] sm:$0xff]  ;;  %v13491_v12 = vld [vmem:[#allocation202_spill] sm:$0xff] }
 0x13e   : > { %13484 = vst [vmem:[#allocation101_spill] sm:$0xff] %v7666_v33  ;;  %v1545_v34 = vrot.slane %v13489_v36, 2  ;;  %v1547_v2 = vrot.slane %v13490_v26, 2  ;;  %v1549_v29 = vrot.slane %v13491_v12, 2  ;;  %v13492_v6 = vld [vmem:[#allocation203_spill] sm:$0xff]  ;;  %v13493_v7 = vld [vmem:[#allocation204_spill] sm:$0xff]  ;;  %v1526_v36 = vsel %vm1478_vm2, %v1524_v46, %v1525_v23 }
 0x13f   : > { %v1550_v32 = vrot.slane %v13492_v6, 2  ;;  %v1552_v47 = vrot.slane %v13493_v7, 2  ;;  %v13494_v0 = vld [vmem:[#allocation205_spill] sm:$0xff]  ;;  %v13495_v33 = vld [vmem:[#allocation206_spill] sm:$0xff]  ;;  %v13496_v49 = vld [vmem:[#allocation103_spill] sm:$0xff]  ;;  %v13497_v18 = vrot.slane %v7224_v9, 2  ;;  %v1528_v26 = vsel %vm1478_vm2, %v1525_v23, %v1527_v17 }
 0x140   : > { %v1554_v35 = vrot.slane %v13494_v0, 2  ;;  %v1555_v13 = vrot.slane %v13495_v33, 2  ;;  %v1557_v62 = vrot.slane %v13496_v49, 2  ;;  %v1531_v12 = vsel %vm1478_vm2, %v1529_v42, %v1530_v50  ;;  %v13505_v0 = vld [vmem:[#allocation170_spill] sm:$0xff]  ;;  %v13541_v11 = vld [vmem:[#allocation28_spill] sm:$0xff]  ;;  %v13545_v59 = vld [vmem:[#allocation87_spill] sm:$0xff] }
 0x141   : > { %v1523_v44 = vsel %vm1478_vm2, %v13497_v18, %v1522_v43  ;;  %v7687_v6 = vsel %vm1478_vm2, %v1530_v50, %v1532_v57  ;;  %v7690_v7 = vsel %vm1478_vm2, %v1534_v25, %v1535_v4  ;;  %v7693_v33 = vsel %vm1478_vm2, %v1535_v4, %v1537_v55  ;;  %v13498_v57 = vld [vmem:[#allocation11_spill] sm:$0xff]  ;;  %v13499_v4 = vld [vmem:[#allocation112_spill] sm:$0xff]  ;;  %v13508_v18 = vld [vmem:[#allocation173_spill] sm:$0xff] }
 0x142   : > { %v7696_v49 = vsel %vm1478_vm2, %v1539_v1, %v1540_v20  ;;  %v7699_v9 = vsel %vm1478_vm2, %v1540_v20, %v1542_v48  ;;  %v7702_v43 = vsel %vm1478_vm2, %v1544_v38, %v1545_v34  ;;  %v7705_v46 = vsel %vm1478_vm2, %v1545_v34, %v1547_v2  ;;  %v13500_v55 = vld [vmem:[#allocation104_spill] sm:$0xff]  ;;  %v13501_v34 = vld [vmem:[#allocation114_spill] sm:$0xff]  ;;  %v13504_v2 = vld [vmem:[#allocation169_spill] sm:$0xff] }
 0x143   : > { %v7708_v23 = vsel %vm1478_vm2, %v1549_v29, %v1550_v32  ;;  %v7711_v17 = vsel %vm1478_vm2, %v1550_v32, %v1552_v47  ;;  %v7714_v42 = vsel %vm1478_vm2, %v1554_v35, %v1555_v13  ;;  %v7717_v50 = vsel %vm1478_vm2, %v1555_v13, %v1557_v62  ;;  %v13502_v29 = vld [vmem:[#allocation35_spill] sm:$0xff]  ;;  %v13503_v20 = vld [vmem:[#allocation168_spill] sm:$0xff]  ;;  %v13539_v14 = vld [vmem:[#allocation86_spill] sm:$0xff] }
 0x144   : > { %v1892_v25 = vsub.s32 4, %v13498_v57  ;;  %v7722_v48 = vadd.f32 %v13500_v55, %v13499_v4  ;;  %v7726_v1 = vadd.f32 %v7481_v31, %v13501_v34  ;;  %v7730_v47 = vadd.f32 %v7484_v5, %v13502_v29  ;;  %v13506_v13 = vld [vmem:[#allocation171_spill] sm:$0xff]  ;;  %v13507_v62 = vld [vmem:[#allocation172_spill] sm:$0xff]  ;;  %v13509_v4 = vld [vmem:[#allocation174_spill] sm:$0xff] }
 0x145   : > { %v7734_v38 = vadd.f32 %v7487_v58, %v13503_v20  ;;  %v7738_v32 = vadd.f32 %v7491_v54, %v13504_v2  ;;  %v7742_v35 = vadd.f32 %v7494_v52, %v13505_v0  ;;  %v7746_v31 = vadd.f32 %v7499_v61, %v13506_v13  ;;  %v13510_v55 = vld [vmem:[#allocation175_spill] sm:$0xff]  ;;  %v13511_v34 = vld [vmem:[#allocation176_spill] sm:$0xff]  ;;  %v13512_v29 = vld [vmem:[#allocation177_spill] sm:$0xff] }
 0x146   : > { %v7750_v5 = vadd.f32 %v7502_v40, %v13507_v62  ;;  %v7754_v58 = vadd.f32 %v7505_v10, %v13508_v18  ;;  %v7758_v54 = vadd.f32 %v7508_v15, %v13509_v4  ;;  %v7762_v52 = vadd.f32 %v7511_v63, %v13510_v55  ;;  %v13513_v20 = vld [vmem:[#allocation178_spill] sm:$0xff]  ;;  %v13514_v2 = vld [vmem:[#allocation179_spill] sm:$0xff]  ;;  %v13515_v0 = vld [vmem:[#allocation105_spill] sm:$0xff] }
 0x147   : > { %v7766_v61 = vadd.f32 %v7514_v56, %v13511_v34  ;;  %v7770_v40 = vadd.f32 %v7517_v24, %v13512_v29  ;;  %v7774_v10 = vadd.f32 %v7520_v51, %v13513_v20  ;;  %v7778_v15 = vadd.f32 %v7523_v16, %v13514_v2  ;;  %v13516_v63 = vld [vmem:[#allocation180_spill] sm:$0xff]  ;;  %v13517_v56 = vld [vmem:[#allocation181_spill] sm:$0xff]  ;;  %v13518_v24 = vld [vmem:[#allocation182_spill] sm:$0xff] }
 0x148   : > { %v7781_v13 = vrot.slane %v13515_v0, %v1892_v25  ;;  %v7785_v62 = vadd.f32 %v7531_v3, %v13516_v63  ;;  %v7788_v18 = vadd.f32 %v1523_v44, %v13517_v56  ;;  %v7791_v4 = vadd.f32 %v1526_v36, %v13518_v24  ;;  %v13519_v55 = vld [vmem:[#allocation183_spill] sm:$0xff]  ;;  %v13520_v34 = vld [vmem:[#allocation184_spill] sm:$0xff]  ;;  %v13523_v20 = vld [vmem:[#allocation25_spill] sm:$0xff] }
 0x149   : > { %v7794_v51 = vadd.f32 %v1528_v26, %v13519_v55  ;;  %v7797_v29 = vadd.f32 %v1531_v12, %v13520_v34  ;;  %v13521_v16 = vld [vmem:[#allocation83_spill] sm:$0xff]  ;;  %v2376_v44 = vsub.s32 5, %v13498_v57  ;;  %v13525_v2 = vld [vmem:[#allocation8_spill] sm:$0xff]  ;;  %v13529_v12 = vld [vmem:[#allocation26_spill] sm:$0xff] }
 0x14a   : > { %v7801_v25 = vmul.f32 %v7781_v13, %v13521_v16  ;;  %v7805_v3 = vmul.f32 %v7781_v13, %v13523_v20  ;;  %v7810_v36 = vmul.f32 %v7781_v13, %v13525_v2  ;;  %v13527_v63 = vld [vmem:[#allocation84_spill] sm:$0xff]  ;;  %v7818_v56 = vmul.f32 %v7781_v13, %v13529_v12  ;;  %v13531_v24 = vld [vmem:[#allocation9_spill] sm:$0xff]  ;;  %v13535_v57 = vld [vmem:[#allocation27_spill] sm:$0xff] }
 0x14b   : > { %v7814_v26 = vmul.f32 %v7781_v13, %v13527_v63  ;;  %v7822_v55 = vmul.f32 %v7781_v13, %v13531_v24  ;;  %v13533_v34 = vld [vmem:[#allocation85_spill] sm:$0xff]  ;;  %v7830_v2 = vmul.f32 %v7781_v13, %v13535_v57  ;;  %v13537_v16 = vld [vmem:[#allocation10_spill] sm:$0xff]  ;;  %v7838_v12 = vmul.f32 %v7781_v13, %v13539_v14  ;;  %v13543_v37 = vld [vmem:[#allocation12_spill] sm:$0xff] }
 0x14c   : > { %13522 = vst [vmem:[#allocation117_spill] sm:$0xff] %v7801_v25  ;;  %13524 = vst [vmem:[#allocation70_spill] sm:$0xff] %v7805_v3  ;;  %v7826_v20 = vmul.f32 %v7781_v13, %v13533_v34  ;;  %v7834_v63 = vmul.f32 %v7781_v13, %v13537_v16  ;;  %v7842_v24 = vmul.f32 %v7781_v13, %v13541_v11  ;;  %v13547_v39 = vld [vmem:[#allocation29_spill] sm:$0xff]  ;;  %v13551_v41 = vld [vmem:[#allocation88_spill] sm:$0xff] }
 0x14d   : > { %13526 = vst [vmem:[#allocation118_spill] sm:$0xff] %v7810_v36  ;;  %13528 = vst [vmem:[#allocation102_spill] sm:$0xff] %v7814_v26  ;;  %v7846_v34 = vmul.f32 %v7781_v13, %v13543_v37  ;;  %v7850_v57 = vmul.f32 %v7781_v13, %v13545_v59  ;;  %v7854_v16 = vmul.f32 %v7781_v13, %v13547_v39  ;;  %v13549_v45 = vld [vmem:[#allocation13_spill] sm:$0xff]  ;;  %v13553_v60 = vld [vmem:[#allocation30_spill] sm:$0xff] }
 0x14e   : > { %13530 = vst [vmem:[#allocation119_spill] sm:$0xff] %v7818_v56  ;;  %13532 = vst [vmem:[#allocation71_spill] sm:$0xff] %v7822_v55  ;;  %v7858_v14 = vmul.f32 %v7781_v13, %v13549_v45  ;;  %v7862_v11 = vmul.f32 %v7781_v13, %v13551_v41  ;;  %v7866_v37 = vmul.f32 %v7781_v13, %v13553_v60  ;;  %v13555_v19 = vld [vmem:[#allocation14_spill] sm:$0xff]  ;;  %v13557_v53 = vld [vmem:[#allocation89_spill] sm:$0xff] }
 0x14f   : > { %13534 = vst [vmem:[#allocation120_spill] sm:$0xff] %v7826_v20  ;;  %13536 = vst [vmem:[#allocation72_spill] sm:$0xff] %v7830_v2  ;;  %v7870_v59 = vmul.f32 %v7781_v13, %v13555_v19  ;;  %v7874_v39 = vmul.f32 %v7781_v13, %v13557_v53  ;;  %v7878_v45 = vmul.f32 %v7781_v13, %v13559_v28  ;;  %v13561_v21 = vld [vmem:[#allocation15_spill] sm:$0xff]  ;;  %v13563_v8 = vld [vmem:[#allocation90_spill] sm:$0xff] }
 0x150   : > { %13538 = vst [vmem:[#allocation121_spill] sm:$0xff] %v7834_v63  ;;  %13540 = vst [vmem:[#allocation73_spill] sm:$0xff] %v7838_v12  ;;  %v7882_v41 = vmul.f32 %v7781_v13, %v13561_v21  ;;  %v7886_v60 = vmul.f32 %v7781_v13, %v13563_v8  ;;  %v13565_v30 = vld [vmem:[#allocation32_spill] sm:$0xff]  ;;  %v13648_v63 = vld [vmem:[#allocation141_spill] sm:$0xff] }
 0x151   : > { %13542 = vst [vmem:[#allocation122_spill] sm:$0xff] %v7842_v24  ;;  %13544 = vst [vmem:[#allocation77_spill] sm:$0xff] %v7846_v34  ;;  %v7890_v19 = vmul.f32 %v7781_v13, %v13565_v30  ;;  %v13567_v27 = vld [vmem:[#allocation16_spill] sm:$0xff]  ;;  %v13645_v34 = vld [vmem:[#allocation58_spill] sm:$0xff] }
 0x152   : > { %13546 = vst [vmem:[#allocation123_spill] sm:$0xff] %v7850_v57  ;;  %13548 = vst [vmem:[#allocation78_spill] sm:$0xff] %v7854_v16  ;;  %v7894_v53 = vmul.f32 %v7781_v13, %v13567_v27  ;;  %v13644_v16 = vld [vmem:[#allocation139_spill] sm:$0xff]  ;;  %v13646_v24 = vld [vmem:[#allocation140_spill] sm:$0xff] }
 0x153   : > { %13550 = vst [vmem:[#allocation124_spill] sm:$0xff] %v7858_v14  ;;  %13552 = vst [vmem:[#allocation111_spill] sm:$0xff] %v7862_v11  ;;  %v13647_v12 = vld [vmem:[#allocation64_spill] sm:$0xff]  ;;  %v13649_v2 = vld [vmem:[#allocation65_spill] sm:$0xff] }
 0x154   : > { %13554 = vst [vmem:[#allocation125_spill] sm:$0xff] %v7866_v37  ;;  %13556 = vst [vmem:[#allocation167_spill] sm:$0xff] %v7870_v59  ;;  %v13638_v37 = vld [vmem:[#allocation4_spill] sm:$0xff]  ;;  %v13650_v20 = vld [vmem:[#allocation142_spill] sm:$0xff] }
 0x155   : > { %13558 = vst [vmem:[#allocation126_spill] sm:$0xff] %v7874_v39  ;;  %13560 = vst [vmem:[#allocation191_spill] sm:$0xff] %v7878_v45  ;;  %v13569_v39 = vld [vmem:[#allocation91_spill] sm:$0xff]  ;;  %v13571_v45 = vld [vmem:[#allocation33_spill] sm:$0xff] }
 0x156   : > { %13562 = vst [vmem:[#allocation127_spill] sm:$0xff] %v7882_v41  ;;  %13564 = vst [vmem:[#allocation192_spill] sm:$0xff] %v7886_v60  ;;  %v7898_v28 = vmul.f32 %v7781_v13, %v13569_v39  ;;  %v7902_v21 = vmul.f32 %v7781_v13, %v13571_v45  ;;  %v13573_v41 = vld [vmem:[#allocation17_spill] sm:$0xff]  ;;  %v13651_v55 = vld [vmem:[#allocation75_spill] sm:$0xff] }
 0x157   : > { %13566 = vst [vmem:[#allocation128_spill] sm:$0xff] %v7890_v19  ;;  %13568 = vst [vmem:[#allocation193_spill] sm:$0xff] %v7894_v53  ;;  %v7906_v8 = vmul.f32 %v7781_v13, %v13573_v41  ;;  %v13575_v60 = vld [vmem:[#allocation93_spill] sm:$0xff]  ;;  %v13577_v19 = vld [vmem:[#allocation34_spill] sm:$0xff] }
 0x158   : > { %13570 = vst [vmem:[#allocation194_spill] sm:$0xff] %v7898_v28  ;;  %13572 = vst [vmem:[#allocation129_spill] sm:$0xff] %v7902_v21  ;;  %v7910_v30 = vmul.f32 %v7781_v13, %v13575_v60  ;;  %v7914_v27 = vmul.f32 %v7781_v13, %v13577_v19  ;;  %v13579_v53 = vld [vmem:[#allocation18_spill] sm:$0xff]  ;;  %v13583_v21 = vld [vmem:[#allocation36_spill] sm:$0xff] }
 0x159   : > { %13574 = vst [vmem:[#allocation195_spill] sm:$0xff] %v7906_v8  ;;  %v7918_v39 = vmul.f32 %v7781_v13, %v13579_v53  ;;  %v13581_v28 = vld [vmem:[#allocation94_spill] sm:$0xff]  ;;  %v7926_v41 = vmul.f32 %v7781_v13, %v13583_v21  ;;  %v13585_v8 = vld [vmem:[#allocation20_spill] sm:$0xff]  ;;  %v13652_v56 = vld [vmem:[#allocation143_spill] sm:$0xff] }
 0x15a   : > { %13576 = vst [vmem:[#allocation196_spill] sm:$0xff] %v7910_v30  ;;  %13578 = vst [vmem:[#allocation197_spill] sm:$0xff] %v7914_v27  ;;  %v7922_v45 = vmul.f32 %v7781_v13, %v13581_v28  ;;  %v7930_v60 = vmul.f32 %v7781_v13, %v13585_v8  ;;  %v13587_v30 = vld [vmem:[#allocation95_spill] sm:$0xff]  ;;  %v13589_v27 = vld [vmem:[#allocation37_spill] sm:$0xff] }
 0x15b   : > { %13580 = vst [vmem:[#allocation198_spill] sm:$0xff] %v7918_v39  ;;  %13584 = vst [vmem:[#allocation200_spill] sm:$0xff] %v7926_v41  ;;  %v7934_v19 = vmul.f32 %v7781_v13, %v13587_v30  ;;  %v7938_v53 = vmul.f32 %v7781_v13, %v13589_v27  ;;  %v13591_v39 = vld [vmem:[#allocation21_spill] sm:$0xff]  ;;  %v13595_v41 = vld [vmem:[#allocation38_spill] sm:$0xff] }
 0x15c   : > { %13582 = vst [vmem:[#allocation199_spill] sm:$0xff] %v7922_v45  ;;  %13586 = vst [vmem:[#allocation201_spill] sm:$0xff] %v7930_v60  ;;  %v7942_v28 = vmul.f32 %v7781_v13, %v13591_v39  ;;  %v13593_v45 = vld [vmem:[#allocation96_spill] sm:$0xff]  ;;  %v7950_v8 = vmul.f32 %v7781_v13, %v13595_v41  ;;  %v13597_v60 = vld [vmem:[#allocation22_spill] sm:$0xff] }
 0x15d   : > { %13588 = vst [vmem:[#allocation202_spill] sm:$0xff] %v7934_v19  ;;  %13590 = vst [vmem:[#allocation203_spill] sm:$0xff] %v7938_v53  ;;  %v7946_v21 = vmul.f32 %v7781_v13, %v13593_v45  ;;  %v7954_v30 = vmul.f32 %v7781_v13, %v13597_v60  ;;  %v13599_v19 = vld [vmem:[#allocation97_spill] sm:$0xff]  ;;  %v13601_v53 = vld [vmem:[#allocation39_spill] sm:$0xff] }
 0x15e   : > { %13592 = vst [vmem:[#allocation204_spill] sm:$0xff] %v7942_v28  ;;  %13596 = vst [vmem:[#allocation206_spill] sm:$0xff] %v7950_v8  ;;  %v7958_v27 = vmul.f32 %v7781_v13, %v13599_v19  ;;  %v7962_v39 = vmul.f32 %v7781_v13, %v13601_v53  ;;  %v13603_v28 = vld [vmem:[#allocation23_spill] sm:$0xff]  ;;  %v13653_v26 = vld [vmem:[#allocation74_spill] sm:$0xff] }
 0x15f   : > { %13594 = vst [vmem:[#allocation205_spill] sm:$0xff] %v7946_v21  ;;  %13598 = vst [vmem:[#allocation103_spill] sm:$0xff] %v7954_v30  ;;  %v7966_v45 = vmul.f32 %v7781_v13, %v13603_v28  ;;  %v13605_v21 = vld [vmem:[#allocation98_spill] sm:$0xff]  ;;  %v13607_v8 = vld [vmem:[#allocation151_spill] sm:$0xff] }
 0x160   : > { %13600 = vst [vmem:[#allocation112_spill] sm:$0xff] %v7958_v27  ;;  %13602 = vst [vmem:[#allocation104_spill] sm:$0xff] %v7962_v39  ;;  %v7970_v41 = vmul.f32 %v7781_v13, %v13605_v21  ;;  %v7974_v60 = vmul.f32 %v7781_v13, %v13607_v8  ;;  %v13609_v30 = vld [vmem:[#allocation137_spill] sm:$0xff]  ;;  %v13611_v27 = vld [vmem:[#allocation166_spill] sm:$0xff] }
 0x161   : > { %13604 = vst [vmem:[#allocation114_spill] sm:$0xff] %v7966_v45  ;;  %v7978_v19 = vmul.f32 %v7781_v13, %v13609_v30  ;;  %v7982_v53 = vmul.f32 %v7781_v13, %v13611_v27  ;;  %v13613_v39 = vld [vmem:[#allocation185_spill] sm:$0xff]  ;;  %v13614_v45 = vld [vmem:[#allocation186_spill] sm:$0xff]  ;;  %v13654_v36 = vld [vmem:[#allocation144_spill] sm:$0xff] }
 0x162   : > { %13606 = vst [vmem:[#allocation35_spill] sm:$0xff] %v7970_v41  ;;  %13608 = vst [vmem:[#allocation168_spill] sm:$0xff] %v7974_v60  ;;  %v7986_v28 = vadd.f32 %v7687_v6, %v13613_v39  ;;  %v7990_v21 = vadd.f32 %v7690_v7, %v13614_v45  ;;  %v13616_v41 = vld [vmem:[#allocation187_spill] sm:$0xff]  ;;  %v13618_v60 = vld [vmem:[#allocation188_spill] sm:$0xff] }
 0x163   : > { %13610 = vst [vmem:[#allocation169_spill] sm:$0xff] %v7978_v19  ;;  %13612 = vst [vmem:[#allocation170_spill] sm:$0xff] %v7982_v53  ;;  %v7994_v8 = vadd.f32 %v7693_v33, %v13616_v41  ;;  %v7998_v30 = vadd.f32 %v7696_v49, %v13618_v60  ;;  %v13620_v19 = vld [vmem:[#allocation189_spill] sm:$0xff]  ;;  %v13622_v53 = vld [vmem:[#allocation190_spill] sm:$0xff] }
 0x164   : > { %13615 = vst [vmem:[#allocation171_spill] sm:$0xff] %v7990_v21  ;;  %v8002_v27 = vadd.f32 %v7699_v9, %v13620_v19  ;;  %v8006_v39 = vadd.f32 %v7702_v43, %v13622_v53  ;;  %v13624_v6 = vld [vmem:[#allocation54_spill] sm:$0xff]  ;;  %v13626_v7 = vld [vmem:[#allocation55_spill] sm:$0xff]  ;;  %v13628_v33 = vld [vmem:[#allocation56_spill] sm:$0xff]  ;;  %v8029_v43 = vrot.slane %v13515_v0, %v2376_v44 }
 0x165   : > { %13617 = vst [vmem:[#allocation172_spill] sm:$0xff] %v7994_v8  ;;  %13619 = vst [vmem:[#allocation173_spill] sm:$0xff] %v7998_v30  ;;  %v8010_v45 = vadd.f32 %v7705_v46, %v13624_v6  ;;  %v8014_v41 = vadd.f32 %v7708_v23, %v13626_v7  ;;  %v8018_v60 = vadd.f32 %v7711_v17, %v13628_v33  ;;  %v13630_v49 = vld [vmem:[#allocation60_spill] sm:$0xff]  ;;  %v13632_v9 = vld [vmem:[#allocation61_spill] sm:$0xff] }
 0x166   : > { %13621 = vst [vmem:[#allocation174_spill] sm:$0xff] %v8002_v27  ;;  %13623 = vst [vmem:[#allocation175_spill] sm:$0xff] %v8006_v39  ;;  %v8022_v19 = vadd.f32 %v7714_v42, %v13630_v49  ;;  %v8026_v53 = vadd.f32 %v7717_v50, %v13632_v9  ;;  %v13635_v46 = vld [vmem:[#allocation2_spill] sm:$0xff]  ;;  %v13637_v23 = vld [vmem:[#allocation80_spill] sm:$0xff] }
 0x167   : > { %13625 = vst [vmem:[#allocation176_spill] sm:$0xff] %v8010_v45  ;;  %13627 = vst [vmem:[#allocation177_spill] sm:$0xff] %v8014_v41  ;;  %v13636_v6 = vld [vmem:[#allocation106_spill] sm:$0xff]  ;;  %v13639_v33 = vld [vmem:[#allocation81_spill] sm:$0xff] }
 0x168   : > { %13629 = vst [vmem:[#allocation178_spill] sm:$0xff] %v8018_v60  ;;  %13631 = vst [vmem:[#allocation179_spill] sm:$0xff] %v8022_v19  ;;  %v1762_v59 = vmul.f32 %v13636_v6, %v13635_v46  ;;  %v1763_v7 = vmul.f32 %v13636_v6, %v13637_v23  ;;  %v1764_v17 = vmul.f32 %v13636_v6, %v13638_v37  ;;  %v13640_v49 = vld [vmem:[#allocation52_spill] sm:$0xff]  ;;  %v13641_v50 = vld [vmem:[#allocation82_spill] sm:$0xff] }
 0x169   : > { %13633 = vst [vmem:[#allocation105_spill] sm:$0xff] %v8026_v53  ;;  %13634 = vst [vmem:[#allocation180_spill] sm:$0xff] %v8029_v43  ;;  %v1765_v42 = vmul.f32 %v13636_v6, %v13639_v33  ;;  %v1766_v11 = vmul.f32 %v13636_v6, %v13640_v49  ;;  %v1767_v9 = vmul.f32 %v13636_v6, %v13641_v50  ;;  %v13642_v0 = vld [vmem:[#allocation138_spill] sm:$0xff]  ;;  %v13643_v43 = vld [vmem:[#allocation59_spill] sm:$0xff] }
 0x16a   : > { %v1768_v44 = vmul.f32 %v13636_v6, %v13642_v0  ;;  %v1769_v14 = vmul.f32 %v13636_v6, %v13643_v43  ;;  %v1770_v57 = vmul.f32 %v13636_v6, %v13644_v16  ;;  %v1771_v37 = vmul.f32 %v13636_v6, %v13645_v34  ;;  %v13655_v3 = vld [vmem:[#allocation79_spill] sm:$0xff]  ;;  %v13656_v25 = vld [vmem:[#allocation145_spill] sm:$0xff]  ;;  %v13657_v23 = vld [vmem:[#allocation76_spill] sm:$0xff] }
 0x16b   : > { %v1772_v33 = vmul.f32 %v13636_v6, %v13646_v24  ;;  %v1773_v49 = vmul.f32 %v13636_v6, %v13647_v12  ;;  %v1774_v50 = vmul.f32 %v13636_v6, %v13648_v63  ;;  %v1775_v0 = vmul.f32 %v13636_v6, %v13649_v2  ;;  %v13658_v46 = vld [vmem:[#allocation146_spill] sm:$0xff]  ;;  %v13659_v53 = vld [vmem:[#allocation131_spill] sm:$0xff]  ;;  %v13661_v60 = vld [vmem:[#allocation132_spill] sm:$0xff] }
 0x16c   : > { %v1776_v43 = vmul.f32 %v13636_v6, %v13650_v20  ;;  %v1777_v16 = vmul.f32 %v13636_v6, %v13651_v55  ;;  %v1778_v34 = vmul.f32 %v13636_v6, %v13652_v56  ;;  %v1779_v24 = vmul.f32 %v13636_v6, %v13653_v26  ;;  %v13660_v19 = vld [vmem:[#allocation147_spill] sm:$0xff]  ;;  %v13662_v41 = vld [vmem:[#allocation148_spill] sm:$0xff]  ;;  %v13663_v45 = vld [vmem:[#allocation133_spill] sm:$0xff] }
 0x16d   : > { %v1780_v12 = vmul.f32 %v13636_v6, %v13654_v36  ;;  %v1781_v63 = vmul.f32 %v13636_v6, %v13655_v3  ;;  %v1782_v2 = vmul.f32 %v13636_v6, %v13656_v25  ;;  %v1783_v20 = vmul.f32 %v13636_v6, %v13657_v23  ;;  %v13664_v39 = vld [vmem:[#allocation149_spill] sm:$0xff]  ;;  %v13665_v27 = vld [vmem:[#allocation134_spill] sm:$0xff]  ;;  %v13667_v8 = vld [vmem:[#allocation135_spill] sm:$0xff] }
 0x16e   : > { %v1784_v55 = vmul.f32 %v13636_v6, %v13658_v46  ;;  %v1785_v56 = vmul.f32 %v13636_v6, %v13659_v53  ;;  %v1786_v26 = vmul.f32 %v13636_v6, %v13660_v19  ;;  %v1787_v36 = vmul.f32 %v13636_v6, %v13661_v60  ;;  %v13666_v30 = vld [vmem:[#allocation150_spill] sm:$0xff]  ;;  %v13668_v21 = vld [vmem:[#allocation24_spill] sm:$0xff] }
 0x16f   : > { %v1788_v3 = vmul.f32 %v13636_v6, %v13662_v41  ;;  %v1789_v25 = vmul.f32 %v13636_v6, %v13663_v45  ;;  %v1790_v23 = vmul.f32 %v13636_v6, %v13664_v39  ;;  %v1791_v46 = vmul.f32 %v13636_v6, %v13665_v27 }
 0x170   : > { %v1792_v53 = vmul.f32 %v13636_v6, %v13666_v30  ;;  %v1793_v19 = vmul.f32 %v13636_v6, %v13667_v8  ;;  %v1794_v60 = vmul.f32 %v13636_v6, %v13668_v21  ;;  %v8098_v41 = vadd.f32 %v1762_v59, %v7722_v48 }
 0x171   : > { %v8101_v45 = vadd.f32 %v1763_v7, %v7537_v22  ;;  %v8104_v39 = vadd.f32 %v1764_v17, %v7726_v1  ;;  %v8107_v27 = vadd.f32 %v1765_v42, %v7730_v47  ;;  %v8110_v30 = vadd.f32 %v1766_v11, %v7734_v38  ;;  %v13716_v17 = vld [vmem:[#allocation117_spill] sm:$0xff] }
 0x172   : > { %13669 = vst [vmem:[#allocation181_spill] sm:$0xff] %v8098_v41  ;;  %v8113_v8 = vadd.f32 %v1767_v9, %v7738_v32  ;;  %v8116_v6 = vadd.f32 %v1768_v44, %v7742_v35  ;;  %v8119_v59 = vadd.f32 %v1769_v14, %v7746_v31  ;;  %v8122_v22 = vadd.f32 %v1770_v57, %v7750_v5  ;;  %v13788_v41 = vld [vmem:[#allocation143_spill] sm:$0xff] }
 0x173   : > { %13670 = vst [vmem:[#allocation182_spill] sm:$0xff] %v8101_v45  ;;  %13671 = vst [vmem:[#allocation183_spill] sm:$0xff] %v8104_v39  ;;  %v8125_v1 = vadd.f32 %v1771_v37, %v7754_v58  ;;  %v8128_v47 = vadd.f32 %v1772_v33, %v7758_v54  ;;  %v8131_v11 = vadd.f32 %v1773_v49, %v7762_v52  ;;  %v13691_v52 = vld [vmem:[#allocation7_spill] sm:$0xff]  ;;  %v2169_v33 = vrot.slane %v13716_v17, 1  ;;  %v13786_v45 = vld [vmem:[#allocation157_spill] sm:$0xff] }
 0x174   : > { %13672 = vst [vmem:[#allocation184_spill] sm:$0xff] %v8107_v27  ;;  %13673 = vst [vmem:[#allocation185_spill] sm:$0xff] %v8110_v30  ;;  %v8134_v38 = vadd.f32 %v1774_v50, %v7766_v61  ;;  %v8137_v32 = vadd.f32 %v1775_v0, %v7770_v40  ;;  %v8140_v14 = vadd.f32 %v1776_v43, %v7774_v10  ;;  %v13693_v40 = vld [vmem:[#allocation171_spill] sm:$0xff]  ;;  %v13720_v50 = vld [vmem:[#allocation102_spill] sm:$0xff] }
 0x175   : > { %13674 = vst [vmem:[#allocation186_spill] sm:$0xff] %v8113_v8  ;;  %13675 = vst [vmem:[#allocation187_spill] sm:$0xff] %v8116_v6  ;;  %v8143_v57 = vadd.f32 %v1777_v16, %v7778_v15  ;;  %v8146_v37 = vadd.f32 %v1778_v34, %v7785_v62  ;;  %v8149_v35 = vadd.f32 %v1779_v24, %v7788_v18  ;;  %v13695_v15 = vld [vmem:[#allocation172_spill] sm:$0xff]  ;;  %v13697_v18 = vld [vmem:[#allocation173_spill] sm:$0xff]  ;;  %v2174_v9 = vrot.slane %v13720_v50, 1 }
 0x176   : > { %13676 = vst [vmem:[#allocation188_spill] sm:$0xff] %v8119_v59  ;;  %13677 = vst [vmem:[#allocation189_spill] sm:$0xff] %v8122_v22  ;;  %v8152_v31 = vadd.f32 %v1780_v12, %v7791_v4  ;;  %v8155_v5 = vadd.f32 %v1781_v63, %v7794_v51  ;;  %v8158_v58 = vadd.f32 %v1782_v2, %v7797_v29  ;;  %v13699_v51 = vld [vmem:[#allocation174_spill] sm:$0xff]  ;;  %v13701_v29 = vld [vmem:[#allocation175_spill] sm:$0xff] }
 0x177   : > { %13678 = vst [vmem:[#allocation190_spill] sm:$0xff] %v8125_v1  ;;  %13679 = vst [vmem:[#allocation54_spill] sm:$0xff] %v8128_v47  ;;  %v8161_v54 = vadd.f32 %v1783_v20, %v7986_v28  ;;  %v8165_v61 = vmul.f32 %v7781_v13, %v13691_v52  ;;  %v8168_v10 = vadd.f32 %v1784_v55, %v13693_v40  ;;  %v13703_v28 = vld [vmem:[#allocation176_spill] sm:$0xff]  ;;  %v13705_v63 = vld [vmem:[#allocation177_spill] sm:$0xff] }
 0x178   : > { %13680 = vst [vmem:[#allocation55_spill] sm:$0xff] %v8131_v11  ;;  %13681 = vst [vmem:[#allocation56_spill] sm:$0xff] %v8134_v38  ;;  %v8171_v62 = vadd.f32 %v1785_v56, %v13695_v15  ;;  %v8174_v4 = vadd.f32 %v1786_v26, %v13697_v18  ;;  %v8177_v16 = vadd.f32 %v1787_v36, %v13699_v51  ;;  %v13707_v24 = vld [vmem:[#allocation178_spill] sm:$0xff]  ;;  %v13709_v56 = vld [vmem:[#allocation179_spill] sm:$0xff] }
 0x179   : > { %13682 = vst [vmem:[#allocation60_spill] sm:$0xff] %v8137_v32  ;;  %13683 = vst [vmem:[#allocation61_spill] sm:$0xff] %v8140_v14  ;;  %v8180_v2 = vadd.f32 %v1788_v3, %v13701_v29  ;;  %v8183_v20 = vadd.f32 %v1789_v25, %v13703_v28  ;;  %v8186_v12 = vadd.f32 %v1790_v23, %v13705_v63  ;;  %v13711_v26 = vld [vmem:[#allocation105_spill] sm:$0xff]  ;;  %v13714_v3 = vld [vmem:[#allocation2_spill] sm:$0xff] }
 0x17a   : > { %13684 = vst [vmem:[#allocation106_spill] sm:$0xff] %v8143_v57  ;;  %13685 = vst [vmem:[#allocation207_spill] sm:$0xff] %v8146_v37  ;;  %v8189_v55 = vadd.f32 %v1791_v46, %v13707_v24  ;;  %v8192_v34 = vadd.f32 %v1792_v53, %v13709_v56  ;;  %v8195_v43 = vadd.f32 %v1793_v19, %v13711_v26  ;;  %v13715_v25 = vld [vmem:[#allocation80_spill] sm:$0xff]  ;;  %v12511_v46 = vrot.slane %v8165_v61, 1  ;;  %v13717_v53 = vld [vmem:[#allocation70_spill] sm:$0xff] }
 0x17b   : > { %13686 = vst [vmem:[#allocation208_spill] sm:$0xff] %v8149_v35  ;;  %13687 = vst [vmem:[#allocation209_spill] sm:$0xff] %v8152_v31  ;;  %v8198_v36 = vadd.f32 %v1794_v60, %v7722_v48  ;;  %v8202_v7 = vmul.f32 %v7781_v13, %v13714_v3  ;;  %v8206_v23 = vmul.f32 %v7781_v13, %v13715_v25  ;;  %v2171_v42 = vrot.slane %v13717_v53, 1  ;;  %v13718_v49 = vld [vmem:[#allocation3_spill] sm:$0xff]  ;;  %v13719_v48 = vld [vmem:[#allocation118_spill] sm:$0xff] }
 0x17c   : > { %13688 = vst [vmem:[#allocation210_spill] sm:$0xff] %v8155_v5  ;;  %13689 = vst [vmem:[#allocation211_spill] sm:$0xff] %v8158_v58  ;;  %v8213_v19 = vmul.f32 %v7781_v13, %v13718_v49  ;;  %v2172_v60 = vrot.slane %v13719_v48, 1  ;;  %v13721_v0 = vld [vmem:[#allocation119_spill] sm:$0xff]  ;;  %v8221_v40 = vsel %vm1008_vm1, %v12511_v46, %v2169_v33  ;;  %v13723_v51 = vld [vmem:[#allocation120_spill] sm:$0xff] }
 0x17d   : > { %13690 = vst [vmem:[#allocation212_spill] sm:$0xff] %v8161_v54  ;;  %13692 = vst [vmem:[#allocation213_spill] sm:$0xff] %v8165_v61  ;;  %v2176_v44 = vrot.slane %v13721_v0, 1  ;;  %v13722_v15 = vld [vmem:[#allocation71_spill] sm:$0xff]  ;;  %v2179_v29 = vrot.slane %v13723_v51, 1  ;;  %v13724_v28 = vld [vmem:[#allocation72_spill] sm:$0xff] }
 0x17e   : > { %13694 = vst [vmem:[#allocation171_spill] sm:$0xff] %v8168_v10  ;;  %13696 = vst [vmem:[#allocation172_spill] sm:$0xff] %v8171_v62  ;;  %v2177_v18 = vrot.slane %v13722_v15, 1  ;;  %v2181_v63 = vrot.slane %v13724_v28, 1  ;;  %v8227_v24 = vsel %vm1008_vm1, %v2171_v42, %v2172_v60  ;;  %v8230_v56 = vsel %vm1008_vm1, %v2172_v60, %v2174_v9  ;;  %v13725_v26 = vld [vmem:[#allocation121_spill] sm:$0xff]  ;;  %v13727_v0 = vld [vmem:[#allocation122_spill] sm:$0xff] }
 0x17f   : > { %13698 = vst [vmem:[#allocation173_spill] sm:$0xff] %v8174_v4  ;;  %13700 = vst [vmem:[#allocation174_spill] sm:$0xff] %v8177_v16  ;;  %v2182_v17 = vrot.slane %v13725_v26, 1  ;;  %v13726_v53 = vld [vmem:[#allocation73_spill] sm:$0xff]  ;;  %v2186_v15 = vrot.slane %v13727_v0, 1  ;;  %v13729_v9 = vld [vmem:[#allocation123_spill] sm:$0xff] }
 0x180   : > { %13702 = vst [vmem:[#allocation175_spill] sm:$0xff] %v8180_v2  ;;  %13704 = vst [vmem:[#allocation176_spill] sm:$0xff] %v8183_v20  ;;  %v2184_v48 = vrot.slane %v13726_v53, 1  ;;  %v8235_v50 = vsel %vm1008_vm1, %v2176_v44, %v2177_v18  ;;  %v8238_v33 = vsel %vm1008_vm1, %v2177_v18, %v2179_v29  ;;  %v13728_v51 = vld [vmem:[#allocation77_spill] sm:$0xff]  ;;  %v2189_v26 = vrot.slane %v13729_v9, 1  ;;  %v13730_v46 = vld [vmem:[#allocation78_spill] sm:$0xff] }
 0x181   : > { %13706 = vst [vmem:[#allocation177_spill] sm:$0xff] %v8186_v12  ;;  %13708 = vst [vmem:[#allocation178_spill] sm:$0xff] %v8189_v55  ;;  %v2187_v28 = vrot.slane %v13728_v51, 1  ;;  %v8243_v42 = vsel %vm1008_vm1, %v2181_v63, %v2182_v17  ;;  %v2191_v53 = vrot.slane %v13730_v46, 1  ;;  %v13731_v49 = vld [vmem:[#allocation124_spill] sm:$0xff]  ;;  %v13732_v29 = vld [vmem:[#allocation111_spill] sm:$0xff] }
 0x182   : > { %13710 = vst [vmem:[#allocation179_spill] sm:$0xff] %v8192_v34  ;;  %13712 = vst [vmem:[#allocation105_spill] sm:$0xff] %v8195_v43  ;;  %v8246_v60 = vsel %vm1008_vm1, %v2182_v17, %v2184_v48  ;;  %v2192_v18 = vrot.slane %v13731_v49, 1  ;;  %v2194_v25 = vrot.slane %v13732_v29, 1  ;;  %v13733_v0 = vld [vmem:[#allocation125_spill] sm:$0xff]  ;;  %v13734_v63 = vld [vmem:[#allocation167_spill] sm:$0xff] }
 0x183   : > { %13713 = vst [vmem:[#allocation214_spill] sm:$0xff] %v8198_v36  ;;  %v8251_v44 = vsel %vm1008_vm1, %v2186_v15, %v2187_v28  ;;  %v2196_v3 = vrot.slane %v13733_v0, 1  ;;  %v8257_v51 = vsel %vm1008_vm1, %v2187_v28, %v2189_v26  ;;  %v2197_v36 = vrot.slane %v13734_v63, 1  ;;  %v13735_v17 = vld [vmem:[#allocation126_spill] sm:$0xff]  ;;  %v13736_v43 = vld [vmem:[#allocation191_spill] sm:$0xff]  ;;  %v13738_v29 = vld [vmem:[#allocation192_spill] sm:$0xff] }
 0x184   : > { %v2199_v48 = vrot.slane %v13735_v17, 1  ;;  %v2201_v9 = vrot.slane %v13736_v43, 1  ;;  %v8263_v46 = vsel %vm1008_vm1, %v2191_v53, %v2192_v18  ;;  %v8266_v15 = vsel %vm1008_vm1, %v2192_v18, %v2194_v25  ;;  %v13737_v49 = vld [vmem:[#allocation127_spill] sm:$0xff]  ;;  %v13739_v26 = vld [vmem:[#allocation128_spill] sm:$0xff]  ;;  %v13740_v17 = vld [vmem:[#allocation193_spill] sm:$0xff] }
 0x185   : > { %v2202_v34 = vrot.slane %v13737_v49, 1  ;;  %v2204_v55 = vrot.slane %v13738_v29, 1  ;;  %v8271_v0 = vsel %vm1008_vm1, %v2196_v3, %v2197_v36  ;;  %v2206_v63 = vrot.slane %v13739_v26, 1  ;;  %v13741_v18 = vld [vmem:[#allocation194_spill] sm:$0xff]  ;;  %v13742_v12 = vld [vmem:[#allocation129_spill] sm:$0xff]  ;;  %v13743_v20 = vld [vmem:[#allocation195_spill] sm:$0xff] }
 0x186   : > { %v8274_v28 = vsel %vm1008_vm1, %v2197_v36, %v2199_v48  ;;  %v2207_v43 = vrot.slane %v13740_v17, 1  ;;  %v2209_v49 = vrot.slane %v13741_v18, 1  ;;  %v2211_v29 = vrot.slane %v13742_v12, 1  ;;  %v13744_v48 = vld [vmem:[#allocation196_spill] sm:$0xff]  ;;  %v13745_v26 = vld [vmem:[#allocation197_spill] sm:$0xff]  ;;  %v13754_v54 = vld [vmem:[#allocation206_spill] sm:$0xff] }
 0x187   : > { %v8279_v53 = vsel %vm1008_vm1, %v2201_v9, %v2202_v34  ;;  %v8282_v25 = vsel %vm1008_vm1, %v2202_v34, %v2204_v55  ;;  %v2212_v36 = vrot.slane %v13743_v20, 1  ;;  %v2214_v2 = vrot.slane %v13744_v48, 1  ;;  %v13746_v9 = vld [vmem:[#allocation198_spill] sm:$0xff]  ;;  %v13747_v55 = vld [vmem:[#allocation199_spill] sm:$0xff]  ;;  %v13748_v62 = vld [vmem:[#allocation200_spill] sm:$0xff] }
 0x188   : > { %v8287_v3 = vsel %vm1008_vm1, %v2206_v63, %v2207_v43  ;;  %v2216_v16 = vrot.slane %v13745_v26, 1  ;;  %v8293_v17 = vsel %vm1008_vm1, %v2207_v43, %v2209_v49  ;;  %v2217_v4 = vrot.slane %v13746_v9, 1  ;;  %v13749_v20 = vld [vmem:[#allocation201_spill] sm:$0xff]  ;;  %v13750_v48 = vld [vmem:[#allocation202_spill] sm:$0xff]  ;;  %v13751_v49 = vld [vmem:[#allocation203_spill] sm:$0xff] }
 0x189   : > { %v2219_v34 = vrot.slane %v13747_v55, 1  ;;  %v2221_v18 = vrot.slane %v13748_v62, 1  ;;  %v8299_v12 = vsel %vm1008_vm1, %v2211_v29, %v2212_v36  ;;  %v8302_v63 = vsel %vm1008_vm1, %v2212_v36, %v2214_v2  ;;  %v13752_v55 = vld [vmem:[#allocation204_spill] sm:$0xff]  ;;  %v13753_v36 = vld [vmem:[#allocation205_spill] sm:$0xff]  ;;  %v13755_v58 = vld [vmem:[#allocation103_spill] sm:$0xff] }
 0x18a   : > { %v2222_v10 = vrot.slane %v13749_v20, 1  ;;  %v2224_v52 = vrot.slane %v13750_v48, 1  ;;  %v8307_v26 = vsel %vm1008_vm1, %v2216_v16, %v2217_v4  ;;  %v2226_v9 = vrot.slane %v13751_v49, 1  ;;  %v13757_v49 = vld [vmem:[#allocation104_spill] sm:$0xff]  ;;  %v13767_v32 = vld [vmem:[#allocation82_spill] sm:$0xff]  ;;  %v13768_v38 = vld [vmem:[#allocation57_spill] sm:$0xff] }
 0x18b   : > { %v8310_v43 = vsel %vm1008_vm1, %v2217_v4, %v2219_v34  ;;  %v2227_v62 = vrot.slane %v13752_v55, 1  ;;  %v2229_v20 = vrot.slane %v13753_v36, 1  ;;  %v2231_v48 = vrot.slane %v13754_v54, 1  ;;  %v13756_v34 = vld [vmem:[#allocation112_spill] sm:$0xff]  ;;  %v13771_v11 = vld [vmem:[#allocation153_spill] sm:$0xff]  ;;  %v13774_v47 = vld [vmem:[#allocation154_spill] sm:$0xff] }
 0x18c   : > { %v8315_v29 = vsel %vm1008_vm1, %v2221_v18, %v2222_v10  ;;  %v8318_v2 = vsel %vm1008_vm1, %v2222_v10, %v2224_v52  ;;  %v2232_v4 = vrot.slane %v13755_v58, 1  ;;  %v2234_v5 = vrot.slane %v13756_v34, 1  ;;  %v13758_v18 = vld [vmem:[#allocation114_spill] sm:$0xff]  ;;  %v13759_v52 = vld [vmem:[#allocation35_spill] sm:$0xff]  ;;  %v13760_v37 = vld [vmem:[#allocation168_spill] sm:$0xff] }
 0x18d   : > { %v8323_v16 = vsel %vm1008_vm1, %v2226_v9, %v2227_v62  ;;  %v2236_v31 = vrot.slane %v13757_v49, 1  ;;  %v8329_v55 = vsel %vm1008_vm1, %v2227_v62, %v2229_v20  ;;  %v2237_v35 = vrot.slane %v13758_v18, 1  ;;  %v13761_v58 = vld [vmem:[#allocation169_spill] sm:$0xff]  ;;  %v13762_v34 = vld [vmem:[#allocation170_spill] sm:$0xff]  ;;  %v13763_v49 = vld [vmem:[#allocation4_spill] sm:$0xff] }
 0x18e   : > { %v2239_v10 = vrot.slane %v13759_v52, 1  ;;  %v2241_v36 = vrot.slane %v13760_v37, 1  ;;  %v8335_v54 = vsel %vm1008_vm1, %v2231_v48, %v2232_v4  ;;  %v8338_v9 = vsel %vm1008_vm1, %v2232_v4, %v2234_v5  ;;  %v13764_v20 = vld [vmem:[#allocation81_spill] sm:$0xff]  ;;  %v13766_v4 = vld [vmem:[#allocation52_spill] sm:$0xff]  ;;  %v13777_v59 = vld [vmem:[#allocation155_spill] sm:$0xff] }
 0x18f   : > { %v2242_v57 = vrot.slane %v13761_v58, 1  ;;  %v2244_v14 = vrot.slane %v13762_v34, 1  ;;  %v8344_v62 = vmul.f32 %v7781_v13, %v13763_v49  ;;  %v8348_v18 = vmul.f32 %v7781_v13, %v13764_v20  ;;  %v13765_v52 = vld [vmem:[#allocation5_spill] sm:$0xff]  ;;  %v13775_v1 = vld [vmem:[#allocation140_spill] sm:$0xff]  ;;  %v13782_v27 = vld [vmem:[#allocation142_spill] sm:$0xff] }
 0x190   : > { %v2238_v37 = vsel %vm1008_vm1, %v2236_v31, %v2237_v35  ;;  %v2240_v48 = vsel %vm1008_vm1, %v2237_v35, %v2239_v10  ;;  %v8354_v5 = vmul.f32 %v7781_v13, %v13765_v52  ;;  %v8358_v58 = vmul.f32 %v7781_v13, %v13766_v4  ;;  %v13769_v35 = vld [vmem:[#allocation138_spill] sm:$0xff]  ;;  %v13770_v52 = vld [vmem:[#allocation59_spill] sm:$0xff]  ;;  %v13776_v22 = vld [vmem:[#allocation64_spill] sm:$0xff] }
 0x191   : > { %v2243_v34 = vsel %vm1008_vm1, %v2241_v36, %v2242_v57  ;;  %v2245_v49 = vsel %vm1008_vm1, %v2242_v57, %v2244_v14  ;;  %v8364_v20 = vmul.f32 %v7781_v13, %v13767_v32  ;;  %v8368_v31 = vmul.f32 %v7781_v13, %v13768_v38  ;;  %v13772_v14 = vld [vmem:[#allocation139_spill] sm:$0xff]  ;;  %v13773_v32 = vld [vmem:[#allocation58_spill] sm:$0xff]  ;;  %v13778_v6 = vld [vmem:[#allocation141_spill] sm:$0xff] }
 0x192   : > { %v8372_v10 = vmul.f32 %v7781_v13, %v13769_v35  ;;  %v8376_v4 = vmul.f32 %v7781_v13, %v13770_v52  ;;  %v8380_v36 = vmul.f32 %v7781_v13, %v13771_v11  ;;  %v8384_v57 = vmul.f32 %v7781_v13, %v13772_v14  ;;  %v13779_v8 = vld [vmem:[#allocation65_spill] sm:$0xff]  ;;  %v13780_v30 = vld [vmem:[#allocation156_spill] sm:$0xff]  ;;  %v13784_v39 = vld [vmem:[#allocation75_spill] sm:$0xff] }
 0x193   : > { %v8388_v38 = vmul.f32 %v7781_v13, %v13773_v32  ;;  %v8392_v35 = vmul.f32 %v7781_v13, %v13774_v47  ;;  %v8396_v52 = vmul.f32 %v7781_v13, %v13775_v1  ;;  %v8400_v11 = vmul.f32 %v7781_v13, %v13776_v22  ;;  %v13790_v61 = vld [vmem:[#allocation74_spill] sm:$0xff] }
 0x194   : > { %v8404_v14 = vmul.f32 %v7781_v13, %v13777_v59  ;;  %v8408_v32 = vmul.f32 %v7781_v13, %v13778_v6  ;;  %v8412_v47 = vmul.f32 %v7781_v13, %v13779_v8  ;;  %v8416_v1 = vmul.f32 %v7781_v13, %v13780_v30 }
 0x195   : > { %v8420_v22 = vmul.f32 %v7781_v13, %v13782_v27  ;;  %v8424_v59 = vmul.f32 %v7781_v13, %v13784_v39  ;;  %v8428_v6 = vmul.f32 %v7781_v13, %v13786_v45  ;;  %v8432_v8 = vmul.f32 %v7781_v13, %v13788_v41 }
 0x196   : > { %13781 = vst [vmem:[#allocation117_spill] sm:$0xff] %v8416_v1  ;;  %v8436_v30 = vmul.f32 %v7781_v13, %v13790_v61  ;;  %v13792_v1 = vld [vmem:[#allocation158_spill] sm:$0xff] }
 0x197   : > { %13783 = vst [vmem:[#allocation70_spill] sm:$0xff] %v8420_v22  ;;  %13785 = vst [vmem:[#allocation118_spill] sm:$0xff] %v8424_v59  ;;  %v8440_v27 = vmul.f32 %v7781_v13, %v13792_v1  ;;  %v13794_v22 = vld [vmem:[#allocation144_spill] sm:$0xff]  ;;  %v13796_v59 = vld [vmem:[#allocation79_spill] sm:$0xff] }
 0x198   : > { %13787 = vst [vmem:[#allocation102_spill] sm:$0xff] %v8428_v6  ;;  %13789 = vst [vmem:[#allocation119_spill] sm:$0xff] %v8432_v8  ;;  %v8444_v39 = vmul.f32 %v7781_v13, %v13794_v22  ;;  %v8448_v45 = vmul.f32 %v7781_v13, %v13796_v59  ;;  %v13798_v6 = vld [vmem:[#allocation159_spill] sm:$0xff]  ;;  %v13800_v8 = vld [vmem:[#allocation145_spill] sm:$0xff] }
 0x199   : > { %13791 = vst [vmem:[#allocation71_spill] sm:$0xff] %v8436_v30  ;;  %13793 = vst [vmem:[#allocation120_spill] sm:$0xff] %v8440_v27  ;;  %v8452_v41 = vmul.f32 %v7781_v13, %v13798_v6  ;;  %v8456_v61 = vmul.f32 %v7781_v13, %v13800_v8  ;;  %v13802_v30 = vld [vmem:[#allocation76_spill] sm:$0xff] }
 0x19a   : > { %13795 = vst [vmem:[#allocation72_spill] sm:$0xff] %v8444_v39  ;;  %13797 = vst [vmem:[#allocation121_spill] sm:$0xff] %v8448_v45  ;;  %v8460_v1 = vmul.f32 %v7781_v13, %v13802_v30  ;;  %v13804_v27 = vld [vmem:[#allocation160_spill] sm:$0xff]  ;;  %v13806_v39 = vld [vmem:[#allocation146_spill] sm:$0xff] }
 0x19b   : > { %13799 = vst [vmem:[#allocation73_spill] sm:$0xff] %v8452_v41  ;;  %13801 = vst [vmem:[#allocation122_spill] sm:$0xff] %v8456_v61  ;;  %v8464_v22 = vmul.f32 %v7781_v13, %v13804_v27  ;;  %v8468_v59 = vmul.f32 %v7781_v13, %v13806_v39  ;;  %v13808_v45 = vld [vmem:[#allocation131_spill] sm:$0xff]  ;;  %v13810_v41 = vld [vmem:[#allocation161_spill] sm:$0xff] }
 0x19c   : > { %13803 = vst [vmem:[#allocation77_spill] sm:$0xff] %v8460_v1  ;;  %v8472_v6 = vmul.f32 %v7781_v13, %v13808_v45  ;;  %v8476_v8 = vmul.f32 %v7781_v13, %v13810_v41  ;;  %v13812_v61 = vld [vmem:[#allocation130_spill] sm:$0xff]  ;;  %v13814_v1 = vld [vmem:[#allocation92_spill] sm:$0xff] }
 0x19d   : > { %13805 = vst [vmem:[#allocation123_spill] sm:$0xff] %v8464_v22  ;;  %13807 = vst [vmem:[#allocation78_spill] sm:$0xff] %v8468_v59  ;;  %v8480_v30 = vadd.f32 %v8221_v40, %v13812_v61  ;;  %v8484_v27 = vadd.f32 %v8227_v24, %v13814_v1  ;;  %v13816_v22 = vld [vmem:[#allocation40_spill] sm:$0xff]  ;;  %v13818_v59 = vld [vmem:[#allocation41_spill] sm:$0xff] }
 0x19e   : > { %13809 = vst [vmem:[#allocation124_spill] sm:$0xff] %v8472_v6  ;;  %13811 = vst [vmem:[#allocation111_spill] sm:$0xff] %v8476_v8  ;;  %v8488_v39 = vadd.f32 %v8230_v56, %v13816_v22  ;;  %v8492_v45 = vadd.f32 %v8235_v50, %v13818_v59  ;;  %v13820_v6 = vld [vmem:[#allocation42_spill] sm:$0xff]  ;;  %v13822_v8 = vld [vmem:[#allocation43_spill] sm:$0xff] }
 0x19f   : > { %13813 = vst [vmem:[#allocation125_spill] sm:$0xff] %v8480_v30  ;;  %13815 = vst [vmem:[#allocation167_spill] sm:$0xff] %v8484_v27  ;;  %v8496_v41 = vadd.f32 %v8238_v33, %v13820_v6  ;;  %v8500_v61 = vadd.f32 %v8243_v42, %v13822_v8  ;;  %v13824_v40 = vld [vmem:[#allocation44_spill] sm:$0xff]  ;;  %v13826_v24 = vld [vmem:[#allocation45_spill] sm:$0xff] }
 0x1a0   : > { %13817 = vst [vmem:[#allocation126_spill] sm:$0xff] %v8488_v39  ;;  %13819 = vst [vmem:[#allocation191_spill] sm:$0xff] %v8492_v45  ;;  %v8504_v1 = vadd.f32 %v8246_v60, %v13824_v40  ;;  %v8508_v22 = vadd.f32 %v8251_v44, %v13826_v24  ;;  %v13828_v56 = vld [vmem:[#allocation46_spill] sm:$0xff]  ;;  %v13830_v50 = vld [vmem:[#allocation47_spill] sm:$0xff] }
 0x1a1   : > { %13821 = vst [vmem:[#allocation127_spill] sm:$0xff] %v8496_v41  ;;  %13823 = vst [vmem:[#allocation192_spill] sm:$0xff] %v8500_v61  ;;  %v8512_v59 = vadd.f32 %v8257_v51, %v13828_v56  ;;  %v8516_v6 = vadd.f32 %v8263_v46, %v13830_v50  ;;  %v13832_v33 = vld [vmem:[#allocation48_spill] sm:$0xff]  ;;  %v13834_v42 = vld [vmem:[#allocation49_spill] sm:$0xff] }
 0x1a2   : > { %13825 = vst [vmem:[#allocation128_spill] sm:$0xff] %v8504_v1  ;;  %13827 = vst [vmem:[#allocation193_spill] sm:$0xff] %v8508_v22  ;;  %v8520_v8 = vadd.f32 %v8266_v15, %v13832_v33  ;;  %v8524_v60 = vadd.f32 %v8271_v0, %v13834_v42  ;;  %v13836_v40 = vld [vmem:[#allocation50_spill] sm:$0xff]  ;;  %v13838_v24 = vld [vmem:[#allocation51_spill] sm:$0xff] }
 0x1a3   : > { %13829 = vst [vmem:[#allocation194_spill] sm:$0xff] %v8512_v59  ;;  %13831 = vst [vmem:[#allocation129_spill] sm:$0xff] %v8516_v6  ;;  %v8528_v44 = vadd.f32 %v8274_v28, %v13836_v40  ;;  %v8532_v51 = vadd.f32 %v8279_v53, %v13838_v24  ;;  %v13840_v56 = vld [vmem:[#allocation53_spill] sm:$0xff]  ;;  %v13842_v50 = vld [vmem:[#allocation62_spill] sm:$0xff] }
 0x1a4   : > { %13833 = vst [vmem:[#allocation195_spill] sm:$0xff] %v8520_v8  ;;  %13835 = vst [vmem:[#allocation196_spill] sm:$0xff] %v8524_v60  ;;  %v8536_v46 = vadd.f32 %v8282_v25, %v13840_v56  ;;  %v8540_v15 = vadd.f32 %v8287_v3, %v13842_v50  ;;  %v13844_v33 = vld [vmem:[#allocation99_spill] sm:$0xff]  ;;  %v13846_v42 = vld [vmem:[#allocation113_spill] sm:$0xff] }
 0x1a5   : > { %13837 = vst [vmem:[#allocation197_spill] sm:$0xff] %v8528_v44  ;;  %13839 = vst [vmem:[#allocation198_spill] sm:$0xff] %v8532_v51  ;;  %v8544_v0 = vadd.f32 %v8293_v17, %v13844_v33  ;;  %v8548_v28 = vadd.f32 %v8299_v12, %v13846_v42  ;;  %v13848_v40 = vld [vmem:[#allocation63_spill] sm:$0xff]  ;;  %v13852_v56 = vld [vmem:[#allocation66_spill] sm:$0xff] }
 0x1a6   : > { %13841 = vst [vmem:[#allocation199_spill] sm:$0xff] %v8536_v46  ;;  %13843 = vst [vmem:[#allocation200_spill] sm:$0xff] %v8540_v15  ;;  %v8552_v53 = vadd.f32 %v8302_v63, %v13848_v40  ;;  %v13850_v24 = vld [vmem:[#allocation107_spill] sm:$0xff]  ;;  %v8560_v3 = vadd.f32 %v8310_v43, %v13852_v56  ;;  %v13854_v50 = vld [vmem:[#allocation108_spill] sm:$0xff] }
 0x1a7   : > { %13845 = vst [vmem:[#allocation201_spill] sm:$0xff] %v8544_v0  ;;  %13847 = vst [vmem:[#allocation202_spill] sm:$0xff] %v8548_v28  ;;  %v8556_v25 = vadd.f32 %v8307_v26, %v13850_v24  ;;  %v8564_v17 = vadd.f32 %v8315_v29, %v13854_v50  ;;  %v13856_v33 = vld [vmem:[#allocation67_spill] sm:$0xff]  ;;  %v13858_v42 = vld [vmem:[#allocation109_spill] sm:$0xff] }
 0x1a8   : > { %13849 = vst [vmem:[#allocation203_spill] sm:$0xff] %v8552_v53  ;;  %13853 = vst [vmem:[#allocation205_spill] sm:$0xff] %v8560_v3  ;;  %v8568_v12 = vadd.f32 %v8318_v2, %v13856_v33  ;;  %v8572_v63 = vadd.f32 %v8323_v16, %v13858_v42  ;;  %v13860_v40 = vld [vmem:[#allocation100_spill] sm:$0xff]  ;;  %v13862_v24 = vld [vmem:[#allocation110_spill] sm:$0xff] }
 0x1a9   : > { %13851 = vst [vmem:[#allocation204_spill] sm:$0xff] %v8556_v25  ;;  %13855 = vst [vmem:[#allocation206_spill] sm:$0xff] %v8564_v17  ;;  %v8576_v26 = vadd.f32 %v8329_v55, %v13860_v40  ;;  %v8580_v43 = vadd.f32 %v8335_v54, %v13862_v24  ;;  %v13864_v56 = vld [vmem:[#allocation68_spill] sm:$0xff]  ;;  %v13866_v50 = vld [vmem:[#allocation115_spill] sm:$0xff] }
 0x1aa   : > { %13857 = vst [vmem:[#allocation103_spill] sm:$0xff] %v8568_v12  ;;  %13859 = vst [vmem:[#allocation112_spill] sm:$0xff] %v8572_v63  ;;  %v8584_v29 = vadd.f32 %v8338_v9, %v13864_v56  ;;  %v8587_v17 = vadd.f32 %v2238_v37, %v13866_v50  ;;  %v13868_v2 = vld [vmem:[#allocation69_spill] sm:$0xff]  ;;  %v13870_v16 = vld [vmem:[#allocation116_spill] sm:$0xff] }
 0x1ab   : > { %13861 = vst [vmem:[#allocation104_spill] sm:$0xff] %v8576_v26  ;;  %13863 = vst [vmem:[#allocation114_spill] sm:$0xff] %v8580_v43  ;;  %v8590_v33 = vadd.f32 %v2240_v48, %v13868_v2  ;;  %v8593_v42 = vadd.f32 %v2243_v34, %v13870_v16  ;;  %v13872_v63 = vld [vmem:[#allocation101_spill] sm:$0xff]  ;;  %v13874_v40 = vld [vmem:[#allocation147_spill] sm:$0xff]  ;;  %v2096_v43 = vrot.slane %v8358_v58, 1  ;;  %v2099_v26 = vrot.slane %v8368_v31, 1 }
 0x1ac   : > { %13865 = vst [vmem:[#allocation35_spill] sm:$0xff] %v8584_v29  ;;  %13867 = vst [vmem:[#allocation168_spill] sm:$0xff] %v8587_v17  ;;  %v8596_v55 = vadd.f32 %v2245_v49, %v13872_v63  ;;  %v8600_v54 = vmul.f32 %v7781_v13, %v13874_v40  ;;  %v13875_v24 = vld [vmem:[#allocation132_spill] sm:$0xff]  ;;  %v13876_v56 = vld [vmem:[#allocation162_spill] sm:$0xff]  ;;  %v2089_v17 = vrot.slane %v8213_v19, 1  ;;  %v2092_v29 = vrot.slane %v8348_v18, 1 }
 0x1ad   : > { %13869 = vst [vmem:[#allocation169_spill] sm:$0xff] %v8590_v33  ;;  %13871 = vst [vmem:[#allocation170_spill] sm:$0xff] %v8593_v42  ;;  %v8604_v9 = vmul.f32 %v7781_v13, %v13875_v24  ;;  %v8608_v37 = vmul.f32 %v7781_v13, %v13876_v56  ;;  %v13877_v48 = vld [vmem:[#allocation148_spill] sm:$0xff]  ;;  %v13878_v34 = vld [vmem:[#allocation133_spill] sm:$0xff]  ;;  %v2086_v33 = vrot.slane %v8202_v7, 1  ;;  %v2102_v7 = vrot.slane %v8376_v4, 1 }
 0x1ae   : > { %13873 = vst [vmem:[#allocation130_spill] sm:$0xff] %v8596_v55  ;;  %v8612_v50 = vmul.f32 %v7781_v13, %v13877_v48  ;;  %v8616_v49 = vmul.f32 %v7781_v13, %v13878_v34  ;;  %v13879_v63 = vld [vmem:[#allocation163_spill] sm:$0xff]  ;;  %v13880_v16 = vld [vmem:[#allocation149_spill] sm:$0xff]  ;;  %v13881_v40 = vld [vmem:[#allocation134_spill] sm:$0xff]  ;;  %v2106_v19 = vrot.slane %v8384_v57, 1  ;;  %v8665_v4 = vmul.f32 %v7781_v13, %v13668_v21 }
 0x1af   : > { %v8620_v2 = vmul.f32 %v7781_v13, %v13879_v63  ;;  %v8624_v24 = vmul.f32 %v7781_v13, %v13880_v16  ;;  %v8628_v56 = vmul.f32 %v7781_v13, %v13881_v40  ;;  %v13882_v55 = vld [vmem:[#allocation164_spill] sm:$0xff]  ;;  %v13883_v42 = vld [vmem:[#allocation150_spill] sm:$0xff]  ;;  %v2087_v63 = vrot.slane %v8206_v23, 1  ;;  %v13884_v12 = vld [vmem:[#allocation135_spill] sm:$0xff] }
 0x1b0   : > { %v8632_v48 = vmul.f32 %v7781_v13, %v13882_v55  ;;  %v8636_v34 = vmul.f32 %v7781_v13, %v13883_v42  ;;  %v2091_v16 = vrot.slane %v8344_v62, 1  ;;  %v2094_v40 = vrot.slane %v8354_v5, 1  ;;  %v13885_v31 = vld [vmem:[#allocation165_spill] sm:$0xff]  ;;  %v13893_v25 = vld [vmem:[#allocation83_spill] sm:$0xff]  ;;  %v13894_v53 = vld [vmem:[#allocation180_spill] sm:$0xff] }
 0x1b1   : > { %v2097_v55 = vrot.slane %v8364_v20, 1  ;;  %v2101_v42 = vrot.slane %v8372_v10, 1  ;;  %v2104_v23 = vrot.slane %v8380_v36, 1  ;;  %v2107_v62 = vrot.slane %v8388_v38, 1  ;;  %v13899_v3 = vld [vmem:[#allocation9_spill] sm:$0xff]  ;;  %v13901_v0 = vld [vmem:[#allocation27_spill] sm:$0xff] }
 0x1b2   : > { %v8654_v18 = vmul.f32 %v7781_v13, %v13884_v12  ;;  %v2109_v5 = vrot.slane %v8392_v35, 1  ;;  %v2111_v20 = vrot.slane %v8396_v52, 1  ;;  %v8661_v10 = vmul.f32 %v7781_v13, %v13885_v31  ;;  %v13890_v31 = vld [vmem:[#allocation102_spill] sm:$0xff]  ;;  %v13891_v12 = vld [vmem:[#allocation119_spill] sm:$0xff]  ;;  %v13900_v28 = vld [vmem:[#allocation85_spill] sm:$0xff] }
 0x1b3   : > { %v8668_v38 = vsel %vm1008_vm1, %v2086_v33, %v2087_v63  ;;  %v8671_v36 = vsel %vm1008_vm1, %v2087_v63, %v2089_v17  ;;  %v8674_v35 = vsel %vm1008_vm1, %v2091_v16, %v2092_v29  ;;  %v8677_v52 = vsel %vm1008_vm1, %v2092_v29, %v2094_v40  ;;  %v13902_v15 = vld [vmem:[#allocation10_spill] sm:$0xff]  ;;  %v13904_v51 = vld [vmem:[#allocation28_spill] sm:$0xff]  ;;  %v13907_v60 = vld [vmem:[#allocation87_spill] sm:$0xff] }
 0x1b4   : > { %v8680_v57 = vsel %vm1008_vm1, %v2096_v43, %v2097_v55  ;;  %v8683_v58 = vsel %vm1008_vm1, %v2097_v55, %v2099_v26  ;;  %v8686_v13 = vsel %vm1008_vm1, %v2101_v42, %v2102_v7  ;;  %v8689_v33 = vsel %vm1008_vm1, %v2102_v7, %v2104_v23  ;;  %v13887_v55 = vld [vmem:[#allocation117_spill] sm:$0xff]  ;;  %v13888_v7 = vld [vmem:[#allocation70_spill] sm:$0xff]  ;;  %v13905_v44 = vld [vmem:[#allocation12_spill] sm:$0xff] }
 0x1b5   : > { %v8692_v17 = vsel %vm1008_vm1, %v2106_v19, %v2107_v62  ;;  %v2114_v63 = vrot.slane %v8404_v14, 1  ;;  %v8696_v29 = vsel %vm1008_vm1, %v2107_v62, %v2109_v5  ;;  %v13886_v43 = vrot.slane %v8400_v11, 1  ;;  %v13889_v19 = vld [vmem:[#allocation118_spill] sm:$0xff]  ;;  %v13892_v5 = vld [vmem:[#allocation71_spill] sm:$0xff]  ;;  %v13909_v8 = vld [vmem:[#allocation29_spill] sm:$0xff] }
 0x1b6   : > { %v2116_v26 = vrot.slane %v8408_v32, 1  ;;  %v2117_v42 = vrot.slane %v8412_v47, 1  ;;  %v2119_v16 = vrot.slane %v13887_v55, 1  ;;  %v2121_v23 = vrot.slane %v13888_v7, 1  ;;  %v13896_v47 = vld [vmem:[#allocation8_spill] sm:$0xff]  ;;  %v13903_v46 = vld [vmem:[#allocation86_spill] sm:$0xff] }
 0x1b7   : > { %v8701_v40 = vsel %vm1008_vm1, %v2111_v20, %v13886_v43  ;;  %v2122_v21 = vrot.slane %v13889_v19, 1  ;;  %v2124_v14 = vrot.slane %v13890_v31, 1  ;;  %v2126_v62 = vrot.slane %v13891_v12, 1  ;;  %v13895_v43 = vld [vmem:[#allocation25_spill] sm:$0xff]  ;;  %v13897_v7 = vld [vmem:[#allocation84_spill] sm:$0xff]  ;;  %v13898_v31 = vld [vmem:[#allocation26_spill] sm:$0xff] }
 0x1b8   : > { %v8713_v20 = vmul.f32 %v13894_v53, %v13893_v25  ;;  %v8717_v32 = vmul.f32 %v13894_v53, %v13895_v43  ;;  %v8721_v55 = vmul.f32 %v13894_v53, %v13896_v47  ;;  %v8725_v19 = vmul.f32 %v13894_v53, %v13897_v7  ;;  %v13911_v6 = vld [vmem:[#allocation13_spill] sm:$0xff]  ;;  %v13913_v59 = vld [vmem:[#allocation88_spill] sm:$0xff]  ;;  %v13915_v22 = vld [vmem:[#allocation30_spill] sm:$0xff] }
 0x1b9   : > { %v8729_v12 = vmul.f32 %v13894_v53, %v13898_v31  ;;  %v8733_v25 = vmul.f32 %v13894_v53, %v13899_v3  ;;  %v8737_v43 = vmul.f32 %v13894_v53, %v13900_v28  ;;  %v8741_v47 = vmul.f32 %v13894_v53, %v13901_v0  ;;  %v13917_v1 = vld [vmem:[#allocation14_spill] sm:$0xff]  ;;  %v13919_v61 = vld [vmem:[#allocation89_spill] sm:$0xff]  ;;  %v13921_v41 = vld [vmem:[#allocation31_spill] sm:$0xff] }
 0x1ba   : > { %v8745_v7 = vmul.f32 %v13894_v53, %v13902_v15  ;;  %v8749_v31 = vmul.f32 %v13894_v53, %v13903_v46  ;;  %v8753_v3 = vmul.f32 %v13894_v53, %v13904_v51  ;;  %v8757_v28 = vmul.f32 %v13894_v53, %v13905_v44  ;;  %v13923_v45 = vld [vmem:[#allocation15_spill] sm:$0xff]  ;;  %v13925_v39 = vld [vmem:[#allocation90_spill] sm:$0xff]  ;;  %v13927_v27 = vld [vmem:[#allocation32_spill] sm:$0xff] }
 0x1bb   : > { %v8761_v0 = vmul.f32 %v13894_v53, %v13907_v60  ;;  %v8765_v15 = vmul.f32 %v13894_v53, %v13909_v8  ;;  %v8769_v46 = vmul.f32 %v13894_v53, %v13911_v6  ;;  %v8773_v51 = vmul.f32 %v13894_v53, %v13913_v59  ;;  %v13929_v30 = vld [vmem:[#allocation16_spill] sm:$0xff] }
 0x1bc   : > { %13906 = vst [vmem:[#allocation92_spill] sm:$0xff] %v8757_v28  ;;  %v8777_v44 = vmul.f32 %v13894_v53, %v13915_v22  ;;  %v8781_v60 = vmul.f32 %v13894_v53, %v13917_v1  ;;  %v8785_v8 = vmul.f32 %v13894_v53, %v13919_v61  ;;  %v8789_v6 = vmul.f32 %v13894_v53, %v13921_v41  ;;  %v13986_v28 = vld [vmem:[#allocation111_spill] sm:$0xff] }
 0x1bd   : > { %13908 = vst [vmem:[#allocation40_spill] sm:$0xff] %v8761_v0  ;;  %13910 = vst [vmem:[#allocation41_spill] sm:$0xff] %v8765_v15  ;;  %v8793_v59 = vmul.f32 %v13894_v53, %v13923_v45  ;;  %v8797_v22 = vmul.f32 %v13894_v53, %v13925_v39  ;;  %v8801_v1 = vmul.f32 %v13894_v53, %v13927_v27  ;;  %v13984_v15 = vld [vmem:[#allocation78_spill] sm:$0xff] }
 0x1be   : > { %13912 = vst [vmem:[#allocation42_spill] sm:$0xff] %v8769_v46  ;;  %13914 = vst [vmem:[#allocation43_spill] sm:$0xff] %v8773_v51  ;;  %v8805_v61 = vmul.f32 %v13894_v53, %v13929_v30  ;;  %v13980_v51 = vld [vmem:[#allocation73_spill] sm:$0xff] }
 0x1bf   : > { %13916 = vst [vmem:[#allocation44_spill] sm:$0xff] %v8777_v44  ;;  %13918 = vst [vmem:[#allocation45_spill] sm:$0xff] %v8781_v60  ;;  %v13979_v44 = vld [vmem:[#allocation121_spill] sm:$0xff] }
 0x1c0   : > { %13920 = vst [vmem:[#allocation46_spill] sm:$0xff] %v8785_v8  ;;  %13922 = vst [vmem:[#allocation47_spill] sm:$0xff] %v8789_v6  ;;  %v13931_v8 = vld [vmem:[#allocation91_spill] sm:$0xff]  ;;  %v13933_v6 = vld [vmem:[#allocation33_spill] sm:$0xff] }
 0x1c1   : > { %13924 = vst [vmem:[#allocation48_spill] sm:$0xff] %v8793_v59  ;;  %13926 = vst [vmem:[#allocation49_spill] sm:$0xff] %v8797_v22  ;;  %v8809_v41 = vmul.f32 %v13894_v53, %v13931_v8  ;;  %v8813_v45 = vmul.f32 %v13894_v53, %v13933_v6  ;;  %v13935_v59 = vld [vmem:[#allocation17_spill] sm:$0xff] }
 0x1c2   : > { %13928 = vst [vmem:[#allocation50_spill] sm:$0xff] %v8801_v1  ;;  %13930 = vst [vmem:[#allocation51_spill] sm:$0xff] %v8805_v61  ;;  %v8817_v39 = vmul.f32 %v13894_v53, %v13935_v59  ;;  %v13937_v22 = vld [vmem:[#allocation93_spill] sm:$0xff]  ;;  %v13939_v1 = vld [vmem:[#allocation34_spill] sm:$0xff] }
 0x1c3   : > { %13932 = vst [vmem:[#allocation53_spill] sm:$0xff] %v8809_v41  ;;  %13934 = vst [vmem:[#allocation62_spill] sm:$0xff] %v8813_v45  ;;  %v8821_v27 = vmul.f32 %v13894_v53, %v13937_v22  ;;  %v8825_v30 = vmul.f32 %v13894_v53, %v13939_v1  ;;  %v13941_v61 = vld [vmem:[#allocation18_spill] sm:$0xff]  ;;  %v13945_v45 = vld [vmem:[#allocation36_spill] sm:$0xff] }
 0x1c4   : > { %13936 = vst [vmem:[#allocation99_spill] sm:$0xff] %v8817_v39  ;;  %v8829_v8 = vmul.f32 %v13894_v53, %v13941_v61  ;;  %v13943_v41 = vld [vmem:[#allocation94_spill] sm:$0xff]  ;;  %v8837_v59 = vmul.f32 %v13894_v53, %v13945_v45  ;;  %v13947_v39 = vld [vmem:[#allocation20_spill] sm:$0xff]  ;;  %v13982_v46 = vld [vmem:[#allocation77_spill] sm:$0xff] }
 0x1c5   : > { %13938 = vst [vmem:[#allocation113_spill] sm:$0xff] %v8821_v27  ;;  %13940 = vst [vmem:[#allocation63_spill] sm:$0xff] %v8825_v30  ;;  %v8833_v6 = vmul.f32 %v13894_v53, %v13943_v41  ;;  %v8841_v22 = vmul.f32 %v13894_v53, %v13947_v39  ;;  %v13949_v27 = vld [vmem:[#allocation95_spill] sm:$0xff]  ;;  %v13951_v30 = vld [vmem:[#allocation37_spill] sm:$0xff] }
 0x1c6   : > { %13942 = vst [vmem:[#allocation107_spill] sm:$0xff] %v8829_v8  ;;  %13946 = vst [vmem:[#allocation108_spill] sm:$0xff] %v8837_v59  ;;  %v8845_v1 = vmul.f32 %v13894_v53, %v13949_v27  ;;  %v8849_v61 = vmul.f32 %v13894_v53, %v13951_v30  ;;  %v13953_v8 = vld [vmem:[#allocation21_spill] sm:$0xff]  ;;  %v13957_v59 = vld [vmem:[#allocation38_spill] sm:$0xff] }
 0x1c7   : > { %13944 = vst [vmem:[#allocation66_spill] sm:$0xff] %v8833_v6  ;;  %13948 = vst [vmem:[#allocation67_spill] sm:$0xff] %v8841_v22  ;;  %v8853_v41 = vmul.f32 %v13894_v53, %v13953_v8  ;;  %v13955_v6 = vld [vmem:[#allocation96_spill] sm:$0xff]  ;;  %v8861_v39 = vmul.f32 %v13894_v53, %v13957_v59  ;;  %v13959_v22 = vld [vmem:[#allocation22_spill] sm:$0xff] }
 0x1c8   : > { %13950 = vst [vmem:[#allocation109_spill] sm:$0xff] %v8845_v1  ;;  %13952 = vst [vmem:[#allocation100_spill] sm:$0xff] %v8849_v61  ;;  %v8857_v45 = vmul.f32 %v13894_v53, %v13955_v6  ;;  %v8865_v27 = vmul.f32 %v13894_v53, %v13959_v22  ;;  %v13961_v1 = vld [vmem:[#allocation97_spill] sm:$0xff]  ;;  %v13963_v61 = vld [vmem:[#allocation39_spill] sm:$0xff] }
 0x1c9   : > { %13954 = vst [vmem:[#allocation110_spill] sm:$0xff] %v8853_v41  ;;  %13958 = vst [vmem:[#allocation115_spill] sm:$0xff] %v8861_v39  ;;  %v8869_v30 = vmul.f32 %v13894_v53, %v13961_v1  ;;  %v8873_v8 = vmul.f32 %v13894_v53, %v13963_v61  ;;  %v13965_v41 = vld [vmem:[#allocation23_spill] sm:$0xff] }
 0x1ca   : > { %13956 = vst [vmem:[#allocation68_spill] sm:$0xff] %v8857_v45  ;;  %13960 = vst [vmem:[#allocation69_spill] sm:$0xff] %v8865_v27  ;;  %v8877_v6 = vmul.f32 %v13894_v53, %v13965_v41  ;;  %v13967_v45 = vld [vmem:[#allocation98_spill] sm:$0xff]  ;;  %v13969_v39 = vld [vmem:[#allocation151_spill] sm:$0xff] }
 0x1cb   : > { %13962 = vst [vmem:[#allocation116_spill] sm:$0xff] %v8869_v30  ;;  %13964 = vst [vmem:[#allocation101_spill] sm:$0xff] %v8873_v8  ;;  %v8881_v59 = vmul.f32 %v13894_v53, %v13967_v45  ;;  %v8885_v22 = vmul.f32 %v13894_v53, %v13969_v39  ;;  %v13971_v27 = vld [vmem:[#allocation137_spill] sm:$0xff]  ;;  %v13973_v30 = vld [vmem:[#allocation166_spill] sm:$0xff]  ;;  %v13975_v8 = vrot.slane %v8400_v11, 1  ;;  %v2120_v45 = vsel %vm1008_vm1, %v2117_v42, %v2119_v16 }
 0x1cc   : > { %13966 = vst [vmem:[#allocation117_spill] sm:$0xff] %v8877_v6  ;;  %v8889_v1 = vmul.f32 %v13894_v53, %v13971_v27  ;;  %v8893_v61 = vmul.f32 %v13894_v53, %v13973_v30  ;;  %v2118_v6 = vsel %vm1008_vm1, %v2116_v26, %v2117_v42  ;;  %v2125_v39 = vsel %vm1008_vm1, %v2122_v21, %v2124_v14  ;;  %v13978_v30 = vld [vmem:[#allocation72_spill] sm:$0xff]  ;;  %v13983_v16 = vld [vmem:[#allocation123_spill] sm:$0xff] }
 0x1cd   : > { %13968 = vst [vmem:[#allocation70_spill] sm:$0xff] %v8881_v59  ;;  %13970 = vst [vmem:[#allocation118_spill] sm:$0xff] %v8885_v22  ;;  %v2115_v41 = vsel %vm1008_vm1, %v13975_v8, %v2114_v63  ;;  %v2123_v59 = vsel %vm1008_vm1, %v2121_v23, %v2122_v21  ;;  %v13976_v22 = vrot.slane %v13892_v5, 1  ;;  %v2132_v11 = vrot.slane %v13979_v44, 1  ;;  %v13981_v63 = vld [vmem:[#allocation122_spill] sm:$0xff]  ;;  %v13985_v14 = vld [vmem:[#allocation124_spill] sm:$0xff] }
 0x1ce   : > { %13972 = vst [vmem:[#allocation102_spill] sm:$0xff] %v8889_v1  ;;  %13974 = vst [vmem:[#allocation119_spill] sm:$0xff] %v8893_v61  ;;  %v13977_v1 = vld [vmem:[#allocation120_spill] sm:$0xff]  ;;  %v2131_v61 = vrot.slane %v13978_v30, 1  ;;  %v2134_v8 = vrot.slane %v13980_v51, 1  ;;  %v2136_v26 = vrot.slane %v13981_v63, 1 }
 0x1cf   : > { %v2128_v27 = vsel %vm1008_vm1, %v2126_v62, %v13976_v22  ;;  %v2129_v60 = vrot.slane %v13977_v1, 1  ;;  %v2137_v42 = vrot.slane %v13982_v46, 1  ;;  %v2139_v23 = vrot.slane %v13983_v16, 1 }
 0x1d0   : > { %v2141_v21 = vrot.slane %v13984_v15, 1  ;;  %v2142_v0 = vrot.slane %v13985_v14, 1  ;;  %v2144_v22 = vrot.slane %v13986_v28, 1  ;;  %v2146_v1 = vrot.slane %v8600_v54, 1 }
 0x1d1   : > { %v2147_v30 = vrot.slane %v8604_v9, 1  ;;  %v2149_v44 = vrot.slane %v8608_v37, 1  ;;  %v2151_v51 = vrot.slane %v8612_v50, 1  ;;  %v2152_v62 = vrot.slane %v8616_v49, 1 }
 0x1d2   : > { %v2154_v46 = vrot.slane %v8620_v2, 1  ;;  %v2156_v63 = vrot.slane %v8624_v24, 1  ;;  %v2157_v15 = vrot.slane %v8628_v56, 1  ;;  %v2159_v16 = vrot.slane %v8632_v48, 1 }
 0x1d3   : > { %v2161_v28 = vrot.slane %v8636_v34, 1  ;;  %v2162_v54 = vrot.slane %v8654_v18, 1  ;;  %v2164_v9 = vrot.slane %v8661_v10, 1  ;;  %v13987_v37 = vrot.slane %v13892_v5, 1 }
 0x1d4   : > { %v2133_v49 = vsel %vm1008_vm1, %v2131_v61, %v2132_v11  ;;  %v2135_v2 = vsel %vm1008_vm1, %v2132_v11, %v2134_v8  ;;  %v2166_v24 = vrot.slane %v8665_v4, 1  ;;  %v2138_v56 = vsel %vm1008_vm1, %v2136_v26, %v2137_v42 }
 0x1d5   : > { %v2130_v50 = vsel %vm1008_vm1, %v13987_v37, %v2129_v60  ;;  %v2140_v48 = vsel %vm1008_vm1, %v2137_v42, %v2139_v23  ;;  %v2143_v34 = vsel %vm1008_vm1, %v2141_v21, %v2142_v0  ;;  %v2145_v18 = vsel %vm1008_vm1, %v2142_v0, %v2144_v22  ;;  %v13988_v42 = vld [vmem:[#allocation213_spill] sm:$0xff]  ;;  %v13992_v22 = vld [vmem:[#allocation182_spill] sm:$0xff] }
 0x1d6   : > { %v2148_v10 = vsel %vm1008_vm1, %v2146_v1, %v2147_v30  ;;  %v2150_v5 = vsel %vm1008_vm1, %v2147_v30, %v2149_v44  ;;  %v2153_v60 = vsel %vm1008_vm1, %v2151_v51, %v2152_v62  ;;  %v2155_v61 = vsel %vm1008_vm1, %v2152_v62, %v2154_v46  ;;  %v13990_v21 = vld [vmem:[#allocation181_spill] sm:$0xff]  ;;  %v13994_v30 = vld [vmem:[#allocation183_spill] sm:$0xff]  ;;  %v13996_v51 = vld [vmem:[#allocation184_spill] sm:$0xff] }
 0x1d7   : > { %v2158_v11 = vsel %vm1008_vm1, %v2156_v63, %v2157_v15  ;;  %v2160_v4 = vsel %vm1008_vm1, %v2157_v15, %v2159_v16  ;;  %v2163_v8 = vsel %vm1008_vm1, %v2161_v28, %v2162_v54  ;;  %v2165_v26 = vsel %vm1008_vm1, %v2162_v54, %v2164_v9  ;;  %v13998_v46 = vld [vmem:[#allocation185_spill] sm:$0xff]  ;;  %v14000_v15 = vld [vmem:[#allocation186_spill] sm:$0xff]  ;;  %v14002_v16 = vld [vmem:[#allocation187_spill] sm:$0xff] }
 0x1d8   : > { %v13989_v23 = vrot.slane %v13988_v42, 1  ;;  %v8950_v14 = vadd.f32 %v8668_v38, %v13990_v21  ;;  %v8954_v1 = vadd.f32 %v8671_v36, %v13992_v22  ;;  %v8958_v44 = vadd.f32 %v8674_v35, %v13994_v30  ;;  %v14004_v28 = vld [vmem:[#allocation188_spill] sm:$0xff]  ;;  %v14006_v54 = vld [vmem:[#allocation189_spill] sm:$0xff]  ;;  %v14008_v9 = vld [vmem:[#allocation190_spill] sm:$0xff] }
 0x1d9   : > { %v8962_v62 = vadd.f32 %v8677_v52, %v13996_v51  ;;  %v8966_v63 = vadd.f32 %v8680_v57, %v13998_v46  ;;  %v8970_v38 = vadd.f32 %v8683_v58, %v14000_v15  ;;  %v8974_v36 = vadd.f32 %v8686_v13, %v14002_v16  ;;  %v14010_v37 = vld [vmem:[#allocation54_spill] sm:$0xff]  ;;  %v14014_v13 = vld [vmem:[#allocation56_spill] sm:$0xff]  ;;  %v14018_v22 = vld [vmem:[#allocation61_spill] sm:$0xff] }
 0x1da   : > { %v2168_v0 = vsel %vm1008_vm1, %v2166_v24, %v13989_v23  ;;  %13991 = vst [vmem:[#allocation71_spill] sm:$0xff] %v8950_v14  ;;  %13993 = vst [vmem:[#allocation83_spill] sm:$0xff] %v8954_v1  ;;  %v8978_v35 = vadd.f32 %v8689_v33, %v14004_v28  ;;  %v8982_v52 = vadd.f32 %v8692_v17, %v14006_v54  ;;  %v14012_v24 = vld [vmem:[#allocation55_spill] sm:$0xff]  ;;  %v14016_v33 = vld [vmem:[#allocation60_spill] sm:$0xff] }
 0x1db   : > { %13995 = vst [vmem:[#allocation180_spill] sm:$0xff] %v8958_v44  ;;  %13997 = vst [vmem:[#allocation120_spill] sm:$0xff] %v8962_v62  ;;  %v8986_v57 = vadd.f32 %v8696_v29, %v14008_v9  ;;  %v8990_v58 = vadd.f32 %v8701_v40, %v14010_v37  ;;  %v8993_v42 = vadd.f32 %v2115_v41, %v14012_v24  ;;  %v14020_v30 = vld [vmem:[#allocation106_spill] sm:$0xff]  ;;  %v14022_v29 = vld [vmem:[#allocation207_spill] sm:$0xff] }
 0x1dc   : > { %13999 = vst [vmem:[#allocation72_spill] sm:$0xff] %v8966_v63  ;;  %14001 = vst [vmem:[#allocation121_spill] sm:$0xff] %v8970_v38  ;;  %v8996_v23 = vadd.f32 %v2118_v6, %v14014_v13  ;;  %v8999_v21 = vadd.f32 %v2120_v45, %v14016_v33  ;;  %v9002_v17 = vadd.f32 %v2123_v59, %v14018_v22  ;;  %v14024_v40 = vld [vmem:[#allocation208_spill] sm:$0xff]  ;;  %v14026_v41 = vld [vmem:[#allocation209_spill] sm:$0xff] }
 0x1dd   : > { %14003 = vst [vmem:[#allocation73_spill] sm:$0xff] %v8974_v36  ;;  %14005 = vst [vmem:[#allocation122_spill] sm:$0xff] %v8978_v35  ;;  %v9005_v51 = vadd.f32 %v2125_v39, %v14020_v30  ;;  %v9008_v46 = vadd.f32 %v2128_v27, %v14022_v29  ;;  %v9011_v15 = vadd.f32 %v2130_v50, %v14024_v40  ;;  %v14028_v6 = vld [vmem:[#allocation210_spill] sm:$0xff]  ;;  %v14030_v45 = vld [vmem:[#allocation211_spill] sm:$0xff] }
 0x1de   : > { %14007 = vst [vmem:[#allocation77_spill] sm:$0xff] %v8982_v52  ;;  %14009 = vst [vmem:[#allocation123_spill] sm:$0xff] %v8986_v57  ;;  %v9014_v16 = vadd.f32 %v2133_v49, %v14026_v41  ;;  %v9017_v28 = vadd.f32 %v2135_v2, %v14028_v6  ;;  %v9020_v54 = vadd.f32 %v2138_v56, %v14030_v45  ;;  %v14032_v59 = vld [vmem:[#allocation212_spill] sm:$0xff]  ;;  %v14034_v39 = vld [vmem:[#allocation7_spill] sm:$0xff] }
 0x1df   : > { %14011 = vst [vmem:[#allocation78_spill] sm:$0xff] %v8990_v58  ;;  %14013 = vst [vmem:[#allocation124_spill] sm:$0xff] %v8993_v42  ;;  %v9023_v9 = vadd.f32 %v2140_v48, %v14032_v59  ;;  %v9027_v37 = vmul.f32 %v13894_v53, %v14034_v39  ;;  %v14036_v27 = vld [vmem:[#allocation171_spill] sm:$0xff]  ;;  %v14038_v50 = vld [vmem:[#allocation172_spill] sm:$0xff] }
 0x1e0   : > { %14015 = vst [vmem:[#allocation111_spill] sm:$0xff] %v8996_v23  ;;  %14017 = vst [vmem:[#allocation213_spill] sm:$0xff] %v8999_v21  ;;  %v9030_v24 = vadd.f32 %v2143_v34, %v14036_v27  ;;  %v9033_v13 = vadd.f32 %v2145_v18, %v14038_v50  ;;  %v14040_v49 = vld [vmem:[#allocation173_spill] sm:$0xff]  ;;  %v14042_v2 = vld [vmem:[#allocation174_spill] sm:$0xff]  ;;  %v2653_v50 = vrot.slane %v8713_v20, 2  ;;  %v2663_v20 = vrot.slane %v8737_v43, 2 }
 0x1e1   : > { %14019 = vst [vmem:[#allocation181_spill] sm:$0xff] %v9002_v17  ;;  %14021 = vst [vmem:[#allocation182_spill] sm:$0xff] %v9005_v51  ;;  %v9036_v33 = vadd.f32 %v2148_v10, %v14040_v49  ;;  %v9039_v22 = vadd.f32 %v2150_v5, %v14042_v2  ;;  %v14044_v56 = vld [vmem:[#allocation175_spill] sm:$0xff]  ;;  %v14046_v48 = vld [vmem:[#allocation176_spill] sm:$0xff]  ;;  %v2658_v2 = vrot.slane %v8725_v19, 2  ;;  %v2666_v19 = vrot.slane %v8745_v7, 2 }
 0x1e2   : > { %14023 = vst [vmem:[#allocation183_spill] sm:$0xff] %v9008_v46  ;;  %14025 = vst [vmem:[#allocation184_spill] sm:$0xff] %v9011_v15  ;;  %v9042_v30 = vadd.f32 %v2153_v60, %v14044_v56  ;;  %v9045_v29 = vadd.f32 %v2155_v61, %v14046_v48  ;;  %v14048_v40 = vld [vmem:[#allocation177_spill] sm:$0xff]  ;;  %v14050_v34 = vld [vmem:[#allocation178_spill] sm:$0xff]  ;;  %v2660_v56 = vrot.slane %v8729_v12, 2  ;;  %v2668_v12 = vrot.slane %v8749_v31, 2 }
 0x1e3   : > { %14027 = vst [vmem:[#allocation185_spill] sm:$0xff] %v9014_v16  ;;  %14029 = vst [vmem:[#allocation186_spill] sm:$0xff] %v9017_v28  ;;  %v9048_v41 = vadd.f32 %v2158_v11, %v14048_v40  ;;  %v9051_v6 = vadd.f32 %v2160_v4, %v14050_v34  ;;  %v14052_v18 = vld [vmem:[#allocation179_spill] sm:$0xff]  ;;  %v14054_v10 = vld [vmem:[#allocation105_spill] sm:$0xff]  ;;  %v12515_v4 = vrot.slane %v9027_v37, 2  ;;  %v2661_v40 = vrot.slane %v8733_v25, 2 }
 0x1e4   : > { %14031 = vst [vmem:[#allocation187_spill] sm:$0xff] %v9020_v54  ;;  %14033 = vst [vmem:[#allocation188_spill] sm:$0xff] %v9023_v9  ;;  %v9054_v45 = vadd.f32 %v2163_v8, %v14052_v18  ;;  %v9057_v59 = vadd.f32 %v2165_v26, %v14054_v10  ;;  %v14056_v5 = vld [vmem:[#allocation214_spill] sm:$0xff]  ;;  %v14059_v61 = vld [vmem:[#allocation80_spill] sm:$0xff]  ;;  %v2655_v8 = vrot.slane %v8717_v32, 2  ;;  %v2665_v32 = vrot.slane %v8741_v47, 2 }
 0x1e5   : > { %14035 = vst [vmem:[#allocation189_spill] sm:$0xff] %v9027_v37  ;;  %14037 = vst [vmem:[#allocation190_spill] sm:$0xff] %v9030_v24  ;;  %v9060_v39 = vadd.f32 %v2168_v0, %v14056_v5  ;;  %v14058_v60 = vld [vmem:[#allocation2_spill] sm:$0xff]  ;;  %v9068_v11 = vmul.f32 %v13894_v53, %v14059_v61  ;;  %v14060_v49 = vld [vmem:[#allocation3_spill] sm:$0xff]  ;;  %v2656_v0 = vrot.slane %v8721_v55, 2  ;;  %v9083_v48 = vsel %vm1478_vm2, %v12515_v4, %v2653_v50 }
 0x1e6   : > { %14039 = vst [vmem:[#allocation54_spill] sm:$0xff] %v9033_v13  ;;  %14041 = vst [vmem:[#allocation55_spill] sm:$0xff] %v9036_v33  ;;  %v9064_v27 = vmul.f32 %v13894_v53, %v14058_v60  ;;  %v9075_v26 = vmul.f32 %v13894_v53, %v14060_v49  ;;  %v9097_v18 = vsel %vm1478_vm2, %v2660_v56, %v2661_v40  ;;  %v2670_v43 = vrot.slane %v8753_v3, 2  ;;  %v14061_v25 = vld [vmem:[#allocation92_spill] sm:$0xff]  ;;  %v14063_v50 = vld [vmem:[#allocation41_spill] sm:$0xff] }
 0x1e7   : > { %14043 = vst [vmem:[#allocation56_spill] sm:$0xff] %v9039_v22  ;;  %14045 = vst [vmem:[#allocation60_spill] sm:$0xff] %v9042_v30  ;;  %v9089_v34 = vsel %vm1478_vm2, %v2655_v8, %v2656_v0  ;;  %v9092_v55 = vsel %vm1478_vm2, %v2656_v0, %v2658_v2  ;;  %v9100_v10 = vsel %vm1478_vm2, %v2661_v40, %v2663_v20  ;;  %v2671_v47 = vrot.slane %v14061_v25, 2  ;;  %v14062_v61 = vld [vmem:[#allocation40_spill] sm:$0xff]  ;;  %v14064_v49 = vld [vmem:[#allocation42_spill] sm:$0xff] }
 0x1e8   : > { %14047 = vst [vmem:[#allocation61_spill] sm:$0xff] %v9045_v29  ;;  %14049 = vst [vmem:[#allocation106_spill] sm:$0xff] %v9048_v41  ;;  %v9105_v5 = vsel %vm1478_vm2, %v2665_v32, %v2666_v19  ;;  %v9108_v60 = vsel %vm1478_vm2, %v2666_v19, %v2668_v12  ;;  %v2673_v7 = vrot.slane %v14062_v61, 2  ;;  %v2675_v31 = vrot.slane %v14063_v50, 2  ;;  %v14065_v2 = vld [vmem:[#allocation43_spill] sm:$0xff]  ;;  %v14066_v3 = vld [vmem:[#allocation44_spill] sm:$0xff] }
 0x1e9   : > { %14051 = vst [vmem:[#allocation207_spill] sm:$0xff] %v9051_v6  ;;  %14053 = vst [vmem:[#allocation208_spill] sm:$0xff] %v9054_v45  ;;  %v9113_v8 = vsel %vm1478_vm2, %v2670_v43, %v2671_v47  ;;  %v2676_v0 = vrot.slane %v14064_v49, 2  ;;  %v2678_v56 = vrot.slane %v14065_v2, 2  ;;  %v2680_v40 = vrot.slane %v14066_v3, 2  ;;  %v14067_v32 = vld [vmem:[#allocation45_spill] sm:$0xff] }
 0x1ea   : > { %14055 = vst [vmem:[#allocation209_spill] sm:$0xff] %v9057_v59  ;;  %14057 = vst [vmem:[#allocation210_spill] sm:$0xff] %v9060_v39  ;;  %v9119_v20 = vsel %vm1478_vm2, %v2671_v47, %v2673_v7  ;;  %v2681_v25 = vrot.slane %v14067_v32, 2  ;;  %v14068_v19 = vld [vmem:[#allocation46_spill] sm:$0xff]  ;;  %v14069_v4 = vld [vmem:[#allocation47_spill] sm:$0xff] }
 0x1eb   : > { %v2683_v12 = vrot.slane %v14068_v19, 2  ;;  %v2685_v61 = vrot.slane %v14069_v4, 2  ;;  %v9125_v50 = vsel %vm1478_vm2, %v2675_v31, %v2676_v0  ;;  %v9128_v43 = vsel %vm1478_vm2, %v2676_v0, %v2678_v56  ;;  %v14070_v49 = vld [vmem:[#allocation48_spill] sm:$0xff]  ;;  %v14071_v2 = vld [vmem:[#allocation49_spill] sm:$0xff]  ;;  %v14072_v7 = vld [vmem:[#allocation50_spill] sm:$0xff] }
 0x1ec   : > { %v2686_v39 = vrot.slane %v14070_v49, 2  ;;  %v2688_v59 = vrot.slane %v14071_v2, 2  ;;  %v9133_v3 = vsel %vm1478_vm2, %v2680_v40, %v2681_v25  ;;  %v2690_v32 = vrot.slane %v14072_v7, 2  ;;  %v14073_v19 = vld [vmem:[#allocation51_spill] sm:$0xff]  ;;  %v14074_v56 = vld [vmem:[#allocation53_spill] sm:$0xff]  ;;  %v14075_v45 = vld [vmem:[#allocation62_spill] sm:$0xff] }
 0x1ed   : > { %v9136_v47 = vsel %vm1478_vm2, %v2681_v25, %v2683_v12  ;;  %v2691_v4 = vrot.slane %v14073_v19, 2  ;;  %v2693_v49 = vrot.slane %v14074_v56, 2  ;;  %v2695_v2 = vrot.slane %v14075_v45, 2  ;;  %v14076_v6 = vld [vmem:[#allocation99_spill] sm:$0xff]  ;;  %v14077_v12 = vld [vmem:[#allocation113_spill] sm:$0xff]  ;;  %v14081_v22 = vld [vmem:[#allocation108_spill] sm:$0xff] }
 0x1ee   : > { %v9141_v31 = vsel %vm1478_vm2, %v2685_v61, %v2686_v39  ;;  %v9144_v0 = vsel %vm1478_vm2, %v2686_v39, %v2688_v59  ;;  %v2696_v25 = vrot.slane %v14076_v6, 2  ;;  %v2698_v41 = vrot.slane %v14077_v12, 2  ;;  %v14078_v7 = vld [vmem:[#allocation63_spill] sm:$0xff]  ;;  %v14080_v59 = vld [vmem:[#allocation66_spill] sm:$0xff]  ;;  %v14083_v12 = vld [vmem:[#allocation109_spill] sm:$0xff] }
 0x1ef   : > { %v9149_v40 = vsel %vm1478_vm2, %v2690_v32, %v2691_v4  ;;  %v2700_v29 = vrot.slane %v14078_v7, 2  ;;  %v9155_v19 = vsel %vm1478_vm2, %v2691_v4, %v2693_v49  ;;  %v14079_v61 = vld [vmem:[#allocation107_spill] sm:$0xff]  ;;  %v2703_v39 = vrot.slane %v14080_v59, 2  ;;  %v14084_v49 = vld [vmem:[#allocation100_spill] sm:$0xff]  ;;  %v14085_v59 = vld [vmem:[#allocation110_spill] sm:$0xff] }
 0x1f0   : > { %v2701_v30 = vrot.slane %v14079_v61, 2  ;;  %v2705_v56 = vrot.slane %v14081_v22, 2  ;;  %v9161_v45 = vsel %vm1478_vm2, %v2695_v2, %v2696_v25  ;;  %v9164_v32 = vsel %vm1478_vm2, %v2696_v25, %v2698_v41  ;;  %v14082_v6 = vld [vmem:[#allocation67_spill] sm:$0xff]  ;;  %v14086_v25 = vld [vmem:[#allocation68_spill] sm:$0xff]  ;;  %v14088_v9 = vld [vmem:[#allocation69_spill] sm:$0xff] }
 0x1f1   : > { %v2706_v33 = vrot.slane %v14082_v6, 2  ;;  %v2708_v13 = vrot.slane %v14083_v12, 2  ;;  %v2710_v61 = vrot.slane %v14084_v49, 2  ;;  %v2711_v22 = vrot.slane %v14085_v59, 2  ;;  %v14087_v24 = vld [vmem:[#allocation115_spill] sm:$0xff]  ;;  %v14090_v49 = vld [vmem:[#allocation101_spill] sm:$0xff] }
 0x1f2   : > { %v9169_v7 = vsel %vm1478_vm2, %v2700_v29, %v2701_v30  ;;  %v9172_v4 = vsel %vm1478_vm2, %v2701_v30, %v2703_v39  ;;  %v2713_v6 = vrot.slane %v14086_v25, 2  ;;  %v2715_v12 = vrot.slane %v14087_v24, 2  ;;  %v14089_v39 = vld [vmem:[#allocation116_spill] sm:$0xff]  ;;  %v14093_v15 = vld [vmem:[#allocation118_spill] sm:$0xff]  ;;  %v14101_v21 = vld [vmem:[#allocation57_spill] sm:$0xff] }
 0x1f3   : > { %v9177_v2 = vsel %vm1478_vm2, %v2705_v56, %v2706_v33  ;;  %v9180_v41 = vsel %vm1478_vm2, %v2706_v33, %v2708_v13  ;;  %v9185_v29 = vsel %vm1478_vm2, %v2710_v61, %v2711_v22  ;;  %v2716_v30 = vrot.slane %v14088_v9, 2  ;;  %v14091_v56 = vld [vmem:[#allocation117_spill] sm:$0xff]  ;;  %v14092_v13 = vld [vmem:[#allocation70_spill] sm:$0xff]  ;;  %v14108_v58 = vld [vmem:[#allocation140_spill] sm:$0xff] }
 0x1f4   : > { %v2718_v54 = vrot.slane %v14089_v39, 2  ;;  %v2720_v28 = vrot.slane %v14090_v49, 2  ;;  %v9191_v59 = vsel %vm1478_vm2, %v2711_v22, %v2713_v6  ;;  %v2721_v16 = vrot.slane %v14091_v56, 2  ;;  %v14094_v9 = vld [vmem:[#allocation102_spill] sm:$0xff]  ;;  %v14095_v39 = vld [vmem:[#allocation119_spill] sm:$0xff]  ;;  %v14096_v49 = vld [vmem:[#allocation4_spill] sm:$0xff] }
 0x1f5   : > { %v2723_v33 = vrot.slane %v14092_v13, 2  ;;  %v2725_v25 = vrot.slane %v14093_v15, 2  ;;  %v9197_v24 = vsel %vm1478_vm2, %v2715_v12, %v2716_v30  ;;  %v2726_v46 = vrot.slane %v14094_v9, 2  ;;  %v14097_v6 = vld [vmem:[#allocation81_spill] sm:$0xff]  ;;  %v14100_v17 = vld [vmem:[#allocation82_spill] sm:$0xff]  ;;  %v14109_v57 = vld [vmem:[#allocation64_spill] sm:$0xff] }
 0x1f6   : > { %v9200_v61 = vsel %vm1478_vm2, %v2716_v30, %v2718_v54  ;;  %v2728_v51 = vrot.slane %v14095_v39, 2  ;;  %v9206_v22 = vmul.f32 %v13894_v53, %v14096_v49  ;;  %v9210_v56 = vmul.f32 %v13894_v53, %v14097_v6  ;;  %v14098_v13 = vld [vmem:[#allocation5_spill] sm:$0xff]  ;;  %v14099_v30 = vld [vmem:[#allocation52_spill] sm:$0xff]  ;;  %v14107_v42 = vld [vmem:[#allocation154_spill] sm:$0xff] }
 0x1f7   : > { %v2722_v15 = vsel %vm1478_vm2, %v2720_v28, %v2721_v16  ;;  %v2724_v12 = vsel %vm1478_vm2, %v2721_v16, %v2723_v33  ;;  %v9216_v54 = vmul.f32 %v13894_v53, %v14098_v13  ;;  %v9220_v9 = vmul.f32 %v13894_v53, %v14099_v30  ;;  %v14102_v16 = vld [vmem:[#allocation138_spill] sm:$0xff]  ;;  %v14103_v13 = vld [vmem:[#allocation59_spill] sm:$0xff]  ;;  %v14104_v23 = vld [vmem:[#allocation153_spill] sm:$0xff] }
 0x1f8   : > { %v2727_v39 = vsel %vm1478_vm2, %v2725_v25, %v2726_v46  ;;  %v2729_v49 = vsel %vm1478_vm2, %v2726_v46, %v2728_v51  ;;  %v9226_v6 = vmul.f32 %v13894_v53, %v14100_v17  ;;  %v9230_v28 = vmul.f32 %v13894_v53, %v14101_v21  ;;  %v14105_v51 = vld [vmem:[#allocation139_spill] sm:$0xff]  ;;  %v14106_v17 = vld [vmem:[#allocation58_spill] sm:$0xff]  ;;  %v14111_v35 = vld [vmem:[#allocation141_spill] sm:$0xff] }
 0x1f9   : > { %v9234_v33 = vmul.f32 %v13894_v53, %v14102_v16  ;;  %v9238_v30 = vmul.f32 %v13894_v53, %v14103_v13  ;;  %v9242_v25 = vmul.f32 %v13894_v53, %v14104_v23  ;;  %v9246_v46 = vmul.f32 %v13894_v53, %v14105_v51  ;;  %v14110_v52 = vld [vmem:[#allocation155_spill] sm:$0xff]  ;;  %v14112_v36 = vld [vmem:[#allocation65_spill] sm:$0xff]  ;;  %v14113_v38 = vld [vmem:[#allocation156_spill] sm:$0xff] }
 0x1fa   : > { %v9250_v21 = vmul.f32 %v13894_v53, %v14106_v17  ;;  %v9254_v16 = vmul.f32 %v13894_v53, %v14107_v42  ;;  %v9258_v13 = vmul.f32 %v13894_v53, %v14108_v58  ;;  %v9262_v23 = vmul.f32 %v13894_v53, %v14109_v57  ;;  %v14114_v63 = vld [vmem:[#allocation142_spill] sm:$0xff]  ;;  %v14116_v62 = vld [vmem:[#allocation75_spill] sm:$0xff]  ;;  %v14118_v44 = vld [vmem:[#allocation157_spill] sm:$0xff] }
 0x1fb   : > { %v9266_v51 = vmul.f32 %v13894_v53, %v14110_v52  ;;  %v9270_v17 = vmul.f32 %v13894_v53, %v14111_v35  ;;  %v9274_v42 = vmul.f32 %v13894_v53, %v14112_v36  ;;  %v9278_v58 = vmul.f32 %v13894_v53, %v14113_v38  ;;  %v14120_v1 = vld [vmem:[#allocation143_spill] sm:$0xff]  ;;  %v14122_v14 = vld [vmem:[#allocation74_spill] sm:$0xff] }
 0x1fc   : > { %v9282_v57 = vmul.f32 %v13894_v53, %v14114_v63  ;;  %v9286_v52 = vmul.f32 %v13894_v53, %v14116_v62  ;;  %v9290_v35 = vmul.f32 %v13894_v53, %v14118_v44  ;;  %v9294_v36 = vmul.f32 %v13894_v53, %v14120_v1  ;;  %v14124_v37 = vld [vmem:[#allocation158_spill] sm:$0xff] }
 0x1fd   : > { %v9298_v38 = vmul.f32 %v13894_v53, %v14122_v14  ;;  %v9302_v63 = vmul.f32 %v13894_v53, %v14124_v37 }
 0x1fe   : > { %14115 = vst [vmem:[#allocation211_spill] sm:$0xff] %v9282_v57  ;;  %14117 = vst [vmem:[#allocation212_spill] sm:$0xff] %v9286_v52  ;;  %v14126_v57 = vld [vmem:[#allocation144_spill] sm:$0xff]  ;;  %v14128_v52 = vld [vmem:[#allocation79_spill] sm:$0xff] }
 0x1ff   : > { %14119 = vst [vmem:[#allocation7_spill] sm:$0xff] %v9290_v35  ;;  %14121 = vst [vmem:[#allocation171_spill] sm:$0xff] %v9294_v36  ;;  %v9306_v62 = vmul.f32 %v13894_v53, %v14126_v57  ;;  %v9310_v44 = vmul.f32 %v13894_v53, %v14128_v52  ;;  %v14130_v35 = vld [vmem:[#allocation159_spill] sm:$0xff]  ;;  %v14132_v36 = vld [vmem:[#allocation145_spill] sm:$0xff] }
 0x200   : > { %14123 = vst [vmem:[#allocation172_spill] sm:$0xff] %v9298_v38  ;;  %14125 = vst [vmem:[#allocation173_spill] sm:$0xff] %v9302_v63  ;;  %v9314_v1 = vmul.f32 %v13894_v53, %v14130_v35  ;;  %v9318_v14 = vmul.f32 %v13894_v53, %v14132_v36  ;;  %v14134_v38 = vld [vmem:[#allocation76_spill] sm:$0xff] }
 0x201   : > { %14127 = vst [vmem:[#allocation174_spill] sm:$0xff] %v9306_v62  ;;  %14129 = vst [vmem:[#allocation175_spill] sm:$0xff] %v9310_v44  ;;  %v9322_v37 = vmul.f32 %v13894_v53, %v14134_v38  ;;  %v14136_v63 = vld [vmem:[#allocation160_spill] sm:$0xff]  ;;  %v14138_v62 = vld [vmem:[#allocation146_spill] sm:$0xff] }
 0x202   : > { %14131 = vst [vmem:[#allocation176_spill] sm:$0xff] %v9314_v1  ;;  %14133 = vst [vmem:[#allocation177_spill] sm:$0xff] %v9318_v14  ;;  %v9326_v57 = vmul.f32 %v13894_v53, %v14136_v63  ;;  %v9330_v52 = vmul.f32 %v13894_v53, %v14138_v62  ;;  %v14140_v44 = vld [vmem:[#allocation131_spill] sm:$0xff]  ;;  %v14142_v1 = vld [vmem:[#allocation161_spill] sm:$0xff] }
 0x203   : > { %14135 = vst [vmem:[#allocation178_spill] sm:$0xff] %v9322_v37  ;;  %v9334_v35 = vmul.f32 %v13894_v53, %v14140_v44  ;;  %v9338_v36 = vmul.f32 %v13894_v53, %v14142_v1  ;;  %v14144_v14 = vld [vmem:[#allocation125_spill] sm:$0xff]  ;;  %v14146_v37 = vld [vmem:[#allocation167_spill] sm:$0xff] }
 0x204   : > { %14137 = vst [vmem:[#allocation179_spill] sm:$0xff] %v9326_v57  ;;  %14139 = vst [vmem:[#allocation105_spill] sm:$0xff] %v9330_v52  ;;  %v9342_v38 = vadd.f32 %v9083_v48, %v14144_v14  ;;  %v9346_v63 = vadd.f32 %v9089_v34, %v14146_v37  ;;  %v14148_v57 = vld [vmem:[#allocation126_spill] sm:$0xff]  ;;  %v14150_v52 = vld [vmem:[#allocation191_spill] sm:$0xff] }
 0x205   : > { %14141 = vst [vmem:[#allocation214_spill] sm:$0xff] %v9334_v35  ;;  %14143 = vst [vmem:[#allocation2_spill] sm:$0xff] %v9338_v36  ;;  %v9350_v62 = vadd.f32 %v9092_v55, %v14148_v57  ;;  %v9354_v44 = vadd.f32 %v9097_v18, %v14150_v52  ;;  %v14152_v35 = vld [vmem:[#allocation127_spill] sm:$0xff]  ;;  %v14154_v36 = vld [vmem:[#allocation192_spill] sm:$0xff] }
 0x206   : > { %14145 = vst [vmem:[#allocation80_spill] sm:$0xff] %v9342_v38  ;;  %14147 = vst [vmem:[#allocation3_spill] sm:$0xff] %v9346_v63  ;;  %v9358_v1 = vadd.f32 %v9100_v10, %v14152_v35  ;;  %v9362_v14 = vadd.f32 %v9105_v5, %v14154_v36  ;;  %v14156_v48 = vld [vmem:[#allocation128_spill] sm:$0xff]  ;;  %v14158_v34 = vld [vmem:[#allocation193_spill] sm:$0xff] }
 0x207   : > { %14149 = vst [vmem:[#allocation92_spill] sm:$0xff] %v9350_v62  ;;  %14151 = vst [vmem:[#allocation40_spill] sm:$0xff] %v9354_v44  ;;  %v9366_v37 = vadd.f32 %v9108_v60, %v14156_v48  ;;  %v9370_v57 = vadd.f32 %v9113_v8, %v14158_v34  ;;  %v14160_v55 = vld [vmem:[#allocation194_spill] sm:$0xff]  ;;  %v14162_v18 = vld [vmem:[#allocation129_spill] sm:$0xff] }
 0x208   : > { %14153 = vst [vmem:[#allocation41_spill] sm:$0xff] %v9358_v1  ;;  %14155 = vst [vmem:[#allocation42_spill] sm:$0xff] %v9362_v14  ;;  %v9374_v52 = vadd.f32 %v9119_v20, %v14160_v55  ;;  %v9378_v35 = vadd.f32 %v9125_v50, %v14162_v18  ;;  %v14164_v10 = vld [vmem:[#allocation195_spill] sm:$0xff]  ;;  %v14166_v5 = vld [vmem:[#allocation196_spill] sm:$0xff] }
 0x209   : > { %14157 = vst [vmem:[#allocation43_spill] sm:$0xff] %v9366_v37  ;;  %14159 = vst [vmem:[#allocation44_spill] sm:$0xff] %v9370_v57  ;;  %v9382_v36 = vadd.f32 %v9128_v43, %v14164_v10  ;;  %v9386_v60 = vadd.f32 %v9133_v3, %v14166_v5  ;;  %v14168_v48 = vld [vmem:[#allocation197_spill] sm:$0xff]  ;;  %v14170_v34 = vld [vmem:[#allocation198_spill] sm:$0xff] }
 0x20a   : > { %14161 = vst [vmem:[#allocation45_spill] sm:$0xff] %v9374_v52  ;;  %14163 = vst [vmem:[#allocation46_spill] sm:$0xff] %v9378_v35  ;;  %v9390_v8 = vadd.f32 %v9136_v47, %v14168_v48  ;;  %v9394_v20 = vadd.f32 %v9141_v31, %v14170_v34  ;;  %v14172_v55 = vld [vmem:[#allocation199_spill] sm:$0xff]  ;;  %v14174_v18 = vld [vmem:[#allocation200_spill] sm:$0xff] }
 0x20b   : > { %14165 = vst [vmem:[#allocation47_spill] sm:$0xff] %v9382_v36  ;;  %14167 = vst [vmem:[#allocation48_spill] sm:$0xff] %v9386_v60  ;;  %v9398_v50 = vadd.f32 %v9144_v0, %v14172_v55  ;;  %v9402_v43 = vadd.f32 %v9149_v40, %v14174_v18  ;;  %v14176_v10 = vld [vmem:[#allocation201_spill] sm:$0xff]  ;;  %v14178_v5 = vld [vmem:[#allocation202_spill] sm:$0xff] }
 0x20c   : > { %14169 = vst [vmem:[#allocation49_spill] sm:$0xff] %v9390_v8  ;;  %14171 = vst [vmem:[#allocation50_spill] sm:$0xff] %v9394_v20  ;;  %v9406_v3 = vadd.f32 %v9155_v19, %v14176_v10  ;;  %v9410_v47 = vadd.f32 %v9161_v45, %v14178_v5  ;;  %v14180_v48 = vld [vmem:[#allocation203_spill] sm:$0xff]  ;;  %v14182_v34 = vld [vmem:[#allocation204_spill] sm:$0xff] }
 0x20d   : > { %14173 = vst [vmem:[#allocation51_spill] sm:$0xff] %v9398_v50  ;;  %14175 = vst [vmem:[#allocation53_spill] sm:$0xff] %v9402_v43  ;;  %v9414_v31 = vadd.f32 %v9164_v32, %v14180_v48  ;;  %v9418_v0 = vadd.f32 %v9169_v7, %v14182_v34  ;;  %v14184_v55 = vld [vmem:[#allocation205_spill] sm:$0xff]  ;;  %v14186_v18 = vld [vmem:[#allocation206_spill] sm:$0xff] }
 0x20e   : > { %14177 = vst [vmem:[#allocation62_spill] sm:$0xff] %v9406_v3  ;;  %14179 = vst [vmem:[#allocation99_spill] sm:$0xff] %v9410_v47  ;;  %v9422_v40 = vadd.f32 %v9172_v4, %v14184_v55  ;;  %v9426_v19 = vadd.f32 %v9177_v2, %v14186_v18  ;;  %v14188_v10 = vld [vmem:[#allocation103_spill] sm:$0xff]  ;;  %v14190_v5 = vld [vmem:[#allocation112_spill] sm:$0xff] }
 0x20f   : > { %14181 = vst [vmem:[#allocation113_spill] sm:$0xff] %v9414_v31  ;;  %14183 = vst [vmem:[#allocation63_spill] sm:$0xff] %v9418_v0  ;;  %v9430_v45 = vadd.f32 %v9180_v41, %v14188_v10  ;;  %v9434_v32 = vadd.f32 %v9185_v29, %v14190_v5  ;;  %v14192_v48 = vld [vmem:[#allocation104_spill] sm:$0xff]  ;;  %v14194_v34 = vld [vmem:[#allocation114_spill] sm:$0xff] }
 0x210   : > { %14185 = vst [vmem:[#allocation107_spill] sm:$0xff] %v9422_v40  ;;  %14187 = vst [vmem:[#allocation66_spill] sm:$0xff] %v9426_v19  ;;  %v9438_v7 = vadd.f32 %v9191_v59, %v14192_v48  ;;  %v9442_v4 = vadd.f32 %v9197_v24, %v14194_v34  ;;  %v14196_v55 = vld [vmem:[#allocation35_spill] sm:$0xff]  ;;  %v14198_v18 = vld [vmem:[#allocation168_spill] sm:$0xff] }
 0x211   : > { %14189 = vst [vmem:[#allocation108_spill] sm:$0xff] %v9430_v45  ;;  %14191 = vst [vmem:[#allocation67_spill] sm:$0xff] %v9434_v32  ;;  %v9446_v2 = vadd.f32 %v9200_v61, %v14196_v55  ;;  %v9449_v19 = vadd.f32 %v2722_v15, %v14198_v18  ;;  %v14200_v41 = vld [vmem:[#allocation169_spill] sm:$0xff]  ;;  %v14202_v29 = vld [vmem:[#allocation170_spill] sm:$0xff] }
 0x212   : > { %14193 = vst [vmem:[#allocation109_spill] sm:$0xff] %v9438_v7  ;;  %14195 = vst [vmem:[#allocation100_spill] sm:$0xff] %v9442_v4  ;;  %v9452_v10 = vadd.f32 %v2724_v12, %v14200_v41  ;;  %v9455_v5 = vadd.f32 %v2727_v39, %v14202_v29  ;;  %v14204_v32 = vld [vmem:[#allocation130_spill] sm:$0xff]  ;;  %v14206_v48 = vld [vmem:[#allocation147_spill] sm:$0xff]  ;;  %v2588_v4 = vrot.slane %v9242_v25, 2 }
 0x213   : > { %14197 = vst [vmem:[#allocation110_spill] sm:$0xff] %v9446_v2  ;;  %14199 = vst [vmem:[#allocation68_spill] sm:$0xff] %v9449_v19  ;;  %v9458_v59 = vadd.f32 %v2729_v49, %v14204_v32  ;;  %v9462_v24 = vmul.f32 %v13894_v53, %v14206_v48  ;;  %v14207_v34 = vld [vmem:[#allocation132_spill] sm:$0xff]  ;;  %v14208_v55 = vld [vmem:[#allocation162_spill] sm:$0xff]  ;;  %v2570_v48 = vrot.slane %v9064_v27, 2  ;;  %v2583_v19 = vrot.slane %v9230_v28, 2 }
 0x214   : > { %14201 = vst [vmem:[#allocation115_spill] sm:$0xff] %v9452_v10  ;;  %14203 = vst [vmem:[#allocation69_spill] sm:$0xff] %v9455_v5  ;;  %v9466_v61 = vmul.f32 %v13894_v53, %v14207_v34  ;;  %v9470_v15 = vmul.f32 %v13894_v53, %v14208_v55  ;;  %v14209_v12 = vld [vmem:[#allocation148_spill] sm:$0xff]  ;;  %v14210_v39 = vld [vmem:[#allocation133_spill] sm:$0xff]  ;;  %v2571_v55 = vrot.slane %v9068_v11, 2  ;;  %v2576_v5 = vrot.slane %v9210_v56, 2 }
 0x215   : > { %14205 = vst [vmem:[#allocation116_spill] sm:$0xff] %v9458_v59  ;;  %v9474_v18 = vmul.f32 %v13894_v53, %v14209_v12  ;;  %v9478_v49 = vmul.f32 %v13894_v53, %v14210_v39  ;;  %v14211_v32 = vld [vmem:[#allocation163_spill] sm:$0xff]  ;;  %v14212_v29 = vld [vmem:[#allocation149_spill] sm:$0xff]  ;;  %v2573_v59 = vrot.slane %v9075_v26, 2  ;;  %v2575_v12 = vrot.slane %v9206_v22, 2  ;;  %v14214_v27 = vld [vmem:[#allocation164_spill] sm:$0xff] }
 0x216   : > { %v9482_v41 = vmul.f32 %v13894_v53, %v14211_v32  ;;  %v9486_v34 = vmul.f32 %v13894_v53, %v14212_v29  ;;  %v2578_v39 = vrot.slane %v9216_v54, 2  ;;  %v2580_v10 = vrot.slane %v9220_v9, 2  ;;  %v14213_v29 = vld [vmem:[#allocation134_spill] sm:$0xff]  ;;  %v14216_v9 = vld [vmem:[#allocation135_spill] sm:$0xff]  ;;  %v14217_v28 = vld [vmem:[#allocation165_spill] sm:$0xff] }
 0x217   : > { %v2581_v32 = vrot.slane %v9226_v6, 2  ;;  %v9499_v2 = vmul.f32 %v13894_v53, %v14213_v29  ;;  %v9503_v11 = vmul.f32 %v13894_v53, %v14214_v27  ;;  %v2585_v26 = vrot.slane %v9234_v33, 2  ;;  %v14215_v56 = vld [vmem:[#allocation150_spill] sm:$0xff]  ;;  %v14219_v27 = vld [vmem:[#allocation24_spill] sm:$0xff]  ;;  %v14248_v0 = vld [vmem:[#allocation31_spill] sm:$0xff] }
 0x218   : > { %v2586_v22 = vrot.slane %v9238_v30, 2  ;;  %v9509_v54 = vmul.f32 %v13894_v53, %v14215_v56  ;;  %v9513_v6 = vmul.f32 %v13894_v53, %v14216_v9  ;;  %v9517_v29 = vmul.f32 %v13894_v53, %v14217_v28  ;;  %v14223_v56 = vld [vmem:[#allocation11_spill] sm:$0xff]  ;;  %v14247_v40 = vld [vmem:[#allocation14_spill] sm:$0xff]  ;;  %v14250_v47 = vld [vmem:[#allocation32_spill] sm:$0xff] }
 0x219   : > { %v9522_v7 = vmul.f32 %v13894_v53, %v14219_v27  ;;  %v9525_v30 = vsel %vm1478_vm2, %v2570_v48, %v2571_v55  ;;  %v9528_v33 = vsel %vm1478_vm2, %v2571_v55, %v2573_v59  ;;  %v2860_v45 = vsub.s32 6, %v14223_v56  ;;  %v14249_v31 = vld [vmem:[#allocation15_spill] sm:$0xff]  ;;  %v14251_v3 = vld [vmem:[#allocation16_spill] sm:$0xff]  ;;  %v14252_v43 = vld [vmem:[#allocation33_spill] sm:$0xff] }
 0x21a   : > { %14218 = vst [vmem:[#allocation101_spill] sm:$0xff] %v9517_v29  ;;  %14221 = vst [vmem:[#allocation70_spill] sm:$0xff] %v9525_v30  ;;  %v9532_v9 = vsel %vm1478_vm2, %v2575_v12, %v2576_v5  ;;  %v9535_v28 = vsel %vm1478_vm2, %v2576_v5, %v2578_v39  ;;  %v9538_v25 = vsel %vm1478_vm2, %v2580_v10, %v2581_v32  ;;  %v2590_v59 = vrot.slane %v9246_v46, 2  ;;  %v9559_v46 = vld [vmem:[%s4963_s24] sm:$0xff]  ;;  %v14244_v30 = vld [vmem:[#allocation29_spill] sm:$0xff] }
 0x21b   : > { %14220 = vst [vmem:[#allocation117_spill] sm:$0xff] %v9522_v7  ;;  %14222 = vst [vmem:[#allocation118_spill] sm:$0xff] %v9528_v33  ;;  %v9541_v53 = vsel %vm1478_vm2, %v2581_v32, %v2583_v19  ;;  %v9544_v48 = vsel %vm1478_vm2, %v2585_v26, %v2586_v22  ;;  %v2591_v55 = vrot.slane %v9250_v21, 2  ;;  %v2593_v27 = vrot.slane %v9254_v16, 2  ;;  %v14232_v16 = vld [vmem:[#allocation211_spill] sm:$0xff]  ;;  %v14243_v33 = vld [vmem:[#allocation12_spill] sm:$0xff] }
 0x21c   : > { %14224 = vst [vmem:[#allocation102_spill] sm:$0xff] %v9532_v9  ;;  %14225 = vst [vmem:[#allocation119_spill] sm:$0xff] %v9535_v28  ;;  %v9550_v12 = vsel %vm1478_vm2, %v2586_v22, %v2588_v4  ;;  %v2595_v5 = vrot.slane %v9258_v13, 2  ;;  %v2596_v10 = vrot.slane %v9262_v23, 2  ;;  %v2598_v39 = vrot.slane %v9266_v51, 2  ;;  %v14233_v22 = vld [vmem:[#allocation212_spill] sm:$0xff] }
 0x21d   : > { %14226 = vst [vmem:[#allocation125_spill] sm:$0xff] %v9538_v25  ;;  %14227 = vst [vmem:[#allocation167_spill] sm:$0xff] %v9541_v53  ;;  %v2600_v19 = vrot.slane %v9270_v17, 2  ;;  %v2601_v32 = vrot.slane %v9274_v42, 2  ;;  %v2603_v26 = vrot.slane %v9278_v58, 2  ;;  %v9562_v21 = vrot.slane %v9559_v46, %v2860_v45  ;;  %v14234_v13 = vld [vmem:[#allocation7_spill] sm:$0xff] }
 0x21e   : > { %14228 = vst [vmem:[#allocation126_spill] sm:$0xff] %v9544_v48  ;;  %14229 = vst [vmem:[#allocation191_spill] sm:$0xff] %v9550_v12  ;;  %v2605_v4 = vrot.slane %v14232_v16, 2  ;;  %v2606_v56 = vrot.slane %v14233_v22, 2  ;;  %v2608_v12 = vrot.slane %v14234_v13, 2  ;;  %v14235_v23 = vld [vmem:[#allocation171_spill] sm:$0xff]  ;;  %v9632_v38 = vsel %vm1478_vm2, %v2591_v55, %v2593_v27 }
 0x21f   : > { %14230 = vst [vmem:[#allocation127_spill] sm:$0xff] %v9559_v46  ;;  %14231 = vst [vmem:[#allocation192_spill] sm:$0xff] %v9562_v21  ;;  %v2610_v48 = vrot.slane %v14235_v23, 2  ;;  %v14236_v51 = vld [vmem:[#allocation172_spill] sm:$0xff]  ;;  %v14238_v25 = vld [vmem:[#allocation26_spill] sm:$0xff] }
 0x220   : > { %v2611_v53 = vrot.slane %v14236_v51, 2  ;;  %v14237_v17 = vld [vmem:[#allocation8_spill] sm:$0xff]  ;;  %v2896_v58 = vmul.f32 %v9562_v21, %v14238_v25  ;;  %v14239_v28 = vld [vmem:[#allocation9_spill] sm:$0xff]  ;;  %v14240_v46 = vld [vmem:[#allocation27_spill] sm:$0xff]  ;;  %v2901_v51 = vmul.f32 %v9562_v21, %v14243_v33  ;;  %v2908_v33 = vmul.f32 %v9562_v21, %v14250_v47  ;;  %14268 = vst [vmem:[#allocation193_spill] sm:$0xff] %v9632_v38 }
 0x221   : > { %v2895_v42 = vmul.f32 %v9562_v21, %v14237_v17  ;;  %v2897_v45 = vmul.f32 %v9562_v21, %v14239_v28  ;;  %v2898_v16 = vmul.f32 %v9562_v21, %v14240_v46  ;;  %v14241_v9 = vld [vmem:[#allocation10_spill] sm:$0xff]  ;;  %v14242_v13 = vld [vmem:[#allocation28_spill] sm:$0xff]  ;;  %v2902_v17 = vmul.f32 %v9562_v21, %v14244_v30  ;;  %v14245_v7 = vld [vmem:[#allocation13_spill] sm:$0xff] }
 0x222   : > { %v2899_v22 = vmul.f32 %v9562_v21, %v14241_v9  ;;  %v2900_v23 = vmul.f32 %v9562_v21, %v14242_v13  ;;  %v2903_v25 = vmul.f32 %v9562_v21, %v14245_v7  ;;  %v14246_v29 = vld [vmem:[#allocation30_spill] sm:$0xff]  ;;  %v2905_v46 = vmul.f32 %v9562_v21, %v14247_v40  ;;  %v14253_v50 = vld [vmem:[#allocation17_spill] sm:$0xff]  ;;  %v14256_v60 = vld [vmem:[#allocation36_spill] sm:$0xff] }
 0x223   : > { %v2904_v28 = vmul.f32 %v9562_v21, %v14246_v29  ;;  %v2906_v9 = vmul.f32 %v9562_v21, %v14248_v0  ;;  %v2907_v13 = vmul.f32 %v9562_v21, %v14249_v31  ;;  %v2909_v30 = vmul.f32 %v9562_v21, %v14251_v3  ;;  %v14254_v20 = vld [vmem:[#allocation34_spill] sm:$0xff]  ;;  %v14257_v36 = vld [vmem:[#allocation20_spill] sm:$0xff]  ;;  %v14258_v35 = vld [vmem:[#allocation37_spill] sm:$0xff] }
 0x224   : > { %v2910_v7 = vmul.f32 %v9562_v21, %v14252_v43  ;;  %v2911_v29 = vmul.f32 %v9562_v21, %v14253_v50  ;;  %v2912_v40 = vmul.f32 %v9562_v21, %v14254_v20  ;;  %v14255_v8 = vld [vmem:[#allocation18_spill] sm:$0xff]  ;;  %v2914_v31 = vmul.f32 %v9562_v21, %v14256_v60  ;;  %v14259_v52 = vld [vmem:[#allocation21_spill] sm:$0xff]  ;;  %v14262_v14 = vld [vmem:[#allocation39_spill] sm:$0xff] }
 0x225   : > { %v2913_v0 = vmul.f32 %v9562_v21, %v14255_v8  ;;  %v2915_v47 = vmul.f32 %v9562_v21, %v14257_v36  ;;  %v2916_v3 = vmul.f32 %v9562_v21, %v14258_v35  ;;  %v2917_v43 = vmul.f32 %v9562_v21, %v14259_v52  ;;  %v14260_v57 = vld [vmem:[#allocation38_spill] sm:$0xff]  ;;  %v14263_v1 = vld [vmem:[#allocation23_spill] sm:$0xff]  ;;  %v14265_v44 = vld [vmem:[#allocation173_spill] sm:$0xff] }
 0x226   : > { %v2918_v50 = vmul.f32 %v9562_v21, %v14260_v57  ;;  %v14261_v37 = vld [vmem:[#allocation22_spill] sm:$0xff]  ;;  %v2920_v8 = vmul.f32 %v9562_v21, %v14262_v14  ;;  %v2921_v60 = vmul.f32 %v9562_v21, %v14263_v1  ;;  %v9624_v36 = vsel %vm1478_vm2, %v2590_v59, %v2591_v55  ;;  %v14266_v62 = vld [vmem:[#allocation151_spill] sm:$0xff]  ;;  %v14267_v63 = vld [vmem:[#allocation137_spill] sm:$0xff] }
 0x227   : > { %v2919_v20 = vmul.f32 %v9562_v21, %v14261_v37  ;;  %14264 = vst [vmem:[#allocation128_spill] sm:$0xff] %v9624_v36  ;;  %v2613_v35 = vrot.slane %v14265_v44, 2  ;;  %v2922_v52 = vmul.f32 %v9562_v21, %v14266_v62  ;;  %v2923_v57 = vmul.f32 %v9562_v21, %v14267_v63  ;;  %v14275_v55 = vld [vmem:[#allocation174_spill] sm:$0xff]  ;;  %v14277_v1 = vld [vmem:[#allocation175_spill] sm:$0xff] }
 0x228   : > { %v9635_v37 = vsel %vm1478_vm2, %v2595_v5, %v2596_v10  ;;  %v9638_v14 = vsel %vm1478_vm2, %v2596_v10, %v2598_v39  ;;  %v9641_v59 = vsel %vm1478_vm2, %v2600_v19, %v2601_v32  ;;  %v9644_v44 = vsel %vm1478_vm2, %v2601_v32, %v2603_v26  ;;  %v14278_v39 = vld [vmem:[#allocation176_spill] sm:$0xff]  ;;  %v14279_v19 = vld [vmem:[#allocation177_spill] sm:$0xff]  ;;  %v14281_v26 = vld [vmem:[#allocation178_spill] sm:$0xff] }
 0x229   : > { %14269 = vst [vmem:[#allocation194_spill] sm:$0xff] %v9635_v37  ;;  %14270 = vst [vmem:[#allocation129_spill] sm:$0xff] %v9638_v14  ;;  %v9647_v62 = vsel %vm1478_vm2, %v2605_v4, %v2606_v56  ;;  %v9650_v63 = vsel %vm1478_vm2, %v2606_v56, %v2608_v12  ;;  %v2615_v27 = vrot.slane %v14275_v55, 2  ;;  %v9654_v5 = vsel %vm1478_vm2, %v2610_v48, %v2611_v53  ;;  %v14283_v56 = vld [vmem:[#allocation105_spill] sm:$0xff]  ;;  %v14285_v37 = vld [vmem:[#allocation2_spill] sm:$0xff] }
 0x22a   : > { %14271 = vst [vmem:[#allocation195_spill] sm:$0xff] %v9641_v59  ;;  %14272 = vst [vmem:[#allocation196_spill] sm:$0xff] %v9644_v44  ;;  %v2616_v10 = vrot.slane %v14277_v1, 2  ;;  %v2618_v14 = vrot.slane %v14278_v39, 2  ;;  %v2620_v59 = vrot.slane %v14279_v19, 2  ;;  %v9660_v32 = vsel %vm1478_vm2, %v2611_v53, %v2613_v35 }
 0x22b   : > { %14273 = vst [vmem:[#allocation197_spill] sm:$0xff] %v9647_v62  ;;  %14274 = vst [vmem:[#allocation198_spill] sm:$0xff] %v9650_v63  ;;  %v2621_v4 = vrot.slane %v14281_v26, 2  ;;  %v14282_v62 = vld [vmem:[#allocation179_spill] sm:$0xff]  ;;  %v2625_v12 = vrot.slane %v14283_v56, 2  ;;  %v14284_v63 = vld [vmem:[#allocation214_spill] sm:$0xff] }
 0x22c   : > { %14276 = vst [vmem:[#allocation199_spill] sm:$0xff] %v9654_v5  ;;  %14280 = vst [vmem:[#allocation200_spill] sm:$0xff] %v9660_v32  ;;  %v2623_v44 = vrot.slane %v14282_v62, 2  ;;  %v2626_v55 = vrot.slane %v14284_v63, 2  ;;  %v2628_v48 = vrot.slane %v14285_v37, 2  ;;  %v2630_v5 = vrot.slane %v9462_v24, 2 }
 0x22d   : > { %v2631_v1 = vrot.slane %v9466_v61, 2  ;;  %v2633_v39 = vrot.slane %v9470_v15, 2  ;;  %v2635_v19 = vrot.slane %v9474_v18, 2  ;;  %v2636_v35 = vrot.slane %v9478_v49, 2  ;;  %v14286_v56 = vld [vmem:[#allocation136_spill] sm:$0xff]  ;;  %v14288_v15 = vld [vmem:[#allocation6_spill] sm:$0xff] }
 0x22e   : > { %v2638_v53 = vrot.slane %v9482_v41, 2  ;;  %v2640_v62 = vrot.slane %v9486_v34, 2  ;;  %v2641_v26 = vrot.slane %v9499_v2, 2  ;;  %v2643_v63 = vrot.slane %v9503_v11, 2  ;;  %v14290_v49 = vld [vmem:[#allocation80_spill] sm:$0xff]  ;;  %v14292_v34 = vld [vmem:[#allocation3_spill] sm:$0xff] }
 0x22f   : > { %v2645_v37 = vrot.slane %v9509_v54, 2  ;;  %v2646_v24 = vrot.slane %v9513_v6, 2  ;;  %v9680_v61 = vmul.f32 %v9562_v21, %v14286_v56  ;;  %v9684_v18 = vmul.f32 %v9562_v21, %v14288_v15  ;;  %v14294_v2 = vld [vmem:[#allocation92_spill] sm:$0xff]  ;;  %v14298_v6 = vld [vmem:[#allocation41_spill] sm:$0xff]  ;;  %v14300_v56 = vld [vmem:[#allocation42_spill] sm:$0xff] }
 0x230   : > { %v9687_v41 = vadd.f32 %v2895_v42, %v14290_v49  ;;  %v9690_v32 = vadd.f32 %v2896_v58, %v14292_v34  ;;  %v9693_v11 = vadd.f32 %v2897_v45, %v14294_v2  ;;  %v14296_v54 = vld [vmem:[#allocation40_spill] sm:$0xff]  ;;  %v9699_v36 = vadd.f32 %v2899_v22, %v14298_v6  ;;  %v14302_v15 = vld [vmem:[#allocation43_spill] sm:$0xff]  ;;  %v14306_v58 = vld [vmem:[#allocation45_spill] sm:$0xff] }
 0x231   : > { %14287 = vst [vmem:[#allocation201_spill] sm:$0xff] %v9680_v61  ;;  %14289 = vst [vmem:[#allocation202_spill] sm:$0xff] %v9684_v18  ;;  %v9696_v38 = vadd.f32 %v2898_v16, %v14296_v54  ;;  %v9702_v61 = vadd.f32 %v2900_v23, %v14300_v56  ;;  %v9705_v21 = vadd.f32 %v2901_v51, %v14302_v15  ;;  %v14304_v42 = vld [vmem:[#allocation44_spill] sm:$0xff]  ;;  %v14308_v45 = vld [vmem:[#allocation46_spill] sm:$0xff] }
 0x232   : > { %14291 = vst [vmem:[#allocation203_spill] sm:$0xff] %v9687_v41  ;;  %14293 = vst [vmem:[#allocation204_spill] sm:$0xff] %v9690_v32  ;;  %v9708_v49 = vadd.f32 %v2902_v17, %v14304_v42  ;;  %v9711_v34 = vadd.f32 %v2903_v25, %v14306_v58  ;;  %v9714_v2 = vadd.f32 %v2904_v28, %v14308_v45  ;;  %v14310_v16 = vld [vmem:[#allocation47_spill] sm:$0xff]  ;;  %v14312_v22 = vld [vmem:[#allocation48_spill] sm:$0xff] }
 0x233   : > { %14295 = vst [vmem:[#allocation205_spill] sm:$0xff] %v9693_v11  ;;  %14297 = vst [vmem:[#allocation206_spill] sm:$0xff] %v9696_v38  ;;  %v9717_v54 = vadd.f32 %v2905_v46, %v14310_v16  ;;  %v9720_v6 = vadd.f32 %v2906_v9, %v14312_v22  ;;  %v14314_v23 = vld [vmem:[#allocation49_spill] sm:$0xff]  ;;  %v14316_v51 = vld [vmem:[#allocation50_spill] sm:$0xff] }
 0x234   : > { %14299 = vst [vmem:[#allocation103_spill] sm:$0xff] %v9699_v36  ;;  %14301 = vst [vmem:[#allocation112_spill] sm:$0xff] %v9702_v61  ;;  %v9723_v56 = vadd.f32 %v2907_v13, %v14314_v23  ;;  %v9726_v15 = vadd.f32 %v2908_v33, %v14316_v51  ;;  %v14318_v17 = vld [vmem:[#allocation51_spill] sm:$0xff]  ;;  %v14320_v25 = vld [vmem:[#allocation53_spill] sm:$0xff] }
 0x235   : > { %14303 = vst [vmem:[#allocation104_spill] sm:$0xff] %v9705_v21  ;;  %14305 = vst [vmem:[#allocation114_spill] sm:$0xff] %v9708_v49  ;;  %v9729_v42 = vadd.f32 %v2909_v30, %v14318_v17  ;;  %v9732_v58 = vadd.f32 %v2910_v7, %v14320_v25  ;;  %v14322_v28 = vld [vmem:[#allocation62_spill] sm:$0xff]  ;;  %v14324_v46 = vld [vmem:[#allocation99_spill] sm:$0xff] }
 0x236   : > { %14307 = vst [vmem:[#allocation35_spill] sm:$0xff] %v9711_v34  ;;  %14309 = vst [vmem:[#allocation168_spill] sm:$0xff] %v9714_v2  ;;  %v9735_v45 = vadd.f32 %v2911_v29, %v14322_v28  ;;  %v9738_v16 = vadd.f32 %v2912_v40, %v14324_v46  ;;  %v14326_v9 = vld [vmem:[#allocation113_spill] sm:$0xff]  ;;  %v14328_v13 = vld [vmem:[#allocation63_spill] sm:$0xff] }
 0x237   : > { %14311 = vst [vmem:[#allocation169_spill] sm:$0xff] %v9717_v54  ;;  %14313 = vst [vmem:[#allocation170_spill] sm:$0xff] %v9720_v6  ;;  %v9741_v22 = vadd.f32 %v2913_v0, %v14326_v9  ;;  %v9744_v23 = vadd.f32 %v2914_v31, %v14328_v13  ;;  %v14330_v33 = vld [vmem:[#allocation107_spill] sm:$0xff]  ;;  %v14332_v30 = vld [vmem:[#allocation66_spill] sm:$0xff] }
 0x238   : > { %14315 = vst [vmem:[#allocation130_spill] sm:$0xff] %v9723_v56  ;;  %14317 = vst [vmem:[#allocation24_spill] sm:$0xff] %v9726_v15  ;;  %v9747_v51 = vadd.f32 %v2915_v47, %v14330_v33  ;;  %v9750_v17 = vadd.f32 %v2916_v3, %v14332_v30  ;;  %v14334_v7 = vld [vmem:[#allocation108_spill] sm:$0xff]  ;;  %v14336_v29 = vld [vmem:[#allocation67_spill] sm:$0xff] }
 0x239   : > { %14319 = vst [vmem:[#allocation211_spill] sm:$0xff] %v9729_v42  ;;  %14321 = vst [vmem:[#allocation212_spill] sm:$0xff] %v9732_v58  ;;  %v9753_v25 = vadd.f32 %v2917_v43, %v14334_v7  ;;  %v9756_v28 = vadd.f32 %v2918_v50, %v14336_v29  ;;  %v14338_v40 = vld [vmem:[#allocation109_spill] sm:$0xff]  ;;  %v14340_v0 = vld [vmem:[#allocation100_spill] sm:$0xff] }
 0x23a   : > { %14323 = vst [vmem:[#allocation7_spill] sm:$0xff] %v9735_v45  ;;  %14325 = vst [vmem:[#allocation171_spill] sm:$0xff] %v9738_v16  ;;  %v9759_v46 = vadd.f32 %v2919_v20, %v14338_v40  ;;  %v9762_v9 = vadd.f32 %v2920_v8, %v14340_v0  ;;  %v14342_v31 = vld [vmem:[#allocation110_spill] sm:$0xff]  ;;  %v14344_v47 = vld [vmem:[#allocation68_spill] sm:$0xff]  ;;  %v2622_v0 = vsel %vm1478_vm2, %v2620_v59, %v2621_v4 }
 0x23b   : > { %14327 = vst [vmem:[#allocation172_spill] sm:$0xff] %v9741_v22  ;;  %14329 = vst [vmem:[#allocation173_spill] sm:$0xff] %v9744_v23  ;;  %v9765_v13 = vadd.f32 %v2921_v60, %v14342_v31  ;;  %v9768_v33 = vadd.f32 %v2922_v52, %v14344_v47  ;;  %v14346_v3 = vld [vmem:[#allocation115_spill] sm:$0xff]  ;;  %v14348_v43 = vld [vmem:[#allocation101_spill] sm:$0xff]  ;;  %v2617_v60 = vsel %vm1478_vm2, %v2615_v27, %v2616_v10 }
 0x23c   : > { %14331 = vst [vmem:[#allocation174_spill] sm:$0xff] %v9747_v51  ;;  %14333 = vst [vmem:[#allocation175_spill] sm:$0xff] %v9750_v17  ;;  %v9771_v30 = vadd.f32 %v2923_v57, %v14346_v3  ;;  %v2648_v7 = vrot.slane %v14348_v43, 2  ;;  %v14350_v29 = vld [vmem:[#allocation69_spill] sm:$0xff]  ;;  %v14353_v40 = vld [vmem:[#allocation116_spill] sm:$0xff]  ;;  %v2619_v52 = vsel %vm1478_vm2, %v2616_v10, %v2618_v14  ;;  %v2624_v57 = vsel %vm1478_vm2, %v2621_v4, %v2623_v44 }
 0x23d   : > { %14335 = vst [vmem:[#allocation176_spill] sm:$0xff] %v9753_v25  ;;  %14337 = vst [vmem:[#allocation177_spill] sm:$0xff] %v9756_v28  ;;  %v14349_v25 = vld [vmem:[#allocation117_spill] sm:$0xff]  ;;  %v9781_v8 = vadd.f32 %v9684_v18, %v14353_v40  ;;  %v2627_v31 = vsel %vm1478_vm2, %v2625_v12, %v2626_v55  ;;  %v2632_v47 = vsel %vm1478_vm2, %v2630_v5, %v2631_v1  ;;  %v14357_v5 = vld [vmem:[#allocation71_spill] sm:$0xff] }
 0x23e   : > { %14339 = vst [vmem:[#allocation178_spill] sm:$0xff] %v9759_v46  ;;  %14341 = vst [vmem:[#allocation179_spill] sm:$0xff] %v9762_v9  ;;  %v2650_v50 = vrot.slane %v14349_v25, 2  ;;  %v14351_v28 = vld [vmem:[#allocation201_spill] sm:$0xff]  ;;  %v2629_v25 = vsel %vm1478_vm2, %v2626_v55, %v2628_v48  ;;  %v2634_v3 = vsel %vm1478_vm2, %v2631_v1, %v2633_v39  ;;  %v2637_v43 = vsel %vm1478_vm2, %v2635_v19, %v2636_v35  ;;  %v14358_v55 = vld [vmem:[#allocation70_spill] sm:$0xff] }
 0x23f   : > { %14343 = vst [vmem:[#allocation105_spill] sm:$0xff] %v9765_v13  ;;  %14345 = vst [vmem:[#allocation214_spill] sm:$0xff] %v9768_v33  ;;  %v9777_v20 = vadd.f32 %v14351_v28, %v14350_v29  ;;  %v2639_v29 = vsel %vm1478_vm2, %v2636_v35, %v2638_v53  ;;  %v2642_v27 = vsel %vm1478_vm2, %v2640_v62, %v2641_v26  ;;  %v14355_v10 = vld [vmem:[#allocation189_spill] sm:$0xff]  ;;  %v14359_v1 = vld [vmem:[#allocation83_spill] sm:$0xff] }
 0x240   : > { %14347 = vst [vmem:[#allocation2_spill] sm:$0xff] %v9771_v30  ;;  %14354 = vst [vmem:[#allocation3_spill] sm:$0xff] %v9781_v8  ;;  %v2644_v14 = vsel %vm1478_vm2, %v2641_v26, %v2643_v63  ;;  %v2647_v59 = vsel %vm1478_vm2, %v2645_v37, %v2646_v24  ;;  %v9797_v44 = vsel %vm1478_vm2, %v2646_v24, %v2648_v7  ;;  %v14356_v4 = vrot.slane %v14355_v10, 2  ;;  %v14360_v39 = vld [vmem:[#allocation118_spill] sm:$0xff]  ;;  %v14361_v35 = vld [vmem:[#allocation180_spill] sm:$0xff] }
 0x241   : > { %14352 = vst [vmem:[#allocation80_spill] sm:$0xff] %v9777_v20  ;;  %v9806_v48 = vadd.f32 %v14358_v55, %v14357_v5  ;;  %v9810_v19 = vadd.f32 %v14360_v39, %v14359_v1  ;;  %v14362_v53 = vld [vmem:[#allocation102_spill] sm:$0xff]  ;;  %v14363_v26 = vld [vmem:[#allocation120_spill] sm:$0xff]  ;;  %v14364_v63 = vld [vmem:[#allocation119_spill] sm:$0xff] }
 0x242   : > { %v9802_v12 = vsel %vm1478_vm2, %v2650_v50, %v14356_v4  ;;  %v9814_v62 = vadd.f32 %v14362_v53, %v14361_v35  ;;  %v9818_v37 = vadd.f32 %v14364_v63, %v14363_v26  ;;  %v14365_v24 = vld [vmem:[#allocation72_spill] sm:$0xff]  ;;  %v14366_v7 = vld [vmem:[#allocation125_spill] sm:$0xff]  ;;  %v14368_v10 = vld [vmem:[#allocation167_spill] sm:$0xff] }
 0x243   : > { %v9822_v50 = vadd.f32 %v14366_v7, %v14365_v24  ;;  %v14367_v40 = vld [vmem:[#allocation121_spill] sm:$0xff]  ;;  %v14370_v55 = vld [vmem:[#allocation126_spill] sm:$0xff]  ;;  %v14372_v8 = vld [vmem:[#allocation191_spill] sm:$0xff] }
 0x244   : > { %v9826_v4 = vadd.f32 %v14368_v10, %v14367_v40  ;;  %v14369_v5 = vld [vmem:[#allocation73_spill] sm:$0xff]  ;;  %v14371_v39 = vld [vmem:[#allocation122_spill] sm:$0xff]  ;;  %v14374_v20 = vld [vmem:[#allocation128_spill] sm:$0xff] }
 0x245   : > { %v9830_v1 = vadd.f32 %v14370_v55, %v14369_v5  ;;  %v9834_v35 = vadd.f32 %v14372_v8, %v14371_v39  ;;  %v14373_v53 = vld [vmem:[#allocation77_spill] sm:$0xff]  ;;  %v14375_v63 = vld [vmem:[#allocation123_spill] sm:$0xff]  ;;  %v14377_v7 = vld [vmem:[#allocation78_spill] sm:$0xff] }
 0x246   : > { %v9838_v26 = vadd.f32 %v14374_v20, %v14373_v53  ;;  %v14376_v30 = vld [vmem:[#allocation193_spill] sm:$0xff]  ;;  %v14378_v33 = vld [vmem:[#allocation194_spill] sm:$0xff]  ;;  %v14379_v10 = vld [vmem:[#allocation124_spill] sm:$0xff] }
 0x247   : > { %v9842_v24 = vadd.f32 %v14376_v30, %v14375_v63  ;;  %v9846_v40 = vadd.f32 %v14378_v33, %v14377_v7  ;;  %v14380_v13 = vld [vmem:[#allocation129_spill] sm:$0xff]  ;;  %v14381_v55 = vld [vmem:[#allocation11_spill] sm:$0xff]  ;;  %v14385_v53 = vld [vmem:[#allocation196_spill] sm:$0xff] }
 0x248   : > { %v9850_v5 = vadd.f32 %v14380_v13, %v14379_v10  ;;  %v2990_v9 = vsub.s32 7, %v14381_v55  ;;  %v14382_v8 = vld [vmem:[#allocation111_spill] sm:$0xff]  ;;  %v14384_v20 = vld [vmem:[#allocation213_spill] sm:$0xff]  ;;  %v14388_v33 = vld [vmem:[#allocation182_spill] sm:$0xff] }
 0x249   : > { %v14383_v39 = vld [vmem:[#allocation195_spill] sm:$0xff]  ;;  %v9859_v17 = vadd.f32 %v14385_v53, %v14384_v20  ;;  %v14386_v30 = vld [vmem:[#allocation181_spill] sm:$0xff]  ;;  %v14389_v7 = vld [vmem:[#allocation198_spill] sm:$0xff] }
 0x24a   : > { %v9855_v46 = vadd.f32 %v14383_v39, %v14382_v8  ;;  %v14387_v63 = vld [vmem:[#allocation197_spill] sm:$0xff]  ;;  %v9867_v23 = vadd.f32 %v14389_v7, %v14388_v33  ;;  %v14390_v13 = vld [vmem:[#allocation183_spill] sm:$0xff]  ;;  %v14392_v55 = vld [vmem:[#allocation184_spill] sm:$0xff] }
 0x24b   : > { %v9863_v51 = vadd.f32 %v14387_v63, %v14386_v30  ;;  %v14391_v10 = vld [vmem:[#allocation199_spill] sm:$0xff]  ;;  %v14393_v16 = vld [vmem:[#allocation200_spill] sm:$0xff]  ;;  %v14394_v39 = vld [vmem:[#allocation185_spill] sm:$0xff] }
 0x24c   : > { %v9871_v22 = vadd.f32 %v14391_v10, %v14390_v13  ;;  %v9875_v8 = vadd.f32 %v14393_v16, %v14392_v55  ;;  %v9878_v45 = vadd.f32 %v2617_v60, %v14394_v39  ;;  %v14395_v20 = vld [vmem:[#allocation186_spill] sm:$0xff]  ;;  %v14396_v30 = vld [vmem:[#allocation187_spill] sm:$0xff]  ;;  %v14397_v58 = vld [vmem:[#allocation188_spill] sm:$0xff] }
 0x24d   : > { %v9881_v53 = vadd.f32 %v2619_v52, %v14395_v20  ;;  %v9884_v63 = vadd.f32 %v2622_v0, %v14396_v30  ;;  %v9887_v33 = vadd.f32 %v2624_v57, %v14397_v58  ;;  %v14398_v7 = vld [vmem:[#allocation190_spill] sm:$0xff]  ;;  %v14400_v16 = vld [vmem:[#allocation55_spill] sm:$0xff]  ;;  %v14402_v60 = vld [vmem:[#allocation56_spill] sm:$0xff] }
 0x24e   : > { %v9890_v42 = vadd.f32 %v2627_v31, %v14398_v7  ;;  %v14399_v13 = vld [vmem:[#allocation54_spill] sm:$0xff]  ;;  %v9896_v55 = vadd.f32 %v2632_v47, %v14400_v16  ;;  %v9899_v39 = vadd.f32 %v2634_v3, %v14402_v60  ;;  %v14404_v52 = vld [vmem:[#allocation60_spill] sm:$0xff]  ;;  %v14406_v0 = vld [vmem:[#allocation127_spill] sm:$0xff] }
 0x24f   : > { %v9893_v10 = vadd.f32 %v2629_v25, %v14399_v13  ;;  %v9902_v20 = vadd.f32 %v2637_v43, %v14404_v52  ;;  %v9905_v30 = vrot.slane %v14406_v0, %v2990_v9  ;;  %v14407_v58 = vld [vmem:[#allocation61_spill] sm:$0xff]  ;;  %v14409_v31 = vld [vmem:[#allocation106_spill] sm:$0xff]  ;;  %v14411_v25 = vld [vmem:[#allocation207_spill] sm:$0xff] }
 0x250   : > { %14401 = vst [vmem:[#allocation92_spill] sm:$0xff] %v9896_v55  ;;  %14403 = vst [vmem:[#allocation40_spill] sm:$0xff] %v9899_v39  ;;  %v9908_v57 = vadd.f32 %v2639_v29, %v14407_v58  ;;  %v9911_v7 = vadd.f32 %v2642_v27, %v14409_v31  ;;  %v9914_v13 = vadd.f32 %v2644_v14, %v14411_v25  ;;  %v14413_v47 = vld [vmem:[#allocation208_spill] sm:$0xff]  ;;  %v14417_v43 = vld [vmem:[#allocation26_spill] sm:$0xff] }
 0x251   : > { %14405 = vst [vmem:[#allocation41_spill] sm:$0xff] %v9902_v20  ;;  %v9917_v16 = vadd.f32 %v2647_v59, %v14413_v47  ;;  %v14415_v3 = vld [vmem:[#allocation84_spill] sm:$0xff]  ;;  %v9925_v9 = vmul.f32 %v9905_v30, %v14417_v43  ;;  %v14419_v52 = vld [vmem:[#allocation9_spill] sm:$0xff]  ;;  %v14423_v14 = vld [vmem:[#allocation27_spill] sm:$0xff] }
 0x252   : > { %14408 = vst [vmem:[#allocation42_spill] sm:$0xff] %v9908_v57  ;;  %14410 = vst [vmem:[#allocation43_spill] sm:$0xff] %v9911_v7  ;;  %v9921_v60 = vmul.f32 %v9905_v30, %v14415_v3  ;;  %v9929_v29 = vmul.f32 %v9905_v30, %v14419_v52  ;;  %v14421_v27 = vld [vmem:[#allocation85_spill] sm:$0xff]  ;;  %v9937_v59 = vmul.f32 %v9905_v30, %v14423_v14  ;;  %v14425_v58 = vld [vmem:[#allocation10_spill] sm:$0xff] }
 0x253   : > { %14412 = vst [vmem:[#allocation44_spill] sm:$0xff] %v9914_v13  ;;  %14414 = vst [vmem:[#allocation45_spill] sm:$0xff] %v9917_v16  ;;  %v9933_v0 = vmul.f32 %v9905_v30, %v14421_v27  ;;  %v9941_v31 = vmul.f32 %v9905_v30, %v14425_v58  ;;  %v14427_v25 = vld [vmem:[#allocation86_spill] sm:$0xff]  ;;  %v14429_v43 = vld [vmem:[#allocation28_spill] sm:$0xff] }
 0x254   : > { %14416 = vst [vmem:[#allocation46_spill] sm:$0xff] %v9921_v60  ;;  %14418 = vst [vmem:[#allocation47_spill] sm:$0xff] %v9925_v9  ;;  %v9945_v47 = vmul.f32 %v9905_v30, %v14427_v25  ;;  %v9949_v52 = vmul.f32 %v9905_v30, %v14429_v43  ;;  %v14431_v3 = vld [vmem:[#allocation12_spill] sm:$0xff]  ;;  %v14433_v15 = vld [vmem:[#allocation87_spill] sm:$0xff] }
 0x255   : > { %14420 = vst [vmem:[#allocation48_spill] sm:$0xff] %v9929_v29  ;;  %14422 = vst [vmem:[#allocation49_spill] sm:$0xff] %v9933_v0  ;;  %v9953_v27 = vmul.f32 %v9905_v30, %v14431_v3  ;;  %v9957_v14 = vmul.f32 %v9905_v30, %v14433_v15  ;;  %v14435_v56 = vld [vmem:[#allocation29_spill] sm:$0xff]  ;;  %v14439_v54 = vld [vmem:[#allocation88_spill] sm:$0xff] }
 0x256   : > { %14424 = vst [vmem:[#allocation50_spill] sm:$0xff] %v9937_v59  ;;  %14426 = vst [vmem:[#allocation51_spill] sm:$0xff] %v9941_v31  ;;  %v9961_v58 = vmul.f32 %v9905_v30, %v14435_v56  ;;  %v14437_v6 = vld [vmem:[#allocation13_spill] sm:$0xff]  ;;  %v9969_v43 = vmul.f32 %v9905_v30, %v14439_v54  ;;  %v14441_v2 = vld [vmem:[#allocation30_spill] sm:$0xff] }
 0x257   : > { %14428 = vst [vmem:[#allocation53_spill] sm:$0xff] %v9945_v47  ;;  %14430 = vst [vmem:[#allocation62_spill] sm:$0xff] %v9949_v52  ;;  %v9965_v25 = vmul.f32 %v9905_v30, %v14437_v6  ;;  %v9973_v3 = vmul.f32 %v9905_v30, %v14441_v2  ;;  %v14443_v34 = vld [vmem:[#allocation14_spill] sm:$0xff]  ;;  %v14445_v49 = vld [vmem:[#allocation89_spill] sm:$0xff] }
 0x258   : > { %14432 = vst [vmem:[#allocation99_spill] sm:$0xff] %v9953_v27  ;;  %14434 = vst [vmem:[#allocation113_spill] sm:$0xff] %v9957_v14  ;;  %v9977_v15 = vmul.f32 %v9905_v30, %v14443_v34  ;;  %v9981_v56 = vmul.f32 %v9905_v30, %v14445_v49  ;;  %v14447_v21 = vld [vmem:[#allocation31_spill] sm:$0xff]  ;;  %v14451_v36 = vld [vmem:[#allocation90_spill] sm:$0xff] }
 0x259   : > { %14436 = vst [vmem:[#allocation63_spill] sm:$0xff] %v9961_v58  ;;  %14438 = vst [vmem:[#allocation107_spill] sm:$0xff] %v9965_v25  ;;  %v9985_v6 = vmul.f32 %v9905_v30, %v14447_v21  ;;  %v14449_v61 = vld [vmem:[#allocation15_spill] sm:$0xff]  ;;  %v9993_v2 = vmul.f32 %v9905_v30, %v14451_v36  ;;  %v14453_v38 = vld [vmem:[#allocation32_spill] sm:$0xff] }
 0x25a   : > { %14440 = vst [vmem:[#allocation66_spill] sm:$0xff] %v9969_v43  ;;  %14442 = vst [vmem:[#allocation108_spill] sm:$0xff] %v9973_v3  ;;  %v9989_v54 = vmul.f32 %v9905_v30, %v14449_v61  ;;  %v9997_v34 = vmul.f32 %v9905_v30, %v14453_v38  ;;  %v14455_v11 = vld [vmem:[#allocation16_spill] sm:$0xff]  ;;  %v14457_v32 = vld [vmem:[#allocation91_spill] sm:$0xff] }
 0x25b   : > { %14444 = vst [vmem:[#allocation67_spill] sm:$0xff] %v9977_v15  ;;  %14446 = vst [vmem:[#allocation109_spill] sm:$0xff] %v9981_v56  ;;  %v10001_v49 = vmul.f32 %v9905_v30, %v14455_v11  ;;  %v10005_v21 = vmul.f32 %v9905_v30, %v14457_v32  ;;  %v14459_v41 = vld [vmem:[#allocation33_spill] sm:$0xff]  ;;  %v14529_v14 = vld [vmem:[#allocation154_spill] sm:$0xff] }
 0x25c   : > { %14448 = vst [vmem:[#allocation100_spill] sm:$0xff] %v9985_v6  ;;  %14450 = vst [vmem:[#allocation110_spill] sm:$0xff] %v9989_v54  ;;  %v10009_v61 = vmul.f32 %v9905_v30, %v14459_v41  ;;  %v14461_v54 = vld [vmem:[#allocation17_spill] sm:$0xff]  ;;  %v14490_v6 = vld [vmem:[#allocation39_spill] sm:$0xff] }
 0x25d   : > { %14452 = vst [vmem:[#allocation68_spill] sm:$0xff] %v9993_v2  ;;  %14454 = vst [vmem:[#allocation115_spill] sm:$0xff] %v9997_v34  ;;  %v10013_v36 = vmul.f32 %v9905_v30, %v14461_v54  ;;  %v14463_v2 = vld [vmem:[#allocation93_spill] sm:$0xff]  ;;  %v14465_v34 = vld [vmem:[#allocation34_spill] sm:$0xff] }
 0x25e   : > { %14456 = vst [vmem:[#allocation101_spill] sm:$0xff] %v10001_v49  ;;  %14458 = vst [vmem:[#allocation117_spill] sm:$0xff] %v10005_v21  ;;  %v10017_v38 = vmul.f32 %v9905_v30, %v14463_v2  ;;  %v10021_v11 = vmul.f32 %v9905_v30, %v14465_v34  ;;  %v14467_v49 = vld [vmem:[#allocation18_spill] sm:$0xff]  ;;  %v14534_v31 = vld [vmem:[#allocation65_spill] sm:$0xff] }
 0x25f   : > { %14460 = vst [vmem:[#allocation69_spill] sm:$0xff] %v10009_v61  ;;  %14462 = vst [vmem:[#allocation116_spill] sm:$0xff] %v10013_v36  ;;  %v10025_v32 = vmul.f32 %v9905_v30, %v14467_v49  ;;  %v14469_v21 = vld [vmem:[#allocation94_spill] sm:$0xff]  ;;  %v14471_v61 = vld [vmem:[#allocation36_spill] sm:$0xff] }
 0x260   : > { %14464 = vst [vmem:[#allocation189_spill] sm:$0xff] %v10017_v38  ;;  %14466 = vst [vmem:[#allocation71_spill] sm:$0xff] %v10021_v11  ;;  %v10029_v41 = vmul.f32 %v9905_v30, %v14469_v21  ;;  %v10033_v54 = vmul.f32 %v9905_v30, %v14471_v61  ;;  %v14473_v36 = vld [vmem:[#allocation20_spill] sm:$0xff]  ;;  %v14475_v38 = vld [vmem:[#allocation95_spill] sm:$0xff] }
 0x261   : > { %14468 = vst [vmem:[#allocation70_spill] sm:$0xff] %v10025_v32  ;;  %v10037_v2 = vmul.f32 %v9905_v30, %v14473_v36  ;;  %v10041_v34 = vmul.f32 %v9905_v30, %v14475_v38  ;;  %v14477_v11 = vld [vmem:[#allocation37_spill] sm:$0xff]  ;;  %v10048_v32 = vld [vmem:[%s4963_s24 + $0x8] ss:$0 sm:$0xff]  ;;  %v14482_v61 = vld [vmem:[#allocation96_spill] sm:$0xff] }
 0x262   : > { %14470 = vst [vmem:[#allocation83_spill] sm:$0xff] %v10029_v41  ;;  %14472 = vst [vmem:[#allocation118_spill] sm:$0xff] %v10033_v54  ;;  %v10045_v49 = vmul.f32 %v9905_v30, %v14477_v11  ;;  %v14480_v21 = vld [vmem:[#allocation21_spill] sm:$0xff]  ;;  %v10056_v54 = vmul.f32 %v9905_v30, %v14482_v61  ;;  %v14484_v36 = vld [vmem:[#allocation38_spill] sm:$0xff] }
 0x263   : > { %14474 = vst [vmem:[#allocation180_spill] sm:$0xff] %v10037_v2  ;;  %14476 = vst [vmem:[#allocation102_spill] sm:$0xff] %v10041_v34  ;;  %v10052_v41 = vmul.f32 %v9905_v30, %v14480_v21  ;;  %v10060_v2 = vmul.f32 %v9905_v30, %v14484_v36  ;;  %v14486_v38 = vld [vmem:[#allocation22_spill] sm:$0xff]  ;;  %v14488_v11 = vld [vmem:[#allocation97_spill] sm:$0xff]  ;;  %v10072_v21 = vmul.f32 %v9905_v30, %v14490_v6 }
 0x264   : > { %14478 = vst [vmem:[#allocation120_spill] sm:$0xff] %v10045_v49  ;;  %14479 = vst [vmem:[#allocation119_spill] sm:$0xff] %v10048_v32  ;;  %v10064_v34 = vmul.f32 %v9905_v30, %v14486_v38  ;;  %v10068_v49 = vmul.f32 %v9905_v30, %v14488_v11  ;;  %v14535_v59 = vld [vmem:[#allocation142_spill] sm:$0xff]  ;;  %v14536_v0 = vld [vmem:[#allocation75_spill] sm:$0xff] }
 0x265   : > { %14481 = vst [vmem:[#allocation72_spill] sm:$0xff] %v10052_v41  ;;  %14483 = vst [vmem:[#allocation125_spill] sm:$0xff] %v10056_v54  ;;  %v14492_v41 = vld [vmem:[#allocation23_spill] sm:$0xff]  ;;  %v14494_v54 = vld [vmem:[#allocation98_spill] sm:$0xff] }
 0x266   : > { %14485 = vst [vmem:[#allocation121_spill] sm:$0xff] %v10060_v2  ;;  %14487 = vst [vmem:[#allocation167_spill] sm:$0xff] %v10064_v34  ;;  %v10076_v61 = vmul.f32 %v9905_v30, %v14492_v41  ;;  %v10080_v36 = vmul.f32 %v9905_v30, %v14494_v54  ;;  %v14496_v2 = vld [vmem:[#allocation209_spill] sm:$0xff]  ;;  %v14498_v34 = vld [vmem:[#allocation151_spill] sm:$0xff] }
 0x267   : > { %14489 = vst [vmem:[#allocation73_spill] sm:$0xff] %v10068_v49  ;;  %14491 = vst [vmem:[#allocation126_spill] sm:$0xff] %v10072_v21  ;;  %v10084_v38 = vadd.f32 %v9797_v44, %v14496_v2  ;;  %v10088_v11 = vmul.f32 %v9905_v30, %v14498_v34  ;;  %v14500_v49 = vld [vmem:[#allocation137_spill] sm:$0xff]  ;;  %v14502_v21 = vld [vmem:[#allocation166_spill] sm:$0xff] }
 0x268   : > { %14493 = vst [vmem:[#allocation122_spill] sm:$0xff] %v10076_v61  ;;  %14495 = vst [vmem:[#allocation191_spill] sm:$0xff] %v10080_v36  ;;  %v10092_v6 = vmul.f32 %v9905_v30, %v14500_v49  ;;  %v10096_v41 = vmul.f32 %v9905_v30, %v14502_v21  ;;  %v14504_v61 = vld [vmem:[#allocation210_spill] sm:$0xff]  ;;  %v14506_v36 = vld [vmem:[#allocation4_spill] sm:$0xff] }
 0x269   : > { %14497 = vst [vmem:[#allocation77_spill] sm:$0xff] %v10084_v38  ;;  %14499 = vst [vmem:[#allocation128_spill] sm:$0xff] %v10088_v11  ;;  %v10100_v54 = vadd.f32 %v9802_v12, %v14504_v61  ;;  %v10104_v2 = vmul.f32 %v10048_v32, %v14506_v36  ;;  %v14508_v44 = vld [vmem:[#allocation81_spill] sm:$0xff]  ;;  %v14538_v29 = vld [vmem:[#allocation74_spill] sm:$0xff] }
 0x26a   : > { %14501 = vst [vmem:[#allocation123_spill] sm:$0xff] %v10092_v6  ;;  %14503 = vst [vmem:[#allocation193_spill] sm:$0xff] %v10096_v41  ;;  %v10108_v34 = vmul.f32 %v10048_v32, %v14508_v44  ;;  %v14510_v11 = vld [vmem:[#allocation5_spill] sm:$0xff]  ;;  %v14512_v6 = vld [vmem:[#allocation52_spill] sm:$0xff] }
 0x26b   : > { %14505 = vst [vmem:[#allocation78_spill] sm:$0xff] %v10100_v54  ;;  %14507 = vst [vmem:[#allocation194_spill] sm:$0xff] %v10104_v2  ;;  %v10112_v49 = vmul.f32 %v10048_v32, %v14510_v11  ;;  %v10116_v21 = vmul.f32 %v10048_v32, %v14512_v6  ;;  %v14514_v41 = vld [vmem:[#allocation82_spill] sm:$0xff]  ;;  %v14516_v12 = vld [vmem:[#allocation57_spill] sm:$0xff] }
 0x26c   : > { %14509 = vst [vmem:[#allocation124_spill] sm:$0xff] %v10108_v34  ;;  %v10120_v61 = vmul.f32 %v10048_v32, %v14514_v41  ;;  %v10124_v56 = vmul.f32 %v10048_v32, %v14516_v12  ;;  %v14518_v2 = vld [vmem:[#allocation138_spill] sm:$0xff]  ;;  %v14520_v34 = vld [vmem:[#allocation59_spill] sm:$0xff]  ;;  %v14539_v9 = vld [vmem:[#allocation144_spill] sm:$0xff] }
 0x26d   : > { %14511 = vst [vmem:[#allocation129_spill] sm:$0xff] %v10112_v49  ;;  %14513 = vst [vmem:[#allocation11_spill] sm:$0xff] %v10116_v21  ;;  %v10128_v15 = vmul.f32 %v10048_v32, %v14518_v2  ;;  %v10132_v3 = vmul.f32 %v10048_v32, %v14520_v34  ;;  %v14522_v49 = vld [vmem:[#allocation153_spill] sm:$0xff]  ;;  %v14524_v21 = vld [vmem:[#allocation139_spill] sm:$0xff] }
 0x26e   : > { %14515 = vst [vmem:[#allocation111_spill] sm:$0xff] %v10120_v61  ;;  %14517 = vst [vmem:[#allocation195_spill] sm:$0xff] %v10124_v56  ;;  %v10136_v43 = vmul.f32 %v10048_v32, %v14522_v49  ;;  %v10140_v25 = vmul.f32 %v10048_v32, %v14524_v21  ;;  %v14526_v61 = vld [vmem:[#allocation58_spill] sm:$0xff]  ;;  %v14528_v56 = vld [vmem:[#allocation192_spill] sm:$0xff] }
 0x26f   : > { %14519 = vst [vmem:[#allocation213_spill] sm:$0xff] %v10128_v15  ;;  %14521 = vst [vmem:[#allocation196_spill] sm:$0xff] %v10132_v3  ;;  %v10144_v12 = vmul.f32 %v10048_v32, %v14526_v61  ;;  %v2862_v58 = vmul.f32 %v14528_v56, %v14506_v36  ;;  %v2863_v15 = vmul.f32 %v14528_v56, %v14508_v44  ;;  %v14537_v11 = vld [vmem:[#allocation143_spill] sm:$0xff]  ;;  %v14541_v36 = vld [vmem:[#allocation145_spill] sm:$0xff] }
 0x270   : > { %14523 = vst [vmem:[#allocation181_spill] sm:$0xff] %v10136_v43  ;;  %14525 = vst [vmem:[#allocation197_spill] sm:$0xff] %v10140_v25  ;;  %v2864_v3 = vmul.f32 %v14528_v56, %v14512_v6  ;;  %v10154_v43 = vmul.f32 %v10048_v32, %v14529_v14  ;;  %v2865_v25 = vmul.f32 %v14528_v56, %v14514_v41  ;;  %v14531_v6 = vld [vmem:[#allocation140_spill] sm:$0xff]  ;;  %v14533_v14 = vld [vmem:[#allocation141_spill] sm:$0xff] }
 0x271   : > { %14527 = vst [vmem:[#allocation182_spill] sm:$0xff] %v10144_v12  ;;  %v2866_v49 = vmul.f32 %v14528_v56, %v14518_v2  ;;  %v2867_v12 = vmul.f32 %v14528_v56, %v14520_v34  ;;  %v2868_v27 = vmul.f32 %v14528_v56, %v14524_v21  ;;  %v2869_v52 = vmul.f32 %v14528_v56, %v14526_v61  ;;  %v14532_v32 = vld [vmem:[#allocation64_spill] sm:$0xff]  ;;  %v14540_v44 = vld [vmem:[#allocation79_spill] sm:$0xff]  ;;  %v14543_v54 = vld [vmem:[#allocation146_spill] sm:$0xff] }
 0x272   : > { %14530 = vst [vmem:[#allocation198_spill] sm:$0xff] %v10154_v43  ;;  %v2870_v47 = vmul.f32 %v14528_v56, %v14531_v6  ;;  %v2871_v43 = vmul.f32 %v14528_v56, %v14532_v32  ;;  %v2872_v41 = vmul.f32 %v14528_v56, %v14533_v14  ;;  %v2873_v2 = vmul.f32 %v14528_v56, %v14534_v31  ;;  %v14542_v60 = vld [vmem:[#allocation76_spill] sm:$0xff]  ;;  %v14544_v18 = vld [vmem:[#allocation131_spill] sm:$0xff]  ;;  %v14548_v13 = vld [vmem:[#allocation133_spill] sm:$0xff] }
 0x273   : > { %v2874_v34 = vmul.f32 %v14528_v56, %v14535_v59  ;;  %v2875_v21 = vmul.f32 %v14528_v56, %v14536_v0  ;;  %v2876_v61 = vmul.f32 %v14528_v56, %v14537_v11  ;;  %v2877_v6 = vmul.f32 %v14528_v56, %v14538_v29  ;;  %v14545_v38 = vld [vmem:[#allocation147_spill] sm:$0xff]  ;;  %v14546_v28 = vld [vmem:[#allocation132_spill] sm:$0xff]  ;;  %v14549_v7 = vld [vmem:[#allocation149_spill] sm:$0xff] }
 0x274   : > { %v2878_v32 = vmul.f32 %v14528_v56, %v14539_v9  ;;  %v2879_v14 = vmul.f32 %v14528_v56, %v14540_v44  ;;  %v2880_v31 = vmul.f32 %v14528_v56, %v14541_v36  ;;  %v2881_v59 = vmul.f32 %v14528_v56, %v14542_v60  ;;  %v14547_v16 = vld [vmem:[#allocation148_spill] sm:$0xff]  ;;  %v14550_v57 = vld [vmem:[#allocation134_spill] sm:$0xff]  ;;  %v14552_v39 = vld [vmem:[#allocation135_spill] sm:$0xff] }
 0x275   : > { %v2882_v0 = vmul.f32 %v14528_v56, %v14543_v54  ;;  %v2883_v11 = vmul.f32 %v14528_v56, %v14544_v18  ;;  %v2884_v29 = vmul.f32 %v14528_v56, %v14545_v38  ;;  %v2885_v9 = vmul.f32 %v14528_v56, %v14546_v28  ;;  %v14551_v20 = vld [vmem:[#allocation150_spill] sm:$0xff]  ;;  %v14553_v55 = vld [vmem:[#allocation25_spill] sm:$0xff] }
 0x276   : > { %v2886_v44 = vmul.f32 %v14528_v56, %v14547_v16  ;;  %v2887_v36 = vmul.f32 %v14528_v56, %v14548_v13  ;;  %v2888_v60 = vmul.f32 %v14528_v56, %v14549_v7  ;;  %v2889_v54 = vmul.f32 %v14528_v56, %v14550_v57 }
 0x277   : > { %v2890_v18 = vmul.f32 %v14528_v56, %v14551_v20  ;;  %v2891_v38 = vmul.f32 %v14528_v56, %v14552_v39  ;;  %v2894_v28 = vmul.f32 %v14528_v56, %v14553_v55  ;;  %v10213_v16 = vadd.f32 %v2862_v58, %v9806_v48  ;;  %v14603_v58 = vld [vmem:[#allocation47_spill] sm:$0xff] }
 0x278   : > { %v10216_v13 = vadd.f32 %v2863_v15, %v9810_v19  ;;  %v10219_v7 = vadd.f32 %v2864_v3, %v9814_v62  ;;  %v10222_v57 = vadd.f32 %v2865_v25, %v9818_v37  ;;  %v10225_v20 = vadd.f32 %v2866_v49, %v9822_v50  ;;  %v14593_v3 = vld [vmem:[#allocation201_spill] sm:$0xff]  ;;  %v14604_v25 = vld [vmem:[#allocation48_spill] sm:$0xff] }
 0x279   : > { %14554 = vst [vmem:[#allocation183_spill] sm:$0xff] %v10213_v16  ;;  %v10228_v39 = vadd.f32 %v2867_v12, %v9826_v4  ;;  %v10231_v56 = vadd.f32 %v2868_v27, %v9830_v1  ;;  %v10234_v48 = vadd.f32 %v2869_v52, %v9834_v35  ;;  %v10237_v15 = vadd.f32 %v2870_v47, %v9838_v26  ;;  %v14596_v52 = vld [vmem:[#allocation202_spill] sm:$0xff] }
 0x27a   : > { %14555 = vst [vmem:[#allocation199_spill] sm:$0xff] %v10216_v13  ;;  %14556 = vst [vmem:[#allocation184_spill] sm:$0xff] %v10219_v7  ;;  %v10240_v19 = vadd.f32 %v2871_v43, %v9842_v24  ;;  %v10243_v62 = vadd.f32 %v2872_v41, %v9846_v40  ;;  %v10246_v49 = vadd.f32 %v2873_v2, %v9850_v5  ;;  %v14584_v40 = vld [vmem:[#allocation41_spill] sm:$0xff]  ;;  %v14600_v27 = vld [vmem:[#allocation46_spill] sm:$0xff]  ;;  %v3264_v47 = vrot.slane %v14604_v25, 1 }
 0x27b   : > { %14557 = vst [vmem:[#allocation200_spill] sm:$0xff] %v10222_v57  ;;  %14558 = vst [vmem:[#allocation185_spill] sm:$0xff] %v10225_v20  ;;  %v10249_v37 = vadd.f32 %v2874_v34, %v9855_v46  ;;  %v10252_v50 = vadd.f32 %v2875_v21, %v9859_v17  ;;  %v10255_v4 = vadd.f32 %v2876_v61, %v9863_v51  ;;  %v14573_v34 = vld [vmem:[#allocation8_spill] sm:$0xff]  ;;  %v14605_v2 = vld [vmem:[#allocation5_spill] sm:$0xff] }
 0x27c   : > { %14559 = vst [vmem:[#allocation186_spill] sm:$0xff] %v10228_v39  ;;  %14560 = vst [vmem:[#allocation187_spill] sm:$0xff] %v10231_v56  ;;  %v10258_v1 = vadd.f32 %v2877_v6, %v9867_v23  ;;  %v10261_v35 = vadd.f32 %v2878_v32, %v9871_v22  ;;  %v10264_v41 = vadd.f32 %v2879_v14, %v9875_v8  ;;  %v14582_v17 = vld [vmem:[#allocation40_spill] sm:$0xff]  ;;  %v14586_v8 = vld [vmem:[#allocation42_spill] sm:$0xff] }
 0x27d   : > { %14561 = vst [vmem:[#allocation188_spill] sm:$0xff] %v10234_v48  ;;  %14562 = vst [vmem:[#allocation190_spill] sm:$0xff] %v10237_v15  ;;  %v10267_v26 = vadd.f32 %v2880_v31, %v9878_v45  ;;  %v10271_v46 = vmul.f32 %v9905_v30, %v14573_v34  ;;  %v10274_v21 = vadd.f32 %v2881_v59, %v9881_v53  ;;  %v14580_v45 = vld [vmem:[#allocation92_spill] sm:$0xff]  ;;  %v3263_v31 = vrot.slane %v14603_v58, 1  ;;  %v14606_v61 = vld [vmem:[#allocation49_spill] sm:$0xff] }
 0x27e   : > { %14563 = vst [vmem:[#allocation54_spill] sm:$0xff] %v10240_v19  ;;  %14564 = vst [vmem:[#allocation55_spill] sm:$0xff] %v10243_v62  ;;  %v10277_v51 = vadd.f32 %v2882_v0, %v9884_v63  ;;  %v10280_v6 = vadd.f32 %v2883_v11, %v9887_v33  ;;  %v10283_v32 = vadd.f32 %v2884_v29, %v9890_v42  ;;  %v14588_v11 = vld [vmem:[#allocation43_spill] sm:$0xff]  ;;  %v14590_v42 = vld [vmem:[#allocation44_spill] sm:$0xff]  ;;  %v3261_v0 = vrot.slane %v14600_v27, 1 }
 0x27f   : > { %14565 = vst [vmem:[#allocation56_spill] sm:$0xff] %v10246_v49  ;;  %14566 = vst [vmem:[#allocation60_spill] sm:$0xff] %v10249_v37  ;;  %v10286_v22 = vadd.f32 %v2885_v9, %v9893_v10  ;;  %v10289_v23 = vadd.f32 %v2886_v44, %v14580_v45  ;;  %v10292_v24 = vadd.f32 %v2887_v36, %v14582_v17  ;;  %v14592_v10 = vld [vmem:[#allocation45_spill] sm:$0xff]  ;;  %v14598_v29 = vld [vmem:[#allocation78_spill] sm:$0xff]  ;;  %v3266_v12 = vrot.slane %v14606_v61, 1 }
 0x280   : > { %14567 = vst [vmem:[#allocation127_spill] sm:$0xff] %v10252_v50  ;;  %14568 = vst [vmem:[#allocation61_spill] sm:$0xff] %v10255_v4  ;;  %v10295_v5 = vadd.f32 %v2888_v60, %v14584_v40  ;;  %v10298_v53 = vadd.f32 %v2889_v54, %v14586_v8  ;;  %v10301_v63 = vadd.f32 %v2890_v18, %v14588_v11  ;;  %v14595_v9 = vld [vmem:[#allocation77_spill] sm:$0xff]  ;;  %v12534_v54 = vrot.slane %v10271_v46, 1  ;;  %v14601_v18 = vld [vmem:[#allocation4_spill] sm:$0xff] }
 0x281   : > { %14569 = vst [vmem:[#allocation106_spill] sm:$0xff] %v10258_v1  ;;  %14570 = vst [vmem:[#allocation207_spill] sm:$0xff] %v10261_v35  ;;  %v10304_v33 = vadd.f32 %v2891_v38, %v14590_v42  ;;  %v10308_v43 = vadd.f32 %v14593_v3, %v14592_v10  ;;  %v10312_v36 = vadd.f32 %v14596_v52, %v14595_v9  ;;  %v14602_v38 = vld [vmem:[#allocation81_spill] sm:$0xff]  ;;  %v14607_v45 = vld [vmem:[#allocation50_spill] sm:$0xff] }
 0x282   : > { %14571 = vst [vmem:[#allocation208_spill] sm:$0xff] %v10264_v41  ;;  %14572 = vst [vmem:[#allocation209_spill] sm:$0xff] %v10267_v26  ;;  %v10315_v60 = vadd.f32 %v2894_v28, %v14598_v29  ;;  %v10321_v14 = vmul.f32 %v9905_v30, %v14601_v18  ;;  %v10325_v59 = vmul.f32 %v9905_v30, %v14602_v38  ;;  %v3268_v17 = vrot.slane %v14607_v45, 1  ;;  %v14608_v8 = vld [vmem:[#allocation51_spill] sm:$0xff]  ;;  %v14609_v42 = vld [vmem:[#allocation53_spill] sm:$0xff] }
 0x283   : > { %14574 = vst [vmem:[#allocation210_spill] sm:$0xff] %v10271_v46  ;;  %14575 = vst [vmem:[#allocation192_spill] sm:$0xff] %v10274_v21  ;;  %v10331_v28 = vmul.f32 %v9905_v30, %v14605_v2  ;;  %v10336_v44 = vsel %vm1008_vm1, %v12534_v54, %v3261_v0  ;;  %v10341_v40 = vsel %vm1008_vm1, %v3263_v31, %v3264_v47  ;;  %v3269_v11 = vrot.slane %v14608_v8, 1  ;;  %v14610_v3 = vld [vmem:[#allocation62_spill] sm:$0xff]  ;;  %v14611_v29 = vld [vmem:[#allocation99_spill] sm:$0xff] }
 0x284   : > { %14576 = vst [vmem:[#allocation215_spill] sm:$0xff] %v10277_v51  ;;  %14577 = vst [vmem:[#allocation216_spill] sm:$0xff] %v10280_v6  ;;  %v3271_v10 = vrot.slane %v14609_v42, 1  ;;  %v3273_v9 = vrot.slane %v14610_v3, 1  ;;  %v10347_v52 = vsel %vm1008_vm1, %v3264_v47, %v3266_v12  ;;  %v3274_v27 = vrot.slane %v14611_v29, 1  ;;  %v14612_v0 = vld [vmem:[#allocation113_spill] sm:$0xff] }
 0x285   : > { %14578 = vst [vmem:[#allocation217_spill] sm:$0xff] %v10283_v32  ;;  %14579 = vst [vmem:[#allocation218_spill] sm:$0xff] %v10286_v22  ;;  %v3276_v18 = vrot.slane %v14612_v0, 1  ;;  %v14613_v38 = vld [vmem:[#allocation63_spill] sm:$0xff]  ;;  %v10353_v25 = vsel %vm1008_vm1, %v3268_v17, %v3269_v11  ;;  %v14615_v45 = vld [vmem:[#allocation66_spill] sm:$0xff] }
 0x286   : > { %14581 = vst [vmem:[#allocation92_spill] sm:$0xff] %v10289_v23  ;;  %14583 = vst [vmem:[#allocation40_spill] sm:$0xff] %v10292_v24  ;;  %v3278_v58 = vrot.slane %v14613_v38, 1  ;;  %v10356_v31 = vsel %vm1008_vm1, %v3269_v11, %v3271_v10  ;;  %v14614_v2 = vld [vmem:[#allocation107_spill] sm:$0xff]  ;;  %v3281_v8 = vrot.slane %v14615_v45, 1  ;;  %v10361_v42 = vsel %vm1008_vm1, %v3273_v9, %v3274_v27  ;;  %v14616_v12 = vld [vmem:[#allocation108_spill] sm:$0xff] }
 0x287   : > { %14585 = vst [vmem:[#allocation41_spill] sm:$0xff] %v10295_v5  ;;  %14587 = vst [vmem:[#allocation42_spill] sm:$0xff] %v10298_v53  ;;  %v3279_v61 = vrot.slane %v14614_v2, 1  ;;  %v10364_v47 = vsel %vm1008_vm1, %v3274_v27, %v3276_v18  ;;  %v3283_v3 = vrot.slane %v14616_v12, 1  ;;  %v14617_v29 = vld [vmem:[#allocation67_spill] sm:$0xff]  ;;  %v14618_v10 = vld [vmem:[#allocation109_spill] sm:$0xff] }
 0x288   : > { %14589 = vst [vmem:[#allocation43_spill] sm:$0xff] %v10301_v63  ;;  %14591 = vst [vmem:[#allocation44_spill] sm:$0xff] %v10304_v33  ;;  %v3284_v0 = vrot.slane %v14617_v29, 1  ;;  %v3286_v38 = vrot.slane %v14618_v10, 1  ;;  %v14619_v2 = vld [vmem:[#allocation100_spill] sm:$0xff]  ;;  %v14620_v54 = vld [vmem:[#allocation110_spill] sm:$0xff] }
 0x289   : > { %14594 = vst [vmem:[#allocation45_spill] sm:$0xff] %v10308_v43  ;;  %14597 = vst [vmem:[#allocation201_spill] sm:$0xff] %v10312_v36  ;;  %v10369_v17 = vsel %vm1008_vm1, %v3278_v58, %v3279_v61  ;;  %v10372_v11 = vsel %vm1008_vm1, %v3279_v61, %v3281_v8  ;;  %v3288_v45 = vrot.slane %v14619_v2, 1  ;;  %v3289_v27 = vrot.slane %v14620_v54, 1  ;;  %v14621_v18 = vld [vmem:[#allocation68_spill] sm:$0xff]  ;;  %v14622_v12 = vld [vmem:[#allocation115_spill] sm:$0xff] }
 0x28a   : > { %14599 = vst [vmem:[#allocation77_spill] sm:$0xff] %v10315_v60  ;;  %v10377_v9 = vsel %vm1008_vm1, %v3283_v3, %v3284_v0  ;;  %v3291_v60 = vrot.slane %v14621_v18, 1  ;;  %v3293_v36 = vrot.slane %v14622_v12, 1  ;;  %v10383_v29 = vsel %vm1008_vm1, %v3284_v0, %v3286_v38  ;;  %v14623_v58 = vld [vmem:[#allocation101_spill] sm:$0xff]  ;;  %v14626_v54 = vld [vmem:[#allocation116_spill] sm:$0xff]  ;;  %v14628_v38 = vld [vmem:[#allocation71_spill] sm:$0xff] }
 0x28b   : > { %v3294_v43 = vrot.slane %v14623_v58, 1  ;;  %v14624_v61 = vld [vmem:[#allocation117_spill] sm:$0xff]  ;;  %v10389_v2 = vsel %vm1008_vm1, %v3288_v45, %v3289_v27  ;;  %v3299_v63 = vrot.slane %v14626_v54, 1  ;;  %v3303_v58 = vrot.slane %v14628_v38, 1  ;;  %v14631_v5 = vld [vmem:[#allocation118_spill] sm:$0xff]  ;;  %v14632_v24 = vld [vmem:[#allocation180_spill] sm:$0xff] }
 0x28c   : > { %v3296_v8 = vrot.slane %v14624_v61, 1  ;;  %v14625_v33 = vld [vmem:[#allocation69_spill] sm:$0xff]  ;;  %v10392_v3 = vsel %vm1008_vm1, %v3289_v27, %v3291_v60  ;;  %v14629_v61 = vld [vmem:[#allocation70_spill] sm:$0xff]  ;;  %v14630_v27 = vld [vmem:[#allocation83_spill] sm:$0xff] }
 0x28d   : > { %v3298_v10 = vrot.slane %v14625_v33, 1  ;;  %v14627_v18 = vld [vmem:[#allocation189_spill] sm:$0xff]  ;;  %v10397_v12 = vsel %vm1008_vm1, %v3293_v36, %v3294_v43  ;;  %v3304_v33 = vrot.slane %v14629_v61, 1  ;;  %v3306_v54 = vrot.slane %v14630_v27, 1  ;;  %v14634_v38 = vld [vmem:[#allocation120_spill] sm:$0xff]  ;;  %v14652_v50 = vld [vmem:[#allocation138_spill] sm:$0xff] }
 0x28e   : > { %v3301_v53 = vrot.slane %v14627_v18, 1  ;;  %v10400_v0 = vsel %vm1008_vm1, %v3294_v43, %v3296_v8  ;;  %v3308_v18 = vrot.slane %v14631_v5, 1  ;;  %v3309_v43 = vrot.slane %v14632_v24, 1  ;;  %v14633_v8 = vld [vmem:[#allocation102_spill] sm:$0xff]  ;;  %v14637_v32 = vld [vmem:[#allocation121_spill] sm:$0xff]  ;;  %v14638_v24 = vld [vmem:[#allocation167_spill] sm:$0xff] }
 0x28f   : > { %v10405_v45 = vsel %vm1008_vm1, %v3298_v10, %v3299_v63  ;;  %v10413_v36 = vsel %vm1008_vm1, %v3303_v58, %v3304_v33  ;;  %v3311_v23 = vrot.slane %v14633_v8, 1  ;;  %v3313_v22 = vrot.slane %v14634_v38, 1  ;;  %v14635_v10 = vld [vmem:[#allocation72_spill] sm:$0xff]  ;;  %v14639_v8 = vld [vmem:[#allocation73_spill] sm:$0xff]  ;;  %v14653_v37 = vld [vmem:[#allocation59_spill] sm:$0xff] }
 0x290   : > { %v10408_v60 = vsel %vm1008_vm1, %v3299_v63, %v3301_v53  ;;  %v10419_v61 = vsel %vm1008_vm1, %v3304_v33, %v3306_v54  ;;  %v3314_v34 = vrot.slane %v14635_v10, 1  ;;  %v14636_v53 = vld [vmem:[#allocation125_spill] sm:$0xff]  ;;  %v3318_v27 = vrot.slane %v14637_v32, 1  ;;  %v14640_v54 = vld [vmem:[#allocation126_spill] sm:$0xff]  ;;  %v14643_v21 = vld [vmem:[#allocation128_spill] sm:$0xff] }
 0x291   : > { %v3316_v63 = vrot.slane %v14636_v53, 1  ;;  %v10425_v5 = vsel %vm1008_vm1, %v3308_v18, %v3309_v43  ;;  %v10428_v58 = vsel %vm1008_vm1, %v3309_v43, %v3311_v23  ;;  %v3319_v6 = vrot.slane %v14638_v24, 1  ;;  %v14641_v53 = vld [vmem:[#allocation122_spill] sm:$0xff]  ;;  %v14642_v43 = vld [vmem:[#allocation191_spill] sm:$0xff]  ;;  %v14644_v26 = vld [vmem:[#allocation52_spill] sm:$0xff] }
 0x292   : > { %v3321_v51 = vrot.slane %v14639_v8, 1  ;;  %v10433_v38 = vsel %vm1008_vm1, %v3313_v22, %v3314_v34  ;;  %v3323_v10 = vrot.slane %v14640_v54, 1  ;;  %v3324_v32 = vrot.slane %v14641_v53, 1  ;;  %v14646_v53 = vld [vmem:[#allocation193_spill] sm:$0xff]  ;;  %v14656_v49 = vld [vmem:[#allocation58_spill] sm:$0xff]  ;;  %v14659_v62 = vld [vmem:[#allocation64_spill] sm:$0xff] }
 0x293   : > { %v10436_v33 = vsel %vm1008_vm1, %v3314_v34, %v3316_v63  ;;  %v10441_v18 = vsel %vm1008_vm1, %v3318_v27, %v3319_v6  ;;  %v3326_v24 = vrot.slane %v14642_v43, 1  ;;  %v3328_v8 = vrot.slane %v14643_v21, 1  ;;  %v14645_v63 = vld [vmem:[#allocation123_spill] sm:$0xff]  ;;  %v14647_v27 = vld [vmem:[#allocation136_spill] sm:$0xff]  ;;  %v14661_v56 = vld [vmem:[#allocation141_spill] sm:$0xff] }
 0x294   : > { %v10444_v23 = vsel %vm1008_vm1, %v3319_v6, %v3321_v51  ;;  %v10450_v22 = vmul.f32 %v9905_v30, %v14644_v26  ;;  %v10453_v34 = vsel %vm1008_vm1, %v3323_v10, %v3324_v32  ;;  %v3329_v54 = vrot.slane %v14645_v63, 1  ;;  %v14648_v51 = vld [vmem:[#allocation6_spill] sm:$0xff]  ;;  %v14649_v43 = vld [vmem:[#allocation152_spill] sm:$0xff]  ;;  %v14651_v10 = vld [vmem:[#allocation57_spill] sm:$0xff] }
 0x295   : > { %v3331_v41 = vrot.slane %v14646_v53, 1  ;;  %v3037_v35 = vmul.f32 %v9905_v30, %v14647_v27  ;;  %v3038_v6 = vmul.f32 %v9905_v30, %v14648_v51  ;;  %v3039_v21 = vmul.f32 %v9905_v30, %v14649_v43  ;;  %v14650_v26 = vld [vmem:[#allocation82_spill] sm:$0xff]  ;;  %v14660_v19 = vld [vmem:[#allocation155_spill] sm:$0xff]  ;;  %v14674_v46 = vld [vmem:[#allocation144_spill] sm:$0xff] }
 0x296   : > { %v3327_v1 = vsel %vm1008_vm1, %v3324_v32, %v3326_v24  ;;  %v10466_v4 = vmul.f32 %v9905_v30, %v14650_v26  ;;  %v10470_v63 = vmul.f32 %v9905_v30, %v14651_v10  ;;  %v3330_v53 = vsel %vm1008_vm1, %v3328_v8, %v3329_v54  ;;  %v14654_v32 = vld [vmem:[#allocation153_spill] sm:$0xff]  ;;  %v14655_v26 = vld [vmem:[#allocation139_spill] sm:$0xff]  ;;  %v14671_v13 = vld [vmem:[#allocation74_spill] sm:$0xff] }
 0x297   : > { %v3332_v27 = vsel %vm1008_vm1, %v3329_v54, %v3331_v41  ;;  %v10476_v51 = vmul.f32 %v9905_v30, %v14652_v50  ;;  %v10480_v43 = vmul.f32 %v9905_v30, %v14653_v37  ;;  %v10484_v24 = vmul.f32 %v9905_v30, %v14654_v32  ;;  %v14657_v41 = vld [vmem:[#allocation154_spill] sm:$0xff]  ;;  %v14658_v54 = vld [vmem:[#allocation140_spill] sm:$0xff] }
 0x298   : > { %v10488_v10 = vmul.f32 %v9905_v30, %v14655_v26  ;;  %v10492_v8 = vmul.f32 %v9905_v30, %v14656_v49  ;;  %v10496_v50 = vmul.f32 %v9905_v30, %v14657_v41  ;;  %v10500_v37 = vmul.f32 %v9905_v30, %v14658_v54  ;;  %v14662_v41 = vld [vmem:[#allocation65_spill] sm:$0xff]  ;;  %v14663_v54 = vld [vmem:[#allocation156_spill] sm:$0xff]  ;;  %v14673_v16 = vld [vmem:[#allocation158_spill] sm:$0xff] }
 0x299   : > { %v10504_v32 = vmul.f32 %v9905_v30, %v14659_v62  ;;  %v10508_v26 = vmul.f32 %v9905_v30, %v14660_v19  ;;  %v3253_v15 = vrot.slane %v3037_v35, 1  ;;  %v3254_v48 = vrot.slane %v3038_v6, 1  ;;  %v14664_v62 = vld [vmem:[#allocation142_spill] sm:$0xff]  ;;  %v14665_v19 = vld [vmem:[#allocation75_spill] sm:$0xff]  ;;  %v14667_v6 = vld [vmem:[#allocation157_spill] sm:$0xff] }
 0x29a   : > { %v3256_v49 = vrot.slane %v3039_v21, 1  ;;  %v10512_v39 = vmul.f32 %v9905_v30, %v14661_v56  ;;  %v10516_v20 = vmul.f32 %v9905_v30, %v14662_v41  ;;  %v10520_v57 = vmul.f32 %v9905_v30, %v14663_v54  ;;  %v14669_v56 = vld [vmem:[#allocation143_spill] sm:$0xff] }
 0x29b   : > { %v10524_v7 = vmul.f32 %v9905_v30, %v14664_v62  ;;  %v10528_v35 = vmul.f32 %v9905_v30, %v14665_v19  ;;  %v10532_v21 = vmul.f32 %v9905_v30, %v14667_v6  ;;  %v10536_v41 = vmul.f32 %v9905_v30, %v14669_v56 }
 0x29c   : > { %v10540_v54 = vmul.f32 %v9905_v30, %v14671_v13  ;;  %v10544_v62 = vmul.f32 %v9905_v30, %v14673_v16  ;;  %v10548_v19 = vmul.f32 %v9905_v30, %v14674_v46  ;;  %v10566_v16 = vsel %vm1008_vm1, %v3254_v48, %v3256_v49  ;;  %v14684_v46 = vld [vmem:[#allocation203_spill] sm:$0xff]  ;;  %v14694_v49 = vld [vmem:[#allocation112_spill] sm:$0xff] }
 0x29d   : > { %14666 = vst [vmem:[#allocation202_spill] sm:$0xff] %v10528_v35  ;;  %14668 = vst [vmem:[#allocation78_spill] sm:$0xff] %v10532_v21  ;;  %v14676_v35 = vld [vmem:[#allocation79_spill] sm:$0xff] }
 0x29e   : > { %14670 = vst [vmem:[#allocation46_spill] sm:$0xff] %v10536_v41  ;;  %14672 = vst [vmem:[#allocation4_spill] sm:$0xff] %v10540_v54  ;;  %v10552_v6 = vmul.f32 %v9905_v30, %v14676_v35  ;;  %v14678_v21 = vld [vmem:[#allocation159_spill] sm:$0xff]  ;;  %v14680_v41 = vld [vmem:[#allocation145_spill] sm:$0xff]  ;;  %v10563_v54 = vsel %vm1008_vm1, %v3253_v15, %v3254_v48 }
 0x29f   : > { %14675 = vst [vmem:[#allocation81_spill] sm:$0xff] %v10548_v19  ;;  %v10556_v56 = vmul.f32 %v9905_v30, %v14678_v21  ;;  %v10560_v13 = vmul.f32 %v9905_v30, %v14680_v41  ;;  %14682 = vst [vmem:[#allocation49_spill] sm:$0xff] %v10563_v54  ;;  %v10570_v19 = vadd.f32 %v10336_v44, %v14684_v46  ;;  %v14686_v35 = vld [vmem:[#allocation204_spill] sm:$0xff]  ;;  %v14688_v21 = vld [vmem:[#allocation205_spill] sm:$0xff] }
 0x2a0   : > { %14677 = vst [vmem:[#allocation47_spill] sm:$0xff] %v10552_v6  ;;  %14683 = vst [vmem:[#allocation50_spill] sm:$0xff] %v10566_v16  ;;  %v10574_v6 = vadd.f32 %v10341_v40, %v14686_v35  ;;  %v14690_v41 = vld [vmem:[#allocation206_spill] sm:$0xff]  ;;  %v14692_v15 = vld [vmem:[#allocation103_spill] sm:$0xff]  ;;  %v10590_v46 = vadd.f32 %v10361_v42, %v14694_v49 }
 0x2a1   : > { %14679 = vst [vmem:[#allocation48_spill] sm:$0xff] %v10556_v56  ;;  %14681 = vst [vmem:[#allocation5_spill] sm:$0xff] %v10560_v13  ;;  %v10578_v56 = vadd.f32 %v10347_v52, %v14688_v21  ;;  %v10582_v13 = vadd.f32 %v10353_v25, %v14690_v41  ;;  %v10586_v48 = vadd.f32 %v10356_v31, %v14692_v15  ;;  %v14696_v44 = vld [vmem:[#allocation104_spill] sm:$0xff]  ;;  %v14698_v35 = vld [vmem:[#allocation114_spill] sm:$0xff] }
 0x2a2   : > { %14685 = vst [vmem:[#allocation51_spill] sm:$0xff] %v10570_v19  ;;  %14687 = vst [vmem:[#allocation53_spill] sm:$0xff] %v10574_v6  ;;  %v10594_v40 = vadd.f32 %v10364_v47, %v14696_v44  ;;  %v10598_v52 = vadd.f32 %v10369_v17, %v14698_v35  ;;  %v14700_v21 = vld [vmem:[#allocation35_spill] sm:$0xff]  ;;  %v14702_v41 = vld [vmem:[#allocation168_spill] sm:$0xff] }
 0x2a3   : > { %14689 = vst [vmem:[#allocation62_spill] sm:$0xff] %v10578_v56  ;;  %14691 = vst [vmem:[#allocation99_spill] sm:$0xff] %v10582_v13  ;;  %v10602_v25 = vadd.f32 %v10372_v11, %v14700_v21  ;;  %v10606_v31 = vadd.f32 %v10377_v9, %v14702_v41  ;;  %v14704_v15 = vld [vmem:[#allocation169_spill] sm:$0xff]  ;;  %v14706_v49 = vld [vmem:[#allocation170_spill] sm:$0xff] }
 0x2a4   : > { %14693 = vst [vmem:[#allocation113_spill] sm:$0xff] %v10586_v48  ;;  %14695 = vst [vmem:[#allocation63_spill] sm:$0xff] %v10590_v46  ;;  %v10610_v42 = vadd.f32 %v10383_v29, %v14704_v15  ;;  %v10614_v47 = vadd.f32 %v10389_v2, %v14706_v49  ;;  %v14708_v44 = vld [vmem:[#allocation130_spill] sm:$0xff]  ;;  %v14710_v35 = vld [vmem:[#allocation24_spill] sm:$0xff] }
 0x2a5   : > { %14697 = vst [vmem:[#allocation107_spill] sm:$0xff] %v10594_v40  ;;  %14699 = vst [vmem:[#allocation66_spill] sm:$0xff] %v10598_v52  ;;  %v10618_v17 = vadd.f32 %v10392_v3, %v14708_v44  ;;  %v10622_v11 = vadd.f32 %v10397_v12, %v14710_v35  ;;  %v14712_v21 = vld [vmem:[#allocation211_spill] sm:$0xff]  ;;  %v14714_v41 = vld [vmem:[#allocation212_spill] sm:$0xff] }
 0x2a6   : > { %14701 = vst [vmem:[#allocation108_spill] sm:$0xff] %v10602_v25  ;;  %14703 = vst [vmem:[#allocation67_spill] sm:$0xff] %v10606_v31  ;;  %v10626_v9 = vadd.f32 %v10400_v0, %v14712_v21  ;;  %v10630_v29 = vadd.f32 %v10405_v45, %v14714_v41  ;;  %v14716_v15 = vld [vmem:[#allocation7_spill] sm:$0xff]  ;;  %v14720_v44 = vld [vmem:[#allocation172_spill] sm:$0xff] }
 0x2a7   : > { %14705 = vst [vmem:[#allocation109_spill] sm:$0xff] %v10610_v42  ;;  %14707 = vst [vmem:[#allocation100_spill] sm:$0xff] %v10614_v47  ;;  %v10634_v2 = vadd.f32 %v10408_v60, %v14716_v15  ;;  %v14718_v49 = vld [vmem:[#allocation171_spill] sm:$0xff]  ;;  %v10642_v12 = vadd.f32 %v10419_v61, %v14720_v44  ;;  %v14722_v35 = vld [vmem:[#allocation173_spill] sm:$0xff] }
 0x2a8   : > { %14709 = vst [vmem:[#allocation110_spill] sm:$0xff] %v10618_v17  ;;  %14711 = vst [vmem:[#allocation68_spill] sm:$0xff] %v10622_v11  ;;  %v10638_v3 = vadd.f32 %v10413_v36, %v14718_v49  ;;  %v10646_v0 = vadd.f32 %v10425_v5, %v14722_v35  ;;  %v14724_v21 = vld [vmem:[#allocation174_spill] sm:$0xff]  ;;  %v14726_v41 = vld [vmem:[#allocation175_spill] sm:$0xff] }
 0x2a9   : > { %14713 = vst [vmem:[#allocation115_spill] sm:$0xff] %v10626_v9  ;;  %14715 = vst [vmem:[#allocation101_spill] sm:$0xff] %v10630_v29  ;;  %v10650_v45 = vadd.f32 %v10428_v58, %v14724_v21  ;;  %v10654_v60 = vadd.f32 %v10433_v38, %v14726_v41  ;;  %v14728_v15 = vld [vmem:[#allocation176_spill] sm:$0xff]  ;;  %v14730_v49 = vld [vmem:[#allocation177_spill] sm:$0xff] }
 0x2aa   : > { %14717 = vst [vmem:[#allocation117_spill] sm:$0xff] %v10634_v2  ;;  %14719 = vst [vmem:[#allocation69_spill] sm:$0xff] %v10638_v3  ;;  %v10658_v36 = vadd.f32 %v10436_v33, %v14728_v15  ;;  %v10662_v61 = vadd.f32 %v10441_v18, %v14730_v49  ;;  %v14732_v44 = vld [vmem:[#allocation178_spill] sm:$0xff]  ;;  %v14734_v35 = vld [vmem:[#allocation179_spill] sm:$0xff]  ;;  %v3189_v3 = vrot.slane %v10480_v43, 1  ;;  %v3191_v2 = vrot.slane %v10484_v24, 1 }
 0x2ab   : > { %14721 = vst [vmem:[#allocation116_spill] sm:$0xff] %v10642_v12  ;;  %14723 = vst [vmem:[#allocation189_spill] sm:$0xff] %v10646_v0  ;;  %v10666_v5 = vadd.f32 %v10444_v23, %v14732_v44  ;;  %v10670_v58 = vadd.f32 %v10453_v34, %v14734_v35  ;;  %v14736_v21 = vld [vmem:[#allocation105_spill] sm:$0xff]  ;;  %v14738_v38 = vld [vmem:[#allocation214_spill] sm:$0xff]  ;;  %v3183_v0 = vrot.slane %v10450_v22, 1  ;;  %v3186_v12 = vrot.slane %v10470_v63, 1 }
 0x2ac   : > { %14725 = vst [vmem:[#allocation71_spill] sm:$0xff] %v10650_v45  ;;  %14727 = vst [vmem:[#allocation70_spill] sm:$0xff] %v10654_v60  ;;  %v10673_v45 = vadd.f32 %v3327_v1, %v14736_v21  ;;  %v10676_v41 = vadd.f32 %v3330_v53, %v14738_v38  ;;  %v14740_v33 = vld [vmem:[#allocation2_spill] sm:$0xff]  ;;  %v14743_v49 = vld [vmem:[#allocation160_spill] sm:$0xff]  ;;  %v3194_v22 = vrot.slane %v10492_v8, 1  ;;  %v3198_v63 = vrot.slane %v10500_v37, 1 }
 0x2ad   : > { %14729 = vst [vmem:[#allocation83_spill] sm:$0xff] %v10658_v36  ;;  %14731 = vst [vmem:[#allocation118_spill] sm:$0xff] %v10662_v61  ;;  %v10679_v15 = vadd.f32 %v3332_v27, %v14740_v33  ;;  %v14742_v36 = vld [vmem:[#allocation76_spill] sm:$0xff]  ;;  %v10687_v23 = vmul.f32 %v9905_v30, %v14743_v49  ;;  %v14746_v1 = vld [vmem:[#allocation3_spill] sm:$0xff]  ;;  %v3201_v43 = vrot.slane %v10508_v26, 1 }
 0x2ae   : > { %14733 = vst [vmem:[#allocation180_spill] sm:$0xff] %v10666_v5  ;;  %14735 = vst [vmem:[#allocation102_spill] sm:$0xff] %v10670_v58  ;;  %v10683_v18 = vmul.f32 %v9905_v30, %v14742_v36  ;;  %v14744_v44 = vld [vmem:[#allocation80_spill] sm:$0xff]  ;;  %v10695_v35 = vadd.f32 %v10566_v16, %v14746_v1  ;;  %v14748_v53 = vld [vmem:[#allocation146_spill] sm:$0xff] }
 0x2af   : > { %14737 = vst [vmem:[#allocation120_spill] sm:$0xff] %v10673_v45  ;;  %14739 = vst [vmem:[#allocation72_spill] sm:$0xff] %v10676_v41  ;;  %v10691_v34 = vadd.f32 %v10563_v54, %v14744_v44  ;;  %v10699_v27 = vmul.f32 %v9905_v30, %v14748_v53  ;;  %v14749_v21 = vld [vmem:[#allocation131_spill] sm:$0xff]  ;;  %v14750_v33 = vld [vmem:[#allocation161_spill] sm:$0xff]  ;;  %v3178_v41 = vrot.slane %v10321_v14, 1  ;;  %v3181_v45 = vrot.slane %v10331_v28, 1 }
 0x2b0   : > { %14741 = vst [vmem:[#allocation125_spill] sm:$0xff] %v10679_v15  ;;  %14747 = vst [vmem:[#allocation167_spill] sm:$0xff] %v10695_v35  ;;  %v10703_v38 = vmul.f32 %v9905_v30, %v14749_v21  ;;  %v10707_v49 = vmul.f32 %v9905_v30, %v14750_v33  ;;  %v14751_v36 = vld [vmem:[#allocation147_spill] sm:$0xff]  ;;  %v14752_v54 = vld [vmem:[#allocation132_spill] sm:$0xff] }
 0x2b1   : > { %14745 = vst [vmem:[#allocation121_spill] sm:$0xff] %v10691_v34  ;;  %v10711_v44 = vmul.f32 %v9905_v30, %v14751_v36  ;;  %v10715_v1 = vmul.f32 %v9905_v30, %v14752_v54  ;;  %v14753_v16 = vld [vmem:[#allocation162_spill] sm:$0xff]  ;;  %v14754_v35 = vld [vmem:[#allocation148_spill] sm:$0xff]  ;;  %v14755_v34 = vld [vmem:[#allocation133_spill] sm:$0xff]  ;;  %v3179_v54 = vrot.slane %v10325_v59, 1 }
 0x2b2   : > { %v10719_v53 = vmul.f32 %v9905_v30, %v14753_v16  ;;  %v10723_v21 = vmul.f32 %v9905_v30, %v14754_v35  ;;  %v10727_v33 = vmul.f32 %v9905_v30, %v14755_v34  ;;  %v14756_v15 = vld [vmem:[#allocation163_spill] sm:$0xff]  ;;  %v14757_v16 = vld [vmem:[#allocation149_spill] sm:$0xff]  ;;  %v14758_v35 = vld [vmem:[#allocation134_spill] sm:$0xff] }
 0x2b3   : > { %v10731_v36 = vmul.f32 %v9905_v30, %v14756_v15  ;;  %v10738_v58 = vmul.f32 %v9905_v30, %v14757_v16  ;;  %v10742_v5 = vmul.f32 %v9905_v30, %v14758_v35  ;;  %v14759_v34 = vld [vmem:[#allocation164_spill] sm:$0xff]  ;;  %v14760_v15 = vld [vmem:[#allocation150_spill] sm:$0xff]  ;;  %v14761_v14 = vld [vmem:[#allocation135_spill] sm:$0xff]  ;;  %v10762_v35 = vmul.f32 %v9905_v30, %v14553_v55 }
 0x2b4   : > { %v10746_v61 = vmul.f32 %v9905_v30, %v14759_v34  ;;  %v10750_v60 = vmul.f32 %v9905_v30, %v14760_v15  ;;  %v10754_v59 = vmul.f32 %v9905_v30, %v14761_v14  ;;  %v14762_v28 = vld [vmem:[#allocation165_spill] sm:$0xff]  ;;  %v3184_v34 = vrot.slane %v10466_v4, 1  ;;  %v14764_v29 = vld [vmem:[#allocation78_spill] sm:$0xff]  ;;  %v14766_v11 = vld [vmem:[#allocation4_spill] sm:$0xff] }
 0x2b5   : > { %v10758_v16 = vmul.f32 %v9905_v30, %v14762_v28  ;;  %v3188_v15 = vrot.slane %v10476_v51, 1  ;;  %v10770_v14 = vsel %vm1008_vm1, %v3178_v41, %v3179_v54  ;;  %v10773_v28 = vsel %vm1008_vm1, %v3179_v54, %v3181_v45  ;;  %v14763_v45 = vld [vmem:[#allocation202_spill] sm:$0xff]  ;;  %v14770_v17 = vld [vmem:[#allocation5_spill] sm:$0xff]  ;;  %v14884_v46 = vld [vmem:[#allocation111_spill] sm:$0xff] }
 0x2b6   : > { %v3193_v30 = vrot.slane %v10488_v10, 1  ;;  %v3196_v4 = vrot.slane %v10496_v50, 1  ;;  %v3199_v51 = vrot.slane %v10504_v32, 1  ;;  %v3203_v41 = vrot.slane %v10512_v39, 1  ;;  %v14765_v9 = vld [vmem:[#allocation46_spill] sm:$0xff]  ;;  %v14882_v25 = vld [vmem:[#allocation129_spill] sm:$0xff] }
 0x2b7   : > { %v3204_v55 = vrot.slane %v10516_v20, 1  ;;  %v3206_v54 = vrot.slane %v10520_v57, 1  ;;  %v3185_v24 = vsel %vm1008_vm1, %v3183_v0, %v3184_v34  ;;  %v3208_v10 = vrot.slane %v10524_v7, 1  ;;  %v14880_v47 = vld [vmem:[#allocation194_spill] sm:$0xff]  ;;  %v14887_v6 = vld [vmem:[#allocation213_spill] sm:$0xff] }
 0x2b8   : > { %v3209_v8 = vrot.slane %v14763_v45, 1  ;;  %v3211_v50 = vrot.slane %v14764_v29, 1  ;;  %v3187_v37 = vsel %vm1008_vm1, %v3184_v34, %v3186_v12  ;;  %v3190_v32 = vsel %vm1008_vm1, %v3188_v15, %v3189_v3  ;;  %v14767_v34 = vld [vmem:[#allocation81_spill] sm:$0xff] }
 0x2b9   : > { %v3213_v26 = vrot.slane %v14765_v9, 1  ;;  %v3214_v39 = vrot.slane %v14766_v11, 1  ;;  %v3192_v20 = vsel %vm1008_vm1, %v3189_v3, %v3191_v2  ;;  %v3195_v57 = vsel %vm1008_vm1, %v3193_v30, %v3194_v22  ;;  %v14768_v3 = vld [vmem:[#allocation47_spill] sm:$0xff] }
 0x2ba   : > { %v3197_v0 = vsel %vm1008_vm1, %v3194_v22, %v3196_v4  ;;  %v3200_v7 = vsel %vm1008_vm1, %v3198_v63, %v3199_v51  ;;  %v3202_v45 = vsel %vm1008_vm1, %v3199_v51, %v3201_v43  ;;  %v3205_v29 = vsel %vm1008_vm1, %v3203_v41, %v3204_v55  ;;  %v14769_v4 = vld [vmem:[#allocation48_spill] sm:$0xff] }
 0x2bb   : > { %v3207_v12 = vsel %vm1008_vm1, %v3204_v55, %v3206_v54  ;;  %v3216_v15 = vrot.slane %v10544_v62, 1  ;;  %v3210_v9 = vsel %vm1008_vm1, %v3208_v10, %v3209_v8  ;;  %v3212_v11 = vsel %vm1008_vm1, %v3209_v8, %v3211_v50 }
 0x2bc   : > { %v3218_v2 = vrot.slane %v14767_v34, 1  ;;  %v3219_v30 = vrot.slane %v14768_v3, 1  ;;  %v3215_v22 = vsel %vm1008_vm1, %v3213_v26, %v3214_v39  ;;  %v3221_v63 = vrot.slane %v14769_v4, 1 }
 0x2bd   : > { %v3223_v51 = vrot.slane %v14770_v17, 1  ;;  %v3224_v43 = vrot.slane %v10683_v18, 1  ;;  %v3226_v55 = vrot.slane %v10687_v23, 1  ;;  %v3228_v62 = vrot.slane %v10699_v27, 1 }
 0x2be   : > { %v3229_v41 = vrot.slane %v10703_v38, 1  ;;  %v3231_v54 = vrot.slane %v10707_v49, 1  ;;  %v3233_v10 = vrot.slane %v10711_v44, 1  ;;  %v3234_v8 = vrot.slane %v10715_v1, 1 }
 0x2bf   : > { %v3236_v50 = vrot.slane %v10719_v53, 1  ;;  %v3238_v26 = vrot.slane %v10723_v21, 1  ;;  %v3239_v17 = vrot.slane %v10727_v33, 1  ;;  %v3241_v18 = vrot.slane %v10731_v36, 1 }
 0x2c0   : > { %v3243_v23 = vrot.slane %v10738_v58, 1  ;;  %v3244_v27 = vrot.slane %v10742_v5, 1  ;;  %v3246_v38 = vrot.slane %v10746_v61, 1  ;;  %v3248_v49 = vrot.slane %v10750_v60, 1 }
 0x2c1   : > { %v3249_v44 = vrot.slane %v10754_v59, 1  ;;  %v3251_v1 = vrot.slane %v10758_v16, 1  ;;  %v3217_v53 = vsel %vm1008_vm1, %v3214_v39, %v3216_v15  ;;  %v3220_v21 = vsel %vm1008_vm1, %v3218_v2, %v3219_v30 }
 0x2c2   : > { %v3222_v33 = vsel %vm1008_vm1, %v3219_v30, %v3221_v63  ;;  %v3258_v36 = vrot.slane %v10762_v35, 1  ;;  %v3225_v58 = vsel %vm1008_vm1, %v3223_v51, %v3224_v43  ;;  %v3227_v5 = vsel %vm1008_vm1, %v3224_v43, %v3226_v55  ;;  %v14778_v30 = vld [vmem:[#allocation210_spill] sm:$0xff]  ;;  %v14781_v51 = vld [vmem:[#allocation183_spill] sm:$0xff] }
 0x2c3   : > { %v3230_v61 = vsel %vm1008_vm1, %v3228_v62, %v3229_v41  ;;  %v3232_v60 = vsel %vm1008_vm1, %v3229_v41, %v3231_v54  ;;  %v3235_v59 = vsel %vm1008_vm1, %v3233_v10, %v3234_v8  ;;  %v10835_v16 = vsel %vm1008_vm1, %v3234_v8, %v3236_v50  ;;  %v14783_v55 = vld [vmem:[#allocation199_spill] sm:$0xff]  ;;  %v14785_v41 = vld [vmem:[#allocation184_spill] sm:$0xff]  ;;  %v14789_v50 = vld [vmem:[#allocation185_spill] sm:$0xff] }
 0x2c4   : > { %14771 = vst [vmem:[#allocation73_spill] sm:$0xff] %v10835_v16  ;;  %v10838_v39 = vsel %vm1008_vm1, %v3238_v26, %v3239_v17  ;;  %v10841_v15 = vsel %vm1008_vm1, %v3239_v17, %v3241_v18  ;;  %v10844_v35 = vsel %vm1008_vm1, %v3243_v23, %v3244_v27  ;;  %v10847_v34 = vsel %vm1008_vm1, %v3244_v27, %v3246_v38  ;;  %v14787_v10 = vld [vmem:[#allocation200_spill] sm:$0xff]  ;;  %v14791_v17 = vld [vmem:[#allocation186_spill] sm:$0xff]  ;;  %v14793_v23 = vld [vmem:[#allocation187_spill] sm:$0xff] }
 0x2c5   : > { %14772 = vst [vmem:[#allocation126_spill] sm:$0xff] %v10838_v39  ;;  %14773 = vst [vmem:[#allocation122_spill] sm:$0xff] %v10841_v15  ;;  %v10850_v2 = vsel %vm1008_vm1, %v3248_v49, %v3249_v44  ;;  %v10853_v3 = vsel %vm1008_vm1, %v3249_v44, %v3251_v1  ;;  %v14779_v4 = vrot.slane %v14778_v30, 1  ;;  %v10862_v43 = vadd.f32 %v10770_v14, %v14781_v51  ;;  %v14795_v14 = vld [vmem:[#allocation188_spill] sm:$0xff]  ;;  %v14869_v15 = vld [vmem:[#allocation94_spill] sm:$0xff] }
 0x2c6   : > { %14774 = vst [vmem:[#allocation191_spill] sm:$0xff] %v10844_v35  ;;  %14775 = vst [vmem:[#allocation128_spill] sm:$0xff] %v10847_v34  ;;  %v10866_v62 = vadd.f32 %v10773_v28, %v14783_v55  ;;  %v10869_v54 = vadd.f32 %v3185_v24, %v14785_v41  ;;  %v10872_v8 = vadd.f32 %v3187_v37, %v14787_v10  ;;  %v14797_v28 = vld [vmem:[#allocation190_spill] sm:$0xff]  ;;  %v14801_v37 = vld [vmem:[#allocation55_spill] sm:$0xff]  ;;  %v3649_v42 = vrot.slane %v14880_v47, 2 }
 0x2c7   : > { %14776 = vst [vmem:[#allocation52_spill] sm:$0xff] %v10850_v2  ;;  %14777 = vst [vmem:[#allocation123_spill] sm:$0xff] %v10853_v3  ;;  %v10858_v63 = vsel %vm1008_vm1, %v3258_v36, %v14779_v4  ;;  %v10875_v26 = vadd.f32 %v3190_v32, %v14789_v50  ;;  %v10878_v18 = vadd.f32 %v3192_v20, %v14791_v17  ;;  %v14799_v24 = vld [vmem:[#allocation54_spill] sm:$0xff]  ;;  %v14803_v32 = vld [vmem:[#allocation56_spill] sm:$0xff]  ;;  %v3652_v52 = vrot.slane %v14882_v25, 2 }
 0x2c8   : > { %14780 = vst [vmem:[#allocation193_spill] sm:$0xff] %v10858_v63  ;;  %14782 = vst [vmem:[#allocation82_spill] sm:$0xff] %v10862_v43  ;;  %v10881_v27 = vadd.f32 %v3195_v57, %v14793_v23  ;;  %v10884_v38 = vadd.f32 %v3197_v0, %v14795_v14  ;;  %v10887_v49 = vadd.f32 %v3200_v7, %v14797_v28  ;;  %v14805_v20 = vld [vmem:[#allocation60_spill] sm:$0xff]  ;;  %v14807_v57 = vld [vmem:[#allocation127_spill] sm:$0xff]  ;;  %v3655_v48 = vrot.slane %v14884_v46, 2 }
 0x2c9   : > { %14784 = vst [vmem:[#allocation57_spill] sm:$0xff] %v10866_v62  ;;  %14786 = vst [vmem:[#allocation138_spill] sm:$0xff] %v10869_v54  ;;  %v10890_v44 = vadd.f32 %v3202_v45, %v14799_v24  ;;  %v10893_v1 = vadd.f32 %v3205_v29, %v14801_v37  ;;  %v10896_v36 = vadd.f32 %v3207_v12, %v14803_v32  ;;  %v14809_v0 = vld [vmem:[#allocation61_spill] sm:$0xff]  ;;  %v14811_v7 = vld [vmem:[#allocation106_spill] sm:$0xff]  ;;  %v3659_v19 = vrot.slane %v14887_v6, 2 }
 0x2ca   : > { %14788 = vst [vmem:[#allocation59_spill] sm:$0xff] %v10872_v8  ;;  %14790 = vst [vmem:[#allocation153_spill] sm:$0xff] %v10875_v26  ;;  %v10899_v30 = vadd.f32 %v3210_v9, %v14805_v20  ;;  %v10902_v4 = vadd.f32 %v3212_v11, %v14807_v57  ;;  %v10905_v51 = vadd.f32 %v3215_v22, %v14809_v0  ;;  %v14813_v45 = vld [vmem:[#allocation207_spill] sm:$0xff]  ;;  %v14815_v29 = vld [vmem:[#allocation208_spill] sm:$0xff] }
 0x2cb   : > { %14792 = vst [vmem:[#allocation139_spill] sm:$0xff] %v10878_v18  ;;  %14794 = vst [vmem:[#allocation58_spill] sm:$0xff] %v10881_v27  ;;  %v10908_v55 = vadd.f32 %v3217_v53, %v14811_v7  ;;  %v10911_v41 = vadd.f32 %v3220_v21, %v14813_v45  ;;  %v10914_v10 = vadd.f32 %v3222_v33, %v14815_v29  ;;  %v14817_v12 = vld [vmem:[#allocation209_spill] sm:$0xff]  ;;  %v14819_v9 = vld [vmem:[#allocation192_spill] sm:$0xff] }
 0x2cc   : > { %14796 = vst [vmem:[#allocation154_spill] sm:$0xff] %v10884_v38  ;;  %14798 = vst [vmem:[#allocation203_spill] sm:$0xff] %v10887_v49  ;;  %v10917_v50 = vadd.f32 %v3225_v58, %v14817_v12  ;;  %v10920_v17 = vadd.f32 %v3227_v5, %v14819_v9  ;;  %v14821_v11 = vld [vmem:[#allocation215_spill] sm:$0xff]  ;;  %v14823_v22 = vld [vmem:[#allocation216_spill] sm:$0xff] }
 0x2cd   : > { %14800 = vst [vmem:[#allocation204_spill] sm:$0xff] %v10890_v44  ;;  %14802 = vst [vmem:[#allocation205_spill] sm:$0xff] %v10893_v1  ;;  %v10923_v23 = vadd.f32 %v3230_v61, %v14821_v11  ;;  %v10926_v14 = vadd.f32 %v3232_v60, %v14823_v22  ;;  %v14825_v53 = vld [vmem:[#allocation217_spill] sm:$0xff]  ;;  %v14827_v21 = vld [vmem:[#allocation140_spill] sm:$0xff] }
 0x2ce   : > { %14804 = vst [vmem:[#allocation206_spill] sm:$0xff] %v10896_v36  ;;  %14806 = vst [vmem:[#allocation103_spill] sm:$0xff] %v10899_v30  ;;  %v10929_v28 = vadd.f32 %v3235_v59, %v14825_v53  ;;  %v14828_v24 = vld [vmem:[#allocation119_spill] sm:$0xff]  ;;  %v14830_v33 = vld [vmem:[#allocation64_spill] sm:$0xff] }
 0x2cf   : > { %14808 = vst [vmem:[#allocation112_spill] sm:$0xff] %v10902_v4  ;;  %14810 = vst [vmem:[#allocation104_spill] sm:$0xff] %v10905_v51  ;;  %v10933_v37 = vmul.f32 %v14828_v24, %v14827_v21  ;;  %v10937_v58 = vmul.f32 %v14828_v24, %v14830_v33  ;;  %v14832_v32 = vld [vmem:[#allocation155_spill] sm:$0xff]  ;;  %v14834_v61 = vld [vmem:[#allocation141_spill] sm:$0xff] }
 0x2d0   : > { %14812 = vst [vmem:[#allocation114_spill] sm:$0xff] %v10908_v55  ;;  %14814 = vst [vmem:[#allocation35_spill] sm:$0xff] %v10911_v41  ;;  %v10941_v5 = vmul.f32 %v14828_v24, %v14832_v32  ;;  %v10945_v20 = vmul.f32 %v14828_v24, %v14834_v61  ;;  %v14836_v60 = vld [vmem:[#allocation65_spill] sm:$0xff]  ;;  %v14838_v57 = vld [vmem:[#allocation136_spill] sm:$0xff] }
 0x2d1   : > { %14816 = vst [vmem:[#allocation168_spill] sm:$0xff] %v10914_v10  ;;  %14818 = vst [vmem:[#allocation169_spill] sm:$0xff] %v10917_v50  ;;  %v10949_v59 = vmul.f32 %v14828_v24, %v14836_v60  ;;  %v10953_v0 = vmul.f32 %v14828_v24, %v14838_v57  ;;  %v14839_v7 = vld [vmem:[#allocation6_spill] sm:$0xff]  ;;  %v14840_v29 = vld [vmem:[#allocation152_spill] sm:$0xff] }
 0x2d2   : > { %14820 = vst [vmem:[#allocation170_spill] sm:$0xff] %v10920_v17  ;;  %14822 = vst [vmem:[#allocation130_spill] sm:$0xff] %v10923_v23  ;;  %v10957_v45 = vmul.f32 %v14828_v24, %v14839_v7  ;;  %v10961_v12 = vmul.f32 %v14828_v24, %v14840_v29  ;;  %v14841_v9 = vld [vmem:[#allocation8_spill] sm:$0xff]  ;;  %v14843_v21 = vld [vmem:[#allocation26_spill] sm:$0xff] }
 0x2d3   : > { %14824 = vst [vmem:[#allocation24_spill] sm:$0xff] %v10926_v14  ;;  %14826 = vst [vmem:[#allocation211_spill] sm:$0xff] %v10929_v28  ;;  %v10965_v11 = vmul.f32 %v14828_v24, %v14841_v9  ;;  %v14842_v22 = vld [vmem:[#allocation84_spill] sm:$0xff]  ;;  %v10973_v33 = vmul.f32 %v14828_v24, %v14843_v21  ;;  %v14844_v32 = vld [vmem:[#allocation9_spill] sm:$0xff] }
 0x2d4   : > { %14829 = vst [vmem:[#allocation212_spill] sm:$0xff] %v10933_v37  ;;  %14831 = vst [vmem:[#allocation7_spill] sm:$0xff] %v10937_v58  ;;  %v10969_v53 = vmul.f32 %v14828_v24, %v14842_v22  ;;  %v10977_v61 = vmul.f32 %v14828_v24, %v14844_v32  ;;  %v14845_v60 = vld [vmem:[#allocation85_spill] sm:$0xff]  ;;  %v14846_v7 = vld [vmem:[#allocation27_spill] sm:$0xff]  ;;  %v3725_v25 = vrot.slane %v10957_v45, 2 }
 0x2d5   : > { %14833 = vst [vmem:[#allocation171_spill] sm:$0xff] %v10941_v5  ;;  %14835 = vst [vmem:[#allocation172_spill] sm:$0xff] %v10945_v20  ;;  %v10981_v57 = vmul.f32 %v14828_v24, %v14845_v60  ;;  %v10985_v29 = vmul.f32 %v14828_v24, %v14846_v7  ;;  %v14847_v9 = vld [vmem:[#allocation10_spill] sm:$0xff]  ;;  %v14849_v28 = vld [vmem:[#allocation28_spill] sm:$0xff] }
 0x2d6   : > { %14837 = vst [vmem:[#allocation173_spill] sm:$0xff] %v10949_v59  ;;  %v10989_v22 = vmul.f32 %v14828_v24, %v14847_v9  ;;  %v14848_v63 = vld [vmem:[#allocation86_spill] sm:$0xff]  ;;  %v10997_v32 = vmul.f32 %v14828_v24, %v14849_v28  ;;  %v14850_v14 = vld [vmem:[#allocation12_spill] sm:$0xff]  ;;  %v14851_v23 = vld [vmem:[#allocation87_spill] sm:$0xff] }
 0x2d7   : > { %v10993_v21 = vmul.f32 %v14828_v24, %v14848_v63  ;;  %v11001_v60 = vmul.f32 %v14828_v24, %v14850_v14  ;;  %v11005_v7 = vmul.f32 %v14828_v24, %v14851_v23  ;;  %v14852_v17 = vld [vmem:[#allocation29_spill] sm:$0xff]  ;;  %v14854_v10 = vld [vmem:[#allocation88_spill] sm:$0xff]  ;;  %v14855_v41 = vld [vmem:[#allocation30_spill] sm:$0xff] }
 0x2d8   : > { %v11009_v9 = vmul.f32 %v14828_v24, %v14852_v17  ;;  %v14853_v50 = vld [vmem:[#allocation13_spill] sm:$0xff]  ;;  %v11017_v28 = vmul.f32 %v14828_v24, %v14854_v10  ;;  %v11021_v14 = vmul.f32 %v14828_v24, %v14855_v41  ;;  %v14856_v55 = vld [vmem:[#allocation14_spill] sm:$0xff]  ;;  %v14858_v4 = vld [vmem:[#allocation31_spill] sm:$0xff] }
 0x2d9   : > { %v11013_v63 = vmul.f32 %v14828_v24, %v14853_v50  ;;  %v11025_v23 = vmul.f32 %v14828_v24, %v14856_v55  ;;  %v14857_v51 = vld [vmem:[#allocation89_spill] sm:$0xff]  ;;  %v11033_v50 = vmul.f32 %v14828_v24, %v14858_v4  ;;  %v14859_v30 = vld [vmem:[#allocation15_spill] sm:$0xff]  ;;  %v14860_v36 = vld [vmem:[#allocation90_spill] sm:$0xff] }
 0x2da   : > { %v11029_v17 = vmul.f32 %v14828_v24, %v14857_v51  ;;  %v11037_v10 = vmul.f32 %v14828_v24, %v14859_v30  ;;  %v11041_v41 = vmul.f32 %v14828_v24, %v14860_v36  ;;  %v14861_v3 = vld [vmem:[#allocation32_spill] sm:$0xff]  ;;  %v14863_v44 = vld [vmem:[#allocation91_spill] sm:$0xff]  ;;  %v14864_v2 = vld [vmem:[#allocation33_spill] sm:$0xff] }
 0x2db   : > { %v11045_v55 = vmul.f32 %v14828_v24, %v14861_v3  ;;  %v14862_v1 = vld [vmem:[#allocation16_spill] sm:$0xff]  ;;  %v11053_v4 = vmul.f32 %v14828_v24, %v14863_v44  ;;  %v11057_v30 = vmul.f32 %v14828_v24, %v14864_v2  ;;  %v14865_v34 = vld [vmem:[#allocation17_spill] sm:$0xff]  ;;  %v14867_v38 = vld [vmem:[#allocation34_spill] sm:$0xff]  ;;  %v11077_v2 = vmul.f32 %v14828_v24, %v14869_v15 }
 0x2dc   : > { %v11049_v51 = vmul.f32 %v14828_v24, %v14862_v1  ;;  %v11061_v36 = vmul.f32 %v14828_v24, %v14865_v34  ;;  %v14866_v49 = vld [vmem:[#allocation93_spill] sm:$0xff]  ;;  %v11069_v1 = vmul.f32 %v14828_v24, %v14867_v38  ;;  %v14868_v35 = vld [vmem:[#allocation18_spill] sm:$0xff]  ;;  %v14870_v59 = vld [vmem:[#allocation36_spill] sm:$0xff] }
 0x2dd   : > { %v11065_v3 = vmul.f32 %v14828_v24, %v14866_v49  ;;  %v11073_v44 = vmul.f32 %v14828_v24, %v14868_v35  ;;  %v11081_v34 = vmul.f32 %v14828_v24, %v14870_v59  ;;  %v14871_v20 = vld [vmem:[#allocation20_spill] sm:$0xff]  ;;  %v14872_v27 = vld [vmem:[#allocation95_spill] sm:$0xff]  ;;  %v14873_v5 = vld [vmem:[#allocation37_spill] sm:$0xff] }
 0x2de   : > { %v11085_v49 = vmul.f32 %v14828_v24, %v14871_v20  ;;  %v11089_v38 = vmul.f32 %v14828_v24, %v14872_v27  ;;  %v11093_v35 = vmul.f32 %v14828_v24, %v14873_v5  ;;  %v14874_v18 = vld [vmem:[#allocation21_spill] sm:$0xff]  ;;  %v14875_v39 = vld [vmem:[#allocation96_spill] sm:$0xff]  ;;  %v14876_v16 = vld [vmem:[#allocation38_spill] sm:$0xff] }
 0x2df   : > { %v11097_v15 = vmul.f32 %v14828_v24, %v14874_v18  ;;  %v11101_v59 = vmul.f32 %v14828_v24, %v14875_v39  ;;  %v11105_v20 = vmul.f32 %v14828_v24, %v14876_v16  ;;  %v14877_v58 = vld [vmem:[#allocation22_spill] sm:$0xff]  ;;  %v14878_v37 = vld [vmem:[#allocation97_spill] sm:$0xff]  ;;  %v14879_v26 = vld [vmem:[#allocation39_spill] sm:$0xff] }
 0x2e0   : > { %v11109_v27 = vmul.f32 %v14828_v24, %v14877_v58  ;;  %v11113_v5 = vmul.f32 %v14828_v24, %v14878_v37  ;;  %v11117_v18 = vmul.f32 %v14828_v24, %v14879_v26  ;;  %v14881_v39 = vld [vmem:[#allocation124_spill] sm:$0xff]  ;;  %v14883_v16 = vld [vmem:[#allocation11_spill] sm:$0xff]  ;;  %v14889_v54 = vld [vmem:[#allocation181_spill] sm:$0xff] }
 0x2e1   : > { %v3650_v31 = vrot.slane %v14881_v39, 2  ;;  %v3654_v40 = vrot.slane %v14883_v16, 2  ;;  %v14885_v58 = vld [vmem:[#allocation23_spill] sm:$0xff]  ;;  %v14888_v26 = vld [vmem:[#allocation196_spill] sm:$0xff]  ;;  %v3662_v47 = vrot.slane %v14889_v54, 2  ;;  %v3724_v39 = vrot.slane %v10953_v0, 2 }
 0x2e2   : > { %v11126_v13 = vmul.f32 %v14828_v24, %v14885_v58  ;;  %v14886_v37 = vld [vmem:[#allocation195_spill] sm:$0xff]  ;;  %v3660_v8 = vrot.slane %v14888_v26, 2  ;;  %v3727_v16 = vrot.slane %v10961_v12, 2  ;;  %v14890_v62 = vld [vmem:[#allocation98_spill] sm:$0xff]  ;;  %v3732_v54 = vrot.slane %v10969_v53, 2  ;;  %v14896_v53 = vld [vmem:[#allocation197_spill] sm:$0xff] }
 0x2e3   : > { %v3657_v56 = vrot.slane %v14886_v37, 2  ;;  %v11137_v46 = vmul.f32 %v14828_v24, %v14890_v62  ;;  %v14891_v58 = vld [vmem:[#allocation151_spill] sm:$0xff]  ;;  %v14892_v37 = vld [vmem:[#allocation137_spill] sm:$0xff]  ;;  %v14894_v26 = vld [vmem:[#allocation166_spill] sm:$0xff]  ;;  %v11153_v45 = vsel %vm1478_vm2, %v3649_v42, %v3650_v31  ;;  %v11156_v62 = vsel %vm1478_vm2, %v3650_v31, %v3652_v52 }
 0x2e4   : > { %v11141_v43 = vmul.f32 %v14828_v24, %v14891_v58  ;;  %v11145_v6 = vmul.f32 %v14828_v24, %v14892_v37  ;;  %v11150_v0 = vmul.f32 %v14828_v24, %v14894_v26  ;;  %14895 = vst [vmem:[#allocation175_spill] sm:$0xff] %v11153_v45  ;;  %v11159_v12 = vsel %vm1478_vm2, %v3654_v40, %v3655_v48  ;;  %v14897_v42 = vld [vmem:[#allocation182_spill] sm:$0xff] }
 0x2e5   : > { %v11162_v58 = vsel %vm1478_vm2, %v3655_v48, %v3657_v56  ;;  %v11165_v37 = vsel %vm1478_vm2, %v3659_v19, %v3660_v8  ;;  %v12539_v24 = vrot.slane %v10965_v11, 2  ;;  %v11170_v26 = vsel %vm1478_vm2, %v3660_v8, %v3662_v47 }
 0x2e6   : > { %14893 = vst [vmem:[#allocation174_spill] sm:$0xff] %v11145_v6  ;;  %v3665_v45 = vrot.slane %v14897_v42, 2  ;;  %v11174_v52 = vsel %vm1478_vm2, %v3724_v39, %v3725_v25  ;;  %v11177_v40 = vsel %vm1478_vm2, %v3725_v25, %v3727_v16  ;;  %v3734_v19 = vrot.slane %v10973_v33, 2  ;;  %v14984_v42 = vld [vmem:[#allocation172_spill] sm:$0xff] }
 0x2e7   : > { %v11182_v56 = vsel %vm1478_vm2, %v12539_v24, %v3732_v54  ;;  %v3735_v48 = vrot.slane %v10977_v61, 2  ;;  %v3737_v31 = vrot.slane %v10981_v57, 2  ;;  %v3739_v8 = vrot.slane %v10985_v29, 2 }
 0x2e8   : > { %v3740_v47 = vrot.slane %v10989_v22, 2  ;;  %v3742_v39 = vrot.slane %v10993_v21, 2  ;;  %v3744_v25 = vrot.slane %v10997_v32, 2  ;;  %v3745_v16 = vrot.slane %v11001_v60, 2 }
 0x2e9   : > { %v3747_v6 = vrot.slane %v11005_v7, 2  ;;  %v3749_v54 = vrot.slane %v11009_v9, 2  ;;  %v3750_v33 = vrot.slane %v11013_v63, 2  ;;  %v3752_v61 = vrot.slane %v11017_v28, 2 }
 0x2ea   : > { %v3754_v57 = vrot.slane %v11021_v14, 2  ;;  %v3755_v29 = vrot.slane %v11025_v23, 2  ;;  %v3757_v22 = vrot.slane %v11029_v17, 2  ;;  %v3736_v21 = vsel %vm1478_vm2, %v3734_v19, %v3735_v48 }
 0x2eb   : > { %v3759_v32 = vrot.slane %v11033_v50, 2  ;;  %v3760_v60 = vrot.slane %v11037_v10, 2  ;;  %v3762_v7 = vrot.slane %v11041_v41, 2  ;;  %v3738_v9 = vsel %vm1478_vm2, %v3735_v48, %v3737_v31 }
 0x2ec   : > { %v3741_v63 = vsel %vm1478_vm2, %v3739_v8, %v3740_v47  ;;  %v3764_v28 = vrot.slane %v11045_v55, 2  ;;  %v3765_v14 = vrot.slane %v11049_v51, 2  ;;  %v3743_v23 = vsel %vm1478_vm2, %v3740_v47, %v3742_v39 }
 0x2ed   : > { %v3746_v17 = vsel %vm1478_vm2, %v3744_v25, %v3745_v16  ;;  %v3748_v19 = vsel %vm1478_vm2, %v3745_v16, %v3747_v6  ;;  %v3751_v50 = vsel %vm1478_vm2, %v3749_v54, %v3750_v33  ;;  %v3753_v10 = vsel %vm1478_vm2, %v3750_v33, %v3752_v61 }
 0x2ee   : > { %v3756_v41 = vsel %vm1478_vm2, %v3754_v57, %v3755_v29  ;;  %v3758_v48 = vsel %vm1478_vm2, %v3755_v29, %v3757_v22  ;;  %v3767_v31 = vrot.slane %v11053_v4, 2  ;;  %v3761_v55 = vsel %vm1478_vm2, %v3759_v32, %v3760_v60  ;;  %v14898_v29 = vld [vmem:[#allocation174_spill] sm:$0xff] }
 0x2ef   : > { %v3763_v51 = vsel %vm1478_vm2, %v3760_v60, %v3762_v7  ;;  %v3769_v8 = vrot.slane %v11057_v30, 2  ;;  %v3770_v47 = vrot.slane %v11061_v36, 2  ;;  %v3766_v6 = vsel %vm1478_vm2, %v3764_v28, %v3765_v14 }
 0x2f0   : > { %v3772_v39 = vrot.slane %v11065_v3, 2  ;;  %v3774_v25 = vrot.slane %v11069_v1, 2  ;;  %v3775_v16 = vrot.slane %v11073_v44, 2  ;;  %v3777_v54 = vrot.slane %v11077_v2, 2 }
 0x2f1   : > { %v3779_v4 = vrot.slane %v11081_v34, 2  ;;  %v3780_v33 = vrot.slane %v11085_v49, 2  ;;  %v3782_v61 = vrot.slane %v11089_v38, 2  ;;  %v3784_v30 = vrot.slane %v11093_v35, 2 }
 0x2f2   : > { %v3785_v36 = vrot.slane %v11097_v15, 2  ;;  %v3787_v57 = vrot.slane %v11101_v59, 2  ;;  %v3789_v3 = vrot.slane %v11105_v20, 2  ;;  %v3790_v1 = vrot.slane %v11109_v27, 2 }
 0x2f3   : > { %v3792_v44 = vrot.slane %v11113_v5, 2  ;;  %v3794_v2 = vrot.slane %v11117_v18, 2  ;;  %v3795_v34 = vrot.slane %v11126_v13, 2  ;;  %v3768_v49 = vsel %vm1478_vm2, %v3765_v14, %v3767_v31  ;;  %v14899_v14 = vld [vmem:[#allocation82_spill] sm:$0xff] }
 0x2f4   : > { %v3771_v38 = vsel %vm1478_vm2, %v3769_v8, %v3770_v47  ;;  %v3773_v35 = vsel %vm1478_vm2, %v3770_v47, %v3772_v39  ;;  %v3797_v15 = vrot.slane %v11137_v46, 2  ;;  %v3776_v59 = vsel %vm1478_vm2, %v3774_v25, %v3775_v16  ;;  %v14902_v8 = vld [vmem:[#allocation57_spill] sm:$0xff]  ;;  %v14904_v39 = vld [vmem:[#allocation138_spill] sm:$0xff] }
 0x2f5   : > { %v3799_v20 = vrot.slane %v11141_v43, 2  ;;  %v3800_v27 = vrot.slane %v14898_v29, 2  ;;  %v3802_v5 = vrot.slane %v11150_v0, 2  ;;  %v3778_v18 = vsel %vm1478_vm2, %v3775_v16, %v3777_v54  ;;  %v14900_v0 = vld [vmem:[#allocation175_spill] sm:$0xff] }
 0x2f6   : > { %v3781_v13 = vsel %vm1478_vm2, %v3779_v4, %v3780_v33  ;;  %v3783_v22 = vsel %vm1478_vm2, %v3780_v33, %v3782_v61  ;;  %v3786_v32 = vsel %vm1478_vm2, %v3784_v30, %v3785_v36  ;;  %v3788_v60 = vsel %vm1478_vm2, %v3785_v36, %v3787_v57  ;;  %v14906_v4 = vld [vmem:[#allocation59_spill] sm:$0xff]  ;;  %v14909_v36 = vld [vmem:[#allocation53_spill] sm:$0xff] }
 0x2f7   : > { %v3791_v46 = vsel %vm1478_vm2, %v3789_v3, %v3790_v1  ;;  %v3793_v7 = vsel %vm1478_vm2, %v3790_v1, %v3792_v44  ;;  %v3796_v43 = vsel %vm1478_vm2, %v3794_v2, %v3795_v34  ;;  %v3798_v28 = vsel %vm1478_vm2, %v3795_v34, %v3797_v15  ;;  %v14907_v61 = vld [vmem:[#allocation51_spill] sm:$0xff]  ;;  %v14915_v44 = vld [vmem:[#allocation113_spill] sm:$0xff] }
 0x2f8   : > { %v11254_v31 = vadd.f32 %v14900_v0, %v14899_v14  ;;  %v11258_v47 = vadd.f32 %v11156_v62, %v14902_v8  ;;  %v11262_v25 = vadd.f32 %v11159_v12, %v14904_v39  ;;  %v3801_v16 = vsel %vm1478_vm2, %v3799_v20, %v3800_v27  ;;  %v14911_v62 = vld [vmem:[#allocation62_spill] sm:$0xff]  ;;  %v14913_v12 = vld [vmem:[#allocation99_spill] sm:$0xff] }
 0x2f9   : > { %v3803_v54 = vsel %vm1478_vm2, %v3800_v27, %v3802_v5  ;;  %v11268_v33 = vadd.f32 %v11162_v58, %v14906_v4  ;;  %v11272_v30 = vadd.f32 %v11182_v56, %v14907_v61  ;;  %v11275_v57 = vadd.f32 %v3736_v21, %v14909_v36  ;;  %v14917_v34 = vld [vmem:[#allocation63_spill] sm:$0xff]  ;;  %v14921_v56 = vld [vmem:[#allocation66_spill] sm:$0xff]  ;;  %v14923_v21 = vld [vmem:[#allocation108_spill] sm:$0xff] }
 0x2fa   : > { %14901 = vst [vmem:[#allocation176_spill] sm:$0xff] %v11254_v31  ;;  %14903 = vst [vmem:[#allocation177_spill] sm:$0xff] %v11258_v47  ;;  %v11278_v3 = vadd.f32 %v3738_v9, %v14911_v62  ;;  %v11281_v1 = vadd.f32 %v3741_v63, %v14913_v12  ;;  %v11284_v2 = vadd.f32 %v3743_v23, %v14915_v44  ;;  %v14919_v58 = vld [vmem:[#allocation107_spill] sm:$0xff]  ;;  %v14927_v63 = vld [vmem:[#allocation109_spill] sm:$0xff] }
 0x2fb   : > { %14905 = vst [vmem:[#allocation178_spill] sm:$0xff] %v11262_v25  ;;  %14908 = vst [vmem:[#allocation179_spill] sm:$0xff] %v11272_v30  ;;  %v11287_v15 = vadd.f32 %v3746_v17, %v14917_v34  ;;  %v11290_v20 = vadd.f32 %v3748_v19, %v14919_v58  ;;  %v11293_v29 = vadd.f32 %v3751_v50, %v14921_v56  ;;  %v14925_v9 = vld [vmem:[#allocation67_spill] sm:$0xff]  ;;  %v14929_v23 = vld [vmem:[#allocation100_spill] sm:$0xff] }
 0x2fc   : > { %14910 = vst [vmem:[#allocation105_spill] sm:$0xff] %v11275_v57  ;;  %14912 = vst [vmem:[#allocation214_spill] sm:$0xff] %v11278_v3  ;;  %v11296_v27 = vadd.f32 %v3753_v10, %v14923_v21  ;;  %v11299_v5 = vadd.f32 %v3756_v41, %v14925_v9  ;;  %v11302_v14 = vadd.f32 %v3758_v48, %v14927_v63  ;;  %v14931_v17 = vld [vmem:[#allocation110_spill] sm:$0xff]  ;;  %v14933_v19 = vld [vmem:[#allocation68_spill] sm:$0xff] }
 0x2fd   : > { %14914 = vst [vmem:[#allocation2_spill] sm:$0xff] %v11281_v1  ;;  %14916 = vst [vmem:[#allocation80_spill] sm:$0xff] %v11284_v2  ;;  %v11305_v0 = vadd.f32 %v3761_v55, %v14929_v23  ;;  %v11308_v8 = vadd.f32 %v3763_v51, %v14931_v17  ;;  %v11311_v39 = vadd.f32 %v3766_v6, %v14933_v19  ;;  %v14935_v50 = vld [vmem:[#allocation115_spill] sm:$0xff]  ;;  %v14937_v10 = vld [vmem:[#allocation101_spill] sm:$0xff] }
 0x2fe   : > { %14918 = vst [vmem:[#allocation3_spill] sm:$0xff] %v11287_v15  ;;  %14920 = vst [vmem:[#allocation202_spill] sm:$0xff] %v11290_v20  ;;  %v11314_v4 = vadd.f32 %v3768_v49, %v14935_v50  ;;  %v11317_v61 = vadd.f32 %v3771_v38, %v14937_v10  ;;  %v14939_v41 = vld [vmem:[#allocation117_spill] sm:$0xff]  ;;  %v14943_v55 = vld [vmem:[#allocation116_spill] sm:$0xff] }
 0x2ff   : > { %14922 = vst [vmem:[#allocation78_spill] sm:$0xff] %v11293_v29  ;;  %14924 = vst [vmem:[#allocation46_spill] sm:$0xff] %v11296_v27  ;;  %v11320_v36 = vadd.f32 %v3773_v35, %v14939_v41  ;;  %v14941_v48 = vld [vmem:[#allocation69_spill] sm:$0xff]  ;;  %v11326_v12 = vadd.f32 %v3778_v18, %v14943_v55  ;;  %v14947_v6 = vld [vmem:[#allocation71_spill] sm:$0xff]  ;;  %v14971_v55 = vrot.slane %v14896_v53, 2  ;;  %v3936_v53 = vsel %vm3930_vm3, %v11268_v33, 0.0 }
 0x300   : > { %14926 = vst [vmem:[#allocation4_spill] sm:$0xff] %v11299_v5  ;;  %14928 = vst [vmem:[#allocation81_spill] sm:$0xff] %v11302_v14  ;;  %v11323_v62 = vadd.f32 %v3776_v59, %v14941_v48  ;;  %v14945_v51 = vld [vmem:[#allocation189_spill] sm:$0xff]  ;;  %v11332_v34 = vadd.f32 %v3783_v22, %v14947_v6  ;;  %v14949_v49 = vld [vmem:[#allocation70_spill] sm:$0xff]  ;;  %v3934_v48 = vsel %vm3930_vm3, %v11262_v25, 0.0 }
 0x301   : > { %14930 = vst [vmem:[#allocation47_spill] sm:$0xff] %v11305_v0  ;;  %14932 = vst [vmem:[#allocation48_spill] sm:$0xff] %v11308_v8  ;;  %v11329_v44 = vadd.f32 %v3781_v13, %v14945_v51  ;;  %v11335_v58 = vadd.f32 %v3786_v32, %v14949_v49  ;;  %v14951_v38 = vld [vmem:[#allocation83_spill] sm:$0xff]  ;;  %v14953_v35 = vld [vmem:[#allocation118_spill] sm:$0xff]  ;;  %v3666_v51 = vsel %vm1478_vm2, %v14971_v55, %v3665_v45 }
 0x302   : > { %14934 = vst [vmem:[#allocation5_spill] sm:$0xff] %v11311_v39  ;;  %14936 = vst [vmem:[#allocation210_spill] sm:$0xff] %v11314_v4  ;;  %v11338_v56 = vadd.f32 %v3788_v60, %v14951_v38  ;;  %v11341_v21 = vadd.f32 %v3791_v46, %v14953_v35  ;;  %v14955_v59 = vld [vmem:[#allocation180_spill] sm:$0xff]  ;;  %v14957_v18 = vld [vmem:[#allocation102_spill] sm:$0xff] }
 0x303   : > { %14938 = vst [vmem:[#allocation183_spill] sm:$0xff] %v11317_v61  ;;  %14940 = vst [vmem:[#allocation199_spill] sm:$0xff] %v11320_v36  ;;  %v11344_v9 = vadd.f32 %v3793_v7, %v14955_v59  ;;  %v11347_v63 = vadd.f32 %v3796_v43, %v14957_v18  ;;  %v14959_v13 = vld [vmem:[#allocation120_spill] sm:$0xff]  ;;  %v14963_v32 = vld [vmem:[#allocation125_spill] sm:$0xff] }
 0x304   : > { %14942 = vst [vmem:[#allocation184_spill] sm:$0xff] %v11323_v62  ;;  %14944 = vst [vmem:[#allocation200_spill] sm:$0xff] %v11326_v12  ;;  %v11350_v23 = vadd.f32 %v3798_v28, %v14959_v13  ;;  %v14961_v22 = vld [vmem:[#allocation72_spill] sm:$0xff]  ;;  %v11356_v19 = vadd.f32 %v3803_v54, %v14963_v32  ;;  %v14965_v60 = vld [vmem:[#allocation198_spill] sm:$0xff]  ;;  %v3932_v54 = vsel %vm3930_vm3, %v11258_v47, 0.0 }
 0x305   : > { %14946 = vst [vmem:[#allocation185_spill] sm:$0xff] %v11329_v44  ;;  %14948 = vst [vmem:[#allocation186_spill] sm:$0xff] %v11332_v34  ;;  %v11353_v17 = vadd.f32 %v3801_v16, %v14961_v22  ;;  %v3667_v50 = vrot.slane %v14965_v60, 2  ;;  %v14966_v10 = vld [vmem:[#allocation121_spill] sm:$0xff]  ;;  %v14968_v7 = vld [vmem:[#allocation167_spill] sm:$0xff]  ;;  %v3931_v16 = vsel %vm3930_vm3, %v11254_v31, 0.0 }
 0x306   : > { %14950 = vst [vmem:[#allocation187_spill] sm:$0xff] %v11335_v58  ;;  %14952 = vst [vmem:[#allocation188_spill] sm:$0xff] %v11338_v56  ;;  %v11361_v46 = vadd.f32 %v11174_v52, %v14966_v10  ;;  %v11365_v43 = vadd.f32 %v11177_v40, %v14968_v7  ;;  %v14970_v28 = vld [vmem:[#allocation153_spill] sm:$0xff]  ;;  %v14972_v6 = vld [vmem:[#allocation212_spill] sm:$0xff]  ;;  %v3933_v35 = vadd.f32 %v3932_v54, %v3931_v16 }
 0x307   : > { %14954 = vst [vmem:[#allocation190_spill] sm:$0xff] %v11341_v21  ;;  %14956 = vst [vmem:[#allocation54_spill] sm:$0xff] %v11344_v9  ;;  %v11369_v41 = vadd.f32 %v11165_v37, %v14970_v28  ;;  %v3669_v49 = vrot.slane %v14972_v6, 2  ;;  %v14973_v38 = vld [vmem:[#allocation7_spill] sm:$0xff]  ;;  %v14974_v59 = vld [vmem:[#allocation218_spill] sm:$0xff]  ;;  %v3668_v54 = vsel %vm1478_vm2, %v3665_v45, %v3667_v50 }
 0x308   : > { %14958 = vst [vmem:[#allocation55_spill] sm:$0xff] %v11347_v63  ;;  %14960 = vst [vmem:[#allocation56_spill] sm:$0xff] %v11350_v23  ;;  %v3670_v37 = vrot.slane %v14973_v38, 2  ;;  %v14975_v18 = vld [vmem:[#allocation73_spill] sm:$0xff]  ;;  %v14976_v22 = vld [vmem:[#allocation92_spill] sm:$0xff] }
 0x309   : > { %14962 = vst [vmem:[#allocation60_spill] sm:$0xff] %v11353_v17  ;;  %14964 = vst [vmem:[#allocation127_spill] sm:$0xff] %v11356_v19  ;;  %v11386_v13 = vadd.f32 %v14975_v18, %v14974_v59  ;;  %v14977_v32 = vld [vmem:[#allocation126_spill] sm:$0xff]  ;;  %v14978_v10 = vld [vmem:[#allocation139_spill] sm:$0xff]  ;;  %v3935_v59 = vadd.f32 %v3934_v48, %v3933_v35 }
 0x30a   : > { %14967 = vst [vmem:[#allocation61_spill] sm:$0xff] %v11361_v46  ;;  %14969 = vst [vmem:[#allocation106_spill] sm:$0xff] %v11365_v43  ;;  %v11390_v60 = vadd.f32 %v14977_v32, %v14976_v22  ;;  %v11394_v7 = vadd.f32 %v11170_v26, %v14978_v10  ;;  %v11399_v28 = vld [vmem:[%s4963_s24 + $0x8] ss:$0 sm:$0xff]  ;;  %v14979_v55 = vld [vmem:[#allocation156_spill] sm:$0xff]  ;;  %v3938_v43 = vsel %vm3930_vm3, %v11369_v41, 0.0 }
 0x30b   : > { %v3480_v16 = vmul.f32 %v11399_v28, %v14979_v55  ;;  %v14980_v6 = vld [vmem:[#allocation171_spill] sm:$0xff]  ;;  %v14981_v18 = vld [vmem:[#allocation142_spill] sm:$0xff]  ;;  %v3671_v55 = vsel %vm1478_vm2, %v3669_v49, %v3670_v37  ;;  %v3674_v46 = vrot.slane %v14984_v42, 2  ;;  %v14985_v45 = vld [vmem:[#allocation173_spill] sm:$0xff] }
 0x30c   : > { %v3672_v38 = vrot.slane %v14980_v6, 2  ;;  %v3481_v22 = vmul.f32 %v11399_v28, %v14981_v18  ;;  %v14982_v26 = vld [vmem:[#allocation75_spill] sm:$0xff]  ;;  %v14983_v10 = vld [vmem:[#allocation58_spill] sm:$0xff]  ;;  %v3675_v50 = vrot.slane %v14985_v45, 2  ;;  %v3937_v6 = vadd.f32 %v3936_v53, %v3935_v59  ;;  %v14986_v48 = vld [vmem:[#allocation40_spill] sm:$0xff] }
 0x30d   : > { %v3482_v32 = vmul.f32 %v11399_v28, %v14982_v26  ;;  %v11412_v24 = vadd.f32 %v3666_v51, %v14983_v10  ;;  %v14987_v35 = vld [vmem:[#allocation122_spill] sm:$0xff]  ;;  %v14988_v18 = vld [vmem:[#allocation41_spill] sm:$0xff]  ;;  %v14989_v17 = vld [vmem:[#allocation191_spill] sm:$0xff]  ;;  %v3940_v23 = vsel %vm3930_vm3, %v11394_v7, 0.0  ;;  %v3677_v53 = vrot.slane %v3480_v16, 2 }
 0x30e   : > { %v11421_v19 = vadd.f32 %v14987_v35, %v14986_v48  ;;  %v11425_v26 = vadd.f32 %v14989_v17, %v14988_v18  ;;  %v14990_v51 = vld [vmem:[#allocation154_spill] sm:$0xff]  ;;  %v14991_v49 = vld [vmem:[#allocation157_spill] sm:$0xff]  ;;  %v3673_v45 = vsel %vm1478_vm2, %v3670_v37, %v3672_v38  ;;  %v3939_v59 = vadd.f32 %v3938_v43, %v3937_v6  ;;  %v14992_v63 = vld [vmem:[#allocation143_spill] sm:$0xff] }
 0x30f   : > { %v11428_v10 = vadd.f32 %v3668_v54, %v14990_v51  ;;  %v3483_v42 = vmul.f32 %v11399_v28, %v14991_v49  ;;  %v3484_v48 = vmul.f32 %v11399_v28, %v14992_v63  ;;  %v14993_v35 = vld [vmem:[#allocation74_spill] sm:$0xff]  ;;  %v14994_v18 = vld [vmem:[#allocation203_spill] sm:$0xff]  ;;  %v3942_v54 = vsel %vm3930_vm3, %v11412_v24, 0.0  ;;  %v14996_v16 = vld [vmem:[#allocation128_spill] sm:$0xff] }
 0x310   : > { %v3485_v17 = vmul.f32 %v11399_v28, %v14993_v35  ;;  %v11440_v9 = vadd.f32 %v3671_v55, %v14994_v18  ;;  %v3676_v51 = vsel %vm1478_vm2, %v3674_v46, %v3675_v50  ;;  %v3679_v21 = vrot.slane %v3481_v22, 2  ;;  %v14995_v37 = vld [vmem:[#allocation42_spill] sm:$0xff]  ;;  %v14997_v38 = vld [vmem:[#allocation43_spill] sm:$0xff]  ;;  %v14998_v63 = vld [vmem:[#allocation52_spill] sm:$0xff] }
 0x311   : > { %v3680_v49 = vrot.slane %v3482_v32, 2  ;;  %v3941_v56 = vadd.f32 %v3940_v23, %v3939_v59  ;;  %v11447_v43 = vadd.f32 %v14996_v16, %v14995_v37  ;;  %v11451_v6 = vadd.f32 %v14998_v63, %v14997_v38  ;;  %v14999_v35 = vld [vmem:[#allocation204_spill] sm:$0xff]  ;;  %v15000_v18 = vld [vmem:[#allocation158_spill] sm:$0xff]  ;;  %v15002_v16 = vld [vmem:[#allocation79_spill] sm:$0xff] }
 0x312   : > { %v11454_v58 = vadd.f32 %v3673_v45, %v14999_v35  ;;  %v3944_v55 = vsel %vm3930_vm3, %v11428_v10, 0.0  ;;  %v3486_v46 = vmul.f32 %v11399_v28, %v15000_v18  ;;  %v3678_v22 = vsel %vm1478_vm2, %v3675_v50, %v3677_v53  ;;  %v15001_v59 = vld [vmem:[#allocation144_spill] sm:$0xff]  ;;  %v15003_v63 = vld [vmem:[#allocation205_spill] sm:$0xff]  ;;  %v15006_v53 = vld [vmem:[#allocation159_spill] sm:$0xff] }
 0x313   : > { %v3682_v23 = vrot.slane %v3483_v42, 2  ;;  %v3943_v32 = vadd.f32 %v3942_v54, %v3941_v56  ;;  %v3487_v37 = vmul.f32 %v11399_v28, %v15001_v59  ;;  %v3488_v38 = vmul.f32 %v11399_v28, %v15002_v16  ;;  %v15004_v50 = vld [vmem:[#allocation44_spill] sm:$0xff]  ;;  %v15005_v42 = vld [vmem:[#allocation123_spill] sm:$0xff]  ;;  %v15007_v59 = vld [vmem:[#allocation206_spill] sm:$0xff] }
 0x314   : > { %v11466_v34 = vadd.f32 %v3676_v51, %v15003_v63  ;;  %v3946_v45 = vsel %vm3930_vm3, %v11440_v9, 0.0  ;;  %v3681_v35 = vsel %vm1478_vm2, %v3679_v21, %v3680_v49  ;;  %v3684_v44 = vrot.slane %v3484_v48, 2  ;;  %v15008_v63 = vld [vmem:[#allocation145_spill] sm:$0xff]  ;;  %v15023_v5 = vld [vmem:[#allocation35_spill] sm:$0xff]  ;;  %v15028_v20 = vld [vmem:[#allocation164_spill] sm:$0xff] }
 0x315   : > { %v3685_v18 = vrot.slane %v3485_v17, 2  ;;  %v3945_v12 = vadd.f32 %v3944_v55, %v3943_v32  ;;  %v11473_v56 = vadd.f32 %v15005_v42, %v15004_v50  ;;  %v3489_v54 = vmul.f32 %v11399_v28, %v15006_v53  ;;  %v15009_v55 = vld [vmem:[#allocation76_spill] sm:$0xff]  ;;  %v15011_v53 = vld [vmem:[#allocation103_spill] sm:$0xff]  ;;  %v15025_v27 = vld [vmem:[#allocation149_spill] sm:$0xff] }
 0x316   : > { %v11478_v16 = vadd.f32 %v3678_v22, %v15007_v59  ;;  %v3948_v51 = vsel %vm3930_vm3, %v11454_v58, 0.0  ;;  %v3490_v62 = vmul.f32 %v11399_v28, %v15008_v63  ;;  %v3683_v21 = vsel %vm1478_vm2, %v3680_v49, %v3682_v23  ;;  %v15010_v50 = vld [vmem:[#allocation160_spill] sm:$0xff]  ;;  %v15012_v49 = vld [vmem:[#allocation146_spill] sm:$0xff]  ;;  %v15031_v15 = vld [vmem:[#allocation135_spill] sm:$0xff] }
 0x317   : > { %v3687_v48 = vrot.slane %v3486_v46, 2  ;;  %v3947_v17 = vadd.f32 %v3946_v45, %v3945_v12  ;;  %v3491_v32 = vmul.f32 %v11399_v28, %v15009_v55  ;;  %v3492_v42 = vmul.f32 %v11399_v28, %v15010_v50  ;;  %v15013_v46 = vld [vmem:[#allocation131_spill] sm:$0xff]  ;;  %v15014_v45 = vld [vmem:[#allocation112_spill] sm:$0xff]  ;;  %v15015_v50 = vld [vmem:[#allocation161_spill] sm:$0xff] }
 0x318   : > { %v11490_v36 = vadd.f32 %v3681_v35, %v15011_v53  ;;  %v3950_v22 = vsel %vm3930_vm3, %v11466_v34, 0.0  ;;  %v3686_v59 = vsel %vm1478_vm2, %v3684_v44, %v3685_v18  ;;  %v3689_v61 = vrot.slane %v3487_v37, 2  ;;  %v15034_v2 = vld [vmem:[#allocation130_spill] sm:$0xff] }
 0x319   : > { %v3690_v63 = vrot.slane %v3488_v38, 2  ;;  %v3949_v4 = vadd.f32 %v3948_v51, %v3947_v17  ;;  %v3493_v12 = vmul.f32 %v11399_v28, %v15012_v49  ;;  %v3494_v23 = vmul.f32 %v11399_v28, %v15013_v46  ;;  %v15016_v51 = vld [vmem:[#allocation147_spill] sm:$0xff]  ;;  %v15017_v49 = vld [vmem:[#allocation132_spill] sm:$0xff] }
 0x31a   : > { %v11500_v55 = vadd.f32 %v3683_v21, %v15014_v45  ;;  %v3952_v35 = vsel %vm3930_vm3, %v11478_v16, 0.0  ;;  %v3495_v53 = vmul.f32 %v11399_v28, %v15015_v50  ;;  %v3688_v44 = vsel %vm1478_vm2, %v3685_v18, %v3687_v48  ;;  %v15018_v46 = vld [vmem:[#allocation104_spill] sm:$0xff]  ;;  %v15019_v18 = vld [vmem:[#allocation162_spill] sm:$0xff] }
 0x31b   : > { %v3692_v37 = vrot.slane %v3489_v54, 2  ;;  %v3951_v38 = vadd.f32 %v3950_v22, %v3949_v4  ;;  %v3496_v17 = vmul.f32 %v11399_v28, %v15016_v51  ;;  %v3497_v39 = vmul.f32 %v11399_v28, %v15017_v49  ;;  %v15020_v54 = vld [vmem:[#allocation148_spill] sm:$0xff]  ;;  %v15021_v22 = vld [vmem:[#allocation114_spill] sm:$0xff]  ;;  %v15022_v49 = vld [vmem:[#allocation133_spill] sm:$0xff] }
 0x31c   : > { %v11512_v8 = vadd.f32 %v3686_v59, %v15018_v46  ;;  %v3954_v21 = vsel %vm3930_vm3, %v11490_v36, 0.0  ;;  %v3691_v45 = vsel %vm1478_vm2, %v3689_v61, %v3690_v63  ;;  %v3694_v0 = vrot.slane %v3490_v62, 2 }
 0x31d   : > { %v3695_v50 = vrot.slane %v3491_v32, 2  ;;  %v3953_v14 = vadd.f32 %v3952_v35, %v3951_v38  ;;  %v3498_v4 = vmul.f32 %v11399_v28, %v15019_v18  ;;  %v3499_v48 = vmul.f32 %v11399_v28, %v15020_v54 }
 0x31e   : > { %v11522_v51 = vadd.f32 %v3688_v44, %v15021_v22  ;;  %v3956_v59 = vsel %vm3930_vm3, %v11500_v55, 0.0  ;;  %v3500_v46 = vmul.f32 %v11399_v28, %v15022_v49  ;;  %v3693_v61 = vsel %vm1478_vm2, %v3690_v63, %v3692_v37  ;;  %v15024_v44 = vld [vmem:[#allocation163_spill] sm:$0xff] }
 0x31f   : > { %v3697_v62 = vrot.slane %v3492_v42, 2  ;;  %v3955_v32 = vadd.f32 %v3954_v21, %v3953_v14  ;;  %v3699_v35 = vrot.slane %v3493_v12, 2  ;;  %v3700_v38 = vrot.slane %v3494_v23, 2  ;;  %v15026_v42 = vld [vmem:[#allocation134_spill] sm:$0xff] }
 0x320   : > { %v11530_v18 = vadd.f32 %v3691_v45, %v15023_v5  ;;  %v3958_v54 = vsel %vm3930_vm3, %v11512_v8, 0.0  ;;  %v3501_v22 = vmul.f32 %v11399_v28, %v15024_v44  ;;  %v11538_v29 = vmul.f32 %v11399_v28, %v15025_v27  ;;  %v15027_v5 = vld [vmem:[#allocation168_spill] sm:$0xff] }
 0x321   : > { %v3696_v49 = vsel %vm1478_vm2, %v3694_v0, %v3695_v50  ;;  %v3957_v63 = vadd.f32 %v3956_v59, %v3955_v32  ;;  %v11543_v14 = vmul.f32 %v11399_v28, %v15026_v42  ;;  %v3702_v12 = vrot.slane %v3495_v53, 2  ;;  %v15029_v32 = vld [vmem:[#allocation169_spill] sm:$0xff] }
 0x322   : > { %v11546_v23 = vadd.f32 %v3693_v61, %v15027_v5  ;;  %v3960_v37 = vsel %vm3930_vm3, %v11522_v51, 0.0  ;;  %v3698_v21 = vsel %vm1478_vm2, %v3695_v50, %v3697_v62  ;;  %v3704_v45 = vrot.slane %v3496_v17, 2  ;;  %v15030_v61 = vld [vmem:[#allocation150_spill] sm:$0xff]  ;;  %v15032_v62 = vld [vmem:[#allocation165_spill] sm:$0xff] }
 0x323   : > { %v3705_v44 = vrot.slane %v3497_v39, 2  ;;  %v3959_v27 = vadd.f32 %v3958_v54, %v3957_v63  ;;  %v3504_v0 = vmul.f32 %v11399_v28, %v15028_v20  ;;  %v3701_v59 = vsel %vm1478_vm2, %v3699_v35, %v3700_v38  ;;  %v15033_v54 = vld [vmem:[#allocation170_spill] sm:$0xff] }
 0x324   : > { %v11555_v42 = vadd.f32 %v3696_v49, %v15029_v32  ;;  %v3962_v53 = vsel %vm3930_vm3, %v11530_v18, 0.0  ;;  %v11561_v5 = vmul.f32 %v11399_v28, %v15030_v61  ;;  %v11565_v17 = vmul.f32 %v11399_v28, %v15031_v15 }
 0x325   : > { %v3707_v39 = vrot.slane %v3498_v4, 2  ;;  %v3961_v50 = vadd.f32 %v3960_v37, %v3959_v27  ;;  %v11569_v20 = vmul.f32 %v11399_v28, %v15032_v62  ;;  %v3709_v35 = vrot.slane %v3499_v48, 2 }
 0x326   : > { %v11572_v49 = vadd.f32 %v3698_v21, %v15033_v54  ;;  %v3964_v63 = vsel %vm3930_vm3, %v11546_v23, 0.0  ;;  %v3703_v32 = vsel %vm1478_vm2, %v3700_v38, %v3702_v12  ;;  %v3706_v61 = vsel %vm1478_vm2, %v3704_v45, %v3705_v44 }
 0x327   : > { %v11579_v15 = vadd.f32 %v3701_v59, %v15034_v2  ;;  %v3963_v4 = vadd.f32 %v3962_v53, %v3961_v50  ;;  %v3966_v37 = vsel %vm3930_vm3, %v11555_v42, 0.0  ;;  %v4064_v48 = vmul.f32 %v11254_v31, %v11254_v31  ;;  %v15035_v59 = vld [vmem:[#allocation24_spill] sm:$0xff]  ;;  %v15036_v31 = vld [vmem:[#allocation211_spill] sm:$0xff] }
 0x328   : > { %v4065_v21 = vmul.f32 %v11258_v47, %v11258_v47  ;;  %v4066_v27 = vmul.f32 %v11262_v25, %v11262_v25  ;;  %v3708_v38 = vsel %vm1478_vm2, %v3705_v44, %v3707_v39  ;;  %v3710_v12 = vrot.slane %v3500_v46, 2 }
 0x329   : > { %v3712_v45 = vrot.slane %v3501_v22, 2  ;;  %v3965_v62 = vadd.f32 %v3964_v63, %v3963_v4  ;;  %v3714_v2 = vrot.slane %v11538_v29, 2  ;;  %v11592_v53 = vadd.f32 %v3703_v32, %v15035_v59 }
 0x32a   : > { %v3968_v50 = vsel %vm3930_vm3, %v11572_v49, 0.0  ;;  %v4067_v54 = vmul.f32 %v11268_v33, %v11268_v33  ;;  %v3715_v47 = vrot.slane %v11543_v14, 2  ;;  %v11600_v25 = vadd.f32 %v3706_v61, %v15036_v31 }
 0x32b   : > { %v3967_v44 = vadd.f32 %v3966_v37, %v3965_v62  ;;  %v3970_v46 = vsel %vm3930_vm3, %v11579_v15, 0.0  ;;  %v4068_v29 = vmul.f32 %v11369_v41, %v11369_v41  ;;  %v4128_v22 = vsel %vm3930_vm3, %v4064_v48, 0.0 }
 0x32c   : > { %v4129_v39 = vsel %vm3930_vm3, %v4065_v21, 0.0  ;;  %v4131_v63 = vsel %vm3930_vm3, %v4066_v27, 0.0  ;;  %v3711_v32 = vsel %vm1478_vm2, %v3709_v35, %v3710_v12  ;;  %v3713_v14 = vsel %vm1478_vm2, %v3710_v12, %v3712_v45 }
 0x32d   : > { %v3969_v4 = vadd.f32 %v3968_v50, %v3967_v44  ;;  %v4130_v31 = vadd.f32 %v4129_v39, %v4128_v22  ;;  %v11612_v61 = vadd.f32 %v3708_v38, %v11386_v13  ;;  %v3972_v37 = vsel %vm3930_vm3, %v11592_v53, 0.0 }
 0x32e   : > { %v4069_v62 = vmul.f32 %v11394_v7, %v11394_v7  ;;  %v4133_v48 = vsel %vm3930_vm3, %v4067_v54, 0.0  ;;  %v3717_v21 = vrot.slane %v3504_v0, 2  ;;  %v3719_v27 = vrot.slane %v11561_v5, 2 }
 0x32f   : > { %v3971_v59 = vadd.f32 %v3970_v46, %v3969_v4  ;;  %v4132_v35 = vadd.f32 %v4131_v63, %v4130_v31  ;;  %v11621_v12 = vadd.f32 %v3711_v32, %v11390_v60  ;;  %v3974_v13 = vsel %vm3930_vm3, %v11600_v25, 0.0  ;;  %v15037_v4 = vld [vmem:[#allocation25_spill] sm:$0xff] }
 0x330   : > { %v4070_v38 = vmul.f32 %v11412_v24, %v11412_v24  ;;  %v4135_v45 = vsel %vm3930_vm3, %v4068_v29, 0.0  ;;  %v3716_v50 = vsel %vm1478_vm2, %v3714_v2, %v3715_v47  ;;  %v3720_v54 = vrot.slane %v11565_v17, 2 }
 0x331   : > { %v3973_v0 = vadd.f32 %v3972_v37, %v3971_v59  ;;  %v4134_v44 = vadd.f32 %v4133_v48, %v4132_v35  ;;  %v11631_v5 = vadd.f32 %v3713_v14, %v11421_v19  ;;  %v3976_v60 = vsel %vm3930_vm3, %v11612_v61, 0.0  ;;  %v15038_v59 = vld [vmem:[#allocation45_spill] sm:$0xff] }
 0x332   : > { %v4071_v46 = vmul.f32 %v11428_v10, %v11428_v10  ;;  %v4137_v22 = vsel %vm3930_vm3, %v4069_v62, 0.0  ;;  %v3718_v39 = vsel %vm1478_vm2, %v3715_v47, %v3717_v21  ;;  %v3722_v29 = vrot.slane %v11569_v20, 2  ;;  %v15039_v35 = vld [vmem:[#allocation49_spill] sm:$0xff] }
 0x333   : > { %v3975_v2 = vadd.f32 %v3974_v13, %v3973_v0  ;;  %v4136_v63 = vadd.f32 %v4135_v45, %v4134_v44  ;;  %v11641_v17 = vadd.f32 %v3716_v50, %v11425_v26  ;;  %v3978_v19 = vsel %vm3930_vm3, %v11621_v12, 0.0  ;;  %v15040_v44 = vld [vmem:[#allocation201_spill] sm:$0xff] }
 0x334   : > { %v4072_v32 = vmul.f32 %v11440_v9, %v11440_v9  ;;  %v4139_v14 = vsel %vm3930_vm3, %v4070_v38, 0.0  ;;  %v3511_v31 = vmul.f32 %v11399_v28, %v15037_v4  ;;  %v3721_v47 = vsel %vm1478_vm2, %v3719_v27, %v3720_v54 }
 0x335   : > { %v3977_v37 = vadd.f32 %v3976_v60, %v3975_v2  ;;  %v4138_v20 = vadd.f32 %v4137_v22, %v4136_v63  ;;  %v11652_v62 = vadd.f32 %v3718_v39, %v11447_v43  ;;  %v3980_v26 = vsel %vm3930_vm3, %v11631_v5, 0.0  ;;  %v15041_v60 = vld [vmem:[#allocation50_spill] sm:$0xff] }
 0x336   : > { %v4073_v48 = vmul.f32 %v11454_v58, %v11454_v58  ;;  %v4141_v21 = vsel %vm3930_vm3, %v4071_v46, 0.0  ;;  %v3425_v13 = vadd.f32 %v15039_v35, %v15038_v59  ;;  %v3723_v28 = vsel %vm1478_vm2, %v3720_v54, %v3722_v29 }
 0x337   : > { %v3979_v38 = vadd.f32 %v3978_v19, %v3977_v37  ;;  %v4140_v27 = vadd.f32 %v4139_v14, %v4138_v20  ;;  %v11663_v45 = vadd.f32 %v3721_v47, %v11451_v6  ;;  %v3982_v43 = vsel %vm3930_vm3, %v11641_v17, 0.0  ;;  %v15042_v19 = vld [vmem:[#allocation77_spill] sm:$0xff] }
 0x338   : > { %v4074_v50 = vmul.f32 %v11466_v34, %v11466_v34  ;;  %v4143_v0 = vsel %vm3930_vm3, %v4072_v32, 0.0  ;;  %v3426_v46 = vadd.f32 %v15041_v60, %v15040_v44  ;;  %v3729_v22 = vrot.slane %v3511_v31, 2  ;;  %v15043_v14 = vld [vmem:[#allocation193_spill] sm:$0xff] }
 0x339   : > { %v3981_v39 = vadd.f32 %v3980_v26, %v3979_v38  ;;  %v4142_v2 = vadd.f32 %v4141_v21, %v4140_v27  ;;  %v11673_v54 = vadd.f32 %v3723_v28, %v11473_v56  ;;  %v3984_v6 = vsel %vm3930_vm3, %v11652_v62, 0.0 }
 0x33a   : > { %v4075_v29 = vmul.f32 %v11478_v16, %v11478_v16  ;;  %v4145_v63 = vsel %vm3930_vm3, %v4073_v48, 0.0  ;;  %v3427_v32 = vadd.f32 %v15043_v14, %v15042_v19  ;;  %v11683_v31 = vadd.f32 %v11174_v52, %v3425_v13 }
 0x33b   : > { %v3983_v4 = vadd.f32 %v3982_v43, %v3981_v39  ;;  %v4144_v47 = vadd.f32 %v4143_v0, %v4142_v2  ;;  %v3986_v56 = vsel %vm3930_vm3, %v11663_v45, 0.0  ;;  %v4076_v37 = vmul.f32 %v11490_v36, %v11490_v36 }
 0x33c   : > { %15044 = vst [vmem:[#allocation207_spill] sm:$0xff] %v11683_v31  ;;  %v4147_v20 = vsel %vm3930_vm3, %v4074_v50, 0.0  ;;  %v15045_v26 = vrot.slane %v10965_v11, 2  ;;  %v11694_v35 = vadd.f32 %v11177_v40, %v3426_v46  ;;  %v3988_v52 = vsel %vm3930_vm3, %v11673_v54, 0.0 }
 0x33d   : > { %v3985_v21 = vadd.f32 %v3984_v6, %v3983_v4  ;;  %v4146_v59 = vadd.f32 %v4145_v63, %v4144_v47  ;;  %v4077_v13 = vmul.f32 %v11500_v55, %v11500_v55  ;;  %v4149_v28 = vsel %vm3930_vm3, %v4075_v29, 0.0 }
 0x33e   : > { %v3731_v48 = vsel %vm1478_vm2, %v3729_v22, %v15045_v26  ;;  %15046 = vst [vmem:[#allocation208_spill] sm:$0xff] %v11694_v35  ;;  %v3990_v11 = vsel %vm3930_vm3, %v11683_v31, 0.0  ;;  %v4078_v50 = vmul.f32 %v11512_v8, %v11512_v8  ;;  %v4151_v40 = vsel %vm3930_vm3, %v4076_v37, 0.0 }
 0x33f   : > { %v3987_v38 = vadd.f32 %v3986_v56, %v3985_v21  ;;  %v4148_v27 = vadd.f32 %v4147_v20, %v4146_v59  ;;  %v11701_v43 = vadd.f32 %v3731_v48, %v3427_v32  ;;  %v3992_v60 = vsel %vm3930_vm3, %v11694_v35, 0.0 }
 0x340   : > { %v4079_v46 = vmul.f32 %v11522_v51, %v11522_v51  ;;  %v4153_v22 = vsel %vm3930_vm3, %v4077_v13, 0.0  ;;  %v4080_v29 = vmul.f32 %v11530_v18, %v11530_v18  ;;  %v4155_v63 = vsel %vm3930_vm3, %v4078_v50, 0.0 }
 0x341   : > { %15047 = vst [vmem:[#allocation209_spill] sm:$0xff] %v11701_v43  ;;  %v3989_v0 = vadd.f32 %v3988_v52, %v3987_v38  ;;  %v4150_v44 = vadd.f32 %v4149_v28, %v4148_v27  ;;  %v3994_v6 = vsel %vm3930_vm3, %v11701_v43, 0.0  ;;  %v3996_v32 = vsel %vm3930_vm3, %v11272_v30, 0.0 }
 0x342   : > { %v4081_v4 = vmul.f32 %v11546_v23, %v11546_v23  ;;  %v4157_v47 = vsel %vm3930_vm3, %v4079_v46, 0.0  ;;  %v3998_v20 = vsel %vm3930_vm3, %v11275_v57, 0.0  ;;  %v4082_v26 = vmul.f32 %v11555_v42, %v11555_v42 }
 0x343   : > { %v3991_v39 = vadd.f32 %v3990_v11, %v3989_v0  ;;  %v4152_v2 = vadd.f32 %v4151_v40, %v4150_v44  ;;  %v4159_v48 = vsel %vm3930_vm3, %v4080_v29, 0.0  ;;  %v4000_v52 = vsel %vm3930_vm3, %v11278_v3, 0.0  ;;  %v15049_v29 = vld [vmem:[#allocation3_spill] sm:$0xff] }
 0x344   : > { %v4083_v13 = vmul.f32 %v11572_v49, %v11572_v49  ;;  %v4161_v28 = vsel %vm3930_vm3, %v4081_v4, 0.0  ;;  %v4002_v11 = vsel %vm3930_vm3, %v11281_v1, 0.0  ;;  %v4084_v50 = vmul.f32 %v11579_v15, %v11579_v15 }
 0x345   : > { %v3993_v19 = vadd.f32 %v3992_v60, %v3991_v39  ;;  %v4154_v14 = vadd.f32 %v4153_v22, %v4152_v2  ;;  %v4163_v40 = vsel %vm3930_vm3, %v4082_v26, 0.0  ;;  %v15048_v60 = vld [vmem:[#allocation80_spill] sm:$0xff]  ;;  %v4085_v22 = vmul.f32 %v11592_v53, %v11592_v53 }
 0x346   : > { %v4004_v46 = vsel %vm3930_vm3, %v15048_v60, 0.0  ;;  %v4165_v39 = vsel %vm3930_vm3, %v4083_v13, 0.0 }
 0x347   : > { %v3995_v56 = vadd.f32 %v3994_v6, %v3993_v19  ;;  %v4156_v37 = vadd.f32 %v4155_v63, %v4154_v14  ;;  %v4006_v63 = vsel %vm3930_vm3, %v15049_v29, 0.0  ;;  %v4086_v19 = vmul.f32 %v11600_v25, %v11600_v25 }
 0x348   : > { %v4167_v14 = vsel %vm3930_vm3, %v4084_v50, 0.0  ;;  %v4089_v50 = vmul.f32 %v11631_v5, %v11631_v5 }
 0x349   : > { %v3997_v21 = vadd.f32 %v3996_v32, %v3995_v56  ;;  %v4158_v59 = vadd.f32 %v4157_v47, %v4156_v37  ;;  %v15050_v47 = vld [vmem:[#allocation202_spill] sm:$0xff]  ;;  %v4087_v37 = vmul.f32 %v11612_v61, %v11612_v61  ;;  %v4171_v13 = vsel %vm3930_vm3, %v4086_v19, 0.0  ;;  %v15054_v19 = vld [vmem:[#allocation81_spill] sm:$0xff] }
 0x34a   : > { %v4008_v56 = vsel %vm3930_vm3, %v15050_v47, 0.0 }
 0x34b   : > { %v3999_v38 = vadd.f32 %v3998_v20, %v3997_v21  ;;  %v4160_v27 = vadd.f32 %v4159_v48, %v4158_v59  ;;  %v4169_v20 = vsel %vm3930_vm3, %v4085_v22, 0.0  ;;  %v15051_v21 = vld [vmem:[#allocation78_spill] sm:$0xff] }
 0x34c   : > { %v4010_v59 = vsel %vm3930_vm3, %v15051_v21, 0.0 }
 0x34d   : > { %v4001_v0 = vadd.f32 %v4000_v52, %v3999_v38  ;;  %v4162_v44 = vadd.f32 %v4161_v28, %v4160_v27  ;;  %v4088_v52 = vmul.f32 %v11621_v12, %v11621_v12  ;;  %v15052_v27 = vld [vmem:[#allocation46_spill] sm:$0xff] }
 0x34f   : > { %v4003_v2 = vadd.f32 %v4002_v11, %v4001_v0  ;;  %v4164_v6 = vadd.f32 %v4163_v40, %v4162_v44  ;;  %v4012_v11 = vsel %vm3930_vm3, %v15052_v27, 0.0  ;;  %v4173_v40 = vsel %vm3930_vm3, %v4087_v37, 0.0 }
 0x351   : > { %v4005_v32 = vadd.f32 %v4004_v46, %v4003_v2  ;;  %v4166_v4 = vadd.f32 %v4165_v39, %v4164_v6  ;;  %v15053_v46 = vld [vmem:[#allocation4_spill] sm:$0xff]  ;;  %v4090_v39 = vmul.f32 %v11641_v17, %v11641_v17  ;;  %v4175_v2 = vsel %vm3930_vm3, %v4088_v52, 0.0 }
 0x352   : > { %v4014_v22 = vsel %vm3930_vm3, %v15053_v46, 0.0 }
 0x353   : > { %v4007_v26 = vadd.f32 %v4006_v63, %v4005_v32  ;;  %v4168_v48 = vadd.f32 %v4167_v14, %v4166_v4  ;;  %v4016_v14 = vsel %vm3930_vm3, %v15054_v19, 0.0  ;;  %v4091_v32 = vmul.f32 %v11652_v62, %v11652_v62 }
 0x354   : > { %v4177_v4 = vsel %vm3930_vm3, %v4089_v50, 0.0 }
 0x355   : > { %v4009_v28 = vadd.f32 %v4008_v56, %v4007_v26  ;;  %v4170_v38 = vadd.f32 %v4169_v20, %v4168_v48  ;;  %v15055_v20 = vld [vmem:[#allocation47_spill] sm:$0xff]  ;;  %v4092_v48 = vmul.f32 %v11663_v45, %v11663_v45  ;;  %v4181_v50 = vsel %vm3930_vm3, %v4091_v32, 0.0 }
 0x356   : > { %v4018_v26 = vsel %vm3930_vm3, %v15055_v20, 0.0 }
 0x357   : > { %v4011_v0 = vadd.f32 %v4010_v59, %v4009_v28  ;;  %v4172_v44 = vadd.f32 %v4171_v13, %v4170_v38  ;;  %v4179_v59 = vsel %vm3930_vm3, %v4090_v39, 0.0  ;;  %v15056_v28 = vld [vmem:[#allocation48_spill] sm:$0xff]  ;;  %v4183_v39 = vsel %vm3930_vm3, %v4092_v48, 0.0 }
 0x358   : > { %v4020_v38 = vsel %vm3930_vm3, %v15056_v28, 0.0 }
 0x359   : > { %v4013_v6 = vadd.f32 %v4012_v11, %v4011_v0  ;;  %v4174_v63 = vadd.f32 %v4173_v40, %v4172_v44  ;;  %v4093_v11 = vmul.f32 %v11673_v54, %v11673_v54  ;;  %v15057_v44 = vld [vmem:[#allocation5_spill] sm:$0xff] }
 0x35b   : > { %v4015_v56 = vadd.f32 %v4014_v22, %v4013_v6  ;;  %v4176_v37 = vadd.f32 %v4175_v2, %v4174_v63  ;;  %v4022_v22 = vsel %vm3930_vm3, %v15057_v44, 0.0  ;;  %v4094_v2 = vmul.f32 %v11683_v31, %v11683_v31 }
 0x35c   : > { %v4185_v32 = vsel %vm3930_vm3, %v4093_v11, 0.0 }
 0x35d   : > { %v4017_v52 = vadd.f32 %v4016_v14, %v4015_v56  ;;  %v4178_v13 = vadd.f32 %v4177_v4, %v4176_v37  ;;  %v15058_v14 = vld [vmem:[#allocation210_spill] sm:$0xff]  ;;  %v4095_v56 = vmul.f32 %v11694_v35, %v11694_v35  ;;  %v4187_v48 = vsel %vm3930_vm3, %v4094_v2, 0.0 }
 0x35e   : > { %v4024_v4 = vsel %vm3930_vm3, %v15058_v14, 0.0  ;;  %v4097_v35 = vmul.f32 %v11272_v30, %v11272_v30  ;;  %v4099_v30 = vmul.f32 %v11278_v3, %v11278_v3  ;;  %v4101_v3 = vmul.f32 %v15048_v60, %v15048_v60 }
 0x35f   : > { %v4019_v40 = vadd.f32 %v4018_v26, %v4017_v52  ;;  %v4180_v0 = vadd.f32 %v4179_v59, %v4178_v13  ;;  %v15059_v59 = vld [vmem:[#allocation183_spill] sm:$0xff]  ;;  %v4096_v13 = vmul.f32 %v11701_v43, %v11701_v43  ;;  %v4189_v11 = vsel %vm3930_vm3, %v4095_v56, 0.0 }
 0x360   : > { %v4026_v52 = vsel %vm3930_vm3, %v15059_v59, 0.0  ;;  %v4098_v43 = vmul.f32 %v11275_v57, %v11275_v57  ;;  %v4193_v56 = vsel %vm3930_vm3, %v4097_v35, 0.0  ;;  %v4100_v57 = vmul.f32 %v11281_v1, %v11281_v1 }
 0x361   : > { %v4021_v6 = vadd.f32 %v4020_v38, %v4019_v40  ;;  %v4182_v63 = vadd.f32 %v4181_v50, %v4180_v0  ;;  %v15060_v40 = vld [vmem:[#allocation199_spill] sm:$0xff]  ;;  %v4191_v2 = vsel %vm3930_vm3, %v4096_v13, 0.0  ;;  %v4197_v35 = vsel %vm3930_vm3, %v4099_v30, 0.0 }
 0x362   : > { %v4028_v0 = vsel %vm3930_vm3, %v15060_v40, 0.0  ;;  %v4195_v13 = vsel %vm3930_vm3, %v4098_v43, 0.0  ;;  %v4102_v1 = vmul.f32 %v15049_v29, %v15049_v29  ;;  %v4199_v43 = vsel %vm3930_vm3, %v4100_v57, 0.0  ;;  %v15067_v57 = vld [vmem:[#allocation190_spill] sm:$0xff] }
 0x363   : > { %v4023_v37 = vadd.f32 %v4022_v22, %v4021_v6  ;;  %v4184_v26 = vadd.f32 %v4183_v39, %v4182_v63  ;;  %v15061_v6 = vld [vmem:[#allocation184_spill] sm:$0xff]  ;;  %v4103_v60 = vmul.f32 %v15050_v47, %v15050_v47  ;;  %v4201_v30 = vsel %vm3930_vm3, %v4101_v3, 0.0 }
 0x364   : > { %v4030_v63 = vsel %vm3930_vm3, %v15061_v6, 0.0  ;;  %v4106_v3 = vmul.f32 %v15053_v46, %v15053_v46  ;;  %v15069_v46 = vld [vmem:[#allocation55_spill] sm:$0xff] }
 0x365   : > { %v4025_v38 = vadd.f32 %v4024_v4, %v4023_v37  ;;  %v4186_v50 = vadd.f32 %v4185_v32, %v4184_v26  ;;  %v15062_v37 = vld [vmem:[#allocation200_spill] sm:$0xff] }
 0x366   : > { %v4032_v26 = vsel %vm3930_vm3, %v15062_v37, 0.0 }
 0x367   : > { %v4027_v22 = vadd.f32 %v4026_v52, %v4025_v38  ;;  %v4188_v39 = vadd.f32 %v4187_v48, %v4186_v50  ;;  %v15063_v38 = vld [vmem:[#allocation185_spill] sm:$0xff] }
 0x368   : > { %v4034_v50 = vsel %vm3930_vm3, %v15063_v38, 0.0 }
 0x369   : > { %v4029_v4 = vadd.f32 %v4028_v0, %v4027_v22  ;;  %v4190_v32 = vadd.f32 %v4189_v11, %v4188_v39  ;;  %v15064_v22 = vld [vmem:[#allocation186_spill] sm:$0xff] }
 0x36a   : > { %v4036_v39 = vsel %vm3930_vm3, %v15064_v22, 0.0 }
 0x36b   : > { %v4031_v52 = vadd.f32 %v4030_v63, %v4029_v4  ;;  %v4192_v48 = vadd.f32 %v4191_v2, %v4190_v32  ;;  %v15065_v4 = vld [vmem:[#allocation187_spill] sm:$0xff] }
 0x36c   : > { %v4038_v32 = vsel %vm3930_vm3, %v15065_v4, 0.0 }
 0x36d   : > { %v4033_v0 = vadd.f32 %v4032_v26, %v4031_v52  ;;  %v4194_v11 = vadd.f32 %v4193_v56, %v4192_v48  ;;  %v15066_v52 = vld [vmem:[#allocation188_spill] sm:$0xff] }
 0x36e   : > { %v4040_v48 = vsel %vm3930_vm3, %v15066_v52, 0.0 }
 0x36f   : > { %v4035_v63 = vadd.f32 %v4034_v50, %v4033_v0  ;;  %v4196_v2 = vadd.f32 %v4195_v13, %v4194_v11  ;;  %v4104_v0 = vmul.f32 %v15051_v21, %v15051_v21  ;;  %v4203_v11 = vsel %vm3930_vm3, %v4102_v1, 0.0 }
 0x371   : > { %v4037_v26 = vadd.f32 %v4036_v39, %v4035_v63  ;;  %v4198_v56 = vadd.f32 %v4197_v35, %v4196_v2  ;;  %v4042_v39 = vsel %vm3930_vm3, %v15067_v57, 0.0  ;;  %v4105_v35 = vmul.f32 %v15052_v27, %v15052_v27 }
 0x372   : > { %v4205_v63 = vsel %vm3930_vm3, %v4103_v60, 0.0  ;;  %v4108_v60 = vmul.f32 %v15055_v20, %v15055_v20  ;;  %v15070_v20 = vld [vmem:[#allocation56_spill] sm:$0xff] }
 0x373   : > { %v4039_v50 = vadd.f32 %v4038_v32, %v4037_v26  ;;  %v4200_v13 = vadd.f32 %v4199_v43, %v4198_v56  ;;  %v4207_v32 = vsel %vm3930_vm3, %v4104_v0, 0.0  ;;  %v15068_v56 = vld [vmem:[#allocation54_spill] sm:$0xff]  ;;  %v4109_v0 = vmul.f32 %v15056_v28, %v15056_v28 }
 0x374   : > { %v4044_v1 = vsel %vm3930_vm3, %v15068_v56, 0.0 }
 0x375   : > { %v4041_v29 = vadd.f32 %v4040_v48, %v4039_v50  ;;  %v4202_v31 = vadd.f32 %v4201_v30, %v4200_v13  ;;  %v4107_v48 = vmul.f32 %v15054_v19, %v15054_v19  ;;  %v4209_v30 = vsel %vm3930_vm3, %v4105_v35, 0.0 }
 0x376   : > { %v4110_v35 = vmul.f32 %v15057_v44, %v15057_v44  ;;  %v15071_v44 = vld [vmem:[#allocation60_spill] sm:$0xff] }
 0x377   : > { %v4204_v2 = vadd.f32 %v4203_v11, %v4202_v31  ;;  %v4043_v43 = vadd.f32 %v4042_v39, %v4041_v29  ;;  %v4211_v31 = vsel %vm3930_vm3, %v4106_v3, 0.0  ;;  %v4046_v29 = vsel %vm3930_vm3, %v15069_v46, 0.0 }
 0x378   : > { %v4213_v39 = vsel %vm3930_vm3, %v4107_v48, 0.0  ;;  %v4048_v3 = vsel %vm3930_vm3, %v15070_v20, 0.0  ;;  %v4112_v48 = vmul.f32 %v15059_v59, %v15059_v59  ;;  %v15072_v59 = vld [vmem:[#allocation127_spill] sm:$0xff] }
 0x379   : > { %v4206_v26 = vadd.f32 %v4205_v63, %v4204_v2  ;;  %v4045_v13 = vadd.f32 %v4044_v1, %v4043_v43  ;;  %v4215_v2 = vsel %vm3930_vm3, %v4108_v60, 0.0  ;;  %v4111_v43 = vmul.f32 %v15058_v14, %v15058_v14 }
 0x37a   : > { %v4217_v1 = vsel %vm3930_vm3, %v4109_v0, 0.0  ;;  %v4050_v60 = vsel %vm3930_vm3, %v15071_v44, 0.0  ;;  %v4114_v0 = vmul.f32 %v15061_v6, %v15061_v6  ;;  %v15073_v6 = vld [vmem:[#allocation61_spill] sm:$0xff] }
 0x37b   : > { %v4208_v50 = vadd.f32 %v4207_v32, %v4206_v26  ;;  %v4047_v32 = vadd.f32 %v4046_v29, %v4045_v13  ;;  %v4113_v13 = vmul.f32 %v15060_v40, %v15060_v40  ;;  %v4221_v29 = vsel %vm3930_vm3, %v4111_v43, 0.0 }
 0x37c   : > { %v4116_v43 = vmul.f32 %v15063_v38, %v15063_v38  ;;  %v15074_v38 = vld [vmem:[#allocation106_spill] sm:$0xff] }
 0x37d   : > { %v4210_v11 = vadd.f32 %v4209_v30, %v4208_v50  ;;  %v4219_v50 = vsel %vm3930_vm3, %v4110_v35, 0.0  ;;  %v4052_v35 = vsel %vm3930_vm3, %v15072_v59, 0.0 }
 0x37f   : > { %v4212_v63 = vadd.f32 %v4211_v31, %v4210_v11  ;;  %v4049_v31 = vadd.f32 %v4048_v3, %v4047_v32  ;;  %v4115_v32 = vmul.f32 %v15062_v37, %v15062_v37  ;;  %v4225_v3 = vsel %vm3930_vm3, %v4113_v13, 0.0 }
 0x380   : > { %v4118_v13 = vmul.f32 %v15065_v4, %v15065_v4 }
 0x381   : > { %v4214_v26 = vadd.f32 %v4213_v39, %v4212_v63  ;;  %v4223_v63 = vsel %vm3930_vm3, %v4112_v48, 0.0  ;;  %v4054_v48 = vsel %vm3930_vm3, %v15073_v6, 0.0 }
 0x383   : > { %v4216_v30 = vadd.f32 %v4215_v2, %v4214_v26  ;;  %v4051_v2 = vadd.f32 %v4050_v60, %v4049_v31  ;;  %v4117_v31 = vmul.f32 %v15064_v22, %v15064_v22  ;;  %v4229_v60 = vsel %vm3930_vm3, %v4115_v32, 0.0 }
 0x384   : > { %v4120_v32 = vmul.f32 %v15067_v57, %v15067_v57 }
 0x385   : > { %v4218_v11 = vadd.f32 %v4217_v1, %v4216_v30  ;;  %v4227_v30 = vsel %vm3930_vm3, %v4114_v0, 0.0  ;;  %v4056_v0 = vsel %vm3930_vm3, %v15074_v38, 0.0 }
 0x387   : > { %v4220_v39 = vadd.f32 %v4219_v50, %v4218_v11  ;;  %v4053_v50 = vadd.f32 %v4052_v35, %v4051_v2  ;;  %v4119_v2 = vmul.f32 %v15066_v52, %v15066_v52  ;;  %v4233_v35 = vsel %vm3930_vm3, %v4117_v31, 0.0 }
 0x389   : > { %v4222_v26 = vadd.f32 %v4221_v29, %v4220_v39  ;;  %v4231_v39 = vsel %vm3930_vm3, %v4116_v43, 0.0  ;;  %v4121_v43 = vmul.f32 %v15068_v56, %v15068_v56 }
 0x38b   : > { %v4224_v1 = vadd.f32 %v4223_v63, %v4222_v26  ;;  %v4055_v63 = vadd.f32 %v4054_v48, %v4053_v50  ;;  %v4237_v50 = vsel %vm3930_vm3, %v4119_v2, 0.0 }
 0x38d   : > { %v4226_v11 = vadd.f32 %v4225_v3, %v4224_v1  ;;  %v4235_v1 = vsel %vm3930_vm3, %v4118_v13, 0.0  ;;  %v4241_v13 = vsel %vm3930_vm3, %v4121_v43, 0.0 }
 0x38f   : > { %v4228_v29 = vadd.f32 %v4227_v30, %v4226_v11  ;;  %v4057_v30 = vadd.f32 %v4056_v0, %v4055_v63  ;;  %v4124_v0 = vmul.f32 %v15071_v44, %v15071_v44 }
 0x391   : > { %v4230_v26 = vadd.f32 %v4229_v60, %v4228_v29  ;;  %v4122_v60 = vmul.f32 %v15069_v46, %v15069_v46  ;;  %v4239_v29 = vsel %vm3930_vm3, %v4120_v32, 0.0  ;;  %v4058_v31 = vrot.slane %v4057_v30, 4 }
 0x393   : > { %v4232_v3 = vadd.f32 %v4231_v39, %v4230_v26  ;;  %v4123_v26 = vmul.f32 %v15070_v20, %v15070_v20  ;;  %v4059_v2 = vadd.f32 %v4058_v31, %v4057_v30 }
 0x395   : > { %v4234_v11 = vadd.f32 %v4233_v35, %v4232_v3  ;;  %v4243_v35 = vsel %vm3930_vm3, %v4122_v60, 0.0  ;;  %v4245_v32 = vsel %vm3930_vm3, %v4123_v26, 0.0  ;;  %v4060_v43 = vrot.slane %v4059_v2, 2 }
 0x397   : > { %v4236_v48 = vadd.f32 %v4235_v1, %v4234_v11  ;;  %v4125_v1 = vmul.f32 %v15072_v59, %v15072_v59 }
 0x399   : > { %v4238_v39 = vadd.f32 %v4237_v50, %v4236_v48  ;;  %v4126_v50 = vmul.f32 %v15073_v6, %v15073_v6  ;;  %v4247_v48 = vsel %vm3930_vm3, %v4124_v0, 0.0  ;;  %v4249_v60 = vsel %vm3930_vm3, %v4125_v1, 0.0 }
 0x39b   : > { %v4240_v63 = vadd.f32 %v4239_v29, %v4238_v39  ;;  %v4127_v39 = vmul.f32 %v15074_v38, %v15074_v38  ;;  %v4251_v31 = vsel %vm3930_vm3, %v4126_v50, 0.0 }
 0x39d   : > { %v4242_v3 = vadd.f32 %v4241_v13, %v4240_v63  ;;  %v4061_v13 = vadd.f32 %v4060_v43, %v4059_v2  ;;  %v4253_v26 = vsel %vm3930_vm3, %v4127_v39, 0.0  ;;  %v4265_v39 = vld [vmem:[%s281_s22] sm:$0x1] }
 0x39f   : > { %v4244_v11 = vadd.f32 %v4243_v35, %v4242_v3  ;;  %v4062_v3 = vrot.slane %v4061_v13, 1 }
 0x3a1   : > { %v4246_v29 = vadd.f32 %v4245_v32, %v4244_v11  ;;  %v4063_v59 = vadd.f32 %v4062_v3, %v4061_v13 }
 0x3a3   : > { %v4248_v30 = vadd.f32 %v4247_v48, %v4246_v29  ;;  %v4261_v38 = vmul.f32 0.001953125, %v4063_v59  ;;  %v4269_v59 = vld [vmem:[%s287_s26] sm:$0x1] }
 0x3a5   : > { %v4250_v63 = vadd.f32 %v4249_v60, %v4248_v30  ;;  %v4263_v29 = vmul.f32 %v4261_v38, %v4261_v38 }
 0x3a7   : > { %v4252_v35 = vadd.f32 %v4251_v31, %v4250_v63  ;;  %v15075_v31 = vld [vmem:[#allocation19_spill] sm:$0xff]  ;;  %v15076_v63 = vld [vmem:[#allocation176_spill] sm:$0xff] }
 0x3a9   : > { %v4254_v6 = vadd.f32 %v4253_v26, %v4252_v35  ;;  %v15077_v35 = vld [vmem:[#allocation177_spill] sm:$0xff] }
 0x3ab   : > { %v4255_v0 = vrot.slane %v4254_v6, 4 }
 0x3ad   : > { %v4256_v32 = vadd.f32 %v4255_v0, %v4254_v6  ;;  %v15078_v0 = vld [vmem:[#allocation178_spill] sm:$0xff] }
 0x3af   : > { %v4257_v11 = vrot.slane %v4256_v32, 2 }
 0x3b1   : > { %v4258_v44 = vadd.f32 %v4257_v11, %v4256_v32 }
 0x3b3   : > { %v4259_v1 = vrot.slane %v4258_v44, 1 }
 0x3b5   : > { %v4260_v48 = vadd.f32 %v4259_v1, %v4258_v44 }
 0x3b7   : > { %v4262_v50 = vmul.f32 0.001953125, %v4260_v48 }
 0x3b9   : > { %v4264_v2 = vsub.f32 %v4262_v50, %v4263_v29 }
 0x3bb   : > { %v4266_v43 = vadd.f32 1e-05, %v4264_v2 }
 0x3bd   : > { %4639 = vrsqrt.f32 %v4266_v43 }
 0x3c7   : > { %v4640_v6 = vpop.eup %4639 }
 0x3c8   : > { %v4268_v60 = vmul.f32 %v4640_v6, %v4265_v39 }
 0x3ca   : > { %v4270_v30 = vmul.f32 %v4268_v60, %v4261_v38  ;;  %v11932_v44 = vrot.slane %v4268_v60, %v15075_v31 }
 0x3cc   : > { %v4271_v13 = vsub.f32 %v4269_v59, %v4270_v30  ;;  %v4278_v26 = vmul.f32 %v11932_v44, %v15076_v63  ;;  %v4279_v3 = vmul.f32 %v11932_v44, %v15077_v35  ;;  %v4280_v32 = vmul.f32 %v11932_v44, %v15078_v0 }
 0x3cd   : > { %v4281_v11 = vmul.f32 %v11932_v44, %v11268_v33  ;;  %v4282_v38 = vmul.f32 %v11932_v44, %v11369_v41  ;;  %v4283_v1 = vmul.f32 %v11932_v44, %v11394_v7  ;;  %v4284_v48 = vmul.f32 %v11932_v44, %v11412_v24 }
 0x3ce   : > { %v11950_v29 = vrot.slane %v4271_v13, %v15075_v31  ;;  %v4285_v50 = vmul.f32 %v11932_v44, %v11428_v10  ;;  %v4286_v2 = vmul.f32 %v11932_v44, %v11440_v9  ;;  %v4287_v33 = vmul.f32 %v11932_v44, %v11454_v58 }
 0x3cf   : > { %v4288_v24 = vmul.f32 %v11932_v44, %v11466_v34  ;;  %v4289_v41 = vmul.f32 %v11932_v44, %v11478_v16  ;;  %v4290_v9 = vmul.f32 %v11932_v44, %v11490_v36  ;;  %v4291_v58 = vmul.f32 %v11932_v44, %v11500_v55 }
 0x3d0   : > { %v4348_v7 = vadd.f32 %v11950_v29, %v4278_v26  ;;  %v4349_v10 = vadd.f32 %v11950_v29, %v4279_v3  ;;  %v4350_v43 = vadd.f32 %v11950_v29, %v4280_v32  ;;  %v4351_v34 = vadd.f32 %v11950_v29, %v4281_v11 }
 0x3d1   : > { %v4352_v16 = vadd.f32 %v11950_v29, %v4282_v38  ;;  %v4353_v39 = vadd.f32 %v11950_v29, %v4283_v1  ;;  %v4354_v36 = vadd.f32 %v11950_v29, %v4284_v48  ;;  %v4355_v55 = vadd.f32 %v11950_v29, %v4285_v50 }
 0x3d2   : > { %4412 = vst.msk [vmem:[%s11961_s29] sm:$0xff] %vm3930_vm3, %v4348_v7  ;;  %4413 = vst.msk [vmem:[%s11961_s29 + $0x8] sm:$0xff] %vm3930_vm3, %v4349_v10  ;;  %v4356_v6 = vadd.f32 %v11950_v29, %v4286_v2  ;;  %v4357_v60 = vadd.f32 %v11950_v29, %v4287_v33  ;;  %v4358_v59 = vadd.f32 %v11950_v29, %v4288_v24  ;;  %v15079_v7 = vld [vmem:[#allocation207_spill] sm:$0xff]  ;;  %v15080_v10 = vld [vmem:[#allocation208_spill] sm:$0xff] }
 0x3d3   : > { %4414 = vst.msk [vmem:[%s11961_s29 + $0x10] sm:$0xff] %vm3930_vm3, %v4350_v43  ;;  %4415 = vst.msk [vmem:[%s11961_s29 + $0x18] sm:$0xff] %vm3930_vm3, %v4351_v34  ;;  %v4359_v30 = vadd.f32 %v11950_v29, %v4289_v41  ;;  %v4360_v31 = vadd.f32 %v11950_v29, %v4290_v9  ;;  %v4361_v13 = vadd.f32 %v11950_v29, %v4291_v58  ;;  %v15081_v34 = vld [vmem:[#allocation209_spill] sm:$0xff] }
 0x3d4   : > { %4416 = vst.msk [vmem:[%s11961_s29 + $0x20] sm:$0xff] %vm3930_vm3, %v4352_v16  ;;  %4417 = vst.msk [vmem:[%s11961_s29 + $0x28] sm:$0xff] %vm3930_vm3, %v4353_v39  ;;  %v4292_v63 = vmul.f32 %v11932_v44, %v11512_v8  ;;  %v4293_v26 = vmul.f32 %v11932_v44, %v11522_v51  ;;  %v4294_v35 = vmul.f32 %v11932_v44, %v11530_v18  ;;  %v15082_v39 = vld [vmem:[#allocation179_spill] sm:$0xff] }
 0x3d5   : > { %4418 = vst.msk [vmem:[%s11961_s29 + $0x30] sm:$0xff] %vm3930_vm3, %v4354_v36  ;;  %4419 = vst.msk [vmem:[%s11961_s29 + $0x38] sm:$0xff] %vm3930_vm3, %v4355_v55  ;;  %v4295_v3 = vmul.f32 %v11932_v44, %v11546_v23  ;;  %v4296_v8 = vmul.f32 %v11932_v44, %v11555_v42  ;;  %v4297_v51 = vmul.f32 %v11932_v44, %v11572_v49  ;;  %v15083_v55 = vld [vmem:[#allocation105_spill] sm:$0xff] }
 0x3d6   : > { %4420 = vst.msk [vmem:[%s11961_s29 + $0x40] sm:$0xff] %vm3930_vm3, %v4356_v6  ;;  %4421 = vst.msk [vmem:[%s11961_s29 + $0x48] sm:$0xff] %vm3930_vm3, %v4357_v60  ;;  %v4362_v0 = vadd.f32 %v11950_v29, %v4292_v63  ;;  %v4363_v18 = vadd.f32 %v11950_v29, %v4293_v26  ;;  %v4298_v23 = vmul.f32 %v11932_v44, %v11579_v15  ;;  %v15084_v60 = vld [vmem:[#allocation214_spill] sm:$0xff]  ;;  %v15086_v26 = vld [vmem:[#allocation80_spill] sm:$0xff] }
 0x3d7   : > { %4422 = vst.msk [vmem:[%s11961_s29 + $0x50] sm:$0xff] %vm3930_vm3, %v4358_v59  ;;  %4423 = vst.msk [vmem:[%s11961_s29 + $0x58] sm:$0xff] %vm3930_vm3, %v4359_v30  ;;  %v4299_v42 = vmul.f32 %v11932_v44, %v11592_v53  ;;  %v4364_v49 = vadd.f32 %v11950_v29, %v4294_v35  ;;  %v4365_v32 = vadd.f32 %v11950_v29, %v4295_v3 }
 0x3d8   : > { %4424 = vst.msk [vmem:[%s11961_s29 + $0x60] sm:$0xff] %vm3930_vm3, %v4360_v31  ;;  %4425 = vst.msk [vmem:[%s11961_s29 + $0x68] sm:$0xff] %vm3930_vm3, %v4361_v13  ;;  %v4366_v11 = vadd.f32 %v11950_v29, %v4296_v8  ;;  %v4367_v38 = vadd.f32 %v11950_v29, %v4297_v51  ;;  %v4368_v1 = vadd.f32 %v11950_v29, %v4298_v23  ;;  %v15085_v13 = vld [vmem:[#allocation2_spill] sm:$0xff] }
 0x3d9   : > { %4426 = vst.msk [vmem:[%s11961_s29 + $0x70] sm:$0xff] %vm3930_vm3, %v4362_v0  ;;  %4427 = vst.msk [vmem:[%s11961_s29 + $0x78] sm:$0xff] %vm3930_vm3, %v4363_v18  ;;  %v4369_v15 = vadd.f32 %v11950_v29, %v4299_v42  ;;  %v4300_v53 = vmul.f32 %v11932_v44, %v11600_v25  ;;  %v4301_v48 = vmul.f32 %v11932_v44, %v11612_v61  ;;  %v15087_v42 = vld [vmem:[#allocation3_spill] sm:$0xff] }
 0x3da   : > { %4428 = vst.msk [vmem:[%s11961_s29 + $0x80] sm:$0xff] %vm3930_vm3, %v4364_v49  ;;  %4429 = vst.msk [vmem:[%s11961_s29 + $0x88] sm:$0xff] %vm3930_vm3, %v4365_v32  ;;  %v4302_v50 = vmul.f32 %v11932_v44, %v11621_v12  ;;  %v4303_v2 = vmul.f32 %v11932_v44, %v11631_v5  ;;  %v4304_v25 = vmul.f32 %v11932_v44, %v11641_v17 }
 0x3db   : > { %4430 = vst.msk [vmem:[%s11961_s29 + $0x90] sm:$0xff] %vm3930_vm3, %v4366_v11  ;;  %4431 = vst.msk [vmem:[%s11961_s29 + $0x98] sm:$0xff] %vm3930_vm3, %v4367_v38  ;;  %v4305_v61 = vmul.f32 %v11932_v44, %v11652_v62  ;;  %v4370_v33 = vadd.f32 %v11950_v29, %v4300_v53  ;;  %v4371_v12 = vadd.f32 %v11950_v29, %v4301_v48  ;;  %v15089_v48 = vld [vmem:[#allocation47_spill] sm:$0xff] }
 0x3dc   : > { %4432 = vst.msk [vmem:[%s11961_s29 + $0xa0] sm:$0xff] %vm3930_vm3, %v4368_v1  ;;  %4433 = vst.msk [vmem:[%s11961_s29 + $0xa8] sm:$0xff] %vm3930_vm3, %v4369_v15  ;;  %v4306_v5 = vmul.f32 %v11932_v44, %v11663_v45  ;;  %v4307_v17 = vmul.f32 %v11932_v44, %v11673_v54  ;;  %v4372_v62 = vadd.f32 %v11950_v29, %v4302_v50  ;;  %v15088_v1 = vld [vmem:[#allocation4_spill] sm:$0xff] }
 0x3dd   : > { %v4373_v24 = vadd.f32 %v11950_v29, %v4303_v2  ;;  %v4374_v41 = vadd.f32 %v11950_v29, %v4304_v25  ;;  %v4375_v9 = vadd.f32 %v11950_v29, %v4305_v61  ;;  %4434 = vst.msk [vmem:[%s11961_s29 + $0xb0] sm:$0xff] %vm3930_vm3, %v4370_v33  ;;  %4435 = vst.msk [vmem:[%s11961_s29 + $0xb8] sm:$0xff] %vm3930_vm3, %v4371_v12 }
 0x3de   : > { %v4376_v58 = vadd.f32 %v11950_v29, %v4306_v5  ;;  %v4377_v45 = vadd.f32 %v11950_v29, %v4307_v17  ;;  %v4308_v54 = vmul.f32 %v11932_v44, %v15079_v7  ;;  %v4309_v43 = vmul.f32 %v11932_v44, %v15080_v10  ;;  %4436 = vst.msk [vmem:[%s11961_s29 + $0xc0] sm:$0xff] %vm3930_vm3, %v4372_v62  ;;  %v15090_v5 = vld [vmem:[#allocation5_spill] sm:$0xff]  ;;  %v15091_v62 = vld [vmem:[#allocation183_spill] sm:$0xff] }
 0x3df   : > { %4437 = vst.msk [vmem:[%s11961_s29 + $0xc8] sm:$0xff] %vm3930_vm3, %v4373_v24  ;;  %4438 = vst.msk [vmem:[%s11961_s29 + $0xd0] sm:$0xff] %vm3930_vm3, %v4374_v41  ;;  %v4310_v16 = vmul.f32 %v11932_v44, %v15081_v34  ;;  %v4311_v36 = vmul.f32 %v11932_v44, %v15082_v39  ;;  %v4312_v6 = vmul.f32 %v11932_v44, %v15083_v55 }
 0x3e0   : > { %4439 = vst.msk [vmem:[%s11961_s29 + $0xd8] sm:$0xff] %vm3930_vm3, %v4375_v9  ;;  %v4313_v59 = vmul.f32 %v11932_v44, %v15084_v60  ;;  %4440 = vst.msk [vmem:[%s11961_s29 + $0xe0] sm:$0xff] %vm3930_vm3, %v4376_v58  ;;  %v4378_v30 = vadd.f32 %v11950_v29, %v4308_v54  ;;  %v4379_v31 = vadd.f32 %v11950_v29, %v4309_v43  ;;  %v15092_v9 = vld [vmem:[#allocation184_spill] sm:$0xff]  ;;  %v15093_v54 = vld [vmem:[#allocation185_spill] sm:$0xff] }
 0x3e1   : > { %4441 = vst.msk [vmem:[%s11961_s29 + $0xe8] sm:$0xff] %vm3930_vm3, %v4377_v45  ;;  %v4314_v63 = vmul.f32 %v11932_v44, %v15085_v13  ;;  %v4315_v35 = vmul.f32 %v11932_v44, %v15086_v26  ;;  %v4380_v3 = vadd.f32 %v11950_v29, %v4310_v16  ;;  %v4381_v8 = vadd.f32 %v11950_v29, %v4311_v36 }
 0x3e2   : > { %v4382_v51 = vadd.f32 %v11950_v29, %v4312_v6  ;;  %v4383_v0 = vadd.f32 %v11950_v29, %v4313_v59  ;;  %4442 = vst.msk [vmem:[%s11961_s29 + $0xf0] sm:$0xff] %vm3930_vm3, %v4378_v30  ;;  %4443 = vst.msk [vmem:[%s11961_s29 + $0xf8] sm:$0xff] %vm3930_vm3, %v4379_v31  ;;  %v4316_v49 = vmul.f32 %v11932_v44, %v15087_v42  ;;  %v15094_v30 = vld [vmem:[#allocation60_spill] sm:$0xff]  ;;  %v15095_v31 = vld [vmem:[#allocation127_spill] sm:$0xff] }
 0x3e3   : > { %v4384_v18 = vadd.f32 %v11950_v29, %v4314_v63  ;;  %v4385_v23 = vadd.f32 %v11950_v29, %v4315_v35  ;;  %v4317_v32 = vmul.f32 %v11932_v44, %v15050_v47  ;;  %4444 = vst.msk [vmem:[%s11961_s29 + $0x100] sm:$0xff] %vm3930_vm3, %v4380_v3  ;;  %4445 = vst.msk [vmem:[%s11961_s29 + $0x108] sm:$0xff] %vm3930_vm3, %v4381_v8  ;;  %v15096_v8 = vld [vmem:[#allocation61_spill] sm:$0xff] }
 0x3e4   : > { %4446 = vst.msk [vmem:[%s11961_s29 + $0x110] sm:$0xff] %vm3930_vm3, %v4382_v51  ;;  %4447 = vst.msk [vmem:[%s11961_s29 + $0x118] sm:$0xff] %vm3930_vm3, %v4383_v0  ;;  %v4318_v11 = vmul.f32 %v11932_v44, %v15051_v21  ;;  %v4319_v38 = vmul.f32 %v11932_v44, %v15052_v27  ;;  %v4320_v15 = vmul.f32 %v11932_v44, %v15088_v1  ;;  %v15097_v0 = vld [vmem:[#allocation106_spill] sm:$0xff] }
 0x3e5   : > { %v4321_v47 = vmul.f32 %v11932_v44, %v15054_v19  ;;  %4448 = vst.msk [vmem:[%s11961_s29 + $0x120] sm:$0xff] %vm3930_vm3, %v4384_v18  ;;  %4449 = vst.msk [vmem:[%s11961_s29 + $0x128] sm:$0xff] %vm3930_vm3, %v4385_v23  ;;  %v4386_v53 = vadd.f32 %v11950_v29, %v4316_v49  ;;  %v4387_v21 = vadd.f32 %v11950_v29, %v4317_v32 }
 0x3e6   : > { %v4322_v27 = vmul.f32 %v11932_v44, %v15089_v48  ;;  %v4323_v50 = vmul.f32 %v11932_v44, %v15056_v28  ;;  %v4388_v19 = vadd.f32 %v11950_v29, %v4318_v11  ;;  %v4389_v2 = vadd.f32 %v11950_v29, %v4319_v38 }
 0x3e7   : > { %v4390_v25 = vadd.f32 %v11950_v29, %v4320_v15  ;;  %v4391_v61 = vadd.f32 %v11950_v29, %v4321_v47  ;;  %4450 = vst.msk [vmem:[%s11961_s29 + $0x130] sm:$0xff] %vm3930_vm3, %v4386_v53  ;;  %4451 = vst.msk [vmem:[%s11961_s29 + $0x138] sm:$0xff] %vm3930_vm3, %v4387_v21  ;;  %v4324_v28 = vmul.f32 %v11932_v44, %v15090_v5 }
 0x3e8   : > { %v4392_v33 = vadd.f32 %v11950_v29, %v4322_v27  ;;  %v4393_v12 = vadd.f32 %v11950_v29, %v4323_v50  ;;  %v4325_v17 = vmul.f32 %v11932_v44, %v15058_v14  ;;  %4452 = vst.msk [vmem:[%s11961_s29 + $0x140] sm:$0xff] %vm3930_vm3, %v4388_v19  ;;  %4453 = vst.msk [vmem:[%s11961_s29 + $0x148] sm:$0xff] %vm3930_vm3, %v4389_v2 }
 0x3e9   : > { %4454 = vst.msk [vmem:[%s11961_s29 + $0x150] sm:$0xff] %vm3930_vm3, %v4390_v25  ;;  %4455 = vst.msk [vmem:[%s11961_s29 + $0x158] sm:$0xff] %vm3930_vm3, %v4391_v61  ;;  %v4326_v24 = vmul.f32 %v11932_v44, %v15091_v62  ;;  %v4327_v41 = vmul.f32 %v11932_v44, %v15060_v40  ;;  %v4328_v58 = vmul.f32 %v11932_v44, %v15092_v9 }
 0x3ea   : > { %v4329_v14 = vmul.f32 %v11932_v44, %v15062_v37  ;;  %4456 = vst.msk [vmem:[%s11961_s29 + $0x160] sm:$0xff] %vm3930_vm3, %v4392_v33  ;;  %4457 = vst.msk [vmem:[%s11961_s29 + $0x168] sm:$0xff] %vm3930_vm3, %v4393_v12  ;;  %v4394_v45 = vadd.f32 %v11950_v29, %v4324_v28  ;;  %v4395_v7 = vadd.f32 %v11950_v29, %v4325_v17 }
 0x3eb   : > { %v4330_v40 = vmul.f32 %v11932_v44, %v15093_v54  ;;  %v4331_v10 = vmul.f32 %v11932_v44, %v15064_v22  ;;  %v4396_v37 = vadd.f32 %v11950_v29, %v4326_v24  ;;  %v4397_v43 = vadd.f32 %v11950_v29, %v4327_v41 }
 0x3ec   : > { %v4398_v34 = vadd.f32 %v11950_v29, %v4328_v58  ;;  %v4399_v16 = vadd.f32 %v11950_v29, %v4329_v14  ;;  %4458 = vst.msk [vmem:[%s11961_s29 + $0x170] sm:$0xff] %vm3930_vm3, %v4394_v45  ;;  %4459 = vst.msk [vmem:[%s11961_s29 + $0x178] sm:$0xff] %vm3930_vm3, %v4395_v7  ;;  %v4332_v22 = vmul.f32 %v11932_v44, %v15065_v4 }
 0x3ed   : > { %v4400_v39 = vadd.f32 %v11950_v29, %v4330_v40  ;;  %v4401_v36 = vadd.f32 %v11950_v29, %v4331_v10  ;;  %v4333_v55 = vmul.f32 %v11932_v44, %v15066_v52  ;;  %4460 = vst.msk [vmem:[%s11961_s29 + $0x180] sm:$0xff] %vm3930_vm3, %v4396_v37  ;;  %4461 = vst.msk [vmem:[%s11961_s29 + $0x188] sm:$0xff] %vm3930_vm3, %v4397_v43 }
 0x3ee   : > { %4462 = vst.msk [vmem:[%s11961_s29 + $0x190] sm:$0xff] %vm3930_vm3, %v4398_v34  ;;  %4463 = vst.msk [vmem:[%s11961_s29 + $0x198] sm:$0xff] %vm3930_vm3, %v4399_v16  ;;  %v4334_v6 = vmul.f32 %v11932_v44, %v15067_v57  ;;  %v4335_v60 = vmul.f32 %v11932_v44, %v15068_v56  ;;  %v4336_v4 = vmul.f32 %v11932_v44, %v15069_v46 }
 0x3ef   : > { %v4337_v52 = vmul.f32 %v11932_v44, %v15070_v20  ;;  %4464 = vst.msk [vmem:[%s11961_s29 + $0x1a0] sm:$0xff] %vm3930_vm3, %v4400_v39  ;;  %4465 = vst.msk [vmem:[%s11961_s29 + $0x1a8] sm:$0xff] %vm3930_vm3, %v4401_v36  ;;  %v4402_v59 = vadd.f32 %v11950_v29, %v4332_v22  ;;  %v4403_v57 = vadd.f32 %v11950_v29, %v4333_v55 }
 0x3f0   : > { %v4338_v56 = vmul.f32 %v11932_v44, %v15094_v30  ;;  %v4339_v46 = vmul.f32 %v11932_v44, %v15095_v31  ;;  %v4404_v20 = vadd.f32 %v11950_v29, %v4334_v6  ;;  %v4405_v13 = vadd.f32 %v11950_v29, %v4335_v60 }
 0x3f1   : > { %v4406_v63 = vadd.f32 %v11950_v29, %v4336_v4  ;;  %v4407_v26 = vadd.f32 %v11950_v29, %v4337_v52  ;;  %4466 = vst.msk [vmem:[%s11961_s29 + $0x1b0] sm:$0xff] %vm3930_vm3, %v4402_v59  ;;  %4467 = vst.msk [vmem:[%s11961_s29 + $0x1b8] sm:$0xff] %vm3930_vm3, %v4403_v57  ;;  %v4340_v51 = vmul.f32 %v11932_v44, %v15096_v8 }
 0x3f2   : > { %v4408_v35 = vadd.f32 %v11950_v29, %v4338_v56  ;;  %v4409_v3 = vadd.f32 %v11950_v29, %v4339_v46  ;;  %v4341_v18 = vmul.f32 %v11932_v44, %v15097_v0  ;;  %4468 = vst.msk [vmem:[%s11961_s29 + $0x1c0] sm:$0xff] %vm3930_vm3, %v4404_v20  ;;  %4469 = vst.msk [vmem:[%s11961_s29 + $0x1c8] sm:$0xff] %vm3930_vm3, %v4405_v13 }
 0x3f3   : > { %4470 = vst.msk [vmem:[%s11961_s29 + $0x1d0] sm:$0xff] %vm3930_vm3, %v4406_v63  ;;  %4471 = vst.msk [vmem:[%s11961_s29 + $0x1d8] sm:$0xff] %vm3930_vm3, %v4407_v26  ;;  %v4410_v23 = vadd.f32 %v11950_v29, %v4340_v51 }
 0x3f4   : > { %4472 = vst.msk [vmem:[%s11961_s29 + $0x1e0] sm:$0xff] %vm3930_vm3, %v4408_v35  ;;  %4473 = vst.msk [vmem:[%s11961_s29 + $0x1e8] sm:$0xff] %vm3930_vm3, %v4409_v3  ;;  %v4411_v42 = vadd.f32 %v11950_v29, %v4341_v18 }
 0x3f5   : > { %4474 = vst.msk [vmem:[%s11961_s29 + $0x1f0] sm:$0xff] %vm3930_vm3, %v4410_v23 }
 0x3f6   : > { %4475 = vst.msk [vmem:[%s11961_s29 + $0x1f8] sm:$0xff] %vm3930_vm3, %v4411_v42 }
 0x3f7 PF: > { %s14_s17 = sadd.s32 1, %s4666_s17   ;;  %s15098_s15 = smov %s4662_s16 }
 0x3f8   : > { %p11_p5 = scmp.ge.s32.totalorder %s14_s17, 4   ;;  %s15099_s16 = smov %s15101_s18 }
 0x3fa   :  { %13 = sbr.rel (!%p11_p5) target bundleno = 2 (0x2), region = 75 }

</bundles_post_ra>
